<compile_context>
chip_gen: v7x
topology: tpu7x:2x2x1
jax: 0.10.0
libtpu: 0.0.40
codegen_flags: <defaults>
</compile_context>

<pallas_src>
import functools

import jax
import jax.numpy as jnp
from jax.experimental import pallas as pl
from jax.experimental.pallas import tpu as pltpu


# ----------------------------------------------------------------------------
# Kernel
# ----------------------------------------------------------------------------
def _cross_attn_kernel(cls_ref, tok_ref, wq_ref, wkv_ref, wl_ref, bl_ref,
                       o_ref, *, num_heads, head_dim, block_b, m_tokens):
    C = num_heads * head_dim
    TB = block_b
    M = m_tokens
    cdt = wq_ref.dtype          # MXU compute dtype (bf16 by default, or f32)

    # ---- Projections: dense 2-D matmuls on the MXU, fp32 accumulation. ----
    # Q for the TB class tokens:            (TB, C)   @ (C, C)  -> (TB, C)
    # Fused K/V for all TB*M patch tokens:  (TB*M, C) @ (C, 2C) -> (TB*M, 2C)
    # The bulky kv intermediate is narrowed back to the compute dtype (halves
    # its VMEM footprint and feeds bf16 operands to the score / p@v matmuls).
    q = jnp.dot(cls_ref[...], wq_ref[...],
                preferred_element_type=jnp.float32).astype(cdt)
    kv = jnp.dot(tok_ref[...], wkv_ref[...],
                 preferred_element_type=jnp.float32).astype(cdt)

    # ---- Block-diagonal batch mask (hoisted out of the head loop). ----
    # Query row b may only attend to token rows [b*M, (b+1)*M).  TB is kept
    # modest (<=16) so the O(TB^2*M) wasted exp/max work stays negligible.
    rows = jax.lax.broadcasted_iota(jnp.int32, (TB, TB * M), 0)
    cols = jax.lax.broadcasted_iota(jnp.int32, (TB, TB * M), 1)
    start = rows * M
    same_batch = (cols >= start) & (cols < start + M)
    neg_bias = jnp.where(same_batch, 0.0, -1e30).astype(jnp.float32)

    # ---- Per-head attention with the output projection folded in. ----
    # Each head contributes (attn_h @ v_h) @ wl[h*D:(h+1)*D, :] to a fp32
    # (TB, C) accumulator -> no masked sub-128-lane scratch stores and a
    # single lane-dense output store.
    nt_dims = (((1,), (1,)), ((), ()))           # contract last dims, no .T
    y = None
    for h in range(num_heads):
        lo = h * head_dim
        hi = lo + head_dim
        qh = q[:, lo:hi]                         # (TB, D)
        kh = kv[:, lo:hi]                        # (TB*M, D)
        vh = kv[:, C + lo:C + hi]                # (TB*M, D)

        # Scores for every (query batch, token) pair: (TB, TB*M), fp32.
        s = jax.lax.dot_general(qh, kh, dimension_numbers=nt_dims,
                                preferred_element_type=jnp.float32)
        s = s + neg_bias
        s = s - jnp.max(s, axis=-1, keepdims=True)
        e = jnp.exp(s)                                         # fp32 softmax
        denom = jnp.sum(e, axis=-1, keepdims=True)             # (TB, 1)
        r = pl.reciprocal(denom, approx=True)                  # EUP
        r = r * (2.0 - denom * r)                              # Newton step
        p = (e * r).astype(cdt)                                # probs -> bf16

        out_h = jnp.dot(p, vh, preferred_element_type=jnp.float32)    # (TB, D)
        y_h = jnp.dot(out_h.astype(cdt), wl_ref[lo:hi, :],
                      preferred_element_type=jnp.float32)              # (TB, C)
        y = y_h if y is None else y + y_h

    # ---- Bias add and one dense, lane-aligned (TB, C) store. ----
    o_ref[...] = (y + bl_ref[...]).astype(o_ref.dtype)


# ----------------------------------------------------------------------------
# Generation-aware tiling / VMEM accounting
# ----------------------------------------------------------------------------
def _vmem_capacity_bytes():
    """Physical VMEM of the current TPU generation (fallback: 64 MiB = v7x)."""
    try:
        info = pltpu.get_tpu_info()
        cap = getattr(info, "vmem_capacity_bytes", None)
        if cap:
            return int(cap)
    except Exception:
        pass
    return 64 * 1024 * 1024


def _estimate_kernel_vmem(block_b, m_tokens, feature_dim, in_bytes, w_bytes,
                          *, single_buffer_weights):
    """Per-grid-step VMEM footprint including kv / score intermediates."""
    TB, M, C = block_b, m_tokens, feature_dim
    io_tiles = 2 * (TB * C * in_bytes            # cls tile (double-buffered)
                    + TB * M * C * in_bytes      # patch-token tile
                    + TB * C * 4)                # fp32 output tile
    wbuf = 1 if single_buffer_weights else 2
    weights = wbuf * (4 * C * C * w_bytes + C * 4)     # wq + wkv + wl + bias
    kv = TB * M * 2 * C * max(in_bytes, 2)             # kv intermediate
    q = TB * C * 4
    scores = 3 * TB * (TB * M) * 4                     # s / exp / mask temps
    acc = TB * C * 4                                   # fp32 head accumulator
    return io_tiles + weights + kv + q + scores + acc


def _pick_block_b(batch, m_tokens, feature_dim, in_bytes, w_bytes, vmem_budget):
    """Largest modest (<=16) batch tile dividing B that fits the VMEM budget
    and (preferably) leaves >= 2 grid steps (two v7x TensorCores)."""
    candidates = [tb for tb in (16, 8) if batch % tb == 0]
    for require_multi_step in (True, False):
        for tb in candidates:
            if require_multi_step and batch // tb < 2:
                continue
            est = _estimate_kernel_vmem(tb, m_tokens, feature_dim, in_bytes,
                                        w_bytes, single_buffer_weights=True)
            if est <= vmem_budget:
                return tb
    if candidates:
        return candidates[-1]
    return batch              # tiny / odd batch: whole batch in one grid step


# ----------------------------------------------------------------------------
# Wrapper
# ----------------------------------------------------------------------------
def prepare_cross_attention_params(wq_t, wk_t, wv_t, wl_t, bl, *,
                                   compute_dtype=jnp.bfloat16):
    """One-time parameter prep: fuse the K/V weights and cast to the MXU
    compute dtype (done once, not per forward call)."""
    wkv_t = jnp.concatenate([wk_t, wv_t], axis=1)          # (C, 2C)
    return {
        "wq_t": wq_t.astype(compute_dtype),
        "wkv_t": wkv_t.astype(compute_dtype),
        "wl_t": wl_t.astype(compute_dtype),
        "bl": bl.astype(jnp.float32),                       # bias stays fp32
    }


_BUFFERED_WEIGHTS_OK = [True]   # memo: is pl.Buffered(1) accepted by Mosaic?


def _const_spec(shape, single_buffer):
    index_map = lambda b: (0, 0)
    if single_buffer and hasattr(pl, "Buffered"):
        # Constant-index weight operands: the second pipeline buffer is pure
        # VMEM waste (matters at C=768 within v7x's 64 MiB VMEM).
        return pl.BlockSpec(shape, index_map, pipeline_mode=pl.Buffered(1))
    return pl.BlockSpec(shape, index_map)


def cross_attention(x, params, *, num_heads, block_b=None):
    """x: (B, N, C) fp32; params from prepare_cross_attention_params."""
    B, N, C = x.shape
    assert N >= 2, "need a class token plus at least one patch token"
    assert C % num_heads == 0
    M = N - 1
    head_dim = C // num_heads

    wq_t, wkv_t, wl_t, bl = (params["wq_t"], params["wkv_t"],
                             params["wl_t"], params["bl"])
    compute_dtype = wq_t.dtype
    in_bytes = jnp.dtype(compute_dtype).itemsize
    w_bytes = in_bytes

    vmem_cap = _vmem_capacity_bytes()
    if block_b is None:
        block_b = _pick_block_b(B, M, C, in_bytes, w_bytes, vmem_cap // 2)
    assert B % block_b == 0, (B, block_b)
    assert block_b == B or block_b % 8 == 0, (B, block_b)

    # Wrapper-side (XLA) plumbing so the kernel only sees aligned 2-D slabs
    # already in the MXU compute dtype (also halves the tok DMA bytes).
    cls = x[:, 0, :].astype(compute_dtype)                        # (B, C)
    tok = x[:, 1:, :].reshape(B * M, C).astype(compute_dtype)     # (B*M, C)

    # VMEM limit: include the kv / score intermediates and leave headroom
    # below physical capacity for compiler-internal scratch.
    est = _estimate_kernel_vmem(block_b, M, C, in_bytes, w_bytes,
                                single_buffer_weights=False)
    vmem_limit = int(min((vmem_cap * 7) // 8,
                         max(32 * 1024 * 1024, int(1.3 * est))))

    kernel = functools.partial(
        _cross_attn_kernel, num_heads=num_heads, head_dim=head_dim,
        block_b=block_b, m_tokens=M)

    def run(single_buffer_weights):
        grid_spec = pltpu.PrefetchScalarGridSpec(
            num_scalar_prefetch=0,
            grid=(B // block_b,),
            in_specs=[
                pl.BlockSpec((block_b, C), lambda b: (b, 0)),       # cls
                pl.BlockSpec((block_b * M, C), lambda b: (b, 0)),   # patches
                _const_spec((C, C), single_buffer_weights),         # wq_t
                _const_spec((C, 2 * C), single_buffer_weights),     # wkv_t
                _const_spec((C, C), single_buffer_weights),         # wl_t
                _const_spec((1, C), single_buffer_weights),         # bias
            ],
            out_specs=pl.BlockSpec((block_b, C), lambda b: (b, 0)),
        )
        return pl.pallas_call(
            kernel,
            out_shape=jax.ShapeDtypeStruct((B, C), x.dtype),
            grid_spec=grid_spec,
            compiler_params=pltpu.CompilerParams(
                dimension_semantics=("parallel",),
                vmem_limit_bytes=vmem_limit,
            ),
        )(cls, tok, wq_t, wkv_t, wl_t, bl)

    if _BUFFERED_WEIGHTS_OK[0]:
        try:
            out2d = run(True)
        except Exception:
            # pipeline_mode=pl.Buffered(1) not supported on this JAX/Mosaic
            # version — fall back to default (double-buffered) weights.
            _BUFFERED_WEIGHTS_OK[0] = False
            out2d = run(False)
    else:
        out2d = run(False)

    return out2d.reshape(B, 1, C)


# ----------------------------------------------------------------------------
# Pure-JAX reference and self-test
# ----------------------------------------------------------------------------
def cross_attention_ref(x, wq_t, wk_t, wv_t, wl_t, bl, *, num_heads):
    """Pure-JAX fp32 reference mirroring the PyTorch forward."""
    B, N, C = x.shape
    D = C // num_heads
    q = x[:, 0:1, :] @ wq_t                                      # (B, 1, C)
    k = x[:, 1:, :] @ wk_t                                       # (B, N-1, C)
    v = x[:, 1:, :] @ wv_t
    q = q.reshape(B, 1, num_heads, D).transpose(0, 2, 1, 3)      # (B, H, 1, D)
    k = k.reshape(B, N - 1, num_heads, D).transpose(0, 2, 1, 3)  # (B, H, M, D)
    v = v.reshape(B, N - 1, num_heads, D).transpose(0, 2, 1, 3)
    attn = jax.nn.softmax(q @ jnp.swapaxes(k, -2, -1), axis=-1)  # (B, H, 1, M)
    out = (attn @ v).transpose(0, 2, 1, 3).reshape(B, 1, C)
    return out @ wl_t + bl[None, :, :]


def _run_case(B, N, C, H, seed, compute_dtype, atol, rtol, block_b=None):
    key = jax.random.PRNGKey(seed)
    kx, kq, kk, kv, kl, kb = jax.random.split(key, 6)
    x = jax.random.normal(kx, (B, N, C), dtype=jnp.float32)
    wq_t = jax.random.normal(kq, (C, C), dtype=jnp.float32) * 0.05
    wk_t = jax.random.normal(kk, (C, C), dtype=jnp.float32) * 0.05
    wv_t = jax.random.normal(kv, (C, C), dtype=jnp.float32) * 0.05
    wl_t = jax.random.normal(kl, (C, C), dtype=jnp.float32) * 0.05
    bl = jax.random.normal(kb, (1, C), dtype=jnp.float32) * 0.05

    params = prepare_cross_attention_params(wq_t, wk_t, wv_t, wl_t, bl,
                                            compute_dtype=compute_dtype)
    out = cross_attention(x, params, num_heads=H, block_b=block_b)
    out = jax.block_until_ready(out)
    ref = cross_attention_ref(x, wq_t, wk_t, wv_t, wl_t, bl, num_heads=H)

    assert out.shape == (B, 1, C), out.shape
    err = float(jnp.max(jnp.abs(out - ref)))
    assert jnp.allclose(out, ref, atol=atol, rtol=rtol), err
    return err


if __name__ == "__main__":
    # Main case: bf16 MXU path, lane-dense C=128, auto TB=16 -> grid of 2
    # (the "parallel" batch axis can shard across v7x's two TensorCores).
    _run_case(B=32, N=17, C=128, H=8, seed=0,
              compute_dtype=jnp.bfloat16, atol=5e-2, rtol=5e-2)
    # fp32 compute path: exactness check against the reference.
    _run_case(B=16, N=17, C=128, H=8, seed=1,
              compute_dtype=jnp.float32, atol=1e-4, rtol=1e-4)
    # Tiny / odd shapes: whole batch per grid step, C < 128 fallback.
    _run_case(B=2, N=9, C=32, H=4, seed=0,
              compute_dtype=jnp.float32, atol=1e-4, rtol=1e-4)
    print("KERNEL_OK")
</pallas_src>

<mosaic_0001>
module attributes {stable_mosaic.version = 11 : i64} {
  func.func @_cross_attn_kernel(%arg0: i32, %arg1: memref<16x128xbf16, #tpu.memory_space<vmem>>, %arg2: memref<256x128xbf16, #tpu.memory_space<vmem>>, %arg3: memref<128x128xbf16, #tpu.memory_space<vmem>>, %arg4: memref<128x256xbf16, #tpu.memory_space<vmem>>, %arg5: memref<128x128xbf16, #tpu.memory_space<vmem>>, %arg6: memref<1x128xf32, #tpu.memory_space<vmem>>, %arg7: memref<16x128xf32, #tpu.memory_space<vmem>>) attributes {dimension_semantics = [#tpu.dimension_semantics<parallel>], iteration_bounds = array<i64: 2>, scalar_prefetch = 0 : i64, scratch_operands = 0 : i64, tpu.core_type = #tpu.core_type<tc>, window_params = [{transform_indices = @transform_0, window_bounds = array<i64: 16, 128>}, {transform_indices = @transform_1, window_bounds = array<i64: 256, 128>}, {pipeline_mode = #tpu.pipeline_mode<synchronous>, transform_indices = @transform_2, window_bounds = array<i64: 128, 128>}, {pipeline_mode = #tpu.pipeline_mode<synchronous>, transform_indices = @transform_3, window_bounds = array<i64: 128, 256>}, {pipeline_mode = #tpu.pipeline_mode<synchronous>, transform_indices = @transform_4, window_bounds = array<i64: 128, 128>}, {pipeline_mode = #tpu.pipeline_mode<synchronous>, transform_indices = @transform_5, window_bounds = array<i64: 1, 128>}, {transform_indices = @transform_6, window_bounds = array<i64: 16, 128>}]} {
    %c0 = arith.constant 0 : index
    %c0_0 = arith.constant 0 : index
    %0 = vector.load %arg1[%c0, %c0_0] : memref<16x128xbf16, #tpu.memory_space<vmem>>, vector<16x128xbf16>
    %c0_1 = arith.constant 0 : index
    %c0_2 = arith.constant 0 : index
    %1 = vector.load %arg3[%c0_1, %c0_2] : memref<128x128xbf16, #tpu.memory_space<vmem>>, vector<128x128xbf16>
    %cst = arith.constant dense<0.000000e+00> : vector<16x128xf32>
    %2 = tpu.matmul %0, %1, %cst {dimension_numbers = #tpu.dot_dimension_numbers<[1], [0], [0], [1], [0, 0, 1, 1], [], []>} : vector<16x128xbf16>, vector<128x128xbf16>, vector<16x128xf32> -> vector<16x128xf32>
    %3 = arith.truncf %2 : vector<16x128xf32> to vector<16x128xbf16>
    %c0_3 = arith.constant 0 : index
    %c0_4 = arith.constant 0 : index
    %4 = vector.load %arg2[%c0_3, %c0_4] : memref<256x128xbf16, #tpu.memory_space<vmem>>, vector<256x128xbf16>
    %c0_5 = arith.constant 0 : index
    %c0_6 = arith.constant 0 : index
    %5 = vector.load %arg4[%c0_5, %c0_6] : memref<128x256xbf16, #tpu.memory_space<vmem>>, vector<128x256xbf16>
    %cst_7 = arith.constant dense<0.000000e+00> : vector<256x256xf32>
    %6 = tpu.matmul %4, %5, %cst_7 {dimension_numbers = #tpu.dot_dimension_numbers<[1], [0], [0], [1], [0, 0, 1, 1], [], []>} : vector<256x128xbf16>, vector<128x256xbf16>, vector<256x256xf32> -> vector<256x256xf32>
    %7 = arith.truncf %6 : vector<256x256xf32> to vector<256x256xbf16>
    %8 = tpu.iota {dimensions = array<i32: 0>} : vector<16x256xi32>
    %9 = tpu.iota {dimensions = array<i32: 1>} : vector<16x256xi32>
    %c16_i32 = arith.constant 16 : i32
    %10 = vector.broadcast %c16_i32 : i32 to vector<16x256xi32>
    %11 = arith.muli %8, %10 : vector<16x256xi32>
    %12 = arith.cmpi sge, %9, %11 : vector<16x256xi32>
    %c16_i32_8 = arith.constant 16 : i32
    %13 = vector.broadcast %c16_i32_8 : i32 to vector<16x256xi32>
    %14 = arith.addi %11, %13 : vector<16x256xi32>
    %15 = arith.cmpi slt, %9, %14 : vector<16x256xi32>
    %16 = arith.andi %12, %15 : vector<16x256xi1>
    %cst_9 = arith.constant 0.000000e+00 : f32
    %cst_10 = arith.constant -1.000000e+30 : f32
    %17 = vector.broadcast %cst_9 : f32 to vector<16x256xf32>
    %18 = vector.broadcast %cst_10 : f32 to vector<16x256xf32>
    %19 = arith.select %16, %17, %18 : vector<16x256xi1>, vector<16x256xf32>
    %20 = vector.extract_strided_slice %3 {offsets = [0, 0], sizes = [16, 16], strides = [1, 1]} : vector<16x128xbf16> to vector<16x16xbf16>
    %21 = vector.extract_strided_slice %7 {offsets = [0, 0], sizes = [256, 16], strides = [1, 1]} : vector<256x256xbf16> to vector<256x16xbf16>
    %22 = vector.extract_strided_slice %7 {offsets = [0, 128], sizes = [256, 16], strides = [1, 1]} : vector<256x256xbf16> to vector<256x16xbf16>
    %cst_11 = arith.constant dense<0.000000e+00> : vector<16x256xf32>
    %23 = tpu.matmul %20, %21, %cst_11 {dimension_numbers = #tpu.dot_dimension_numbers<[1], [1], [0], [0], [0, 0, 1, 0], [], []>} : vector<16x16xbf16>, vector<256x16xbf16>, vector<16x256xf32> -> vector<16x256xf32>
    %24 = arith.addf %23, %19 : vector<16x256xf32>
    %cst_12 = arith.constant dense<0xFF800000> : vector<16xf32>
    %25 = vector.multi_reduction <maximumf>, %24, %cst_12 [1] : vector<16x256xf32> to vector<16xf32>
    %26 = vector.shape_cast %25 : vector<16xf32> to vector<16x1xf32>
    %27 = vector.broadcast %26 : vector<16x1xf32> to vector<16x256xf32>
    %28 = arith.subf %24, %27 : vector<16x256xf32>
    %29 = math.exp %28 : vector<16x256xf32>
    %cst_13 = arith.constant dense<0.000000e+00> : vector<16xf32>
    %30 = vector.multi_reduction <add>, %29, %cst_13 [1] : vector<16x256xf32> to vector<16xf32>
    %31 = vector.shape_cast %30 : vector<16xf32> to vector<16x1xf32>
    %32 = tpu.reciprocal %31 {approx = true} : vector<16x1xf32> -> vector<16x1xf32>
    %33 = arith.mulf %31, %32 : vector<16x1xf32>
    %cst_14 = arith.constant 2.000000e+00 : f32
    %34 = vector.broadcast %cst_14 : f32 to vector<16x1xf32>
    %35 = arith.subf %34, %33 : vector<16x1xf32>
    %36 = arith.mulf %32, %35 : vector<16x1xf32>
    %37 = vector.broadcast %36 : vector<16x1xf32> to vector<16x256xf32>
    %38 = arith.mulf %29, %37 : vector<16x256xf32>
    %39 = arith.truncf %38 : vector<16x256xf32> to vector<16x256xbf16>
    %cst_15 = arith.constant dense<0.000000e+00> : vector<16x16xf32>
    %40 = tpu.matmul %39, %22, %cst_15 {dimension_numbers = #tpu.dot_dimension_numbers<[1], [0], [0], [1], [0, 0, 1, 1], [], []>} : vector<16x256xbf16>, vector<256x16xbf16>, vector<16x16xf32> -> vector<16x16xf32>
    %41 = arith.truncf %40 : vector<16x16xf32> to vector<16x16xbf16>
    %c0_16 = arith.constant 0 : index
    %c0_17 = arith.constant 0 : index
    %42 = vector.load %arg5[%c0_16, %c0_17] : memref<128x128xbf16, #tpu.memory_space<vmem>>, vector<16x128xbf16>
    %cst_18 = arith.constant dense<0.000000e+00> : vector<16x128xf32>
    %43 = tpu.matmul %41, %42, %cst_18 {dimension_numbers = #tpu.dot_dimension_numbers<[1], [0], [0], [1], [0, 0, 1, 1], [], []>} : vector<16x16xbf16>, vector<16x128xbf16>, vector<16x128xf32> -> vector<16x128xf32>
    %44 = vector.extract_strided_slice %3 {offsets = [0, 16], sizes = [16, 16], strides = [1, 1]} : vector<16x128xbf16> to vector<16x16xbf16>
    %45 = vector.extract_strided_slice %7 {offsets = [0, 16], sizes = [256, 16], strides = [1, 1]} : vector<256x256xbf16> to vector<256x16xbf16>
    %46 = vector.extract_strided_slice %7 {offsets = [0, 144], sizes = [256, 16], strides = [1, 1]} : vector<256x256xbf16> to vector<256x16xbf16>
    %cst_19 = arith.constant dense<0.000000e+00> : vector<16x256xf32>
    %47 = tpu.matmul %44, %45, %cst_19 {dimension_numbers = #tpu.dot_dimension_numbers<[1], [1], [0], [0], [0, 0, 1, 0], [], []>} : vector<16x16xbf16>, vector<256x16xbf16>, vector<16x256xf32> -> vector<16x256xf32>
    %48 = arith.addf %47, %19 : vector<16x256xf32>
    %cst_20 = arith.constant dense<0xFF800000> : vector<16xf32>
    %49 = vector.multi_reduction <maximumf>, %48, %cst_20 [1] : vector<16x256xf32> to vector<16xf32>
    %50 = vector.shape_cast %49 : vector<16xf32> to vector<16x1xf32>
    %51 = vector.broadcast %50 : vector<16x1xf32> to vector<16x256xf32>
    %52 = arith.subf %48, %51 : vector<16x256xf32>
    %53 = math.exp %52 : vector<16x256xf32>
    %cst_21 = arith.constant dense<0.000000e+00> : vector<16xf32>
    %54 = vector.multi_reduction <add>, %53, %cst_21 [1] : vector<16x256xf32> to vector<16xf32>
    %55 = vector.shape_cast %54 : vector<16xf32> to vector<16x1xf32>
    %56 = tpu.reciprocal %55 {approx = true} : vector<16x1xf32> -> vector<16x1xf32>
    %57 = arith.mulf %55, %56 : vector<16x1xf32>
    %cst_22 = arith.constant 2.000000e+00 : f32
    %58 = vector.broadcast %cst_22 : f32 to vector<16x1xf32>
    %59 = arith.subf %58, %57 : vector<16x1xf32>
    %60 = arith.mulf %56, %59 : vector<16x1xf32>
    %61 = vector.broadcast %60 : vector<16x1xf32> to vector<16x256xf32>
    %62 = arith.mulf %53, %61 : vector<16x256xf32>
    %63 = arith.truncf %62 : vector<16x256xf32> to vector<16x256xbf16>
    %cst_23 = arith.constant dense<0.000000e+00> : vector<16x16xf32>
    %64 = tpu.matmul %63, %46, %cst_23 {dimension_numbers = #tpu.dot_dimension_numbers<[1], [0], [0], [1], [0, 0, 1, 1], [], []>} : vector<16x256xbf16>, vector<256x16xbf16>, vector<16x16xf32> -> vector<16x16xf32>
    %65 = arith.truncf %64 : vector<16x16xf32> to vector<16x16xbf16>
    %c16 = arith.constant 16 : index
    %c0_24 = arith.constant 0 : index
    %66 = vector.load %arg5[%c16, %c0_24] : memref<128x128xbf16, #tpu.memory_space<vmem>>, vector<16x128xbf16>
    %cst_25 = arith.constant dense<0.000000e+00> : vector<16x128xf32>
    %67 = tpu.matmul %65, %66, %cst_25 {dimension_numbers = #tpu.dot_dimension_numbers<[1], [0], [0], [1], [0, 0, 1, 1], [], []>} : vector<16x16xbf16>, vector<16x128xbf16>, vector<16x128xf32> -> vector<16x128xf32>
    %68 = arith.addf %43, %67 : vector<16x128xf32>
    %69 = vector.extract_strided_slice %3 {offsets = [0, 32], sizes = [16, 16], strides = [1, 1]} : vector<16x128xbf16> to vector<16x16xbf16>
    %70 = vector.extract_strided_slice %7 {offsets = [0, 32], sizes = [256, 16], strides = [1, 1]} : vector<256x256xbf16> to vector<256x16xbf16>
    %71 = vector.extract_strided_slice %7 {offsets = [0, 160], sizes = [256, 16], strides = [1, 1]} : vector<256x256xbf16> to vector<256x16xbf16>
    %cst_26 = arith.constant dense<0.000000e+00> : vector<16x256xf32>
    %72 = tpu.matmul %69, %70, %cst_26 {dimension_numbers = #tpu.dot_dimension_numbers<[1], [1], [0], [0], [0, 0, 1, 0], [], []>} : vector<16x16xbf16>, vector<256x16xbf16>, vector<16x256xf32> -> vector<16x256xf32>
    %73 = arith.addf %72, %19 : vector<16x256xf32>
    %cst_27 = arith.constant dense<0xFF800000> : vector<16xf32>
    %74 = vector.multi_reduction <maximumf>, %73, %cst_27 [1] : vector<16x256xf32> to vector<16xf32>
    %75 = vector.shape_cast %74 : vector<16xf32> to vector<16x1xf32>
    %76 = vector.broadcast %75 : vector<16x1xf32> to vector<16x256xf32>
    %77 = arith.subf %73, %76 : vector<16x256xf32>
    %78 = math.exp %77 : vector<16x256xf32>
    %cst_28 = arith.constant dense<0.000000e+00> : vector<16xf32>
    %79 = vector.multi_reduction <add>, %78, %cst_28 [1] : vector<16x256xf32> to vector<16xf32>
    %80 = vector.shape_cast %79 : vector<16xf32> to vector<16x1xf32>
    %81 = tpu.reciprocal %80 {approx = true} : vector<16x1xf32> -> vector<16x1xf32>
    %82 = arith.mulf %80, %81 : vector<16x1xf32>
    %cst_29 = arith.constant 2.000000e+00 : f32
    %83 = vector.broadcast %cst_29 : f32 to vector<16x1xf32>
    %84 = arith.subf %83, %82 : vector<16x1xf32>
    %85 = arith.mulf %81, %84 : vector<16x1xf32>
    %86 = vector.broadcast %85 : vector<16x1xf32> to vector<16x256xf32>
    %87 = arith.mulf %78, %86 : vector<16x256xf32>
    %88 = arith.truncf %87 : vector<16x256xf32> to vector<16x256xbf16>
    %cst_30 = arith.constant dense<0.000000e+00> : vector<16x16xf32>
    %89 = tpu.matmul %88, %71, %cst_30 {dimension_numbers = #tpu.dot_dimension_numbers<[1], [0], [0], [1], [0, 0, 1, 1], [], []>} : vector<16x256xbf16>, vector<256x16xbf16>, vector<16x16xf32> -> vector<16x16xf32>
    %90 = arith.truncf %89 : vector<16x16xf32> to vector<16x16xbf16>
    %c32 = arith.constant 32 : index
    %c0_31 = arith.constant 0 : index
    %91 = vector.load %arg5[%c32, %c0_31] : memref<128x128xbf16, #tpu.memory_space<vmem>>, vector<16x128xbf16>
    %cst_32 = arith.constant dense<0.000000e+00> : vector<16x128xf32>
    %92 = tpu.matmul %90, %91, %cst_32 {dimension_numbers = #tpu.dot_dimension_numbers<[1], [0], [0], [1], [0, 0, 1, 1], [], []>} : vector<16x16xbf16>, vector<16x128xbf16>, vector<16x128xf32> -> vector<16x128xf32>
    %93 = arith.addf %68, %92 : vector<16x128xf32>
    %94 = vector.extract_strided_slice %3 {offsets = [0, 48], sizes = [16, 16], strides = [1, 1]} : vector<16x128xbf16> to vector<16x16xbf16>
    %95 = vector.extract_strided_slice %7 {offsets = [0, 48], sizes = [256, 16], strides = [1, 1]} : vector<256x256xbf16> to vector<256x16xbf16>
    %96 = vector.extract_strided_slice %7 {offsets = [0, 176], sizes = [256, 16], strides = [1, 1]} : vector<256x256xbf16> to vector<256x16xbf16>
    %cst_33 = arith.constant dense<0.000000e+00> : vector<16x256xf32>
    %97 = tpu.matmul %94, %95, %cst_33 {dimension_numbers = #tpu.dot_dimension_numbers<[1], [1], [0], [0], [0, 0, 1, 0], [], []>} : vector<16x16xbf16>, vector<256x16xbf16>, vector<16x256xf32> -> vector<16x256xf32>
    %98 = arith.addf %97, %19 : vector<16x256xf32>
    %cst_34 = arith.constant dense<0xFF800000> : vector<16xf32>
    %99 = vector.multi_reduction <maximumf>, %98, %cst_34 [1] : vector<16x256xf32> to vector<16xf32>
    %100 = vector.shape_cast %99 : vector<16xf32> to vector<16x1xf32>
    %101 = vector.broadcast %100 : vector<16x1xf32> to vector<16x256xf32>
    %102 = arith.subf %98, %101 : vector<16x256xf32>
    %103 = math.exp %102 : vector<16x256xf32>
    %cst_35 = arith.constant dense<0.000000e+00> : vector<16xf32>
    %104 = vector.multi_reduction <add>, %103, %cst_35 [1] : vector<16x256xf32> to vector<16xf32>
    %105 = vector.shape_cast %104 : vector<16xf32> to vector<16x1xf32>
    %106 = tpu.reciprocal %105 {approx = true} : vector<16x1xf32> -> vector<16x1xf32>
    %107 = arith.mulf %105, %106 : vector<16x1xf32>
    %cst_36 = arith.constant 2.000000e+00 : f32
    %108 = vector.broadcast %cst_36 : f32 to vector<16x1xf32>
    %109 = arith.subf %108, %107 : vector<16x1xf32>
    %110 = arith.mulf %106, %109 : vector<16x1xf32>
    %111 = vector.broadcast %110 : vector<16x1xf32> to vector<16x256xf32>
    %112 = arith.mulf %103, %111 : vector<16x256xf32>
    %113 = arith.truncf %112 : vector<16x256xf32> to vector<16x256xbf16>
    %cst_37 = arith.constant dense<0.000000e+00> : vector<16x16xf32>
    %114 = tpu.matmul %113, %96, %cst_37 {dimension_numbers = #tpu.dot_dimension_numbers<[1], [0], [0], [1], [0, 0, 1, 1], [], []>} : vector<16x256xbf16>, vector<256x16xbf16>, vector<16x16xf32> -> vector<16x16xf32>
    %115 = arith.truncf %114 : vector<16x16xf32> to vector<16x16xbf16>
    %c48 = arith.constant 48 : index
    %c0_38 = arith.constant 0 : index
    %116 = vector.load %arg5[%c48, %c0_38] : memref<128x128xbf16, #tpu.memory_space<vmem>>, vector<16x128xbf16>
    %cst_39 = arith.constant dense<0.000000e+00> : vector<16x128xf32>
    %117 = tpu.matmul %115, %116, %cst_39 {dimension_numbers = #tpu.dot_dimension_numbers<[1], [0], [0], [1], [0, 0, 1, 1], [], []>} : vector<16x16xbf16>, vector<16x128xbf16>, vector<16x128xf32> -> vector<16x128xf32>
    %118 = arith.addf %93, %117 : vector<16x128xf32>
    %119 = vector.extract_strided_slice %3 {offsets = [0, 64], sizes = [16, 16], strides = [1, 1]} : vector<16x128xbf16> to vector<16x16xbf16>
    %120 = vector.extract_strided_slice %7 {offsets = [0, 64], sizes = [256, 16], strides = [1, 1]} : vector<256x256xbf16> to vector<256x16xbf16>
    %121 = vector.extract_strided_slice %7 {offsets = [0, 192], sizes = [256, 16], strides = [1, 1]} : vector<256x256xbf16> to vector<256x16xbf16>
    %cst_40 = arith.constant dense<0.000000e+00> : vector<16x256xf32>
    %122 = tpu.matmul %119, %120, %cst_40 {dimension_numbers = #tpu.dot_dimension_numbers<[1], [1], [0], [0], [0, 0, 1, 0], [], []>} : vector<16x16xbf16>, vector<256x16xbf16>, vector<16x256xf32> -> vector<16x256xf32>
    %123 = arith.addf %122, %19 : vector<16x256xf32>
    %cst_41 = arith.constant dense<0xFF800000> : vector<16xf32>
    %124 = vector.multi_reduction <maximumf>, %123, %cst_41 [1] : vector<16x256xf32> to vector<16xf32>
    %125 = vector.shape_cast %124 : vector<16xf32> to vector<16x1xf32>
    %126 = vector.broadcast %125 : vector<16x1xf32> to vector<16x256xf32>
    %127 = arith.subf %123, %126 : vector<16x256xf32>
    %128 = math.exp %127 : vector<16x256xf32>
    %cst_42 = arith.constant dense<0.000000e+00> : vector<16xf32>
    %129 = vector.multi_reduction <add>, %128, %cst_42 [1] : vector<16x256xf32> to vector<16xf32>
    %130 = vector.shape_cast %129 : vector<16xf32> to vector<16x1xf32>
    %131 = tpu.reciprocal %130 {approx = true} : vector<16x1xf32> -> vector<16x1xf32>
    %132 = arith.mulf %130, %131 : vector<16x1xf32>
    %cst_43 = arith.constant 2.000000e+00 : f32
    %133 = vector.broadcast %cst_43 : f32 to vector<16x1xf32>
    %134 = arith.subf %133, %132 : vector<16x1xf32>
    %135 = arith.mulf %131, %134 : vector<16x1xf32>
    %136 = vector.broadcast %135 : vector<16x1xf32> to vector<16x256xf32>
    %137 = arith.mulf %128, %136 : vector<16x256xf32>
    %138 = arith.truncf %137 : vector<16x256xf32> to vector<16x256xbf16>
    %cst_44 = arith.constant dense<0.000000e+00> : vector<16x16xf32>
    %139 = tpu.matmul %138, %121, %cst_44 {dimension_numbers = #tpu.dot_dimension_numbers<[1], [0], [0], [1], [0, 0, 1, 1], [], []>} : vector<16x256xbf16>, vector<256x16xbf16>, vector<16x16xf32> -> vector<16x16xf32>
    %140 = arith.truncf %139 : vector<16x16xf32> to vector<16x16xbf16>
    %c64 = arith.constant 64 : index
    %c0_45 = arith.constant 0 : index
    %141 = vector.load %arg5[%c64, %c0_45] : memref<128x128xbf16, #tpu.memory_space<vmem>>, vector<16x128xbf16>
    %cst_46 = arith.constant dense<0.000000e+00> : vector<16x128xf32>
    %142 = tpu.matmul %140, %141, %cst_46 {dimension_numbers = #tpu.dot_dimension_numbers<[1], [0], [0], [1], [0, 0, 1, 1], [], []>} : vector<16x16xbf16>, vector<16x128xbf16>, vector<16x128xf32> -> vector<16x128xf32>
    %143 = arith.addf %118, %142 : vector<16x128xf32>
    %144 = vector.extract_strided_slice %3 {offsets = [0, 80], sizes = [16, 16], strides = [1, 1]} : vector<16x128xbf16> to vector<16x16xbf16>
    %145 = vector.extract_strided_slice %7 {offsets = [0, 80], sizes = [256, 16], strides = [1, 1]} : vector<256x256xbf16> to vector<256x16xbf16>
    %146 = vector.extract_strided_slice %7 {offsets = [0, 208], sizes = [256, 16], strides = [1, 1]} : vector<256x256xbf16> to vector<256x16xbf16>
    %cst_47 = arith.constant dense<0.000000e+00> : vector<16x256xf32>
    %147 = tpu.matmul %144, %145, %cst_47 {dimension_numbers = #tpu.dot_dimension_numbers<[1], [1], [0], [0], [0, 0, 1, 0], [], []>} : vector<16x16xbf16>, vector<256x16xbf16>, vector<16x256xf32> -> vector<16x256xf32>
    %148 = arith.addf %147, %19 : vector<16x256xf32>
    %cst_48 = arith.constant dense<0xFF800000> : vector<16xf32>
    %149 = vector.multi_reduction <maximumf>, %148, %cst_48 [1] : vector<16x256xf32> to vector<16xf32>
    %150 = vector.shape_cast %149 : vector<16xf32> to vector<16x1xf32>
    %151 = vector.broadcast %150 : vector<16x1xf32> to vector<16x256xf32>
    %152 = arith.subf %148, %151 : vector<16x256xf32>
    %153 = math.exp %152 : vector<16x256xf32>
    %cst_49 = arith.constant dense<0.000000e+00> : vector<16xf32>
    %154 = vector.multi_reduction <add>, %153, %cst_49 [1] : vector<16x256xf32> to vector<16xf32>
    %155 = vector.shape_cast %154 : vector<16xf32> to vector<16x1xf32>
    %156 = tpu.reciprocal %155 {approx = true} : vector<16x1xf32> -> vector<16x1xf32>
    %157 = arith.mulf %155, %156 : vector<16x1xf32>
    %cst_50 = arith.constant 2.000000e+00 : f32
    %158 = vector.broadcast %cst_50 : f32 to vector<16x1xf32>
    %159 = arith.subf %158, %157 : vector<16x1xf32>
    %160 = arith.mulf %156, %159 : vector<16x1xf32>
    %161 = vector.broadcast %160 : vector<16x1xf32> to vector<16x256xf32>
    %162 = arith.mulf %153, %161 : vector<16x256xf32>
    %163 = arith.truncf %162 : vector<16x256xf32> to vector<16x256xbf16>
    %cst_51 = arith.constant dense<0.000000e+00> : vector<16x16xf32>
    %164 = tpu.matmul %163, %146, %cst_51 {dimension_numbers = #tpu.dot_dimension_numbers<[1], [0], [0], [1], [0, 0, 1, 1], [], []>} : vector<16x256xbf16>, vector<256x16xbf16>, vector<16x16xf32> -> vector<16x16xf32>
    %165 = arith.truncf %164 : vector<16x16xf32> to vector<16x16xbf16>
    %c80 = arith.constant 80 : index
    %c0_52 = arith.constant 0 : index
    %166 = vector.load %arg5[%c80, %c0_52] : memref<128x128xbf16, #tpu.memory_space<vmem>>, vector<16x128xbf16>
    %cst_53 = arith.constant dense<0.000000e+00> : vector<16x128xf32>
    %167 = tpu.matmul %165, %166, %cst_53 {dimension_numbers = #tpu.dot_dimension_numbers<[1], [0], [0], [1], [0, 0, 1, 1], [], []>} : vector<16x16xbf16>, vector<16x128xbf16>, vector<16x128xf32> -> vector<16x128xf32>
    %168 = arith.addf %143, %167 : vector<16x128xf32>
    %169 = vector.extract_strided_slice %3 {offsets = [0, 96], sizes = [16, 16], strides = [1, 1]} : vector<16x128xbf16> to vector<16x16xbf16>
    %170 = vector.extract_strided_slice %7 {offsets = [0, 96], sizes = [256, 16], strides = [1, 1]} : vector<256x256xbf16> to vector<256x16xbf16>
    %171 = vector.extract_strided_slice %7 {offsets = [0, 224], sizes = [256, 16], strides = [1, 1]} : vector<256x256xbf16> to vector<256x16xbf16>
    %cst_54 = arith.constant dense<0.000000e+00> : vector<16x256xf32>
    %172 = tpu.matmul %169, %170, %cst_54 {dimension_numbers = #tpu.dot_dimension_numbers<[1], [1], [0], [0], [0, 0, 1, 0], [], []>} : vector<16x16xbf16>, vector<256x16xbf16>, vector<16x256xf32> -> vector<16x256xf32>
    %173 = arith.addf %172, %19 : vector<16x256xf32>
    %cst_55 = arith.constant dense<0xFF800000> : vector<16xf32>
    %174 = vector.multi_reduction <maximumf>, %173, %cst_55 [1] : vector<16x256xf32> to vector<16xf32>
    %175 = vector.shape_cast %174 : vector<16xf32> to vector<16x1xf32>
    %176 = vector.broadcast %175 : vector<16x1xf32> to vector<16x256xf32>
    %177 = arith.subf %173, %176 : vector<16x256xf32>
    %178 = math.exp %177 : vector<16x256xf32>
    %cst_56 = arith.constant dense<0.000000e+00> : vector<16xf32>
    %179 = vector.multi_reduction <add>, %178, %cst_56 [1] : vector<16x256xf32> to vector<16xf32>
    %180 = vector.shape_cast %179 : vector<16xf32> to vector<16x1xf32>
    %181 = tpu.reciprocal %180 {approx = true} : vector<16x1xf32> -> vector<16x1xf32>
    %182 = arith.mulf %180, %181 : vector<16x1xf32>
    %cst_57 = arith.constant 2.000000e+00 : f32
    %183 = vector.broadcast %cst_57 : f32 to vector<16x1xf32>
    %184 = arith.subf %183, %182 : vector<16x1xf32>
    %185 = arith.mulf %181, %184 : vector<16x1xf32>
    %186 = vector.broadcast %185 : vector<16x1xf32> to vector<16x256xf32>
    %187 = arith.mulf %178, %186 : vector<16x256xf32>
    %188 = arith.truncf %187 : vector<16x256xf32> to vector<16x256xbf16>
    %cst_58 = arith.constant dense<0.000000e+00> : vector<16x16xf32>
    %189 = tpu.matmul %188, %171, %cst_58 {dimension_numbers = #tpu.dot_dimension_numbers<[1], [0], [0], [1], [0, 0, 1, 1], [], []>} : vector<16x256xbf16>, vector<256x16xbf16>, vector<16x16xf32> -> vector<16x16xf32>
    %190 = arith.truncf %189 : vector<16x16xf32> to vector<16x16xbf16>
    %c96 = arith.constant 96 : index
    %c0_59 = arith.constant 0 : index
    %191 = vector.load %arg5[%c96, %c0_59] : memref<128x128xbf16, #tpu.memory_space<vmem>>, vector<16x128xbf16>
    %cst_60 = arith.constant dense<0.000000e+00> : vector<16x128xf32>
    %192 = tpu.matmul %190, %191, %cst_60 {dimension_numbers = #tpu.dot_dimension_numbers<[1], [0], [0], [1], [0, 0, 1, 1], [], []>} : vector<16x16xbf16>, vector<16x128xbf16>, vector<16x128xf32> -> vector<16x128xf32>
    %193 = arith.addf %168, %192 : vector<16x128xf32>
    %194 = vector.extract_strided_slice %3 {offsets = [0, 112], sizes = [16, 16], strides = [1, 1]} : vector<16x128xbf16> to vector<16x16xbf16>
    %195 = vector.extract_strided_slice %7 {offsets = [0, 112], sizes = [256, 16], strides = [1, 1]} : vector<256x256xbf16> to vector<256x16xbf16>
    %196 = vector.extract_strided_slice %7 {offsets = [0, 240], sizes = [256, 16], strides = [1, 1]} : vector<256x256xbf16> to vector<256x16xbf16>
    %cst_61 = arith.constant dense<0.000000e+00> : vector<16x256xf32>
    %197 = tpu.matmul %194, %195, %cst_61 {dimension_numbers = #tpu.dot_dimension_numbers<[1], [1], [0], [0], [0, 0, 1, 0], [], []>} : vector<16x16xbf16>, vector<256x16xbf16>, vector<16x256xf32> -> vector<16x256xf32>
    %198 = arith.addf %197, %19 : vector<16x256xf32>
    %cst_62 = arith.constant dense<0xFF800000> : vector<16xf32>
    %199 = vector.multi_reduction <maximumf>, %198, %cst_62 [1] : vector<16x256xf32> to vector<16xf32>
    %200 = vector.shape_cast %199 : vector<16xf32> to vector<16x1xf32>
    %201 = vector.broadcast %200 : vector<16x1xf32> to vector<16x256xf32>
    %202 = arith.subf %198, %201 : vector<16x256xf32>
    %203 = math.exp %202 : vector<16x256xf32>
    %cst_63 = arith.constant dense<0.000000e+00> : vector<16xf32>
    %204 = vector.multi_reduction <add>, %203, %cst_63 [1] : vector<16x256xf32> to vector<16xf32>
    %205 = vector.shape_cast %204 : vector<16xf32> to vector<16x1xf32>
    %206 = tpu.reciprocal %205 {approx = true} : vector<16x1xf32> -> vector<16x1xf32>
    %207 = arith.mulf %205, %206 : vector<16x1xf32>
    %cst_64 = arith.constant 2.000000e+00 : f32
    %208 = vector.broadcast %cst_64 : f32 to vector<16x1xf32>
    %209 = arith.subf %208, %207 : vector<16x1xf32>
    %210 = arith.mulf %206, %209 : vector<16x1xf32>
    %211 = vector.broadcast %210 : vector<16x1xf32> to vector<16x256xf32>
    %212 = arith.mulf %203, %211 : vector<16x256xf32>
    %213 = arith.truncf %212 : vector<16x256xf32> to vector<16x256xbf16>
    %cst_65 = arith.constant dense<0.000000e+00> : vector<16x16xf32>
    %214 = tpu.matmul %213, %196, %cst_65 {dimension_numbers = #tpu.dot_dimension_numbers<[1], [0], [0], [1], [0, 0, 1, 1], [], []>} : vector<16x256xbf16>, vector<256x16xbf16>, vector<16x16xf32> -> vector<16x16xf32>
    %215 = arith.truncf %214 : vector<16x16xf32> to vector<16x16xbf16>
    %c112 = arith.constant 112 : index
    %c0_66 = arith.constant 0 : index
    %216 = vector.load %arg5[%c112, %c0_66] : memref<128x128xbf16, #tpu.memory_space<vmem>>, vector<16x128xbf16>
    %cst_67 = arith.constant dense<0.000000e+00> : vector<16x128xf32>
    %217 = tpu.matmul %215, %216, %cst_67 {dimension_numbers = #tpu.dot_dimension_numbers<[1], [0], [0], [1], [0, 0, 1, 1], [], []>} : vector<16x16xbf16>, vector<16x128xbf16>, vector<16x128xf32> -> vector<16x128xf32>
    %218 = arith.addf %193, %217 : vector<16x128xf32>
    %c0_68 = arith.constant 0 : index
    %c0_69 = arith.constant 0 : index
    %219 = vector.load %arg6[%c0_68, %c0_69] : memref<1x128xf32, #tpu.memory_space<vmem>>, vector<1x128xf32>
    %220 = vector.broadcast %219 : vector<1x128xf32> to vector<16x128xf32>
    %221 = arith.addf %218, %220 : vector<16x128xf32>
    %c0_70 = arith.constant 0 : index
    %c0_71 = arith.constant 0 : index
    %222 = vector.load %arg7[%c0_70, %c0_71] : memref<16x128xf32, #tpu.memory_space<vmem>>, vector<16x128xf32>
    tpu.vector_store %arg7[%c0_70, %c0_71], %221 {strides = array<i32>} : memref<16x128xf32, #tpu.memory_space<vmem>>, vector<16x128xf32>,
    return
  }
  func.func @transform_0(%arg0: i32) -> (i32, i32) {
    %c0_i32 = arith.constant 0 : i32
    %c0_i32_0 = arith.constant 0 : i32
    return %arg0, %c0_i32 : i32, i32
  }
  func.func @transform_1(%arg0: i32) -> (i32, i32) {
    %c0_i32 = arith.constant 0 : i32
    %c0_i32_0 = arith.constant 0 : i32
    return %arg0, %c0_i32 : i32, i32
  }
  func.func @transform_2(%arg0: i32) -> (i32, i32) {
    %c0_i32 = arith.constant 0 : i32
    %c0_i32_0 = arith.constant 0 : i32
    %c0_i32_1 = arith.constant 0 : i32
    return %c0_i32, %c0_i32_0 : i32, i32
  }
  func.func @transform_3(%arg0: i32) -> (i32, i32) {
    %c0_i32 = arith.constant 0 : i32
    %c0_i32_0 = arith.constant 0 : i32
    %c0_i32_1 = arith.constant 0 : i32
    return %c0_i32, %c0_i32_0 : i32, i32
  }
  func.func @transform_4(%arg0: i32) -> (i32, i32) {
    %c0_i32 = arith.constant 0 : i32
    %c0_i32_0 = arith.constant 0 : i32
    %c0_i32_1 = arith.constant 0 : i32
    return %c0_i32, %c0_i32_0 : i32, i32
  }
  func.func @transform_5(%arg0: i32) -> (i32, i32) {
    %c0_i32 = arith.constant 0 : i32
    %c0_i32_0 = arith.constant 0 : i32
    %c0_i32_1 = arith.constant 0 : i32
    return %c0_i32, %c0_i32_0 : i32, i32
  }
  func.func @transform_6(%arg0: i32) -> (i32, i32) {
    %c0_i32 = arith.constant 0 : i32
    %c0_i32_0 = arith.constant 0 : i32
    return %arg0, %c0_i32 : i32, i32
  }
}

module attributes {stable_mosaic.version = 11 : i64} {
  func.func @_cross_attn_kernel(%arg0: i32, %arg1: memref<16x128xbf16, #tpu.memory_space<vmem>>, %arg2: memref<256x128xbf16, #tpu.memory_space<vmem>>, %arg3: memref<128x128xbf16, #tpu.memory_space<vmem>>, %arg4: memref<128x256xbf16, #tpu.memory_space<vmem>>, %arg5: memref<128x128xbf16, #tpu.memory_space<vmem>>, %arg6: memref<1x128xf32, #tpu.memory_space<vmem>>, %arg7: memref<16x128xf32, #tpu.memory_space<vmem>>) attributes {dimension_semantics = [#tpu.dimension_semantics<parallel>], iteration_bounds = array<i64: 2>, scalar_prefetch = 0 : i64, scratch_operands = 0 : i64, tpu.core_type = #tpu.core_type<tc>, window_params = [{transform_indices = @transform_0, window_bounds = array<i64: 16, 128>}, {transform_indices = @transform_1, window_bounds = array<i64: 256, 128>}, {pipeline_mode = #tpu.pipeline_mode<synchronous>, transform_indices = @transform_2, window_bounds = array<i64: 128, 128>}, {pipeline_mode = #tpu.pipeline_mode<synchronous>, transform_indices = @transform_3, window_bounds = array<i64: 128, 256>}, {pipeline_mode = #tpu.pipeline_mode<synchronous>, transform_indices = @transform_4, window_bounds = array<i64: 128, 128>}, {pipeline_mode = #tpu.pipeline_mode<synchronous>, transform_indices = @transform_5, window_bounds = array<i64: 1, 128>}, {transform_indices = @transform_6, window_bounds = array<i64: 16, 128>}]} {
    %c0 = arith.constant 0 : index
    %c0_0 = arith.constant 0 : index
    %0 = vector.load %arg1[%c0, %c0_0] : memref<16x128xbf16, #tpu.memory_space<vmem>>, vector<16x128xbf16>
    %c0_1 = arith.constant 0 : index
    %c0_2 = arith.constant 0 : index
    %1 = vector.load %arg3[%c0_1, %c0_2] : memref<128x128xbf16, #tpu.memory_space<vmem>>, vector<128x128xbf16>
    %cst = arith.constant dense<0.000000e+00> : vector<16x128xf32>
    %2 = tpu.matmul %0, %1, %cst {dimension_numbers = #tpu.dot_dimension_numbers<[1], [0], [0], [1], [0, 0, 1, 1], [], []>} : vector<16x128xbf16>, vector<128x128xbf16>, vector<16x128xf32> -> vector<16x128xf32>
    %3 = arith.truncf %2 : vector<16x128xf32> to vector<16x128xbf16>
    %c0_3 = arith.constant 0 : index
    %c0_4 = arith.constant 0 : index
    %4 = vector.load %arg2[%c0_3, %c0_4] : memref<256x128xbf16, #tpu.memory_space<vmem>>, vector<256x128xbf16>
    %c0_5 = arith.constant 0 : index
    %c0_6 = arith.constant 0 : index
    %5 = vector.load %arg4[%c0_5, %c0_6] : memref<128x256xbf16, #tpu.memory_space<vmem>>, vector<128x256xbf16>
    %cst_7 = arith.constant dense<0.000000e+00> : vector<256x256xf32>
    %6 = tpu.matmul %4, %5, %cst_7 {dimension_numbers = #tpu.dot_dimension_numbers<[1], [0], [0], [1], [0, 0, 1, 1], [], []>} : vector<256x128xbf16>, vector<128x256xbf16>, vector<256x256xf32> -> vector<256x256xf32>
    %7 = arith.truncf %6 : vector<256x256xf32> to vector<256x256xbf16>
    %8 = tpu.iota {dimensions = array<i32: 0>} : vector<16x256xi32>
    %9 = tpu.iota {dimensions = array<i32: 1>} : vector<16x256xi32>
    %c16_i32 = arith.constant 16 : i32
    %10 = vector.broadcast %c16_i32 : i32 to vector<16x256xi32>
    %11 = arith.muli %8, %10 : vector<16x256xi32>
    %12 = arith.cmpi sge, %9, %11 : vector<16x256xi32>
    %c16_i32_8 = arith.constant 16 : i32
    %13 = vector.broadcast %c16_i32_8 : i32 to vector<16x256xi32>
    %14 = arith.addi %11, %13 : vector<16x256xi32>
    %15 = arith.cmpi slt, %9, %14 : vector<16x256xi32>
    %16 = arith.andi %12, %15 : vector<16x256xi1>
    %cst_9 = arith.constant 0.000000e+00 : f32
    %cst_10 = arith.constant -1.000000e+30 : f32
    %17 = vector.broadcast %cst_9 : f32 to vector<16x256xf32>
    %18 = vector.broadcast %cst_10 : f32 to vector<16x256xf32>
    %19 = arith.select %16, %17, %18 : vector<16x256xi1>, vector<16x256xf32>
    %20 = vector.extract_strided_slice %3 {offsets = [0, 0], sizes = [16, 16], strides = [1, 1]} : vector<16x128xbf16> to vector<16x16xbf16>
    %21 = vector.extract_strided_slice %7 {offsets = [0, 0], sizes = [256, 16], strides = [1, 1]} : vector<256x256xbf16> to vector<256x16xbf16>
    %22 = vector.extract_strided_slice %7 {offsets = [0, 128], sizes = [256, 16], strides = [1, 1]} : vector<256x256xbf16> to vector<256x16xbf16>
    %cst_11 = arith.constant dense<0.000000e+00> : vector<16x256xf32>
    %23 = tpu.matmul %20, %21, %cst_11 {dimension_numbers = #tpu.dot_dimension_numbers<[1], [1], [0], [0], [0, 0, 1, 0], [], []>} : vector<16x16xbf16>, vector<256x16xbf16>, vector<16x256xf32> -> vector<16x256xf32>
    %24 = arith.addf %23, %19 : vector<16x256xf32>
    %cst_12 = arith.constant dense<0xFF800000> : vector<16xf32>
    %25 = vector.multi_reduction <maximumf>, %24, %cst_12 [1] : vector<16x256xf32> to vector<16xf32>
    %26 = vector.shape_cast %25 : vector<16xf32> to vector<16x1xf32>
    %27 = vector.broadcast %26 : vector<16x1xf32> to vector<16x256xf32>
    %28 = arith.subf %24, %27 : vector<16x256xf32>
    %29 = math.exp %28 : vector<16x256xf32>
    %cst_13 = arith.constant dense<0.000000e+00> : vector<16xf32>
    %30 = vector.multi_reduction <add>, %29, %cst_13 [1] : vector<16x256xf32> to vector<16xf32>
    %31 = vector.shape_cast %30 : vector<16xf32> to vector<16x1xf32>
    %32 = tpu.reciprocal %31 {approx = true} : vector<16x1xf32> -> vector<16x1xf32>
    %33 = arith.mulf %31, %32 : vector<16x1xf32>
    %cst_14 = arith.constant 2.000000e+00 : f32
    %34 = vector.broadcast %cst_14 : f32 to vector<16x1xf32>
    %35 = arith.subf %34, %33 : vector<16x1xf32>
    %36 = arith.mulf %32, %35 : vector<16x1xf32>
    %37 = vector.broadcast %36 : vector<16x1xf32> to vector<16x256xf32>
    %38 = arith.mulf %29, %37 : vector<16x256xf32>
    %39 = arith.truncf %38 : vector<16x256xf32> to vector<16x256xbf16>
    %cst_15 = arith.constant dense<0.000000e+00> : vector<16x16xf32>
    %40 = tpu.matmul %39, %22, %cst_15 {dimension_numbers = #tpu.dot_dimension_numbers<[1], [0], [0], [1], [0, 0, 1, 1], [], []>} : vector<16x256xbf16>, vector<256x16xbf16>, vector<16x16xf32> -> vector<16x16xf32>
    %41 = arith.truncf %40 : vector<16x16xf32> to vector<16x16xbf16>
    %c0_16 = arith.constant 0 : index
    %c0_17 = arith.constant 0 : index
    %42 = vector.load %arg5[%c0_16, %c0_17] : memref<128x128xbf16, #tpu.memory_space<vmem>>, vector<16x128xbf16>
    %cst_18 = arith.constant dense<0.000000e+00> : vector<16x128xf32>
    %43 = tpu.matmul %41, %42, %cst_18 {dimension_numbers = #tpu.dot_dimension_numbers<[1], [0], [0], [1], [0, 0, 1, 1], [], []>} : vector<16x16xbf16>, vector<16x128xbf16>, vector<16x128xf32> -> vector<16x128xf32>
    %44 = vector.extract_strided_slice %3 {offsets = [0, 16], sizes = [16, 16], strides = [1, 1]} : vector<16x128xbf16> to vector<16x16xbf16>
    %45 = vector.extract_strided_slice %7 {offsets = [0, 16], sizes = [256, 16], strides = [1, 1]} : vector<256x256xbf16> to vector<256x16xbf16>
    %46 = vector.extract_strided_slice %7 {offsets = [0, 144], sizes = [256, 16], strides = [1, 1]} : vector<256x256xbf16> to vector<256x16xbf16>
    %cst_19 = arith.constant dense<0.000000e+00> : vector<16x256xf32>
    %47 = tpu.matmul %44, %45, %cst_19 {dimension_numbers = #tpu.dot_dimension_numbers<[1], [1], [0], [0], [0, 0, 1, 0], [], []>} : vector<16x16xbf16>, vector<256x16xbf16>, vector<16x256xf32> -> vector<16x256xf32>
    %48 = arith.addf %47, %19 : vector<16x256xf32>
    %cst_20 = arith.constant dense<0xFF800000> : vector<16xf32>
    %49 = vector.multi_reduction <maximumf>, %48, %cst_20 [1] : vector<16x256xf32> to vector<16xf32>
    %50 = vector.shape_cast %49 : vector<16xf32> to vector<16x1xf32>
    %51 = vector.broadcast %50 : vector<16x1xf32> to vector<16x256xf32>
    %52 = arith.subf %48, %51 : vector<16x256xf32>
    %53 = math.exp %52 : vector<16x256xf32>
    %cst_21 = arith.constant dense<0.000000e+00> : vector<16xf32>
    %54 = vector.multi_reduction <add>, %53, %cst_21 [1] : vector<16x256xf32> to vector<16xf32>
    %55 = vector.shape_cast %54 : vector<16xf32> to vector<16x1xf32>
    %56 = tpu.reciprocal %55 {approx = true} : vector<16x1xf32> -> vector<16x1xf32>
    %57 = arith.mulf %55, %56 : vector<16x1xf32>
    %cst_22 = arith.constant 2.000000e+00 : f32
    %58 = vector.broadcast %cst_22 : f32 to vector<16x1xf32>
    %59 = arith.subf %58, %57 : vector<16x1xf32>
    %60 = arith.mulf %56, %59 : vector<16x1xf32>
    %61 = vector.broadcast %60 : vector<16x1xf32> to vector<16x256xf32>
    %62 = arith.mulf %53, %61 : vector<16x256xf32>
    %63 = arith.truncf %62 : vector<16x256xf32> to vector<16x256xbf16>
    %cst_23 = arith.constant dense<0.000000e+00> : vector<16x16xf32>
    %64 = tpu.matmul %63, %46, %cst_23 {dimension_numbers = #tpu.dot_dimension_numbers<[1], [0], [0], [1], [0, 0, 1, 1], [], []>} : vector<16x256xbf16>, vector<256x16xbf16>, vector<16x16xf32> -> vector<16x16xf32>
    %65 = arith.truncf %64 : vector<16x16xf32> to vector<16x16xbf16>
    %c16 = arith.constant 16 : index
    %c0_24 = arith.constant 0 : index
    %66 = vector.load %arg5[%c16, %c0_24] : memref<128x128xbf16, #tpu.memory_space<vmem>>, vector<16x128xbf16>
    %cst_25 = arith.constant dense<0.000000e+00> : vector<16x128xf32>
    %67 = tpu.matmul %65, %66, %cst_25 {dimension_numbers = #tpu.dot_dimension_numbers<[1], [0], [0], [1], [0, 0, 1, 1], [], []>} : vector<16x16xbf16>, vector<16x128xbf16>, vector<16x128xf32> -> vector<16x128xf32>
    %68 = arith.addf %43, %67 : vector<16x128xf32>
    %69 = vector.extract_strided_slice %3 {offsets = [0, 32], sizes = [16, 16], strides = [1, 1]} : vector<16x128xbf16> to vector<16x16xbf16>
    %70 = vector.extract_strided_slice %7 {offsets = [0, 32], sizes = [256, 16], strides = [1, 1]} : vector<256x256xbf16> to vector<256x16xbf16>
    %71 = vector.extract_strided_slice %7 {offsets = [0, 160], sizes = [256, 16], strides = [1, 1]} : vector<256x256xbf16> to vector<256x16xbf16>
    %cst_26 = arith.constant dense<0.000000e+00> : vector<16x256xf32>
    %72 = tpu.matmul %69, %70, %cst_26 {dimension_numbers = #tpu.dot_dimension_numbers<[1], [1], [0], [0], [0, 0, 1, 0], [], []>} : vector<16x16xbf16>, vector<256x16xbf16>, vector<16x256xf32> -> vector<16x256xf32>
    %73 = arith.addf %72, %19 : vector<16x256xf32>
    %cst_27 = arith.constant dense<0xFF800000> : vector<16xf32>
    %74 = vector.multi_reduction <maximumf>, %73, %cst_27 [1] : vector<16x256xf32> to vector<16xf32>
    %75 = vector.shape_cast %74 : vector<16xf32> to vector<16x1xf32>
    %76 = vector.broadcast %75 : vector<16x1xf32> to vector<16x256xf32>
    %77 = arith.subf %73, %76 : vector<16x256xf32>
    %78 = math.exp %77 : vector<16x256xf32>
    %cst_28 = arith.constant dense<0.000000e+00> : vector<16xf32>
    %79 = vector.multi_reduction <add>, %78, %cst_28 [1] : vector<16x256xf32> to vector<16xf32>
    %80 = vector.shape_cast %79 : vector<16xf32> to vector<16x1xf32>
    %81 = tpu.reciprocal %80 {approx = true} : vector<16x1xf32> -> vector<16x1xf32>
    %82 = arith.mulf %80, %81 : vector<16x1xf32>
    %cst_29 = arith.constant 2.000000e+00 : f32
    %83 = vector.broadcast %cst_29 : f32 to vector<16x1xf32>
    %84 = arith.subf %83, %82 : vector<16x1xf32>
    %85 = arith.mulf %81, %84 : vector<16x1xf32>
    %86 = vector.broadcast %85 : vector<16x1xf32> to vector<16x256xf32>
    %87 = arith.mulf %78, %86 : vector<16x256xf32>
    %88 = arith.truncf %87 : vector<16x256xf32> to vector<16x256xbf16>
    %cst_30 = arith.constant dense<0.000000e+00> : vector<16x16xf32>
    %89 = tpu.matmul %88, %71, %cst_30 {dimension_numbers = #tpu.dot_dimension_numbers<[1], [0], [0], [1], [0, 0, 1, 1], [], []>} : vector<16x256xbf16>, vector<256x16xbf16>, vector<16x16xf32> -> vector<16x16xf32>
    %90 = arith.truncf %89 : vector<16x16xf32> to vector<16x16xbf16>
    %c32 = arith.constant 32 : index
    %c0_31 = arith.constant 0 : index
    %91 = vector.load %arg5[%c32, %c0_31] : memref<128x128xbf16, #tpu.memory_space<vmem>>, vector<16x128xbf16>
    %cst_32 = arith.constant dense<0.000000e+00> : vector<16x128xf32>
    %92 = tpu.matmul %90, %91, %cst_32 {dimension_numbers = #tpu.dot_dimension_numbers<[1], [0], [0], [1], [0, 0, 1, 1], [], []>} : vector<16x16xbf16>, vector<16x128xbf16>, vector<16x128xf32> -> vector<16x128xf32>
    %93 = arith.addf %68, %92 : vector<16x128xf32>
    %94 = vector.extract_strided_slice %3 {offsets = [0, 48], sizes = [16, 16], strides = [1, 1]} : vector<16x128xbf16> to vector<16x16xbf16>
    %95 = vector.extract_strided_slice %7 {offsets = [0, 48], sizes = [256, 16], strides = [1, 1]} : vector<256x256xbf16> to vector<256x16xbf16>
    %96 = vector.extract_strided_slice %7 {offsets = [0, 176], sizes = [256, 16], strides = [1, 1]} : vector<256x256xbf16> to vector<256x16xbf16>
    %cst_33 = arith.constant dense<0.000000e+00> : vector<16x256xf32>
    %97 = tpu.matmul %94, %95, %cst_33 {dimension_numbers = #tpu.dot_dimension_numbers<[1], [1], [0], [0], [0, 0, 1, 0], [], []>} : vector<16x16xbf16>, vector<256x16xbf16>, vector<16x256xf32> -> vector<16x256xf32>
    %98 = arith.addf %97, %19 : vector<16x256xf32>
    %cst_34 = arith.constant dense<0xFF800000> : vector<16xf32>
    %99 = vector.multi_reduction <maximumf>, %98, %cst_34 [1] : vector<16x256xf32> to vector<16xf32>
    %100 = vector.shape_cast %99 : vector<16xf32> to vector<16x1xf32>
    %101 = vector.broadcast %100 : vector<16x1xf32> to vector<16x256xf32>
    %102 = arith.subf %98, %101 : vector<16x256xf32>
    %103 = math.exp %102 : vector<16x256xf32>
    %cst_35 = arith.constant dense<0.000000e+00> : vector<16xf32>
    %104 = vector.multi_reduction <add>, %103, %cst_35 [1] : vector<16x256xf32> to vector<16xf32>
    %105 = vector.shape_cast %104 : vector<16xf32> to vector<16x1xf32>
    %106 = tpu.reciprocal %105 {approx = true} : vector<16x1xf32> -> vector<16x1xf32>
    %107 = arith.mulf %105, %106 : vector<16x1xf32>
    %cst_36 = arith.constant 2.000000e+00 : f32
    %108 = vector.broadcast %cst_36 : f32 to vector<16x1xf32>
    %109 = arith.subf %108, %107 : vector<16x1xf32>
    %110 = arith.mulf %106, %109 : vector<16x1xf32>
    %111 = vector.broadcast %110 : vector<16x1xf32> to vector<16x256xf32>
    %112 = arith.mulf %103, %111 : vector<16x256xf32>
    %113 = arith.truncf %112 : vector<16x256xf32> to vector<16x256xbf16>
    %cst_37 = arith.constant dense<0.000000e+00> : vector<16x16xf32>
    %114 = tpu.matmul %113, %96, %cst_37 {dimension_numbers = #tpu.dot_dimension_numbers<[1], [0], [0], [1], [0, 0, 1, 1], [], []>} : vector<16x256xbf16>, vector<256x16xbf16>, vector<16x16xf32> -> vector<16x16xf32>
    %115 = arith.truncf %114 : vector<16x16xf32> to vector<16x16xbf16>
    %c48 = arith.constant 48 : index
    %c0_38 = arith.constant 0 : index
    %116 = vector.load %arg5[%c48, %c0_38] : memref<128x128xbf16, #tpu.memory_space<vmem>>, vector<16x128xbf16>
    %cst_39 = arith.constant dense<0.000000e+00> : vector<16x128xf32>
    %117 = tpu.matmul %115, %116, %cst_39 {dimension_numbers = #tpu.dot_dimension_numbers<[1], [0], [0], [1], [0, 0, 1, 1], [], []>} : vector<16x16xbf16>, vector<16x128xbf16>, vector<16x128xf32> -> vector<16x128xf32>
    %118 = arith.addf %93, %117 : vector<16x128xf32>
    %119 = vector.extract_strided_slice %3 {offsets = [0, 64], sizes = [16, 16], strides = [1, 1]} : vector<16x128xbf16> to vector<16x16xbf16>
    %120 = vector.extract_strided_slice %7 {offsets = [0, 64], sizes = [256, 16], strides = [1, 1]} : vector<256x256xbf16> to vector<256x16xbf16>
    %121 = vector.extract_strided_slice %7 {offsets = [0, 192], sizes = [256, 16], strides = [1, 1]} : vector<256x256xbf16> to vector<256x16xbf16>
    %cst_40 = arith.constant dense<0.000000e+00> : vector<16x256xf32>
    %122 = tpu.matmul %119, %120, %cst_40 {dimension_numbers = #tpu.dot_dimension_numbers<[1], [1], [0], [0], [0, 0, 1, 0], [], []>} : vector<16x16xbf16>, vector<256x16xbf16>, vector<16x256xf32> -> vector<16x256xf32>
    %123 = arith.addf %122, %19 : vector<16x256xf32>
    %cst_41 = arith.constant dense<0xFF800000> : vector<16xf32>
    %124 = vector.multi_reduction <maximumf>, %123, %cst_41 [1] : vector<16x256xf32> to vector<16xf32>
    %125 = vector.shape_cast %124 : vector<16xf32> to vector<16x1xf32>
    %126 = vector.broadcast %125 : vector<16x1xf32> to vector<16x256xf32>
    %127 = arith.subf %123, %126 : vector<16x256xf32>
    %128 = math.exp %127 : vector<16x256xf32>
    %cst_42 = arith.constant dense<0.000000e+00> : vector<16xf32>
    %129 = vector.multi_reduction <add>, %128, %cst_42 [1] : vector<16x256xf32> to vector<16xf32>
    %130 = vector.shape_cast %129 : vector<16xf32> to vector<16x1xf32>
    %131 = tpu.reciprocal %130 {approx = true} : vector<16x1xf32> -> vector<16x1xf32>
    %132 = arith.mulf %130, %131 : vector<16x1xf32>
    %cst_43 = arith.constant 2.000000e+00 : f32
    %133 = vector.broadcast %cst_43 : f32 to vector<16x1xf32>
    %134 = arith.subf %133, %132 : vector<16x1xf32>
    %135 = arith.mulf %131, %134 : vector<16x1xf32>
    %136 = vector.broadcast %135 : vector<16x1xf32> to vector<16x256xf32>
    %137 = arith.mulf %128, %136 : vector<16x256xf32>
    %138 = arith.truncf %137 : vector<16x256xf32> to vector<16x256xbf16>
    %cst_44 = arith.constant dense<0.000000e+00> : vector<16x16xf32>
    %139 = tpu.matmul %138, %121, %cst_44 {dimension_numbers = #tpu.dot_dimension_numbers<[1], [0], [0], [1], [0, 0, 1, 1], [], []>} : vector<16x256xbf16>, vector<256x16xbf16>, vector<16x16xf32> -> vector<16x16xf32>
    %140 = arith.truncf %139 : vector<16x16xf32> to vector<16x16xbf16>
    %c64 = arith.constant 64 : index
    %c0_45 = arith.constant 0 : index
    %141 = vector.load %arg5[%c64, %c0_45] : memref<128x128xbf16, #tpu.memory_space<vmem>>, vector<16x128xbf16>
    %cst_46 = arith.constant dense<0.000000e+00> : vector<16x128xf32>
    %142 = tpu.matmul %140, %141, %cst_46 {dimension_numbers = #tpu.dot_dimension_numbers<[1], [0], [0], [1], [0, 0, 1, 1], [], []>} : vector<16x16xbf16>, vector<16x128xbf16>, vector<16x128xf32> -> vector<16x128xf32>
    %143 = arith.addf %118, %142 : vector<16x128xf32>
    %144 = vector.extract_strided_slice %3 {offsets = [0, 80], sizes = [16, 16], strides = [1, 1]} : vector<16x128xbf16> to vector<16x16xbf16>
    %145 = vector.extract_strided_slice %7 {offsets = [0, 80], sizes = [256, 16], strides = [1, 1]} : vector<256x256xbf16> to vector<256x16xbf16>
    %146 = vector.extract_strided_slice %7 {offsets = [0, 208], sizes = [256, 16], strides = [1, 1]} : vector<256x256xbf16> to vector<256x16xbf16>
    %cst_47 = arith.constant dense<0.000000e+00> : vector<16x256xf32>
    %147 = tpu.matmul %144, %145, %cst_47 {dimension_numbers = #tpu.dot_dimension_numbers<[1], [1], [0], [0], [0, 0, 1, 0], [], []>} : vector<16x16xbf16>, vector<256x16xbf16>, vector<16x256xf32> -> vector<16x256xf32>
    %148 = arith.addf %147, %19 : vector<16x256xf32>
    %cst_48 = arith.constant dense<0xFF800000> : vector<16xf32>
    %149 = vector.multi_reduction <maximumf>, %148, %cst_48 [1] : vector<16x256xf32> to vector<16xf32>
    %150 = vector.shape_cast %149 : vector<16xf32> to vector<16x1xf32>
    %151 = vector.broadcast %150 : vector<16x1xf32> to vector<16x256xf32>
    %152 = arith.subf %148, %151 : vector<16x256xf32>
    %153 = math.exp %152 : vector<16x256xf32>
    %cst_49 = arith.constant dense<0.000000e+00> : vector<16xf32>
    %154 = vector.multi_reduction <add>, %153, %cst_49 [1] : vector<16x256xf32> to vector<16xf32>
    %155 = vector.shape_cast %154 : vector<16xf32> to vector<16x1xf32>
    %156 = tpu.reciprocal %155 {approx = true} : vector<16x1xf32> -> vector<16x1xf32>
    %157 = arith.mulf %155, %156 : vector<16x1xf32>
    %cst_50 = arith.constant 2.000000e+00 : f32
    %158 = vector.broadcast %cst_50 : f32 to vector<16x1xf32>
    %159 = arith.subf %158, %157 : vector<16x1xf32>
    %160 = arith.mulf %156, %159 : vector<16x1xf32>
    %161 = vector.broadcast %160 : vector<16x1xf32> to vector<16x256xf32>
    %162 = arith.mulf %153, %161 : vector<16x256xf32>
    %163 = arith.truncf %162 : vector<16x256xf32> to vector<16x256xbf16>
    %cst_51 = arith.constant dense<0.000000e+00> : vector<16x16xf32>
    %164 = tpu.matmul %163, %146, %cst_51 {dimension_numbers = #tpu.dot_dimension_numbers<[1], [0], [0], [1], [0, 0, 1, 1], [], []>} : vector<16x256xbf16>, vector<256x16xbf16>, vector<16x16xf32> -> vector<16x16xf32>
    %165 = arith.truncf %164 : vector<16x16xf32> to vector<16x16xbf16>
    %c80 = arith.constant 80 : index
    %c0_52 = arith.constant 0 : index
    %166 = vector.load %arg5[%c80, %c0_52] : memref<128x128xbf16, #tpu.memory_space<vmem>>, vector<16x128xbf16>
    %cst_53 = arith.constant dense<0.000000e+00> : vector<16x128xf32>
    %167 = tpu.matmul %165, %166, %cst_53 {dimension_numbers = #tpu.dot_dimension_numbers<[1], [0], [0], [1], [0, 0, 1, 1], [], []>} : vector<16x16xbf16>, vector<16x128xbf16>, vector<16x128xf32> -> vector<16x128xf32>
    %168 = arith.addf %143, %167 : vector<16x128xf32>
    %169 = vector.extract_strided_slice %3 {offsets = [0, 96], sizes = [16, 16], strides = [1, 1]} : vector<16x128xbf16> to vector<16x16xbf16>
    %170 = vector.extract_strided_slice %7 {offsets = [0, 96], sizes = [256, 16], strides = [1, 1]} : vector<256x256xbf16> to vector<256x16xbf16>
    %171 = vector.extract_strided_slice %7 {offsets = [0, 224], sizes = [256, 16], strides = [1, 1]} : vector<256x256xbf16> to vector<256x16xbf16>
    %cst_54 = arith.constant dense<0.000000e+00> : vector<16x256xf32>
    %172 = tpu.matmul %169, %170, %cst_54 {dimension_numbers = #tpu.dot_dimension_numbers<[1], [1], [0], [0], [0, 0, 1, 0], [], []>} : vector<16x16xbf16>, vector<256x16xbf16>, vector<16x256xf32> -> vector<16x256xf32>
    %173 = arith.addf %172, %19 : vector<16x256xf32>
    %cst_55 = arith.constant dense<0xFF800000> : vector<16xf32>
    %174 = vector.multi_reduction <maximumf>, %173, %cst_55 [1] : vector<16x256xf32> to vector<16xf32>
    %175 = vector.shape_cast %174 : vector<16xf32> to vector<16x1xf32>
    %176 = vector.broadcast %175 : vector<16x1xf32> to vector<16x256xf32>
    %177 = arith.subf %173, %176 : vector<16x256xf32>
    %178 = math.exp %177 : vector<16x256xf32>
    %cst_56 = arith.constant dense<0.000000e+00> : vector<16xf32>
    %179 = vector.multi_reduction <add>, %178, %cst_56 [1] : vector<16x256xf32> to vector<16xf32>
    %180 = vector.shape_cast %179 : vector<16xf32> to vector<16x1xf32>
    %181 = tpu.reciprocal %180 {approx = true} : vector<16x1xf32> -> vector<16x1xf32>
    %182 = arith.mulf %180, %181 : vector<16x1xf32>
    %cst_57 = arith.constant 2.000000e+00 : f32
    %183 = vector.broadcast %cst_57 : f32 to vector<16x1xf32>
    %184 = arith.subf %183, %182 : vector<16x1xf32>
    %185 = arith.mulf %181, %184 : vector<16x1xf32>
    %186 = vector.broadcast %185 : vector<16x1xf32> to vector<16x256xf32>
    %187 = arith.mulf %178, %186 : vector<16x256xf32>
    %188 = arith.truncf %187 : vector<16x256xf32> to vector<16x256xbf16>
    %cst_58 = arith.constant dense<0.000000e+00> : vector<16x16xf32>
    %189 = tpu.matmul %188, %171, %cst_58 {dimension_numbers = #tpu.dot_dimension_numbers<[1], [0], [0], [1], [0, 0, 1, 1], [], []>} : vector<16x256xbf16>, vector<256x16xbf16>, vector<16x16xf32> -> vector<16x16xf32>
    %190 = arith.truncf %189 : vector<16x16xf32> to vector<16x16xbf16>
    %c96 = arith.constant 96 : index
    %c0_59 = arith.constant 0 : index
    %191 = vector.load %arg5[%c96, %c0_59] : memref<128x128xbf16, #tpu.memory_space<vmem>>, vector<16x128xbf16>
    %cst_60 = arith.constant dense<0.000000e+00> : vector<16x128xf32>
    %192 = tpu.matmul %190, %191, %cst_60 {dimension_numbers = #tpu.dot_dimension_numbers<[1], [0], [0], [1], [0, 0, 1, 1], [], []>} : vector<16x16xbf16>, vector<16x128xbf16>, vector<16x128xf32> -> vector<16x128xf32>
    %193 = arith.addf %168, %192 : vector<16x128xf32>
    %194 = vector.extract_strided_slice %3 {offsets = [0, 112], sizes = [16, 16], strides = [1, 1]} : vector<16x128xbf16> to vector<16x16xbf16>
    %195 = vector.extract_strided_slice %7 {offsets = [0, 112], sizes = [256, 16], strides = [1, 1]} : vector<256x256xbf16> to vector<256x16xbf16>
    %196 = vector.extract_strided_slice %7 {offsets = [0, 240], sizes = [256, 16], strides = [1, 1]} : vector<256x256xbf16> to vector<256x16xbf16>
    %cst_61 = arith.constant dense<0.000000e+00> : vector<16x256xf32>
    %197 = tpu.matmul %194, %195, %cst_61 {dimension_numbers = #tpu.dot_dimension_numbers<[1], [1], [0], [0], [0, 0, 1, 0], [], []>} : vector<16x16xbf16>, vector<256x16xbf16>, vector<16x256xf32> -> vector<16x256xf32>
    %198 = arith.addf %197, %19 : vector<16x256xf32>
    %cst_62 = arith.constant dense<0xFF800000> : vector<16xf32>
    %199 = vector.multi_reduction <maximumf>, %198, %cst_62 [1] : vector<16x256xf32> to vector<16xf32>
    %200 = vector.shape_cast %199 : vector<16xf32> to vector<16x1xf32>
    %201 = vector.broadcast %200 : vector<16x1xf32> to vector<16x256xf32>
    %202 = arith.subf %198, %201 : vector<16x256xf32>
    %203 = math.exp %202 : vector<16x256xf32>
    %cst_63 = arith.constant dense<0.000000e+00> : vector<16xf32>
    %204 = vector.multi_reduction <add>, %203, %cst_63 [1] : vector<16x256xf32> to vector<16xf32>
    %205 = vector.shape_cast %204 : vector<16xf32> to vector<16x1xf32>
    %206 = tpu.reciprocal %205 {approx = true} : vector<16x1xf32> -> vector<16x1xf32>
    %207 = arith.mulf %205, %206 : vector<16x1xf32>
    %cst_64 = arith.constant 2.000000e+00 : f32
    %208 = vector.broadcast %cst_64 : f32 to vector<16x1xf32>
    %209 = arith.subf %208, %207 : vector<16x1xf32>
    %210 = arith.mulf %206, %209 : vector<16x1xf32>
    %211 = vector.broadcast %210 : vector<16x1xf32> to vector<16x256xf32>
    %212 = arith.mulf %203, %211 : vector<16x256xf32>
    %213 = arith.truncf %212 : vector<16x256xf32> to vector<16x256xbf16>
    %cst_65 = arith.constant dense<0.000000e+00> : vector<16x16xf32>
    %214 = tpu.matmul %213, %196, %cst_65 {dimension_numbers = #tpu.dot_dimension_numbers<[1], [0], [0], [1], [0, 0, 1, 1], [], []>} : vector<16x256xbf16>, vector<256x16xbf16>, vector<16x16xf32> -> vector<16x16xf32>
    %215 = arith.truncf %214 : vector<16x16xf32> to vector<16x16xbf16>
    %c112 = arith.constant 112 : index
    %c0_66 = arith.constant 0 : index
    %216 = vector.load %arg5[%c112, %c0_66] : memref<128x128xbf16, #tpu.memory_space<vmem>>, vector<16x128xbf16>
    %cst_67 = arith.constant dense<0.000000e+00> : vector<16x128xf32>
    %217 = tpu.matmul %215, %216, %cst_67 {dimension_numbers = #tpu.dot_dimension_numbers<[1], [0], [0], [1], [0, 0, 1, 1], [], []>} : vector<16x16xbf16>, vector<16x128xbf16>, vector<16x128xf32> -> vector<16x128xf32>
    %218 = arith.addf %193, %217 : vector<16x128xf32>
    %c0_68 = arith.constant 0 : index
    %c0_69 = arith.constant 0 : index
    %219 = vector.load %arg6[%c0_68, %c0_69] : memref<1x128xf32, #tpu.memory_space<vmem>>, vector<1x128xf32>
    %220 = vector.broadcast %219 : vector<1x128xf32> to vector<16x128xf32>
    %221 = arith.addf %218, %220 : vector<16x128xf32>
    %c0_70 = arith.constant 0 : index
    %c0_71 = arith.constant 0 : index
    %222 = vector.load %arg7[%c0_70, %c0_71] : memref<16x128xf32, #tpu.memory_space<vmem>>, vector<16x128xf32>
    tpu.vector_store %arg7[%c0_70, %c0_71], %221 {strides = array<i32>} : memref<16x128xf32, #tpu.memory_space<vmem>>, vector<16x128xf32>,
    return
  }
  func.func @transform_0(%arg0: i32) -> (i32, i32) {
    %c0_i32 = arith.constant 0 : i32
    %c0_i32_0 = arith.constant 0 : i32
    return %arg0, %c0_i32 : i32, i32
  }
  func.func @transform_1(%arg0: i32) -> (i32, i32) {
    %c0_i32 = arith.constant 0 : i32
    %c0_i32_0 = arith.constant 0 : i32
    return %arg0, %c0_i32 : i32, i32
  }
  func.func @transform_2(%arg0: i32) -> (i32, i32) {
    %c0_i32 = arith.constant 0 : i32
    %c0_i32_0 = arith.constant 0 : i32
    %c0_i32_1 = arith.constant 0 : i32
    return %c0_i32, %c0_i32_0 : i32, i32
  }
  func.func @transform_3(%arg0: i32) -> (i32, i32) {
    %c0_i32 = arith.constant 0 : i32
    %c0_i32_0 = arith.constant 0 : i32
    %c0_i32_1 = arith.constant 0 : i32
    return %c0_i32, %c0_i32_0 : i32, i32
  }
  func.func @transform_4(%arg0: i32) -> (i32, i32) {
    %c0_i32 = arith.constant 0 : i32
    %c0_i32_0 = arith.constant 0 : i32
    %c0_i32_1 = arith.constant 0 : i32
    return %c0_i32, %c0_i32_0 : i32, i32
  }
  func.func @transform_5(%arg0: i32) -> (i32, i32) {
    %c0_i32 = arith.constant 0 : i32
    %c0_i32_0 = arith.constant 0 : i32
    %c0_i32_1 = arith.constant 0 : i32
    return %c0_i32, %c0_i32_0 : i32, i32
  }
  func.func @transform_6(%arg0: i32) -> (i32, i32) {
    %c0_i32 = arith.constant 0 : i32
    %c0_i32_0 = arith.constant 0 : i32
    return %arg0, %c0_i32 : i32, i32
  }
}

</mosaic_0001>

<bundles_post_ra>
// kernel: tpu_custom_call.1
= control target key start
LH: loop header
LB: loop body
LE: loop exit
PB: predicated region body
PF: predicated region fallthrough
CT: control target
= control target key end

     0   :  { %s5879_s0 = inlined_call_operand.hbm [shape: bf16[32,128], index: 0, kind: input, shape index: {}]   ;;  %s5880_s1 = inlined_call_operand.hbm [shape: bf16[512,128], index: 1, kind: input, shape index: {}]   ;;  %s5881_s2 = inlined_call_operand.hbm [shape: bf16[128,128], index: 2, kind: input, shape index: {}]   ;;  %s5882_s3 = inlined_call_operand.hbm [shape: bf16[128,256], index: 3, kind: input, shape index: {}]   ;;  %s5883_s4 = inlined_call_operand.hbm [shape: bf16[128,128], index: 4, kind: input, shape index: {}]   ;;  %s5884_s5 = inlined_call_operand.vmem [shape: f32[1,128], index: 5, kind: input, shape index: {}]   ;;  %s5885_s6 = inlined_call_operand.hbm [shape: f32[32,128], index: 6, kind: output, shape index: {}]  }
   0x1   :  { %5901 = sst [smem:[#allocation20_spill]] %s5879_s0 }
   0x2   :  { %5902 = sst [smem:[#allocation21_spill]] %s5881_s2 }
   0x3   :  { %5903 = sst [smem:[#allocation22_spill]] %s5882_s3 }
   0x4   :  { %5904 = sst [smem:[#allocation23_spill]] %s5883_s4 }
   0x5   :  { %11 = vsyncpa [#allocation3], 0 }
   0x6   :  { %13 = vsyncpa [#allocation3 + $0x1], 0 }
   0x7   :  { %14 = vsyncpa [#allocation6], 0 }
   0x8   :  { %16 = vsyncpa [#allocation6 + $0x1], 0 }
   0x9   :  { %17 = vsyncpa [#allocation9], 0 }
   0xa   :  { %18 = vsyncpa [#allocation4], 0 }
   0xb   :  { %20 = vsyncpa [#allocation4 + $0x1], 0  ;;  %s4627_s21 = smov 0   ;;  %s4629_s22 = smov 0  }
   0xc   :  { %s4631_s23 = smov 0   ;;  %s4633_s24 = smov 0  }
   0xd LB: > { %s4648_s25 = sadd.s32 4294967295, %s4567_s24   ;;  %s3523_s26 = sadd.s32 4294967294, %s4567_s24   ;;  %s4567_s24 = sphi %s4633_s24, %s5938_s24   ;;  %s4563_s23 = sphi %s4631_s23, %s5937_s23   ;;  %s4559_s22 = sphi %s4629_s22, %s5936_s22   ;;  %s4555_s21 = sphi %s4627_s21, %s5935_s21  }
   0xe   : > { %p46_p0 = scmp.ne.s32.totalorder %s4559_s22, %s4555_s21  ;;  %p5886_p1 = scmp.eq.s32.totalorder %s4648_s25, 0 }
   0xf   : > { %p186_p3 = scmp.eq.s32.totalorder %s3523_s26, 1  ;;  %p3524_p5 = scmp.ge.s32.totalorder %s4567_s24, 1 }
  0x10   : > { %p4657_p4 = por %p5886_p1, %p46_p0  ;;  %p193_p7 = scmp.lt.s32.totalorder %s4567_s24, 3 }
  0x11   : > { %p4662_p6 = por %p186_p3, %p46_p0  ;;  %s4569_s30 = smov [#allocation7]  }
  0x12   : > { %s5905_s27 = scalar_select %p4657_p4, 1, 0 }
  0x13   : > { %s5906_s28 = scalar_select %p4662_p6, 1, 0 }
  0x14   : > { %p4667_p8 = pnand %p3524_p5, %p193_p7  ;;  %s205_s7 = sshll.u32 %s4569_s30, 4  ;;  %s4671_s7 = int_to_ptr.vmem [resolvable:$true] %s205_s7 }
  0x15   : > { %s4570_s9 = smov [#allocation8]   ;;  %s5909_s2 = sld [smem:[#allocation21_spill]] }
  0x16   : > { %s5907_s29 = scalar_select %p4667_p8, 1, 0 }
  0x17   : > { %p4111_p9 = pneg %p4667_p8  ;;  %s218_s10 = sshll.u32 %s4570_s9, 4  ;;  %s4682_s10 = int_to_ptr.vmem [resolvable:$true] %s218_s10 }
  0x19   : > { %p4678_p11 = pnand %p4111_p9, %p5886_p1 }
  0x1b   : > { %s4345_s13 = scalar_lea.hbm %s5909_s2, 1024  ;;  %p4692_p13 = pneg %p4678_p11 }
  0x1c   : > { %p4346_p12 = scmp.ne.s32.totalorder %s5909_s2, %s4345_s13  ;;  %p4352_p5 = scmp.lt.u32.totalorder %s4345_s13, %s5909_s2 }
  0x1e   : > { %p4348_p0 = pnand %p4692_p13, %p4346_p12 }
  0x20   : > { %p4349_p3 = pneg %p4348_p0 }
  0x22   : > { %p4354_p7 = pnand %p4352_p5, %p4349_p3 }
  0x24   : > { %4357 = shalt.err (!%p4354_p7)
}
  0x25   : > { %s4358_s19 = scalar_lea.vmem %s4671_s7, 1024  ;;  %p4366_p2 = scmp.lt.s32.totalorder %s4671_s7, %s4671_s7 }
  0x26   : > { %p4359_p9 = scmp.ne.s32.totalorder %s4671_s7, %s4358_s19  ;;  %p4367_p6 = scmp.lt.s32.totalorder %s4358_s19, %s4358_s19 }
  0x28   : > { %p4361_p10 = pnand %p4359_p9, %p4692_p13  ;;  %p4368_p12 = por %p4367_p6, %p4366_p2 }
  0x2a   : > { %p4362_p1 = pneg %p4361_p10 }
  0x2c   : > { %p4369_p0 = pnand %p4368_p12, %p4362_p1 }
  0x2e   : > { %4372 = shalt.err (!%p4369_p0)
}
  0x2f   : > { %s5887_s20 = smov 64   ;;  %s5889_s26 = smov 4  }
  0x30   : > { %4114 = dma.hbm_to_vmem [thread:$0]  (!%p4678_p11), %s5909_s2, 1024, %s4671_s7, [#allocation6], %s5887_s20, %s5887_s20, %s5889_s26  }
  0x31   : > { %s5911_s3 = sld [smem:[#allocation22_spill]] }
  0x37   : > { %s4373_s13 = scalar_lea.hbm %s5911_s3, 2048 }
  0x38   : > { %p4374_p1 = scmp.ne.s32.totalorder %s5911_s3, %s4373_s13  ;;  %p4380_p10 = scmp.lt.u32.totalorder %s4373_s13, %s5911_s3 }
  0x3a   : > { %p4376_p2 = pnand %p4374_p1, %p4692_p13 }
  0x3c   : > { %p4377_p6 = pneg %p4376_p2 }
  0x3e   : > { %p4382_p3 = pnand %p4380_p10, %p4377_p6 }
  0x40   : > { %4385 = shalt.err (!%p4382_p3)
}
  0x41   : > { %s4386_s7 = scalar_lea.vmem %s4682_s10, 2048  ;;  %p4394_p12 = scmp.lt.s32.totalorder %s4682_s10, %s4682_s10 }
  0x42   : > { %p4387_p5 = scmp.ne.s32.totalorder %s4682_s10, %s4386_s7  ;;  %p4395_p0 = scmp.lt.s32.totalorder %s4386_s7, %s4386_s7 }
  0x44   : > { %p4389_p7 = pnand %p4387_p5, %p4692_p13  ;;  %p4396_p1 = por %p4395_p0, %p4394_p12 }
  0x46   : > { %p4390_p9 = pneg %p4389_p7 }
  0x48   : > { %p4397_p2 = pnand %p4396_p1, %p4390_p9 }
  0x4a   : > { %4400 = shalt.err (!%p4397_p2)
}
  0x4b   : > { %s4573_s19 = smov 128   ;;  %s4574_s30 = smov 8  }
  0x4c   : > { %4117 = dma.hbm_to_vmem [thread:$0]  (!%p4678_p11), %s5911_s3, 2048, %s4682_s10, [#allocation9], %s4573_s19, %s4573_s19, %s4574_s30  }
  0x4d   : > { %s4575_s12 = smov [#allocation10]   ;;  %s4740_s14 = sadd.s32 1, %s4567_s24  }
  0x4e   : > { %s231_s13 = sshll.u32 %s4575_s12, 4  ;;  %s5912_s4 = sld [smem:[#allocation23_spill]]  ;;  %s232_s13 = int_to_ptr.vmem [resolvable:$true] %s231_s13 }
  0x54   : > { %s4401_s18 = scalar_lea.hbm %s5912_s4, 1024 }
  0x55   : > { %p4402_p6 = scmp.ne.s32.totalorder %s5912_s4, %s4401_s18  ;;  %p4408_p5 = scmp.lt.u32.totalorder %s4401_s18, %s5912_s4 }
  0x57   : > { %p4404_p10 = pnand %p4402_p6, %p4692_p13 }
  0x59   : > { %p4405_p3 = pneg %p4404_p10 }
  0x5b   : > { %p4410_p7 = pnand %p4408_p5, %p4405_p3 }
  0x5d   : > { %4413 = shalt.err (!%p4410_p7)
}
  0x5e   : > { %s4414_s10 = scalar_lea.vmem %s232_s13, 1024  ;;  %p4422_p1 = scmp.lt.s32.totalorder %s232_s13, %s232_s13 }
  0x5f   : > { %p4415_p9 = scmp.ne.s32.totalorder %s232_s13, %s4414_s10  ;;  %p4423_p2 = scmp.lt.s32.totalorder %s4414_s10, %s4414_s10 }
  0x61   : > { %p4417_p12 = pnand %p4415_p9, %p4692_p13  ;;  %p4424_p4 = por %p4423_p2, %p4422_p1 }
  0x63   : > { %p4418_p0 = pneg %p4417_p12 }
  0x65   : > { %p4425_p8 = pnand %p4424_p4, %p4418_p0 }
  0x67   : > { %4428 = shalt.err (!%p4425_p8)
}
  0x68   : > { %s5913_s20 = smov 4   ;;  %s5914_s19 = smov 64  }
  0x69   : > { %4120 = dma.hbm_to_vmem [thread:$0]  (!%p4678_p11), %s5912_s4, 1024, %s232_s13, [#allocation9], %s5914_s19, %s5914_s19, %s5913_s20  }
  0x6a   : > { %s30_s16 = ssub.s32 %s4567_s24, %s4740_s14  ;;  %s33_s8 = sadd.s32 1, %s4563_s23 }
  0x6b   : > { %p31_p4 = scmp.eq.s32.totalorder %s30_s16, 0  ;;  %p40_p8 = scmp.ne.s32.totalorder %s4563_s23, %s4559_s22 }
  0x6c   : > { %p41_p13 = scmp.eq.s32.totalorder %s4567_s24, 0  ;;  %p4135_p6 = scmp.lt.s32.totalorder %s4567_s24, 2 }
  0x6d   : > { %s4771_s30 = scalar_select %p31_p4, %s4563_s23, %s33_s8  }
  0x6e   : > { %p42_p10 = por %p41_p13, %p40_p8  ;;  %p5915_p3 = scmp.eq.s32.totalorder %s4648_s25, 1 }
  0x6f   : > { %s4780_s11 = sand.u32 1, %s4563_s23   ;;  %s3613_s12 = sshll.u32 %s4567_s24, 7 }
  0x70   : > { %p4775_p5 = por %p5915_p3, %p40_p8  ;;  %s3529_s13 = sshll.u32 %s4780_s11, 3 }
  0x71   : > { %s5917_s0 = sld [smem:[#allocation20_spill]]  ;;  %s252_s7 = scalar_lea.vmem [#allocation2], %s3529_s13 }
  0x72   : > { %s259_s10 = sshll.u32 %s252_s7, 4  ;;  %p4789_p11 = pnand %p4135_p6, %p42_p10  ;;  %s4793_s10 = int_to_ptr.vmem [resolvable:$true] %s259_s10 }
  0x73   : > { %s249_s16 = scalar_lea.sflag [#allocation3], %s4780_s11 }
  0x74   : > { %p4431_p9 = pneg %p4789_p11 }
  0x77   : > { %s4787_s18 = scalar_lea.hbm %s5917_s0, %s3613_s12  ;;  %s4434_s15 = scalar_lea.hbm %s5917_s0, 256 }
  0x78   : > { %s4429_s8 = scalar_lea.hbm %s4787_s18, 128  ;;  %p4435_p1 = scmp.lt.u32.totalorder %s4787_s18, %s5917_s0 }
  0x79   : > { %p4430_p7 = scmp.ne.s32.totalorder %s4787_s18, %s4429_s8  ;;  %p4436_p2 = scmp.lt.u32.totalorder %s4434_s15, %s4429_s8 }
  0x7a   : > { %p4438_p8 = scmp.lt.u32.totalorder %s4429_s8, %s4787_s18 }
  0x7b   : > { %p4432_p12 = pnand %p4431_p9, %p4430_p7  ;;  %p4437_p4 = por %p4436_p2, %p4435_p1 }
  0x7d   : > { %p4433_p0 = pneg %p4432_p12  ;;  %p4439_p13 = por %p4438_p8, %p4437_p4 }
  0x7f   : > { %p4440_p6 = pnand %p4439_p13, %p4433_p0 }
  0x81   : > { %4443 = shalt.err (!%p4440_p6)
}
  0x82   : > { %s4444_s26 = scalar_lea.vmem %s4793_s10, 128  ;;  %s4576_s12 = smov [#allocation2]  }
  0x83   : > { %p4445_p10 = scmp.ne.s32.totalorder %s4793_s10, %s4444_s26  ;;  %s4449_s13 = sshll.u32 %s4576_s12, 4  ;;  %s4450_s13 = int_to_ptr.vmem [resolvable:$false] %s4449_s13 }
  0x84   : > { %s4451_s17 = scalar_lea.vmem %s4450_s13, 256  ;;  %p4452_p12 = scmp.lt.s32.totalorder %s4793_s10, %s4450_s13 }
  0x85   : > { %p4447_p3 = pnand %p4445_p10, %p4431_p9  ;;  %p4453_p1 = scmp.lt.s32.totalorder %s4451_s17, %s4444_s26 }
  0x87   : > { %p4448_p7 = pneg %p4447_p3  ;;  %p4454_p2 = por %p4453_p1, %p4452_p12 }
  0x89   : > { %p4455_p4 = pnand %p4454_p2, %p4448_p7 }
  0x8b   : > { %4458 = shalt.err (!%p4455_p4)
}
  0x8c   : > { %4124 = dma.hbm_to_vmem [thread:$0]  (!%p4789_p11), %s4787_s18, 128, %s4793_s10, %s249_s16, %s5914_s19, %s5914_s19, %s5913_s20  }
  0x8d   : > { %s3532_s8 = sshll.u32 %s4780_s11, 7  ;;  %s3614_s15 = sshll.u32 %s4567_s24, 11 }
  0x8e   : > { %s4832_s12 = scalar_lea.hbm %s5880_s1, %s3614_s15  ;;  %s273_s13 = scalar_lea.vmem [#allocation5], %s3532_s8 }
  0x8f   : > { %s280_s17 = sshll.u32 %s273_s13, 4  ;;  %s5919_s0 = sand.u32 1, %s4567_s24   ;;  %s4834_s17 = int_to_ptr.vmem [resolvable:$true] %s280_s17 }
  0x90   : > { %s4838_s3 = scalar_lea.sflag [#allocation6], %s5919_s0  ;;  %s4459_s4 = scalar_lea.hbm %s4832_s12, 2048 }
  0x91   : > { %p4460_p0 = scmp.ne.s32.totalorder %s4832_s12, %s4459_s4  ;;  %s4464_s10 = scalar_lea.hbm %s5880_s1, 4096 }
  0x92   : > { %p4465_p6 = scmp.lt.u32.totalorder %s4832_s12, %s5880_s1  ;;  %p4466_p10 = scmp.lt.u32.totalorder %s4464_s10, %s4459_s4 }
  0x93   : > { %p4462_p8 = pnand %p4460_p0, %p4431_p9  ;;  %p4468_p7 = scmp.lt.u32.totalorder %s4459_s4, %s4832_s12 }
  0x94   : > { %p4467_p3 = por %p4466_p10, %p4465_p6 }
  0x95   : > { %p4463_p13 = pneg %p4462_p8 }
  0x96   : > { %p4469_p12 = por %p4468_p7, %p4467_p3 }
  0x98   : > { %p4470_p1 = pnand %p4469_p12, %p4463_p13 }
  0x9a   : > { %4473 = shalt.err (!%p4470_p1)
}
  0x9b   : > { %s4474_s0 = scalar_lea.vmem %s4834_s17, 2048  ;;  %s4577_s8 = smov [#allocation5]  }
  0x9c   : > { %p4475_p2 = scmp.ne.s32.totalorder %s4834_s17, %s4474_s0  ;;  %s4479_s26 = sshll.u32 %s4577_s8, 4  ;;  %s4480_s26 = int_to_ptr.vmem [resolvable:$false] %s4479_s26 }
  0x9d   : > { %s4481_s7 = scalar_lea.vmem %s4480_s26, 4096  ;;  %p4482_p8 = scmp.lt.s32.totalorder %s4834_s17, %s4480_s26 }
  0x9e   : > { %p4477_p4 = pnand %p4475_p2, %p4431_p9  ;;  %p4483_p6 = scmp.lt.s32.totalorder %s4481_s7, %s4474_s0 }
  0xa0   : > { %p4478_p0 = pneg %p4477_p4  ;;  %p4484_p10 = por %p4483_p6, %p4482_p8 }
  0xa2   : > { %p4485_p3 = pnand %p4484_p10, %p4478_p0 }
  0xa4   : > { %4488 = shalt.err (!%p4485_p3)
}
  0xa5   : > { %4127 = dma.hbm_to_vmem [thread:$0]  (!%p4789_p11), %s4832_s12, 2048, %s4834_s17, %s4838_s3, %s5914_s19, %s5914_s19, %s5913_s20  }
  0xa6   : > { %p5920_p9 = scmp.ne.s32.totalorder %s5907_s29, 0 }
  0xa8   : > { %292 = sbr.rel (%p5920_p9) target bundleno = 6639 (0x19ef), region = 44 }
  0xaf   : > { %s4870_s4 = sand.u32 1, %s4559_s22   ;;  %p5921_p13 = scmp.ne.s32.totalorder %s5905_s27, 0 }
  0xb0   : > { %s3536_s13 = sshll.u32 %s4870_s4, 3  ;;  %s295_s11 = scalar_lea.sflag [#allocation3], %s4870_s4 }
  0xb1   : > { %s4874_s18 = scalar_lea.vmem [#allocation2], %s3536_s13 }
  0xb2   : > { %4534 = dma.done.wait (%p5921_p13), %s295_s11, 128  }
  0xb3   : > { %4536 = vsyncadd (%p5921_p13), %s295_s11, 4294967168  ;;  %s303_s3 = sand.u32 1, %s4648_s25   ;;  %s3537_s29 = sshll.u32 %s4870_s4, 7 }
  0xb4   : > { %s304_s20 = scalar_lea.sflag [#allocation6], %s303_s3  ;;  %s4882_s19 = scalar_lea.vmem [#allocation5], %s3537_s29 }
  0xb5   : > { %4538 = dma.done.wait (%p5921_p13), %s304_s20, 2048  }
  0xb6   : > { %4540 = vsyncadd (%p5921_p13), %s304_s20, 4294965248  ;;  %p5922_p11 = scmp.eq.s32.totalorder %s4648_s25, 0 }
  0xb8   : > { %4542 = dma.done.wait (%p5922_p11), [#allocation6], 1024   ;;  %p5923_p7 = pmov %p5922_p11 }
  0xba   : > { %4544 = vsyncadd (%p5923_p7), [#allocation6], 4294966272  ;;  %p5924_p12 = pmov %p5923_p7 }
  0xbb   : > { %p5925_p1 = pmov %p5923_p7 }
  0xbc   : > { %4546 = dma.done.wait (%p5924_p12), [#allocation9], 3072  }
  0xbd   : > { %4548 = vsyncadd (%p5925_p1), [#allocation9], 4294964224  ;;  %v4578_v0 = vmov 0   ;;  %v5893_v1 = vmov 0.0   ;;  %vm4580_vm0 = vmmov 0   ;;  %v4224_v14 = vld [vmem:[#allocation7] sm:$0xff]  }
  0xbe   : > { %727 = vmatprep.mubr.bf16.mxu1 %v4578_v0  ;;  %3961 = vmatprep.subr.bf16.mxu0 %v5893_v1  ;;  %v4192_v2 = vld [vmem:[#allocation8 + $0x4] ss:$8 sps:$4 sm:$0xff]   ;;  %v4194_v3 = vld [vmem:[#allocation8] ss:$8 sps:$4 sm:$0xff]   ;;  %v4195_v4 = vld [vmem:[#allocation8 + $0x14] ss:$8 sps:$4 sm:$0xff]  }
  0xbf   : > { %3977 = vmatprep.mubr.msk.bf16.mxu0 %vm4580_vm0, %v5893_v1  ;;  %695 = vmatprep.subr.bf16.mxu1 %v4192_v2  ;;  %v4197_v5 = vld [vmem:[#allocation8 + $0x10] ss:$8 sps:$4 sm:$0xff]   ;;  %v4198_v6 = vld [vmem:[#allocation8 + $0x24] ss:$8 sps:$4 sm:$0xff]   ;;  %v4200_v7 = vld [vmem:[#allocation8 + $0x20] ss:$8 sps:$4 sm:$0xff]  }
  0xc0   : > { %696 = vmatpush1.bf16.msra.mxu1 %v4194_v3  ;;  %v4201_v8 = vld [vmem:[#allocation8 + $0x34] ss:$8 sps:$4 sm:$0xff]   ;;  %v4203_v9 = vld [vmem:[#allocation8 + $0x30] ss:$8 sps:$4 sm:$0xff]   ;;  %v4204_v10 = vld [vmem:[#allocation8 + $0x44] ss:$8 sps:$4 sm:$0xff]   ;;  %3962 = vmatpush3.bf16.msra.mxu0 %v4224_v14 }
  0xc1   : > { %697 = vmatprep.subr.bf16.mxu1 %v4195_v4  ;;  %v4206_v11 = vld [vmem:[#allocation8 + $0x40] ss:$8 sps:$4 sm:$0xff]   ;;  %v4207_v12 = vld [vmem:[#allocation8 + $0x54] ss:$8 sps:$4 sm:$0xff]   ;;  %v4209_v13 = vld [vmem:[#allocation8 + $0x50] ss:$8 sps:$4 sm:$0xff]   ;;  %3963 = vmatprep.subr.bf16.mxu0 %v5893_v1 }
  0xc2   : > { %v4210_v15 = vld [vmem:[#allocation8 + $0x64] ss:$8 sps:$4 sm:$0xff]   ;;  %v4212_v17 = vld [vmem:[#allocation8 + $0x60] ss:$8 sps:$4 sm:$0xff]   ;;  %v4213_v18 = vld [vmem:[#allocation8 + $0x74] ss:$8 sps:$4 sm:$0xff]  }
  0xc3   : > { %v4226_v16 = vld [vmem:[#allocation7 + $0x8] sm:$0xff]   ;;  %v4227_v19 = vld [vmem:[#allocation7 + $0x10] sm:$0xff]   ;;  %v4229_v21 = vld [vmem:[#allocation7 + $0x18] sm:$0xff]   ;;  %s4581_s27 = smov 112   ;;  %vm946_vm1 = vcmask 130048   ;;  %s4583_s2 = smov 96  }
  0xc4   : > { %698 = vmatpush1.bf16.msra.mxu1 %v4197_v5  ;;  %3964 = vmatpush3.bf16.msra.mxu0 %v4226_v16  ;;  %v4215_v20 = vld [vmem:[#allocation8 + $0x70] ss:$8 sps:$4 sm:$0xff]   ;;  %v4216_v22 = vld [vmem:[%s4882_s19] sm:$0xff]   ;;  %v4232_v24 = vld [vmem:[#allocation7 + $0x28] sm:$0xff]   ;;  %s4584_s12 = smov 80   ;;  %s4585_s17 = smov 64  }
  0xc5   : > { %699 = vmatprep.subr.bf16.mxu1 %v4198_v6  ;;  %3965 = vmatprep.subr.bf16.mxu0 %v5893_v1  ;;  %v4230_v23 = vld [vmem:[#allocation7 + $0x20] sm:$0xff]   ;;  %v4217_v25 = vld [vmem:[%s4882_s19 + $0x8] sm:$0xff]   ;;  %v4233_v26 = vld [vmem:[#allocation7 + $0x30] sm:$0xff]   ;;  %s4586_s10 = smov 48   ;;  %s4587_s16 = smov 32  }
  0xc6   : > { %v4235_v27 = vld [vmem:[#allocation7 + $0x38] sm:$0xff]   ;;  %v4218_v28 = vld [vmem:[%s4882_s19 + $0x10] sm:$0xff]   ;;  %v4220_v31 = vld [vmem:[%s4882_s19 + $0x20] sm:$0xff]   ;;  %s4588_s15 = smov 16   ;;  %s3541_s0 = sshll.u32 %s4870_s4, 4 }
  0xc7   : > { %v4236_v29 = vld [vmem:[%s4874_s18] sm:$0xff]   ;;  %v4221_v32 = vld [vmem:[%s4882_s19 + $0x28] sm:$0xff]   ;;  %v4225_v35 = vld [vmem:[%s4882_s19 + $0x40] sm:$0xff]   ;;  %s352_s7 = scalar_lea.vmem [#allocation11], %s3541_s0  ;;  %s3615_s11 = sshll.u32 %s4648_s25, 8 }
  0xc8   : > { %700 = vmatpush1.bf16.msra.mxu1 %v4200_v7  ;;  %3966 = vmatpush3.bf16.msra.mxu0 %v4227_v19  ;;  %v4219_v30 = vld [vmem:[%s4882_s19 + $0x18] sm:$0xff]   ;;  %v4222_v33 = vld [vmem:[%s4882_s19 + $0x30] sm:$0xff]   ;;  %v4228_v36 = vld [vmem:[%s4882_s19 + $0x48] sm:$0xff]   ;;  %s3399_s13 = sshll.u32 %s352_s7, 4  ;;  %s5835_s29 = scalar_lea.hbm %s5885_s6, %s3615_s11  ;;  %s5829_s13 = int_to_ptr.vmem [resolvable:$true] %s3399_s13 }
  0xc9   : > { %701 = vmatprep.subr.bf16.mxu1 %v4201_v8  ;;  %3967 = vmatprep.subr.bf16.mxu0 %v5893_v1  ;;  %v4223_v34 = vld [vmem:[%s4882_s19 + $0x38] sm:$0xff]   ;;  %v4231_v37 = vld [vmem:[%s4882_s19 + $0x50] sm:$0xff]   ;;  %v4237_v39 = vld [vmem:[%s4882_s19 + $0x60] sm:$0xff]   ;;  %s3386_s20 = scalar_lea.sflag [#allocation4], %s4870_s4  ;;  %s4489_s25 = scalar_lea.vmem %s5829_s13, 256 }
  0xca   : > { %v4234_v38 = vld [vmem:[%s4882_s19 + $0x58] sm:$0xff]   ;;  %v4238_v40 = vld [vmem:[%s4882_s19 + $0x68] sm:$0xff]   ;;  %v4239_v41 = vld [vmem:[%s4882_s19 + $0x70] sm:$0xff]   ;;  %p4490_p2 = scmp.ne.s32.totalorder %s5829_s13, %s4489_s25 }
  0xcb   : > { %v4240_v42 = vld [vmem:[%s4882_s19 + $0x78] sm:$0xff]   ;;  %s4589_s19 = smov [#allocation11]  }
  0xcc   : > { %702 = vmatpush1.bf16.msra.mxu1 %v4203_v9  ;;  %3968 = vmatpush3.bf16.msra.mxu0 %v4229_v21  ;;  %p4491_p4 = pnand %p4490_p2, %p4775_p5 }
  0xcd   : > { %703 = vmatprep.subr.bf16.mxu1 %v4204_v10  ;;  %3969 = vmatprep.subr.bf16.mxu0 %v5893_v1 }
  0xce   : > { %p4492_p0 = pneg %p4491_p4 }
  0xd0   : > { %704 = vmatpush1.bf16.msra.mxu1 %v4206_v11  ;;  %3970 = vmatpush3.bf16.msra.mxu0 %v4230_v23 }
  0xd1   : > { %705 = vmatprep.subr.bf16.mxu1 %v4207_v12  ;;  %3971 = vmatprep.subr.bf16.mxu0 %v5893_v1 }
  0xd4   : > { %706 = vmatpush1.bf16.msra.mxu1 %v4209_v13  ;;  %3972 = vmatpush3.bf16.msra.mxu0 %v4232_v24 }
  0xd5   : > { %707 = vmatprep.subr.bf16.mxu1 %v4210_v15  ;;  %3973 = vmatprep.subr.bf16.mxu0 %v5893_v1 }
  0xd8   : > { %708 = vmatpush1.bf16.msra.mxu1 %v4212_v17  ;;  %3974 = vmatpush3.bf16.msra.mxu0 %v4233_v26 }
  0xd9   : > { %709 = vmatprep.subr.bf16.mxu1 %v4213_v18  ;;  %3975 = vmatprep.subr.bf16.mxu0 %v5893_v1 }
  0xdc   : > { %710 = vmatpush1.bf16.msra.mxu1 %v4215_v20  ;;  %3976 = vmatpush3.bf16.msra.mxu0 %v4235_v27 }
  0xdf   : > { %728 = vmatmul.mubr.bf16.vlgmr.msra.gmra.mrb[0].mxu1 %v4216_v22  ;;  %3978 = vmatmul.mubr.bf16.vlgmr.msra.gmra.mrb[0].mxu0 %v4236_v29 }
  0xe0   : > { %737 = vmatprep.mubr.bf16.mxu1 %v4578_v0 }
  0xe7   : > { %738 = vmatmul.mubr.bf16.gmra.mrb[4].mxu1 %v4217_v25 }
  0xe8   : > { %747 = vmatprep.mubr.bf16.mxu1 %v4578_v0 }
  0xef   : > { %748 = vmatmul.mubr.bf16.gmra.mrb[8].mxu1 %v4218_v28 }
  0xf0   : > { %757 = vmatprep.mubr.bf16.mxu1 %v4578_v0 }
  0xf7   : > { %758 = vmatmul.mubr.bf16.gmra.mrb[12].mxu1 %v4219_v30 }
  0xf8   : > { %767 = vmatprep.mubr.bf16.mxu1 %v4578_v0 }
  0xff   : > { %768 = vmatmul.mubr.bf16.gmra.mrb[16].mxu1 %v4220_v31 }
 0x100   : > { %777 = vmatprep.mubr.bf16.mxu1 %v4578_v0 }
 0x107   : > { %778 = vmatmul.mubr.bf16.gmra.mrb[20].mxu1 %v4221_v32 }
 0x108   : > { %787 = vmatprep.mubr.bf16.mxu1 %v4578_v0 }
 0x10f   : > { %788 = vmatmul.mubr.bf16.gmra.mrb[24].mxu1 %v4222_v33 }
 0x110   : > { %797 = vmatprep.mubr.bf16.mxu1 %v4578_v0 }
 0x117   : > { %798 = vmatmul.mubr.bf16.gmra.mrb[28].mxu1 %v4223_v34 }
 0x118   : > { %807 = vmatprep.mubr.bf16.mxu1 %v4578_v0 }
 0x11f   : > { %808 = vmatmul.mubr.bf16.gmra.mrb[32].mxu1 %v4225_v35 }
 0x120   : > { %817 = vmatprep.mubr.bf16.mxu1 %v4578_v0 }
 0x127   : > { %818 = vmatmul.mubr.bf16.gmra.mrb[36].mxu1 %v4228_v36 }
 0x128   : > { %827 = vmatprep.mubr.bf16.mxu1 %v4578_v0 }
 0x12f   : > { %828 = vmatmul.mubr.bf16.gmra.mrb[40].mxu1 %v4231_v37 }
 0x130   : > { %837 = vmatprep.mubr.bf16.mxu1 %v4578_v0 }
 0x137   : > { %838 = vmatmul.mubr.bf16.gmra.mrb[44].mxu1 %v4234_v38 }
 0x138   : > { %847 = vmatprep.mubr.bf16.mxu1 %v4578_v0 }
 0x13f   : > { %848 = vmatmul.mubr.bf16.gmra.mrb[48].mxu1 %v4237_v39 }
 0x140   : > { %857 = vmatprep.mubr.bf16.mxu1 %v4578_v0 }
 0x147   : > { %858 = vmatmul.mubr.bf16.gmra.mrb[52].mxu1 %v4238_v40 }
 0x148   : > { %867 = vmatprep.mubr.bf16.mxu1 %v4578_v0 }
 0x14f   : > { %868 = vmatmul.mubr.bf16.gmra.mrb[56].mxu1 %v4239_v41 }
 0x150   : > { %877 = vmatprep.mubr.bf16.mxu1 %v4578_v0 }
 0x157   : > { %878 = vmatmul.mubr.bf16.gmra.mrb[60].mxu1 %v4240_v42 }
 0x1b2   : > { %v729_v43 = vpop.f32.mrb[0].mxu1  ;;  %v463_v58 = vpop.f32.mrb[0].mxu0 }
 0x1b3   : > { %v731_v44 = vpop.f32.mrb[1].mxu1  ;;  %v3979_v61 = vpop.f32.mrb[1].mxu0 }
 0x1b4   : > { %v733_v45 = vpop.f32.mrb[2].mxu1  ;;  %v466_v63 = vpop.f32.mrb[2].mxu0 }
 0x1b5   : > { %v4939_v46 = vpack.c.bf16 %v733_v45, %v729_v43  ;;  %v735_v47 = vpop.f32.mrb[3].mxu1  ;;  %v4955_v0 = vpack.c.bf16 %v466_v63, %v463_v58  ;;  %v3980_v2 = vpop.f32.mrb[3].mxu0 }
 0x1b6   : > { %v4941_v48 = vpack.c.bf16 %v735_v47, %v731_v44 }
 0x1b7   : > { %1142 = vrot.lane.b32.xlu0 %v4939_v46, %s4581_s27  ;;  %3641 = vmatprep.mubr.msk.bf16.mxu0 %vm946_vm1, %v4955_v0  ;;  %v951_v39 = vsel %vm946_vm1, %v4939_v46, 0 }
 0x1ba   : > { %v739_v49 = vpop.f32.mrb[4].mxu1 }
 0x1bb   : > { %v741_v50 = vpop.f32.mrb[5].mxu1 }
 0x1bc   : > { %v743_v51 = vpop.f32.mrb[6].mxu1 }
 0x1bd   : > { %v4945_v52 = vpack.c.bf16 %v743_v51, %v739_v49  ;;  %v745_v53 = vpop.f32.mrb[7].mxu1 }
 0x1be   : > { %v4947_v54 = vpack.c.bf16 %v745_v53, %v741_v50 }
 0x1bf   : > { %1144 = vrot.lane.b32.xlu1 %v4945_v52, %s4581_s27  ;;  %v954_v47 = vsel %vm946_vm1, %v4945_v52, 0 }
 0x1c2   : > { %v749_v55 = vpop.f32.mrb[8].mxu1 }
 0x1c3   : > { %v751_v56 = vpop.f32.mrb[9].mxu1 }
 0x1c4   : > { %v753_v57 = vpop.f32.mrb[10].mxu1 }
 0x1c5   : > { %v4951_v59 = vpack.c.bf16 %v753_v57, %v749_v55  ;;  %v755_v60 = vpop.f32.mrb[11].mxu1 }
 0x1c6   : > { %v4953_v62 = vpack.c.bf16 %v755_v60, %v751_v56 }
 0x1c7   : > { %v957_v57 = vsel %vm946_vm1, %v4951_v59, 0 }
 0x1ca   : > { %v759_v3 = vpop.f32.mrb[12].mxu1 }
 0x1cb   : > { %v761_v4 = vpop.f32.mrb[13].mxu1 }
 0x1cc   : > { %v763_v5 = vpop.f32.mrb[14].mxu1 }
 0x1cd   : > { %v4959_v6 = vpack.c.bf16 %v763_v5, %v759_v3  ;;  %v765_v7 = vpop.f32.mrb[15].mxu1 }
 0x1ce   : > { %v4961_v8 = vpack.c.bf16 %v765_v7, %v761_v4 }
 0x1cf   : > { %v960_v4 = vsel %vm946_vm1, %v4959_v6, 0 }
 0x1d2   : > { %v769_v9 = vpop.f32.mrb[16].mxu1 }
 0x1d3   : > { %v771_v10 = vpop.f32.mrb[17].mxu1 }
 0x1d4   : > { %v773_v11 = vpop.f32.mrb[18].mxu1 }
 0x1d5   : > { %v4963_v12 = vpack.c.bf16 %v773_v11, %v769_v9  ;;  %v775_v13 = vpop.f32.mrb[19].mxu1 }
 0x1d6   : > { %v4965_v14 = vpack.c.bf16 %v775_v13, %v771_v10 }
 0x1d8   : > { %5926 = vst [vmem:[#allocation17_spill] sm:$0xff] %v4965_v14 }
 0x1da   : > { %v779_v15 = vpop.f32.mrb[20].mxu1 }
 0x1db   : > { %v781_v16 = vpop.f32.mrb[21].mxu1 }
 0x1dc   : > { %v783_v17 = vpop.f32.mrb[22].mxu1 }
 0x1dd   : > { %v4967_v18 = vpack.c.bf16 %v783_v17, %v779_v15  ;;  %v785_v19 = vpop.f32.mrb[23].mxu1  ;;  %v963_v15 = vsel %vm946_vm1, %v4963_v12, 0 }
 0x1de   : > { %v4969_v20 = vpack.c.bf16 %v785_v19, %v781_v16 }
 0x1e2   : > { %v789_v21 = vpop.f32.mrb[24].mxu1 }
 0x1e3   : > { %v791_v22 = vpop.f32.mrb[25].mxu1 }
 0x1e4   : > { %v793_v23 = vpop.f32.mrb[26].mxu1 }
 0x1e5   : > { %v4971_v24 = vpack.c.bf16 %v793_v23, %v789_v21  ;;  %v795_v25 = vpop.f32.mrb[27].mxu1 }
 0x1e6   : > { %v4973_v26 = vpack.c.bf16 %v795_v25, %v791_v22  ;;  %v966_v25 = vsel %vm946_vm1, %v4967_v18, 0 }
 0x1e7   : > { %5927 = vst [vmem:[#allocation18_spill] sm:$0xff] %v4971_v24 }
 0x1ea   : > { %v799_v27 = vpop.f32.mrb[28].mxu1 }
 0x1eb   : > { %v801_v28 = vpop.f32.mrb[29].mxu1 }
 0x1ec   : > { %v803_v29 = vpop.f32.mrb[30].mxu1 }
 0x1ed   : > { %v4975_v30 = vpack.c.bf16 %v803_v29, %v799_v27  ;;  %v805_v31 = vpop.f32.mrb[31].mxu1 }
 0x1ee   : > { %v4977_v32 = vpack.c.bf16 %v805_v31, %v801_v28 }
 0x1f2   : > { %v809_v33 = vpop.f32.mrb[32].mxu1 }
 0x1f3   : > { %v811_v34 = vpop.f32.mrb[33].mxu1 }
 0x1f4   : > { %v813_v35 = vpop.f32.mrb[34].mxu1 }
 0x1f5   : > { %v4979_v36 = vpack.c.bf16 %v813_v35, %v809_v33  ;;  %v815_v37 = vpop.f32.mrb[35].mxu1  ;;  %v969_v35 = vsel %vm946_vm1, %v4971_v24, 0 }
 0x1f6   : > { %v4981_v38 = vpack.c.bf16 %v815_v37, %v811_v34 }
 0x1f7   : > { %1158 = vrot.lane.b32.xlu0 %v4979_v36, %s4581_s27  ;;  %4029 = vmatprep.subr.msk.bf16.mxu0 %vm946_vm1, %v4979_v36 }
 0x1f8   : > { %3626 = vmatpush3.bf16.xpose.msra.mxu0 %v951_v39 }
 0x1fa   : > { %v819_v40 = vpop.f32.mrb[36].mxu1 }
 0x1fb   : > { %1146 = vrot.lane.b32.xlu0 %v4951_v59, %s4581_s27  ;;  %v821_v41 = vpop.f32.mrb[37].mxu1 }
 0x1fc   : > { %v823_v42 = vpop.f32.mrb[38].mxu1 }
 0x1fd   : > { %v4991_v43 = vpack.c.bf16 %v823_v42, %v819_v40  ;;  %v825_v44 = vpop.f32.mrb[39].mxu1 }
 0x1fe   : > { %v4993_v45 = vpack.c.bf16 %v825_v44, %v821_v41 }
 0x1ff   : > { %1148 = vrot.lane.b32.xlu0 %v4959_v6, %s4581_s27  ;;  %1160 = vrot.lane.b32.xlu1 %v4991_v43, %s4581_s27 }
 0x200   : > { %4030 = vmatprep.subr.msk.bf16.mxu0 %vm946_vm1, %v4991_v43 }
 0x201   : > { %3628 = vmatpush3.bf16.xpose.msra.mxu0 %v954_v47  ;;  %v972_v47 = vsel %vm946_vm1, %v4975_v30, 0 }
 0x202   : > { %v829_v49 = vpop.f32.mrb[40].mxu1 }
 0x203   : > { %1150 = vrot.lane.b32.xlu0 %v4963_v12, %s4581_s27  ;;  %v831_v50 = vpop.f32.mrb[41].mxu1 }
 0x204   : > { %v833_v51 = vpop.f32.mrb[42].mxu1 }
 0x205   : > { %v5005_v53 = vpack.c.bf16 %v833_v51, %v829_v49  ;;  %v835_v55 = vpop.f32.mrb[43].mxu1 }
 0x206   : > { %v5007_v56 = vpack.c.bf16 %v835_v55, %v831_v50 }
 0x207   : > { %1152 = vrot.lane.b32.xlu0 %v4967_v18, %s4581_s27  ;;  %1162 = vrot.lane.b32.xlu1 %v5005_v53, %s4581_s27 }
 0x208   : > { %4031 = vmatprep.subr.msk.bf16.mxu0 %vm946_vm1, %v5005_v53 }
 0x209   : > { %3630 = vmatpush3.bf16.xpose.msra.mxu0 %v957_v57 }
 0x20a   : > { %v839_v58 = vpop.f32.mrb[44].mxu1 }
 0x20b   : > { %1154 = vrot.lane.b32.xlu0 %v4971_v24, %s4581_s27  ;;  %v841_v60 = vpop.f32.mrb[45].mxu1 }
 0x20c   : > { %v843_v61 = vpop.f32.mrb[46].mxu1 }
 0x20d   : > { %v5019_v63 = vpack.c.bf16 %v843_v61, %v839_v58  ;;  %v845_v2 = vpop.f32.mrb[47].mxu1 }
 0x20e   : > { %v5021_v3 = vpack.c.bf16 %v845_v2, %v841_v60 }
 0x20f   : > { %1156 = vrot.lane.b32.xlu0 %v4975_v30, %s4581_s27  ;;  %1164 = vrot.lane.b32.xlu1 %v5019_v63, %s4581_s27 }
 0x210   : > { %4032 = vmatprep.subr.msk.bf16.mxu0 %vm946_vm1, %v5019_v63 }
 0x211   : > { %3632 = vmatpush3.bf16.xpose.msra.mxu0 %v960_v4 }
 0x212   : > { %v849_v5 = vpop.f32.mrb[48].mxu1 }
 0x213   : > { %v851_v7 = vpop.f32.mrb[49].mxu1  ;;  %1124 = vrot.lane.b32.xlu0 %v4955_v0, %s4581_s27 }
 0x214   : > { %v853_v9 = vpop.f32.mrb[50].mxu1 }
 0x215   : > { %v5033_v10 = vpack.c.bf16 %v853_v9, %v849_v5  ;;  %v855_v11 = vpop.f32.mrb[51].mxu1 }
 0x216   : > { %v5035_v13 = vpack.c.bf16 %v855_v11, %v851_v7 }
 0x217   : > { %1166 = vrot.lane.b32.xlu1 %v5033_v10, %s4581_s27  ;;  %4033 = vmatprep.subr.msk.bf16.mxu0 %vm946_vm1, %v5033_v10 }
 0x218   : > { %1338 = vrot.lane.b32.xlu0 %v4981_v38, %s4581_s27 }
 0x219   : > { %3634 = vmatpush3.bf16.xpose.msra.mxu0 %v963_v15 }
 0x21a   : > { %v859_v16 = vpop.f32.mrb[52].mxu1 }
 0x21b   : > { %v861_v17 = vpop.f32.mrb[53].mxu1 }
 0x21c   : > { %1324 = vrot.lane.b32.xlu0 %v4947_v54, %s4581_s27  ;;  %v863_v19 = vpop.f32.mrb[54].mxu1 }
 0x21d   : > { %v5047_v21 = vpack.c.bf16 %v863_v19, %v859_v16  ;;  %v865_v22 = vpop.f32.mrb[55].mxu1 }
 0x21e   : > { %v5049_v23 = vpack.c.bf16 %v865_v22, %v861_v17 }
 0x21f   : > { %1168 = vrot.lane.b32.xlu1 %v5047_v21, %s4581_s27  ;;  %4034 = vmatprep.subr.msk.bf16.mxu0 %vm946_vm1, %v5047_v21 }
 0x220   : > { %1326 = vrot.lane.b32.xlu0 %v4953_v62, %s4581_s27 }
 0x221   : > { %3636 = vmatpush3.bf16.xpose.msra.mxu0 %v966_v25 }
 0x222   : > { %v869_v27 = vpop.f32.mrb[56].mxu1 }
 0x223   : > { %v871_v28 = vpop.f32.mrb[57].mxu1 }
 0x224   : > { %v873_v29 = vpop.f32.mrb[58].mxu1 }
 0x225   : > { %v5059_v31 = vpack.c.bf16 %v873_v29, %v869_v27  ;;  %v875_v33 = vpop.f32.mrb[59].mxu1 }
 0x226   : > { %v5061_v34 = vpack.c.bf16 %v875_v33, %v871_v28 }
 0x227   : > { %1170 = vrot.lane.b32.xlu1 %v5059_v31, %s4581_s27  ;;  %4035 = vmatprep.subr.msk.bf16.mxu0 %vm946_vm1, %v5059_v31 }
 0x228   : > { %5928 = vst [vmem:[#allocation19_spill] sm:$0xff] %v5061_v34 }
 0x229   : > { %3638 = vmatpush3.bf16.xpose.msra.mxu0 %v969_v35  ;;  %v1143_v49 = vpop.permute.xlu0 %1142 }
 0x22a   : > { %v879_v37 = vpop.f32.mrb[60].mxu1  ;;  %v1178_v51 = vsel %vm946_vm1, %v1143_v49, 0 }
 0x22b   : > { %v881_v39 = vpop.f32.mrb[61].mxu1 }
 0x22c   : > { %v883_v40 = vpop.f32.mrb[62].mxu1 }
 0x22d   : > { %v5069_v41 = vpack.c.bf16 %v883_v40, %v879_v37  ;;  %v885_v42 = vpop.f32.mrb[63].mxu1 }
 0x22e   : > { %v5071_v44 = vpack.c.bf16 %v885_v42, %v881_v39  ;;  %v920_v39 = vlaneseq }
 0x22f   : > { %1172 = vrot.lane.b32.xlu1 %v5069_v41, %s4581_s27  ;;  %4036 = vmatprep.subr.msk.bf16.mxu0 %vm946_vm1, %v5069_v41 }
 0x230   : > { %v921_v40 = vshrl.u32 %v920_v39, 7  ;;  %v924_v49 = vand.u32 127, %v920_v39 }
 0x231   : > { %3640 = vmatpush3.bf16.xpose.msra.mxu0 %v972_v47  ;;  %v1145_v55 = vpop.permute.xlu1 %1144 }
 0x232   : > { %3643 = vmatprep.subr.bf16.mxu0 %v4981_v38  ;;  %v1181_v61 = vsel %vm946_vm1, %v1145_v55, 0  ;;  %v922_v42 = vadd.s32 8, %v921_v40  ;;  %v926_v47 = vmul.u32 16, %v921_v40  ;;  %v925_v55 = vadd.s32 128, %v924_v49 }
 0x233   : > { %1322 = vrot.lane.b32.xlu1 %v4941_v48, %s4581_s27 }
 0x234   : > { %vm928_vm2 = vcmp.ge.s32.totalorder %v924_v49, %v926_v47  ;;  %vm929_vm4 = vcmp.ge.s32.totalorder %v925_v55, %v926_v47 }
 0x237   : > { %1340 = vrot.lane.b32.xlu1 %v4993_v45, %s4581_s27 }
 0x238   : > { %3642 = vmatmul.mubr.msk.bf16.vlgmr.msra.gmra.mrb[4].mxu0 %vm946_vm1, %v4955_v0 }
 0x239   : > { %3644 = vmatpush3.bf16.msra.mxu0 %v4941_v48 }
 0x23a   : > { %3645 = vmatprep.subr.bf16.mxu0 %v4993_v45 }
 0x23b   : > { %1342 = vrot.lane.b32.xlu1 %v5007_v56, %s4581_s27 }
 0x23d   : > { %3646 = vmatpush3.bf16.msra.mxu0 %v4947_v54 }
 0x23e   : > { %3647 = vmatprep.subr.bf16.mxu0 %v5007_v56 }
 0x23f   : > { %1344 = vrot.lane.b32.xlu1 %v5021_v3, %s4581_s27 }
 0x241   : > { %3648 = vmatpush3.bf16.msra.mxu0 %v4953_v62 }
 0x242   : > { %3649 = vmatprep.subr.bf16.mxu0 %v5021_v3 }
 0x245   : > { %3650 = vmatpush3.bf16.msra.mxu0 %v4961_v8 }
 0x246   : > { %3651 = vmatprep.subr.bf16.mxu0 %v5035_v13 }
 0x249   : > { %3652 = vmatpush3.bf16.msra.mxu0 %v4965_v14 }
 0x24a   : > { %3653 = vmatprep.subr.bf16.mxu0 %v5049_v23 }
 0x24d   : > { %3654 = vmatpush3.bf16.msra.mxu0 %v4969_v20 }
 0x24e   : > { %3655 = vmatprep.subr.bf16.mxu0 %v5061_v34 }
 0x251   : > { %3656 = vmatpush3.bf16.msra.mxu0 %v4973_v26 }
 0x252   : > { %3657 = vmatprep.subr.bf16.mxu0 %v5071_v44 }
 0x255   : > { %3658 = vmatpush3.bf16.msra.mxu0 %v4977_v32 }
 0x269   : > { %v1159_v50 = vpop.permute.xlu0 %1158 }
 0x26a   : > { %4037 = vmatprep.subr.msk.bf16.mxu1 %vm946_vm1, %v1159_v50  ;;  %v927_v50 = vmul.u32 16, %v922_v42 }
 0x26b   : > { %3666 = vmatpush3.bf16.xpose.msra.mxu1 %v1178_v51  ;;  %v932_v51 = vadd.s32 16, %v926_v47 }
 0x26c   : > { %vm930_vm6 = vcmp.ge.s32.totalorder %v924_v49, %v927_v50  ;;  %vm931_vm9 = vcmp.ge.s32.totalorder %v925_v55, %v927_v50 }
 0x26d   : > { %v1147_v57 = vpop.permute.xlu0 %1146  ;;  %vm934_vm3 = vcmp.lt.s32.totalorder %v924_v49, %v932_v51  ;;  %vm935_vm5 = vcmp.lt.s32.totalorder %v925_v55, %v932_v51 }
 0x26e   : > { %v1184_v7 = vsel %vm946_vm1, %v1147_v57, 0  ;;  %v933_v57 = vadd.s32 16, %v927_v50  ;;  %vm938_vm8 = vmand %vm928_vm2, %vm934_vm3 }
 0x26f   : > { %vm939_vm11 = vmand %vm929_vm4, %vm935_vm5 }
 0x270   : > { %vm936_vm7 = vcmp.lt.s32.totalorder %v924_v49, %v933_v57  ;;  %vm937_vm10 = vcmp.lt.s32.totalorder %v925_v55, %v933_v57 }
 0x271   : > { %v1149_v58 = vpop.permute.xlu0 %1148  ;;  %v1161_v60 = vpop.permute.xlu1 %1160  ;;  %vm940_vm12 = vmand %vm930_vm6, %vm936_vm7 }
 0x272   : > { %4038 = vmatprep.subr.msk.bf16.mxu1 %vm946_vm1, %v1161_v60  ;;  %v1187_v16 = vsel %vm946_vm1, %v1149_v58, 0  ;;  %v4582_v58 = vmov -1e+30   ;;  %vm941_vm13 = vmand %vm931_vm9, %vm937_vm10 }
 0x273   : > { %3668 = vmatpush3.bf16.xpose.msra.mxu1 %v1181_v61  ;;  %v5126_v60 = vsel %vm938_vm8, 0.0, %v4582_v58  ;;  %v5128_v61 = vsel %vm939_vm11, 0.0, %v4582_v58 }
 0x275   : > { %v1151_v2 = vpop.permute.xlu0 %1150 }
 0x276   : > { %v1190_v22 = vsel %vm946_vm1, %v1151_v2, 0 }
 0x279   : > { %v1153_v4 = vpop.permute.xlu0 %1152  ;;  %v1163_v5 = vpop.permute.xlu1 %1162 }
 0x27a   : > { %4039 = vmatprep.subr.msk.bf16.mxu1 %vm946_vm1, %v1163_v5  ;;  %v1193_v28 = vsel %vm946_vm1, %v1153_v4, 0  ;;  %v5130_v4 = vsel %vm940_vm12, 0.0, %v4582_v58 }
 0x27b   : > { %3670 = vmatpush3.bf16.xpose.msra.mxu1 %v1184_v7 }
 0x27d   : > { %v1155_v9 = vpop.permute.xlu0 %1154 }
 0x27e   : > { %v1196_v33 = vsel %vm946_vm1, %v1155_v9, 0  ;;  %v5133_v9 = vsel %vm941_vm13, 0.0, %v4582_v58 }
 0x281   : > { %v1157_v11 = vpop.permute.xlu0 %1156  ;;  %v1165_v15 = vpop.permute.xlu1 %1164 }
 0x282   : > { %4040 = vmatprep.subr.msk.bf16.mxu1 %vm946_vm1, %v1165_v15  ;;  %v1199_v37 = vsel %vm946_vm1, %v1157_v11, 0 }
 0x283   : > { %3672 = vmatpush3.bf16.xpose.msra.mxu1 %v1187_v16 }
 0x285   : > { %v1125_v17 = vpop.permute.xlu0 %1124 }
 0x286   : > { %3681 = vmatprep.mubr.msk.bf16.mxu1 %vm946_vm1, %v1125_v17 }
 0x289   : > { %v1167_v19 = vpop.permute.xlu1 %1166 }
 0x28a   : > { %v1339_v25 = vpop.permute.xlu0 %1338  ;;  %4041 = vmatprep.subr.msk.bf16.mxu1 %vm946_vm1, %v1167_v19 }
 0x28b   : > { %3683 = vmatprep.subr.bf16.mxu0 %v1339_v25  ;;  %3674 = vmatpush3.bf16.xpose.msra.mxu1 %v1190_v22 }
 0x28e   : > { %v5152_v55 = vpop.permute.xlu0 %1324 }
 0x291   : > { %v1169_v27 = vpop.permute.xlu1 %1168 }
 0x292   : > { %4042 = vmatprep.subr.msk.bf16.mxu1 %vm946_vm1, %v1169_v27  ;;  %v5160_v58 = vpop.permute.xlu0 %1326 }
 0x293   : > { %3676 = vmatpush3.bf16.xpose.msra.mxu1 %v1193_v28 }
 0x299   : > { %v1171_v29 = vpop.permute.xlu1 %1170 }
 0x29a   : > { %4043 = vmatprep.subr.msk.bf16.mxu1 %vm946_vm1, %v1171_v29 }
 0x29b   : > { %3678 = vmatpush3.bf16.xpose.msra.mxu1 %v1196_v33 }
 0x2a1   : > { %v1173_v35 = vpop.permute.xlu1 %1172 }
 0x2a2   : > { %4044 = vmatprep.subr.msk.bf16.mxu1 %vm946_vm1, %v1173_v35 }
 0x2a3   : > { %3680 = vmatpush3.bf16.xpose.msra.mxu1 %v1199_v37 }
 0x2a4   : > { %3987 = vmatprep.subr.bf16.mxu1 %v5893_v1 }
 0x2a5   : > { %v5146_v49 = vpop.permute.xlu1 %1322 }
 0x2a9   : > { %v5148_v50 = vpop.permute.xlu1 %1340 }
 0x2aa   : > { %3682 = vmatmul.mubr.msk.bf16.vlgmr.msra.gmra.mrb[64].mxu1 %vm946_vm1, %v1125_v17 }
 0x2ab   : > { %3989 = vmatprep.mubr.msk.bf16.mxu1 %vm4580_vm0, %v5893_v1 }
 0x2ad   : > { %v5150_v51 = vpop.permute.xlu1 %1342 }
 0x2b1   : > { %v5158_v57 = vpop.permute.xlu1 %1344 }
 0x30b   : > { %v1032_v2 = vpop.f32.mrb[4].mxu0 }
 0x30c   : > { %v1033_v5 = vadd.f32 %v1032_v2, %v5126_v60  ;;  %v1034_v7 = vpop.f32.mrb[5].mxu0 }
 0x30d   : > { %v1035_v11 = vadd.f32 %v1034_v7, %v5128_v61  ;;  %v1036_v15 = vpop.f32.mrb[6].mxu0 }
 0x30e   : > { %v1037_v16 = vadd.f32 %v1036_v15, %v5130_v4  ;;  %v1038_v17 = vpop.f32.mrb[7].mxu0 }
 0x30f   : > { %v1039_v19 = vadd.f32 %v1038_v17, %v5133_v9  ;;  %v1041_v22 = vmax.f32 %v1033_v5, %v1035_v11 }
 0x311   : > { %1042 = vmax.xlane.f32.xlu1 %v1041_v22  ;;  %v1044_v25 = vmax.f32 %v1037_v16, %v1039_v19 }
 0x313   : > { %1045 = vmax.xlane.f32.xlu0 %v1044_v25 }
 0x322   : > { %1346 = vrot.lane.b32.xlu1 %v5035_v13, %s4581_s27 }
 0x329   : > { %1328 = vrot.lane.b32.xlu0 %v4961_v8, %s4581_s27 }
 0x37d   : > { %v1259_v27 = vpop.f32.mrb[64].mxu1 }
 0x37e   : > { %v1260_v28 = vadd.f32 %v1259_v27, %v5126_v60  ;;  %v1261_v29 = vpop.f32.mrb[65].mxu1 }
 0x37f   : > { %v1262_v33 = vadd.f32 %v1261_v29, %v5128_v61  ;;  %v1263_v35 = vpop.f32.mrb[66].mxu1 }
 0x380   : > { %v1264_v37 = vadd.f32 %v1263_v35, %v5130_v4  ;;  %v1265_v39 = vpop.f32.mrb[67].mxu1 }
 0x381   : > { %v1266_v40 = vadd.f32 %v1265_v39, %v5133_v9  ;;  %v1268_v42 = vmax.f32 %v1260_v28, %v1262_v33 }
 0x383   : > { %1269 = vmax.xlane.f32.xlu0 %v1268_v42  ;;  %v1271_v47 = vmax.f32 %v1264_v37, %v1266_v40 }
 0x385   : > { %1272 = vmax.xlane.f32.xlu1 %v1271_v47 }
 0x396   : > { %1348 = vrot.lane.b32.xlu1 %v5049_v23, %s4581_s27 }
 0x399   : > { %1330 = vrot.lane.b32.xlu0 %v4965_v14, %s4581_s27 }
 0x39e   : > { %v1043_v2 = vpop.xlane.xlu1 %1042 }
 0x39f   : > { %v1047_v7 = vsub.f32 %v1033_v5, %v1043_v2  ;;  %v1048_v17 = vsub.f32 %v1035_v11, %v1043_v2 }
 0x3a0   : > { %v1046_v15 = vpop.xlane.xlu0 %1045 }
 0x3a1   : > { %v1049_v22 = vsub.f32 %v1037_v16, %v1046_v15  ;;  %v1050_v25 = vsub.f32 %v1039_v19, %v1046_v15  ;;  %v1051_v27 = vmul.f32 1.442695, %v1047_v7  ;;  %v1053_v29 = vmul.f32 1.442695, %v1048_v17 }
 0x3a2   : > { %v5180_v19 = vpop.permute.xlu1 %1346 }
 0x3a3   : > { %v1055_v35 = vmul.f32 1.442695, %v1049_v22  ;;  %v1057_v39 = vmul.f32 1.442695, %v1050_v25  ;;  %4249 = vpow2.f32 %v1051_v27 }
 0x3a4   : > { %4251 = vpow2.f32 %v1053_v29  ;;  %v5178_v16 = vpop.permute.xlu0 %1328 }
 0x3a5   : > { %4253 = vpow2.f32 %v1055_v35 }
 0x3a6   : > { %4255 = vpow2.f32 %v1057_v39 }
 0x3ad   : > { %v5162_v42 = vpop.eup %4249 }
 0x3ae   : > { %v5164_v47 = vpop.eup %4251 }
 0x3af   : > { %v5166_v1 = vpop.eup %4253  ;;  %v1059_v5 = vadd.f32 %v5164_v47, %v5162_v42 }
 0x3b0   : > { %v5168_v14 = vpop.eup %4255 }
 0x3b1   : > { %v1062_v11 = vadd.f32 %v5168_v14, %v5166_v1 }
 0x3b8   : > { %1060 = vadd.xlane.f32.xlu0 %v1059_v5 }
 0x3ba   : > { %1063 = vadd.xlane.f32.xlu1 %v1062_v11 }
 0x3cb   : > { %1350 = vrot.lane.b32.xlu1 %v5061_v34, %s4581_s27 }
 0x3ce   : > { %1332 = vrot.lane.b32.xlu0 %v4969_v20, %s4581_s27 }
 0x410   : > { %v1270_v2 = vpop.xlane.xlu0 %1269 }
 0x411   : > { %v1274_v7 = vsub.f32 %v1260_v28, %v1270_v2  ;;  %v1275_v15 = vsub.f32 %v1262_v33, %v1270_v2 }
 0x412   : > { %v1273_v17 = vpop.xlane.xlu1 %1272 }
 0x413   : > { %v1278_v22 = vmul.f32 1.442695, %v1274_v7  ;;  %v1280_v25 = vmul.f32 1.442695, %v1275_v15  ;;  %v1276_v27 = vsub.f32 %v1264_v37, %v1273_v17  ;;  %v1277_v29 = vsub.f32 %v1266_v40, %v1273_v17 }
 0x414   : > { %v1331_v40 = vpop.permute.xlu0 %1330 }
 0x415   : > { %4257 = vpow2.f32 %v1278_v22  ;;  %v1282_v35 = vmul.f32 1.442695, %v1276_v27  ;;  %v1284_v39 = vmul.f32 1.442695, %v1277_v29 }
 0x416   : > { %4259 = vpow2.f32 %v1280_v25  ;;  %v1349_v2 = vpop.permute.xlu1 %1348 }
 0x417   : > { %4261 = vpow2.f32 %v1282_v35 }
 0x418   : > { %4263 = vpow2.f32 %v1284_v39 }
 0x41f   : > { %v5182_v5 = vpop.eup %4257 }
 0x420   : > { %v5184_v11 = vpop.eup %4259 }
 0x421   : > { %v5186_v34 = vpop.eup %4261  ;;  %v1286_v28 = vadd.f32 %v5184_v11, %v5182_v5 }
 0x422   : > { %v5190_v33 = vpop.eup %4263 }
 0x423   : > { %1287 = vadd.xlane.f32.xlu0 %v1286_v28  ;;  %v1289_v37 = vadd.f32 %v5190_v33, %v5186_v34 }
 0x425   : > { %1290 = vadd.xlane.f32.xlu1 %v1289_v37 }
 0x436   : > { %1352 = vrot.lane.b32.xlu1 %v5071_v44, %s4581_s27 }
 0x439   : > { %1334 = vrot.lane.b32.xlu0 %v4973_v26, %s4581_s27 }
 0x43a   : > { %1516 = vrot.lane.b32.xlu1 %v4939_v46, %s4583_s2 }
 0x43d   : > { %1336 = vrot.lane.b32.xlu0 %v4977_v32, %s4581_s27  ;;  %s4493_s27 = sshll.u32 %s4589_s19, 4  ;;  %s4494_s27 = int_to_ptr.vmem [resolvable:$false] %s4493_s27 }
 0x43e   : > { %1518 = vrot.lane.b32.xlu1 %v4945_v52, %s4583_s2  ;;  %p4496_p8 = scmp.lt.s32.totalorder %s5829_s13, %s4494_s27 }
 0x441   : > { %1532 = vrot.lane.b32.xlu0 %v4979_v36, %s4583_s2 }
 0x442   : > { %1520 = vrot.lane.b32.xlu1 %v4951_v59, %s4583_s2 }
 0x445   : > { %1534 = vrot.lane.b32.xlu0 %v4991_v43, %s4583_s2  ;;  %v1061_v7 = vpop.xlane.xlu0 %1060 }
 0x446   : > { %4265 = vrcp.f32 %v1061_v7  ;;  %1522 = vrot.lane.b32.xlu1 %v4959_v6, %s4583_s2 }
 0x447   : > { %v1064_v15 = vpop.xlane.xlu1 %1063 }
 0x448   : > { %4267 = vrcp.f32 %v1064_v15 }
 0x449   : > { %1536 = vrot.lane.b32.xlu0 %v5005_v53, %s4583_s2 }
 0x44a   : > { %1524 = vrot.lane.b32.xlu1 %v4963_v12, %s4583_s2 }
 0x44d   : > { %1538 = vrot.lane.b32.xlu0 %v5019_v63, %s4583_s2 }
 0x44e   : > { %1526 = vrot.lane.b32.xlu1 %v4967_v18, %s4583_s2 }
 0x450   : > { %v4266_v17 = vpop.eup %4265 }
 0x451   : > { %v1067_v22 = vmul.f32 %v4266_v17, %v1061_v7  ;;  %1540 = vrot.lane.b32.xlu0 %v5033_v10, %s4583_s2 }
 0x452   : > { %v4268_v25 = vpop.eup %4267  ;;  %1528 = vrot.lane.b32.xlu1 %v4971_v24, %s4583_s2 }
 0x453   : > { %v1069_v27 = vsub.f32 2.0, %v1067_v22  ;;  %v1068_v29 = vmul.f32 %v4268_v25, %v1064_v15 }
 0x455   : > { %v1071_v35 = vmul.f32 %v4266_v17, %v1069_v27  ;;  %v1070_v39 = vsub.f32 2.0, %v1068_v29  ;;  %1542 = vrot.lane.b32.xlu0 %v5047_v21, %s4583_s2 }
 0x456   : > { %1530 = vrot.lane.b32.xlu1 %v4975_v30, %s4583_s2 }
 0x457   : > { %v1072_v28 = vmul.f32 %v4268_v25, %v1070_v39  ;;  %v1073_v37 = vmul.f32 %v5162_v42, %v1071_v35  ;;  %v1074_v24 = vmul.f32 %v5164_v47, %v1071_v35 }
 0x459   : > { %v1075_v7 = vmul.f32 %v5166_v1, %v1072_v28  ;;  %1544 = vrot.lane.b32.xlu0 %v5059_v31, %s4583_s2  ;;  %v1076_v15 = vmul.f32 %v5168_v14, %v1072_v28  ;;  %v1333_v1 = vpop.permute.xlu0 %1332  ;;  %v1351_v14 = vpop.permute.xlu1 %1350 }
 0x45a   : > { %1514 = vrot.lane.b32.xlu1 %v4955_v0, %s4583_s2 }
 0x45b   : > { %v1078_v17 = vpack.c.bf16 %v1076_v15, %v1074_v24  ;;  %v1077_v22 = vpack.c.bf16 %v1075_v7, %v1073_v37  ;;  %v4241_v15 = vld [vmem:[#allocation10 + $0x8] sm:$0xff]  }
 0x45d   : > { %1546 = vrot.lane.b32.xlu0 %v5069_v41, %s4583_s2  ;;  %1111 = vmatprep.mubr.bf16.mxu0 %v1078_v17 }
 0x45e   : > { %1112 = vmatmul.mubr.bf16.vlgmr.msra.gmra.mrb[8].mxu0 %v1077_v22 }
 0x45f   : > { %3684 = vmatpush3.bf16.msra.mxu0 %v5146_v49 }
 0x460   : > { %3685 = vmatprep.subr.bf16.mxu0 %v5148_v50 }
 0x463   : > { %3686 = vmatpush3.bf16.msra.mxu0 %v5152_v55  ;;  %v4242_v55 = vld [vmem:[#allocation10] sm:$0xff]  }
 0x464   : > { %3687 = vmatprep.subr.bf16.mxu0 %v5150_v51  ;;  %3988 = vmatpush3.bf16.msra.mxu1 %v4242_v55 }
 0x467   : > { %3688 = vmatpush3.bf16.msra.mxu0 %v5160_v58  ;;  %v5929_v58 = vmov 0.0  }
 0x468   : > { %3689 = vmatprep.subr.bf16.mxu0 %v5158_v57 }
 0x46b   : > { %3690 = vmatpush3.bf16.msra.mxu0 %v5178_v16 }
 0x46c   : > { %3691 = vmatprep.subr.bf16.mxu0 %v5180_v19 }
 0x46f   : > { %3692 = vmatpush3.bf16.msra.mxu0 %v1331_v40 }
 0x470   : > { %3693 = vmatprep.subr.bf16.mxu0 %v1349_v2 }
 0x473   : > { %3694 = vmatpush3.bf16.msra.mxu0 %v1333_v1 }
 0x474   : > { %3695 = vmatprep.subr.bf16.mxu0 %v1351_v14 }
 0x4b0   : > { %v1288_v24 = vpop.xlane.xlu0 %1287 }
 0x4b1   : > { %4269 = vrcp.f32 %v1288_v24 }
 0x4b2   : > { %v1291_v49 = vpop.xlane.xlu1 %1290 }
 0x4b3   : > { %4271 = vrcp.f32 %v1291_v49 }
 0x4b4   : > { %v1335_v50 = vpop.permute.xlu0 %1334 }
 0x4b5   : > { %3696 = vmatpush3.bf16.msra.mxu0 %v1335_v50 }
 0x4b6   : > { %v1353_v51 = vpop.permute.xlu1 %1352 }
 0x4b7   : > { %3697 = vmatprep.subr.bf16.mxu0 %v1353_v51 }
 0x4b8   : > { %v1337_v57 = vpop.permute.xlu0 %1336 }
 0x4b9   : > { %3698 = vmatpush3.bf16.msra.mxu0 %v1337_v57 }
 0x4ba   : > { %3981 = vmatprep.subr.bf16.mxu0 %v5929_v58 }
 0x4bb   : > { %v4270_v42 = vpop.eup %4269 }
 0x4bc   : > { %v1294_v47 = vmul.f32 %v4270_v42, %v1288_v24  ;;  %v1533_v17 = vpop.permute.xlu0 %1532 }
 0x4bd   : > { %v4272_v16 = vpop.eup %4271 }
 0x4be   : > { %v1296_v19 = vsub.f32 2.0, %v1294_v47  ;;  %v1295_v40 = vmul.f32 %v4272_v16, %v1291_v49 }
 0x4c0   : > { %v1298_v2 = vmul.f32 %v4270_v42, %v1296_v19  ;;  %v1297_v25 = vsub.f32 2.0, %v1295_v40 }
 0x4c2   : > { %v1299_v27 = vmul.f32 %v4272_v16, %v1297_v25  ;;  %v1300_v29 = vmul.f32 %v5182_v5, %v1298_v2  ;;  %v1301_v39 = vmul.f32 %v5184_v11, %v1298_v2 }
 0x4c4   : > { %v1302_v35 = vmul.f32 %v5186_v34, %v1299_v27  ;;  %v1303_v28 = vmul.f32 %v5190_v33, %v1299_v27  ;;  %v1517_v33 = vpop.permute.xlu1 %1516 }
 0x4c6   : > { %v1305_v37 = vpack.c.bf16 %v1303_v28, %v1301_v39  ;;  %v1304_v7 = vpack.c.bf16 %v1302_v35, %v1300_v29  ;;  %v1552_v35 = vsel %vm946_vm1, %v1517_v33, 0  ;;  %v1535_v28 = vpop.permute.xlu0 %1534 }
 0x4c8   : > { %1402 = vmatprep.mubr.bf16.mxu0 %v1305_v37  ;;  %v1519_v49 = vpop.permute.xlu1 %1518 }
 0x4c9   : > { %1403 = vmatmul.mubr.bf16.vlgmr.msra.gmra.mrb[12].mxu0 %v1304_v7  ;;  %v1555_v37 = vsel %vm946_vm1, %v1519_v49, 0 }
 0x4ca   : > { %3982 = vmatpush3.bf16.msra.mxu0 %v4241_v15  ;;  %3983 = vmatprep.mubr.msk.bf16.mxu0 %vm4580_vm0, %v5929_v58  ;;  %v1537_v7 = vpop.permute.xlu0 %1536 }
 0x4cb   : > { %4045 = vmatprep.subr.msk.bf16.mxu0 %vm946_vm1, %v1533_v17 }
 0x4cc   : > { %v1521_v50 = vpop.permute.xlu1 %1520 }
 0x4cd   : > { %v1558_v15 = vsel %vm946_vm1, %v1521_v50, 0 }
 0x4ce   : > { %v1539_v17 = vpop.permute.xlu0 %1538 }
 0x4d0   : > { %v1523_v51 = vpop.permute.xlu1 %1522 }
 0x4d4   : > { %v1525_v55 = vpop.permute.xlu1 %1524 }
 0x4d8   : > { %v1527_v57 = vpop.permute.xlu1 %1526 }
 0x4dc   : > { %v1529_v42 = vpop.permute.xlu1 %1528 }
 0x4e0   : > { %v1531_v19 = vpop.permute.xlu1 %1530 }
 0x4e1   : > { %v1573_v49 = vsel %vm946_vm1, %v1531_v19, 0 }
 0x4e4   : > { %v1515_v39 = vpop.permute.xlu1 %1514 }
 0x531   : > { %v3659_v22 = vpop.f32.mrb[8].mxu0 }
 0x532   : > { %v3660_v5 = vpop.f32.mrb[9].mxu0 }
 0x533   : > { %v3661_v1 = vadd.f32 %v3660_v5, %v3659_v22  ;;  %v3662_v34 = vpop.f32.mrb[10].mxu0  ;;  %v1561_v22 = vsel %vm946_vm1, %v1523_v51, 0  ;;  %v1541_v5 = vpop.permute.xlu0 %1540 }
 0x534   : > { %v3663_v14 = vpop.f32.mrb[11].mxu0 }
 0x535   : > { %v3664_v11 = vadd.f32 %v3663_v14, %v3662_v34  ;;  %v1567_v14 = vsel %vm946_vm1, %v1527_v57, 0 }
 0x537   : > { %v1120_v24 = vpack.c.bf16 %v3664_v11, %v3661_v1  ;;  %v1564_v1 = vsel %vm946_vm1, %v1525_v55, 0  ;;  %v1543_v34 = vpop.permute.xlu0 %1542 }
 0x539   : > { %3990 = vmatmul.mubr.msk.bf16.vlgmr.msra.gmra.mrb[68].mxu1 %vm946_vm1, %v1120_v24  ;;  %v1570_v24 = vsel %vm946_vm1, %v1529_v42, 0 }
 0x53b   : > { %v1545_v11 = vpop.permute.xlu0 %1544 }
 0x53f   : > { %v1547_v33 = vpop.permute.xlu0 %1546 }
 0x59c   : > { %v3699_v47 = vpop.f32.mrb[12].mxu0 }
 0x59d   : > { %v3700_v16 = vpop.f32.mrb[13].mxu0 }
 0x59e   : > { %v3701_v40 = vadd.f32 %v3700_v16, %v3699_v47  ;;  %v3702_v2 = vpop.f32.mrb[14].mxu0 }
 0x59f   : > { %v3703_v25 = vpop.f32.mrb[15].mxu0 }
 0x5a0   : > { %v3704_v27 = vadd.f32 %v3703_v25, %v3702_v2 }
 0x5a2   : > { %v1411_v29 = vpack.c.bf16 %v3704_v27, %v3701_v40 }
 0x5a4   : > { %3984 = vmatmul.mubr.msk.bf16.vlgmr.msra.gmra.mrb[16].mxu0 %vm946_vm1, %v1411_v29 }
 0x5a5   : > { %3710 = vmatpush3.bf16.xpose.msra.mxu0 %v1552_v35  ;;  %3725 = vmatprep.mubr.msk.bf16.mxu0 %vm946_vm1, %v1515_v39 }
 0x5a6   : > { %4046 = vmatprep.subr.msk.bf16.mxu0 %vm946_vm1, %v1535_v28 }
 0x5ad   : > { %3712 = vmatpush3.bf16.xpose.msra.mxu0 %v1555_v37 }
 0x5ae   : > { %4047 = vmatprep.subr.msk.bf16.mxu0 %vm946_vm1, %v1537_v7 }
 0x5b5   : > { %3714 = vmatpush3.bf16.xpose.msra.mxu0 %v1558_v15 }
 0x5b6   : > { %4048 = vmatprep.subr.msk.bf16.mxu0 %vm946_vm1, %v1539_v17 }
 0x5bd   : > { %3716 = vmatpush3.bf16.xpose.msra.mxu0 %v1561_v22  ;;  %v5930_v22 = vld [vmem:[#allocation17_spill] sm:$0xff] }
 0x5be   : > { %4049 = vmatprep.subr.msk.bf16.mxu0 %vm946_vm1, %v1541_v5 }
 0x5c5   : > { %3718 = vmatpush3.bf16.xpose.msra.mxu0 %v1564_v1 }
 0x5c6   : > { %4050 = vmatprep.subr.msk.bf16.mxu0 %vm946_vm1, %v1543_v34 }
 0x5cd   : > { %3720 = vmatpush3.bf16.xpose.msra.mxu0 %v1567_v14 }
 0x5ce   : > { %4051 = vmatprep.subr.msk.bf16.mxu0 %vm946_vm1, %v1545_v11 }
 0x5d5   : > { %3722 = vmatpush3.bf16.xpose.msra.mxu0 %v1570_v24 }
 0x5d6   : > { %4052 = vmatprep.subr.msk.bf16.mxu0 %vm946_vm1, %v1547_v33 }
 0x5dd   : > { %3724 = vmatpush3.bf16.xpose.msra.mxu0 %v1573_v49 }
 0x5e4   : > { %3726 = vmatmul.mubr.msk.bf16.vlgmr.msra.gmra.mrb[20].mxu0 %vm946_vm1, %v1515_v39 }
 0x60c   : > { %v1507_v50 = vpop.f32.mrb[68].mxu1 }
 0x60d   : > { %v3991_v51 = vpop.f32.mrb[69].mxu1 }
 0x60e   : > { %v1510_v55 = vpop.f32.mrb[70].mxu1 }
 0x60f   : > { %v3992_v47 = vpop.f32.mrb[71].mxu1 }
 0x677   : > { %v1457_v57 = vpop.f32.mrb[16].mxu0 }
 0x678   : > { %v5273_v16 = vadd.f32 %v1507_v50, %v1457_v57  ;;  %v3985_v40 = vpop.f32.mrb[17].mxu0 }
 0x679   : > { %v1460_v2 = vpop.f32.mrb[18].mxu0 }
 0x67a   : > { %v5275_v25 = vadd.f32 %v1510_v55, %v1460_v2  ;;  %v3986_v42 = vpop.f32.mrb[19].mxu0 }
 0x6b7   : > { %v1633_v27 = vpop.f32.mrb[20].mxu0 }
 0x6b8   : > { %v1634_v29 = vadd.f32 %v1633_v27, %v5126_v60  ;;  %v1635_v35 = vpop.f32.mrb[21].mxu0 }
 0x6b9   : > { %v1636_v19 = vadd.f32 %v1635_v35, %v5128_v61  ;;  %v1637_v28 = vpop.f32.mrb[22].mxu0 }
 0x6ba   : > { %v1638_v39 = vadd.f32 %v1637_v28, %v5130_v4  ;;  %v1639_v37 = vpop.f32.mrb[23].mxu0 }
 0x6bb   : > { %v1640_v7 = vadd.f32 %v1639_v37, %v5133_v9  ;;  %v1642_v15 = vmax.f32 %v1634_v29, %v1636_v19 }
 0x6bd   : > { %1643 = vmax.xlane.f32.xlu0 %v1642_v15  ;;  %v1645_v17 = vmax.f32 %v1638_v39, %v1640_v7 }
 0x6bf   : > { %1646 = vmax.xlane.f32.xlu1 %v1645_v17 }
 0x6d0   : > { %1696 = vrot.lane.b32.xlu1 %v4981_v38, %s4583_s2 }
 0x6d3   : > { %1680 = vrot.lane.b32.xlu0 %v4941_v48, %s4583_s2 }
 0x6d4   : > { %1698 = vrot.lane.b32.xlu1 %v4993_v45, %s4583_s2 }
 0x6d7   : > { %1700 = vrot.lane.b32.xlu0 %v5007_v56, %s4583_s2 }
 0x6d8   : > { %1682 = vrot.lane.b32.xlu1 %v4947_v54, %s4583_s2 }
 0x6db   : > { %1702 = vrot.lane.b32.xlu0 %v5021_v3, %s4583_s2 }
 0x6dc   : > { %1684 = vrot.lane.b32.xlu1 %v4953_v62, %s4583_s2 }
 0x6df   : > { %1704 = vrot.lane.b32.xlu0 %v5035_v13, %s4583_s2 }
 0x6e0   : > { %1686 = vrot.lane.b32.xlu1 %v4961_v8, %s4583_s2 }
 0x6e3   : > { %1706 = vrot.lane.b32.xlu0 %v5049_v23, %s4583_s2 }
 0x6e4   : > { %1688 = vrot.lane.b32.xlu1 %v5930_v22, %s4583_s2 }
 0x6e8   : > { %1690 = vrot.lane.b32.xlu1 %v4969_v20, %s4583_s2 }
 0x6ec   : > { %1692 = vrot.lane.b32.xlu1 %v4973_v26, %s4583_s2 }
 0x6f0   : > { %1694 = vrot.lane.b32.xlu1 %v4977_v32, %s4583_s2 }
 0x6f4   : > { %1842 = vrot.lane.b32.xlu1 %v4979_v36, %s4584_s12 }
 0x6f8   : > { %1844 = vrot.lane.b32.xlu1 %v4991_v43, %s4584_s12 }
 0x6fc   : > { %1846 = vrot.lane.b32.xlu1 %v5005_v53, %s4584_s12 }
 0x700   : > { %1848 = vrot.lane.b32.xlu1 %v5019_v63, %s4584_s12 }
 0x704   : > { %1850 = vrot.lane.b32.xlu1 %v5033_v10, %s4584_s12 }
 0x708   : > { %1852 = vrot.lane.b32.xlu1 %v5047_v21, %s4584_s12 }
 0x70c   : > { %1854 = vrot.lane.b32.xlu1 %v5059_v31, %s4584_s12 }
 0x710   : > { %1856 = vrot.lane.b32.xlu1 %v5069_v41, %s4584_s12 }
 0x74a   : > { %v1644_v5 = vpop.xlane.xlu0 %1643 }
 0x74b   : > { %v1648_v1 = vsub.f32 %v1634_v29, %v1644_v5  ;;  %v1649_v34 = vsub.f32 %v1636_v19, %v1644_v5 }
 0x74c   : > { %v1647_v14 = vpop.xlane.xlu1 %1646 }
 0x74d   : > { %v1652_v11 = vmul.f32 1.442695, %v1648_v1  ;;  %v1654_v24 = vmul.f32 1.442695, %v1649_v34  ;;  %v1650_v33 = vsub.f32 %v1638_v39, %v1647_v14  ;;  %v1651_v49 = vsub.f32 %v1640_v7, %v1647_v14  ;;  %v5931_v34 = vld [vmem:[#allocation19_spill] sm:$0xff]  ;;  %v5932_v14 = vld [vmem:[#allocation18_spill] sm:$0xff] }
 0x74e   : > { %v1681_v50 = vpop.permute.xlu0 %1680 }
 0x74f   : > { %4273 = vpow2.f32 %v1652_v11  ;;  %v1656_v51 = vmul.f32 1.442695, %v1650_v33  ;;  %v1658_v55 = vmul.f32 1.442695, %v1651_v49 }
 0x750   : > { %4275 = vpow2.f32 %v1654_v24  ;;  %v1697_v47 = vpop.permute.xlu1 %1696 }
 0x751   : > { %4277 = vpow2.f32 %v1656_v51  ;;  %3727 = vmatprep.subr.bf16.mxu1 %v1697_v47 }
 0x752   : > { %4279 = vpow2.f32 %v1658_v55  ;;  %3728 = vmatpush3.bf16.msra.mxu1 %v1681_v50  ;;  %v1701_v57 = vpop.permute.xlu0 %1700 }
 0x754   : > { %v1699_v40 = vpop.permute.xlu1 %1698 }
 0x755   : > { %3729 = vmatprep.subr.bf16.mxu1 %v1699_v40 }
 0x756   : > { %v1703_v27 = vpop.permute.xlu0 %1702 }
 0x758   : > { %v1683_v2 = vpop.permute.xlu1 %1682 }
 0x759   : > { %v4274_v42 = vpop.eup %4273  ;;  %3730 = vmatpush3.bf16.msra.mxu1 %v1683_v2 }
 0x75a   : > { %v4276_v29 = vpop.eup %4275  ;;  %3731 = vmatprep.subr.bf16.mxu1 %v1701_v57  ;;  %v1705_v37 = vpop.permute.xlu0 %1704 }
 0x75b   : > { %v4278_v35 = vpop.eup %4277  ;;  %v1660_v19 = vadd.f32 %v4276_v29, %v4274_v42 }
 0x75c   : > { %v4280_v28 = vpop.eup %4279  ;;  %v1685_v39 = vpop.permute.xlu1 %1684 }
 0x75d   : > { %1661 = vadd.xlane.f32.xlu0 %v1660_v19  ;;  %3732 = vmatpush3.bf16.msra.mxu1 %v1685_v39  ;;  %v1663_v7 = vadd.f32 %v4280_v28, %v4278_v35 }
 0x75e   : > { %3733 = vmatprep.subr.bf16.mxu1 %v1703_v27  ;;  %v1707_v5 = vpop.permute.xlu0 %1706 }
 0x760   : > { %v1687_v15 = vpop.permute.xlu1 %1686 }
 0x761   : > { %1664 = vadd.xlane.f32.xlu0 %v1663_v7  ;;  %3734 = vmatpush3.bf16.msra.mxu1 %v1687_v15 }
 0x762   : > { %3735 = vmatprep.subr.bf16.mxu1 %v1705_v37 }
 0x764   : > { %v1689_v17 = vpop.permute.xlu1 %1688 }
 0x765   : > { %3736 = vmatpush3.bf16.msra.mxu1 %v1689_v17 }
 0x766   : > { %3737 = vmatprep.subr.bf16.mxu1 %v1707_v5 }
 0x768   : > { %v1691_v1 = vpop.permute.xlu1 %1690 }
 0x769   : > { %3738 = vmatpush3.bf16.msra.mxu1 %v1691_v1 }
 0x76c   : > { %v1693_v33 = vpop.permute.xlu1 %1692 }
 0x770   : > { %v1695_v47 = vpop.permute.xlu1 %1694 }
 0x777   : > { %1708 = vrot.lane.b32.xlu0 %v5931_v34, %s4583_s2 }
 0x77b   : > { %1710 = vrot.lane.b32.xlu0 %v5071_v44, %s4583_s2  ;;  %s4495_s2 = scalar_lea.vmem %s4494_s27, 512 }
 0x77c   : > { %p4497_p6 = scmp.lt.s32.totalorder %s4495_s2, %s4489_s25 }
 0x77e   : > { %p4498_p10 = por %p4497_p6, %p4496_p8 }
 0x77f   : > { %1826 = vrot.lane.b32.xlu0 %v4939_v46, %s4584_s12 }
 0x780   : > { %p4499_p3 = pnand %p4498_p10, %p4492_p0 }
 0x783   : > { %1828 = vrot.lane.b32.xlu0 %v4945_v52, %s4584_s12 }
 0x787   : > { %1830 = vrot.lane.b32.xlu0 %v4951_v59, %s4584_s12 }
 0x78b   : > { %1832 = vrot.lane.b32.xlu0 %v4959_v6, %s4584_s12 }
 0x78f   : > { %1834 = vrot.lane.b32.xlu0 %v4963_v12, %s4584_s12 }
 0x793   : > { %1836 = vrot.lane.b32.xlu0 %v4967_v18, %s4584_s12 }
 0x797   : > { %1838 = vrot.lane.b32.xlu0 %v5932_v14, %s4584_s12 }
 0x79b   : > { %1840 = vrot.lane.b32.xlu0 %v4975_v30, %s4584_s12 }
 0x79f   : > { %1824 = vrot.lane.b32.xlu0 %v4955_v0, %s4584_s12 }
 0x7ea   : > { %v1662_v11 = vpop.xlane.xlu0 %1661 }
 0x7eb   : > { %4281 = vrcp.f32 %v1662_v11 }
 0x7ee   : > { %v1665_v24 = vpop.xlane.xlu0 %1664 }
 0x7ef   : > { %4283 = vrcp.f32 %v1665_v24 }
 0x7f2   : > { %v1709_v49 = vpop.permute.xlu0 %1708 }
 0x7f3   : > { %3739 = vmatprep.subr.bf16.mxu1 %v1709_v49 }
 0x7f4   : > { %3740 = vmatpush3.bf16.msra.mxu1 %v1693_v33  ;;  %v4243_v33 = vld [vmem:[#allocation10 + $0x10] sm:$0xff]  }
 0x7f5   : > { %v4282_v50 = vpop.eup %4281 }
 0x7f6   : > { %v1668_v51 = vmul.f32 %v4282_v50, %v1662_v11  ;;  %v1711_v55 = vpop.permute.xlu0 %1710  ;;  %v1843_v11 = vpop.permute.xlu1 %1842 }
 0x7f7   : > { %3741 = vmatprep.subr.bf16.mxu1 %v1711_v55 }
 0x7f8   : > { %v1670_v57 = vsub.f32 2.0, %v1668_v51  ;;  %3742 = vmatpush3.bf16.msra.mxu1 %v1695_v47 }
 0x7f9   : > { %v4284_v40 = vpop.eup %4283  ;;  %3993 = vmatprep.subr.bf16.mxu1 %v5929_v58 }
 0x7fa   : > { %v1669_v2 = vmul.f32 %v4284_v40, %v1665_v24  ;;  %v1672_v27 = vmul.f32 %v4282_v50, %v1670_v57  ;;  %v1827_v24 = vpop.permute.xlu0 %1826 }
 0x7fc   : > { %v1671_v19 = vsub.f32 2.0, %v1669_v2  ;;  %v1674_v37 = vmul.f32 %v4274_v42, %v1672_v27  ;;  %v1675_v15 = vmul.f32 %v4276_v29, %v1672_v27 }
 0x7fe   : > { %v1673_v39 = vmul.f32 %v4284_v40, %v1671_v19  ;;  %v1829_v49 = vpop.permute.xlu0 %1828 }
 0x800   : > { %v1676_v7 = vmul.f32 %v4278_v35, %v1673_v39  ;;  %v1677_v17 = vmul.f32 %v4280_v28, %v1673_v39  ;;  %v1862_v39 = vsel %vm946_vm1, %v1827_v24, 0 }
 0x802   : > { %v1679_v5 = vpack.c.bf16 %v1677_v17, %v1675_v15  ;;  %v1678_v1 = vpack.c.bf16 %v1676_v7, %v1674_v37  ;;  %v1831_v50 = vpop.permute.xlu0 %1830  ;;  %v1845_v7 = vpop.permute.xlu1 %1844  ;;  %v1865_v15 = vsel %vm946_vm1, %v1829_v49, 0 }
 0x804   : > { %1760 = vmatprep.mubr.bf16.mxu1 %v1679_v5  ;;  %v1868_v5 = vsel %vm946_vm1, %v1831_v50, 0 }
 0x805   : > { %1761 = vmatmul.mubr.bf16.vlgmr.msra.gmra.mrb[72].mxu1 %v1678_v1 }
 0x806   : > { %3994 = vmatpush3.bf16.msra.mxu1 %v4243_v33  ;;  %3995 = vmatprep.mubr.msk.bf16.mxu1 %vm4580_vm0, %v5929_v58  ;;  %v1833_v51 = vpop.permute.xlu0 %1832  ;;  %v1847_v17 = vpop.permute.xlu1 %1846 }
 0x807   : > { %4053 = vmatprep.subr.msk.bf16.mxu1 %vm946_vm1, %v1843_v11  ;;  %v1871_v33 = vsel %vm946_vm1, %v1833_v51, 0 }
 0x80a   : > { %v1835_v42 = vpop.permute.xlu0 %1834  ;;  %v1849_v1 = vpop.permute.xlu1 %1848 }
 0x80b   : > { %v1874_v24 = vsel %vm946_vm1, %v1835_v42, 0 }
 0x80e   : > { %v1837_v35 = vpop.permute.xlu0 %1836  ;;  %v1851_v11 = vpop.permute.xlu1 %1850 }
 0x80f   : > { %v1877_v49 = vsel %vm946_vm1, %v1837_v35, 0 }
 0x812   : > { %v1839_v29 = vpop.permute.xlu0 %1838 }
 0x813   : > { %v1880_v50 = vsel %vm946_vm1, %v1839_v29, 0 }
 0x816   : > { %v1841_v47 = vpop.permute.xlu0 %1840 }
 0x817   : > { %v1883_v51 = vsel %vm946_vm1, %v1841_v47, 0 }
 0x81a   : > { %v1825_v37 = vpop.permute.xlu0 %1824 }
 0x8d8   : > { %v3743_v28 = vpop.f32.mrb[72].mxu1 }
 0x8d9   : > { %v3744_v55 = vpop.f32.mrb[73].mxu1 }
 0x8da   : > { %v3745_v57 = vadd.f32 %v3744_v55, %v3743_v28  ;;  %v3746_v40 = vpop.f32.mrb[74].mxu1  ;;  %v1853_v28 = vpop.permute.xlu1 %1852 }
 0x8db   : > { %v3747_v2 = vpop.f32.mrb[75].mxu1 }
 0x8dc   : > { %v3748_v27 = vadd.f32 %v3747_v2, %v3746_v40 }
 0x8de   : > { %v1769_v19 = vpack.c.bf16 %v3748_v27, %v3745_v57  ;;  %v1855_v55 = vpop.permute.xlu1 %1854 }
 0x8e0   : > { %3996 = vmatmul.mubr.msk.bf16.vlgmr.msra.gmra.mrb[76].mxu1 %vm946_vm1, %v1769_v19 }
 0x8e1   : > { %3752 = vmatpush3.bf16.xpose.msra.mxu1 %v1862_v39  ;;  %3767 = vmatprep.mubr.msk.bf16.mxu1 %vm946_vm1, %v1825_v37 }
 0x8e2   : > { %4054 = vmatprep.subr.msk.bf16.mxu1 %vm946_vm1, %v1845_v7  ;;  %v1857_v57 = vpop.permute.xlu1 %1856 }
 0x8e9   : > { %3754 = vmatpush3.bf16.xpose.msra.mxu1 %v1865_v15 }
 0x8ea   : > { %4055 = vmatprep.subr.msk.bf16.mxu1 %vm946_vm1, %v1847_v17 }
 0x8f1   : > { %3756 = vmatpush3.bf16.xpose.msra.mxu1 %v1868_v5 }
 0x8f2   : > { %4056 = vmatprep.subr.msk.bf16.mxu1 %vm946_vm1, %v1849_v1 }
 0x8f9   : > { %3758 = vmatpush3.bf16.xpose.msra.mxu1 %v1871_v33 }
 0x8fa   : > { %4057 = vmatprep.subr.msk.bf16.mxu1 %vm946_vm1, %v1851_v11 }
 0x901   : > { %3760 = vmatpush3.bf16.xpose.msra.mxu1 %v1874_v24 }
 0x902   : > { %4058 = vmatprep.subr.msk.bf16.mxu1 %vm946_vm1, %v1853_v28 }
 0x909   : > { %3762 = vmatpush3.bf16.xpose.msra.mxu1 %v1877_v49 }
 0x90a   : > { %4059 = vmatprep.subr.msk.bf16.mxu1 %vm946_vm1, %v1855_v55 }
 0x911   : > { %3764 = vmatpush3.bf16.xpose.msra.mxu1 %v1880_v50 }
 0x912   : > { %4060 = vmatprep.subr.msk.bf16.mxu1 %vm946_vm1, %v1857_v57 }
 0x919   : > { %3766 = vmatpush3.bf16.xpose.msra.mxu1 %v1883_v51 }
 0x920   : > { %3768 = vmatmul.mubr.msk.bf16.vlgmr.msra.gmra.mrb[80].mxu1 %vm946_vm1, %v1825_v37 }
 0x9b3   : > { %v1815_v42 = vpop.f32.mrb[76].mxu1 }
 0x9b4   : > { %v5370_v40 = vadd.f32 %v1815_v42, %v5273_v16  ;;  %v3997_v35 = vpop.f32.mrb[77].mxu1 }
 0x9b5   : > { %v1818_v2 = vpop.f32.mrb[78].mxu1 }
 0x9b6   : > { %v5373_v27 = vadd.f32 %v1818_v2, %v5275_v25  ;;  %v3998_v19 = vpop.f32.mrb[79].mxu1 }
 0x9f3   : > { %v1943_v29 = vpop.f32.mrb[80].mxu1 }
 0x9f4   : > { %v1944_v39 = vadd.f32 %v1943_v29, %v5126_v60  ;;  %v1945_v7 = vpop.f32.mrb[81].mxu1 }
 0x9f5   : > { %v1946_v15 = vadd.f32 %v1945_v7, %v5128_v61  ;;  %v1947_v47 = vpop.f32.mrb[82].mxu1 }
 0x9f6   : > { %v1948_v17 = vadd.f32 %v1947_v47, %v5130_v4  ;;  %v1949_v37 = vpop.f32.mrb[83].mxu1 }
 0x9f7   : > { %v1950_v5 = vadd.f32 %v1949_v37, %v5133_v9  ;;  %v1952_v16 = vmax.f32 %v1944_v39, %v1946_v15 }
 0x9f9   : > { %1953 = vmax.xlane.f32.xlu1 %v1952_v16  ;;  %v1955_v1 = vmax.f32 %v1948_v17, %v1950_v5 }
 0x9fb   : > { %1956 = vmax.xlane.f32.xlu0 %v1955_v1 }
 0xa0a   : > { %1990 = vrot.lane.b32.xlu1 %v4941_v48, %s4584_s12 }
 0xa0e   : > { %2008 = vrot.lane.b32.xlu1 %v4993_v45, %s4584_s12 }
 0xa11   : > { %2006 = vrot.lane.b32.xlu0 %v4981_v38, %s4584_s12 }
 0xa12   : > { %2010 = vrot.lane.b32.xlu1 %v5007_v56, %s4584_s12 }
 0xa15   : > { %1992 = vrot.lane.b32.xlu0 %v4947_v54, %s4584_s12 }
 0xa16   : > { %2012 = vrot.lane.b32.xlu1 %v5021_v3, %s4584_s12 }
 0xa19   : > { %1994 = vrot.lane.b32.xlu0 %v4953_v62, %s4584_s12 }
 0xa1a   : > { %2014 = vrot.lane.b32.xlu1 %v5035_v13, %s4584_s12 }
 0xa1d   : > { %1996 = vrot.lane.b32.xlu0 %v4961_v8, %s4584_s12 }
 0xa1e   : > { %2016 = vrot.lane.b32.xlu1 %v5049_v23, %s4584_s12 }
 0xa21   : > { %1998 = vrot.lane.b32.xlu0 %v5930_v22, %s4584_s12 }
 0xa22   : > { %2018 = vrot.lane.b32.xlu1 %v5931_v34, %s4584_s12 }
 0xa25   : > { %2000 = vrot.lane.b32.xlu0 %v4969_v20, %s4584_s12 }
 0xa86   : > { %v1954_v25 = vpop.xlane.xlu1 %1953 }
 0xa87   : > { %v1958_v33 = vsub.f32 %v1944_v39, %v1954_v25  ;;  %v1959_v11 = vsub.f32 %v1946_v15, %v1954_v25 }
 0xa88   : > { %v1957_v24 = vpop.xlane.xlu0 %1956 }
 0xa89   : > { %v1962_v28 = vmul.f32 1.442695, %v1958_v33  ;;  %v1964_v49 = vmul.f32 1.442695, %v1959_v11  ;;  %v1960_v55 = vsub.f32 %v1948_v17, %v1957_v24  ;;  %v1961_v50 = vsub.f32 %v1950_v5, %v1957_v24 }
 0xa8a   : > { %v1991_v57 = vpop.permute.xlu1 %1990 }
 0xa8b   : > { %4285 = vpow2.f32 %v1962_v28  ;;  %v1966_v51 = vmul.f32 1.442695, %v1960_v55  ;;  %v1968_v42 = vmul.f32 1.442695, %v1961_v50 }
 0xa8c   : > { %4287 = vpow2.f32 %v1964_v49  ;;  %v2007_v35 = vpop.permute.xlu0 %2006 }
 0xa8d   : > { %4289 = vpow2.f32 %v1966_v51  ;;  %3769 = vmatprep.subr.bf16.mxu0 %v2007_v35 }
 0xa8e   : > { %4291 = vpow2.f32 %v1968_v42  ;;  %3770 = vmatpush3.bf16.msra.mxu0 %v1991_v57  ;;  %v2009_v2 = vpop.permute.xlu1 %2008 }
 0xa8f   : > { %3771 = vmatprep.subr.bf16.mxu0 %v2009_v2 }
 0xa90   : > { %v1993_v19 = vpop.permute.xlu0 %1992 }
 0xa92   : > { %3772 = vmatpush3.bf16.msra.mxu0 %v1993_v19  ;;  %v2011_v29 = vpop.permute.xlu1 %2010 }
 0xa93   : > { %3773 = vmatprep.subr.bf16.mxu0 %v2011_v29 }
 0xa94   : > { %v1995_v39 = vpop.permute.xlu0 %1994 }
 0xa95   : > { %v5405_v7 = vpop.eup %4285 }
 0xa96   : > { %v5407_v15 = vpop.eup %4287  ;;  %3774 = vmatpush3.bf16.msra.mxu0 %v1995_v39  ;;  %v2013_v47 = vpop.permute.xlu1 %2012 }
 0xa97   : > { %v4290_v17 = vpop.eup %4289  ;;  %3775 = vmatprep.subr.bf16.mxu0 %v2013_v47  ;;  %v1970_v37 = vadd.f32 %v5407_v15, %v5405_v7 }
 0xa98   : > { %v4292_v5 = vpop.eup %4291  ;;  %v1997_v16 = vpop.permute.xlu0 %1996 }
 0xa99   : > { %1971 = vadd.xlane.f32.xlu0 %v1970_v37  ;;  %v1973_v1 = vadd.f32 %v4292_v5, %v4290_v17 }
 0xa9a   : > { %3776 = vmatpush3.bf16.msra.mxu0 %v1997_v16  ;;  %v2015_v25 = vpop.permute.xlu1 %2014 }
 0xa9b   : > { %1974 = vadd.xlane.f32.xlu1 %v1973_v1  ;;  %3777 = vmatprep.subr.bf16.mxu0 %v2015_v25 }
 0xa9c   : > { %v1999_v33 = vpop.permute.xlu0 %1998 }
 0xa9e   : > { %3778 = vmatpush3.bf16.msra.mxu0 %v1999_v33  ;;  %v2017_v11 = vpop.permute.xlu1 %2016 }
 0xa9f   : > { %3779 = vmatprep.subr.bf16.mxu0 %v2017_v11 }
 0xaa0   : > { %v2001_v24 = vpop.permute.xlu0 %2000 }
 0xaa2   : > { %3780 = vmatpush3.bf16.msra.mxu0 %v2001_v24  ;;  %v2019_v28 = vpop.permute.xlu1 %2018 }
 0xaa3   : > { %3781 = vmatprep.subr.bf16.mxu0 %v2019_v28  ;;  %v4244_v28 = vld [vmem:[#allocation10 + $0x18] sm:$0xff]  }
 0xaac   : > { %2020 = vrot.lane.b32.xlu1 %v5071_v44, %s4584_s12 }
 0xaaf   : > { %2002 = vrot.lane.b32.xlu0 %v4973_v26, %s4584_s12 }
 0xab0   : > { %2136 = vrot.lane.b32.xlu1 %v4939_v46, %s4585_s17 }
 0xab3   : > { %2004 = vrot.lane.b32.xlu0 %v4977_v32, %s4584_s12 }
 0xab4   : > { %2138 = vrot.lane.b32.xlu1 %v4945_v52, %s4585_s17 }
 0xab7   : > { %2152 = vrot.lane.b32.xlu0 %v4979_v36, %s4585_s17 }
 0xab8   : > { %2140 = vrot.lane.b32.xlu1 %v4951_v59, %s4585_s17 }
 0xabb   : > { %2154 = vrot.lane.b32.xlu0 %v4991_v43, %s4585_s17 }
 0xabc   : > { %2142 = vrot.lane.b32.xlu1 %v4959_v6, %s4585_s17 }
 0xabf   : > { %2156 = vrot.lane.b32.xlu0 %v5005_v53, %s4585_s17 }
 0xac0   : > { %2144 = vrot.lane.b32.xlu1 %v4963_v12, %s4585_s17 }
 0xac3   : > { %2158 = vrot.lane.b32.xlu0 %v5019_v63, %s4585_s17 }
 0xac4   : > { %2146 = vrot.lane.b32.xlu1 %v4967_v18, %s4585_s17 }
 0xac7   : > { %2160 = vrot.lane.b32.xlu0 %v5033_v10, %s4585_s17 }
 0xac8   : > { %2148 = vrot.lane.b32.xlu1 %v5932_v14, %s4585_s17 }
 0xacb   : > { %2162 = vrot.lane.b32.xlu0 %v5047_v21, %s4585_s17 }
 0xacc   : > { %2150 = vrot.lane.b32.xlu1 %v4975_v30, %s4585_s17 }
 0xacf   : > { %2164 = vrot.lane.b32.xlu0 %v5059_v31, %s4585_s17 }
 0xad0   : > { %2134 = vrot.lane.b32.xlu1 %v4955_v0, %s4585_s17 }
 0xad3   : > { %2166 = vrot.lane.b32.xlu0 %v5069_v41, %s4585_s17 }
 0xb26   : > { %v1972_v49 = vpop.xlane.xlu0 %1971 }
 0xb27   : > { %4293 = vrcp.f32 %v1972_v49 }
 0xb28   : > { %v1975_v55 = vpop.xlane.xlu1 %1974 }
 0xb29   : > { %4295 = vrcp.f32 %v1975_v55 }
 0xb2a   : > { %v2003_v50 = vpop.permute.xlu0 %2002 }
 0xb2b   : > { %3782 = vmatpush3.bf16.msra.mxu0 %v2003_v50 }
 0xb2c   : > { %v2021_v57 = vpop.permute.xlu1 %2020 }
 0xb2d   : > { %3783 = vmatprep.subr.bf16.mxu0 %v2021_v57 }
 0xb2e   : > { %v2005_v51 = vpop.permute.xlu0 %2004 }
 0xb2f   : > { %3784 = vmatpush3.bf16.msra.mxu0 %v2005_v51 }
 0xb30   : > { %3999 = vmatprep.subr.bf16.mxu0 %v5929_v58 }
 0xb31   : > { %v4294_v42 = vpop.eup %4293 }
 0xb32   : > { %v1978_v35 = vmul.f32 %v4294_v42, %v1972_v49  ;;  %v2153_v50 = vpop.permute.xlu0 %2152  ;;  %v2137_v49 = vpop.permute.xlu1 %2136 }
 0xb33   : > { %v4296_v2 = vpop.eup %4295 }
 0xb34   : > { %v1980_v19 = vsub.f32 2.0, %v1978_v35  ;;  %v1979_v29 = vmul.f32 %v4296_v2, %v1975_v55 }
 0xb36   : > { %v1982_v39 = vmul.f32 %v4294_v42, %v1980_v19  ;;  %v1981_v47 = vsub.f32 2.0, %v1979_v29  ;;  %v2139_v55 = vpop.permute.xlu1 %2138 }
 0xb38   : > { %v1983_v37 = vmul.f32 %v4296_v2, %v1981_v47  ;;  %v1984_v16 = vmul.f32 %v5405_v7, %v1982_v39  ;;  %v1985_v25 = vmul.f32 %v5407_v15, %v1982_v39 }
 0xb3a   : > { %v1986_v1 = vmul.f32 %v4290_v17, %v1983_v37  ;;  %v1987_v33 = vmul.f32 %v4292_v5, %v1983_v37  ;;  %v2141_v57 = vpop.permute.xlu1 %2140  ;;  %v2172_v37 = vsel %vm946_vm1, %v2137_v49, 0 }
 0xb3c   : > { %v1989_v11 = vpack.c.bf16 %v1987_v33, %v1985_v25  ;;  %v1988_v24 = vpack.c.bf16 %v1986_v1, %v1984_v16  ;;  %v2155_v1 = vpop.permute.xlu0 %2154  ;;  %v2175_v25 = vsel %vm946_vm1, %v2139_v55, 0 }
 0xb3e   : > { %2070 = vmatprep.mubr.bf16.mxu0 %v1989_v11  ;;  %v2143_v7 = vpop.permute.xlu1 %2142  ;;  %v2178_v11 = vsel %vm946_vm1, %v2141_v57, 0 }
 0xb3f   : > { %2071 = vmatmul.mubr.bf16.vlgmr.msra.gmra.mrb[24].mxu0 %v1988_v24 }
 0xb40   : > { %4000 = vmatpush3.bf16.msra.mxu0 %v4244_v28  ;;  %4001 = vmatprep.mubr.msk.bf16.mxu0 %vm4580_vm0, %v5929_v58  ;;  %v2157_v33 = vpop.permute.xlu0 %2156  ;;  %v2181_v28 = vsel %vm946_vm1, %v2143_v7, 0 }
 0xb41   : > { %4061 = vmatprep.subr.msk.bf16.mxu0 %vm946_vm1, %v2153_v50 }
 0xb42   : > { %v2145_v17 = vpop.permute.xlu1 %2144 }
 0xb43   : > { %v2184_v49 = vsel %vm946_vm1, %v2145_v17, 0 }
 0xb44   : > { %v2159_v24 = vpop.permute.xlu0 %2158 }
 0xb46   : > { %v2147_v51 = vpop.permute.xlu1 %2146 }
 0xb47   : > { %v2187_v55 = vsel %vm946_vm1, %v2147_v51, 0 }
 0xb48   : > { %v2161_v50 = vpop.permute.xlu0 %2160 }
 0xb4a   : > { %v2149_v15 = vpop.permute.xlu1 %2148 }
 0xb4b   : > { %v2190_v57 = vsel %vm946_vm1, %v2149_v15, 0 }
 0xb4e   : > { %v2151_v35 = vpop.permute.xlu1 %2150 }
 0xb4f   : > { %v2193_v7 = vsel %vm946_vm1, %v2151_v35, 0 }
 0xb52   : > { %v2135_v16 = vpop.permute.xlu1 %2134 }
 0xc12   : > { %v3785_v5 = vpop.f32.mrb[24].mxu0 }
 0xc13   : > { %v3786_v42 = vpop.f32.mrb[25].mxu0 }
 0xc14   : > { %v3787_v2 = vadd.f32 %v3786_v42, %v3785_v5  ;;  %v3788_v19 = vpop.f32.mrb[26].mxu0  ;;  %v2163_v5 = vpop.permute.xlu0 %2162 }
 0xc15   : > { %v3789_v29 = vpop.f32.mrb[27].mxu0 }
 0xc16   : > { %v3790_v39 = vadd.f32 %v3789_v29, %v3788_v19 }
 0xc18   : > { %v2079_v47 = vpack.c.bf16 %v3790_v39, %v3787_v2  ;;  %v2165_v42 = vpop.permute.xlu0 %2164 }
 0xc1a   : > { %4002 = vmatmul.mubr.msk.bf16.vlgmr.msra.gmra.mrb[28].mxu0 %vm946_vm1, %v2079_v47 }
 0xc1b   : > { %3794 = vmatpush3.bf16.xpose.msra.mxu0 %v2172_v37  ;;  %3809 = vmatprep.mubr.msk.bf16.mxu0 %vm946_vm1, %v2135_v16 }
 0xc1c   : > { %4062 = vmatprep.subr.msk.bf16.mxu0 %vm946_vm1, %v2155_v1  ;;  %v2167_v2 = vpop.permute.xlu0 %2166 }
 0xc23   : > { %3796 = vmatpush3.bf16.xpose.msra.mxu0 %v2175_v25 }
 0xc24   : > { %4063 = vmatprep.subr.msk.bf16.mxu0 %vm946_vm1, %v2157_v33 }
 0xc2b   : > { %3798 = vmatpush3.bf16.xpose.msra.mxu0 %v2178_v11 }
 0xc2c   : > { %4064 = vmatprep.subr.msk.bf16.mxu0 %vm946_vm1, %v2159_v24 }
 0xc33   : > { %3800 = vmatpush3.bf16.xpose.msra.mxu0 %v2181_v28 }
 0xc34   : > { %4065 = vmatprep.subr.msk.bf16.mxu0 %vm946_vm1, %v2161_v50 }
 0xc3b   : > { %3802 = vmatpush3.bf16.xpose.msra.mxu0 %v2184_v49 }
 0xc3c   : > { %4066 = vmatprep.subr.msk.bf16.mxu0 %vm946_vm1, %v2163_v5 }
 0xc43   : > { %3804 = vmatpush3.bf16.xpose.msra.mxu0 %v2187_v55 }
 0xc44   : > { %4067 = vmatprep.subr.msk.bf16.mxu0 %vm946_vm1, %v2165_v42 }
 0xc4b   : > { %3806 = vmatpush3.bf16.xpose.msra.mxu0 %v2190_v57 }
 0xc4c   : > { %4068 = vmatprep.subr.msk.bf16.mxu0 %vm946_vm1, %v2167_v2 }
 0xc53   : > { %3808 = vmatpush3.bf16.xpose.msra.mxu0 %v2193_v7 }
 0xc5a   : > { %3810 = vmatmul.mubr.msk.bf16.vlgmr.msra.gmra.mrb[32].mxu0 %vm946_vm1, %v2135_v16 }
 0xced   : > { %v2125_v17 = vpop.f32.mrb[28].mxu0 }
 0xcee   : > { %v5476_v19 = vadd.f32 %v2125_v17, %v5370_v40  ;;  %v4003_v51 = vpop.f32.mrb[29].mxu0 }
 0xcef   : > { %v2128_v29 = vpop.f32.mrb[30].mxu0 }
 0xcf0   : > { %v5479_v39 = vadd.f32 %v2128_v29, %v5373_v27  ;;  %v4004_v47 = vpop.f32.mrb[31].mxu0 }
 0xd2d   : > { %v2253_v15 = vpop.f32.mrb[32].mxu0 }
 0xd2e   : > { %v2254_v37 = vadd.f32 %v2253_v15, %v5126_v60  ;;  %v2255_v1 = vpop.f32.mrb[33].mxu0 }
 0xd2f   : > { %v2256_v25 = vadd.f32 %v2255_v1, %v5128_v61  ;;  %v2257_v35 = vpop.f32.mrb[34].mxu0 }
 0xd30   : > { %v2258_v33 = vadd.f32 %v2257_v35, %v5130_v4  ;;  %v2259_v16 = vpop.f32.mrb[35].mxu0 }
 0xd31   : > { %v2262_v11 = vmax.f32 %v2254_v37, %v2256_v25  ;;  %v2260_v40 = vadd.f32 %v2259_v16, %v5133_v9 }
 0xd33   : > { %v2265_v24 = vmax.f32 %v2258_v33, %v2260_v40  ;;  %2263 = vmax.xlane.f32.xlu0 %v2262_v11 }
 0xd35   : > { %2266 = vmax.xlane.f32.xlu1 %v2265_v24 }
 0xd46   : > { %2316 = vrot.lane.b32.xlu1 %v4981_v38, %s4585_s17 }
 0xd49   : > { %2300 = vrot.lane.b32.xlu0 %v4941_v48, %s4585_s17 }
 0xd4a   : > { %2318 = vrot.lane.b32.xlu1 %v4993_v45, %s4585_s17 }
 0xd4d   : > { %2320 = vrot.lane.b32.xlu0 %v5007_v56, %s4585_s17 }
 0xd4e   : > { %2302 = vrot.lane.b32.xlu1 %v4947_v54, %s4585_s17 }
 0xd51   : > { %2322 = vrot.lane.b32.xlu0 %v5021_v3, %s4585_s17 }
 0xd52   : > { %2304 = vrot.lane.b32.xlu1 %v4953_v62, %s4585_s17 }
 0xd55   : > { %2324 = vrot.lane.b32.xlu0 %v5035_v13, %s4585_s17 }
 0xd56   : > { %2306 = vrot.lane.b32.xlu1 %v4961_v8, %s4585_s17 }
 0xd59   : > { %2326 = vrot.lane.b32.xlu0 %v5049_v23, %s4585_s17 }
 0xd5a   : > { %2308 = vrot.lane.b32.xlu1 %v5930_v22, %s4585_s17 }
 0xd5e   : > { %2310 = vrot.lane.b32.xlu1 %v4969_v20, %s4585_s17 }
 0xd62   : > { %2312 = vrot.lane.b32.xlu1 %v4973_v26, %s4585_s17 }
 0xd66   : > { %2314 = vrot.lane.b32.xlu1 %v4977_v32, %s4585_s17 }
 0xd6a   : > { %2462 = vrot.lane.b32.xlu1 %v4979_v36, %s4586_s10 }
 0xd6e   : > { %2464 = vrot.lane.b32.xlu1 %v4991_v43, %s4586_s10 }
 0xd72   : > { %2466 = vrot.lane.b32.xlu1 %v5005_v53, %s4586_s10 }
 0xd76   : > { %2468 = vrot.lane.b32.xlu1 %v5019_v63, %s4586_s10 }
 0xd7a   : > { %2470 = vrot.lane.b32.xlu1 %v5033_v10, %s4586_s10 }
 0xd7e   : > { %2472 = vrot.lane.b32.xlu1 %v5047_v21, %s4586_s10 }
 0xd82   : > { %2474 = vrot.lane.b32.xlu1 %v5059_v31, %s4586_s10 }
 0xd86   : > { %2476 = vrot.lane.b32.xlu1 %v5069_v41, %s4586_s10 }
 0xdc0   : > { %v2264_v27 = vpop.xlane.xlu0 %2263 }
 0xdc1   : > { %v2268_v28 = vsub.f32 %v2254_v37, %v2264_v27  ;;  %v2269_v50 = vsub.f32 %v2256_v25, %v2264_v27 }
 0xdc2   : > { %v2267_v49 = vpop.xlane.xlu1 %2266 }
 0xdc3   : > { %v2272_v5 = vmul.f32 1.442695, %v2268_v28  ;;  %v2274_v55 = vmul.f32 1.442695, %v2269_v50  ;;  %v2270_v42 = vsub.f32 %v2258_v33, %v2267_v49  ;;  %v2271_v57 = vsub.f32 %v2260_v40, %v2267_v49 }
 0xdc4   : > { %v2301_v2 = vpop.permute.xlu0 %2300 }
 0xdc5   : > { %4297 = vpow2.f32 %v2272_v5  ;;  %v2276_v7 = vmul.f32 1.442695, %v2270_v42  ;;  %v2278_v17 = vmul.f32 1.442695, %v2271_v57 }
 0xdc6   : > { %4299 = vpow2.f32 %v2274_v55  ;;  %v2317_v51 = vpop.permute.xlu1 %2316 }
 0xdc7   : > { %4301 = vpow2.f32 %v2276_v7  ;;  %3811 = vmatprep.subr.bf16.mxu1 %v2317_v51 }
 0xdc8   : > { %4303 = vpow2.f32 %v2278_v17  ;;  %3812 = vmatpush3.bf16.msra.mxu1 %v2301_v2  ;;  %v2321_v29 = vpop.permute.xlu0 %2320 }
 0xdca   : > { %v2319_v47 = vpop.permute.xlu1 %2318 }
 0xdcb   : > { %3813 = vmatprep.subr.bf16.mxu1 %v2319_v47 }
 0xdcc   : > { %v2323_v1 = vpop.permute.xlu0 %2322 }
 0xdce   : > { %v2303_v15 = vpop.permute.xlu1 %2302 }
 0xdcf   : > { %v4298_v37 = vpop.eup %4297  ;;  %3814 = vmatpush3.bf16.msra.mxu1 %v2303_v15 }
 0xdd0   : > { %v4300_v25 = vpop.eup %4299  ;;  %3815 = vmatprep.subr.bf16.mxu1 %v2321_v29  ;;  %v2325_v40 = vpop.permute.xlu0 %2324 }
 0xdd1   : > { %v4302_v35 = vpop.eup %4301  ;;  %v2280_v33 = vadd.f32 %v4300_v25, %v4298_v37 }
 0xdd2   : > { %v4304_v16 = vpop.eup %4303  ;;  %v2305_v11 = vpop.permute.xlu1 %2304 }
 0xdd3   : > { %2281 = vadd.xlane.f32.xlu0 %v2280_v33  ;;  %3816 = vmatpush3.bf16.msra.mxu1 %v2305_v11  ;;  %v2283_v24 = vadd.f32 %v4304_v16, %v4302_v35 }
 0xdd4   : > { %3817 = vmatprep.subr.bf16.mxu1 %v2323_v1  ;;  %v2327_v50 = vpop.permute.xlu0 %2326 }
 0xdd6   : > { %v2307_v27 = vpop.permute.xlu1 %2306 }
 0xdd7   : > { %2284 = vadd.xlane.f32.xlu0 %v2283_v24  ;;  %3818 = vmatpush3.bf16.msra.mxu1 %v2307_v27 }
 0xdd8   : > { %3819 = vmatprep.subr.bf16.mxu1 %v2325_v40 }
 0xdda   : > { %v2309_v28 = vpop.permute.xlu1 %2308 }
 0xddb   : > { %3820 = vmatpush3.bf16.msra.mxu1 %v2309_v28 }
 0xddc   : > { %3821 = vmatprep.subr.bf16.mxu1 %v2327_v50 }
 0xdde   : > { %v2311_v49 = vpop.permute.xlu1 %2310 }
 0xddf   : > { %3822 = vmatpush3.bf16.msra.mxu1 %v2311_v49 }
 0xde2   : > { %v2313_v42 = vpop.permute.xlu1 %2312 }
 0xde6   : > { %v2315_v51 = vpop.permute.xlu1 %2314 }
 0xded   : > { %2328 = vrot.lane.b32.xlu0 %v5931_v34, %s4585_s17 }
 0xdf1   : > { %2330 = vrot.lane.b32.xlu0 %v5071_v44, %s4585_s17 }
 0xdf5   : > { %2446 = vrot.lane.b32.xlu0 %v4939_v46, %s4586_s10 }
 0xdf9   : > { %2448 = vrot.lane.b32.xlu0 %v4945_v52, %s4586_s10 }
 0xdfd   : > { %2450 = vrot.lane.b32.xlu0 %v4951_v59, %s4586_s10 }
 0xe01   : > { %2452 = vrot.lane.b32.xlu0 %v4959_v6, %s4586_s10 }
 0xe05   : > { %2454 = vrot.lane.b32.xlu0 %v4963_v12, %s4586_s10 }
 0xe09   : > { %2456 = vrot.lane.b32.xlu0 %v4967_v18, %s4586_s10 }
 0xe0d   : > { %2458 = vrot.lane.b32.xlu0 %v5932_v14, %s4586_s10 }
 0xe11   : > { %2460 = vrot.lane.b32.xlu0 %v4975_v30, %s4586_s10 }
 0xe15   : > { %2444 = vrot.lane.b32.xlu0 %v4955_v0, %s4586_s10 }
 0xe60   : > { %v2282_v5 = vpop.xlane.xlu0 %2281 }
 0xe61   : > { %4305 = vrcp.f32 %v2282_v5 }
 0xe64   : > { %v2285_v55 = vpop.xlane.xlu0 %2284 }
 0xe65   : > { %4307 = vrcp.f32 %v2285_v55 }
 0xe68   : > { %v2329_v57 = vpop.permute.xlu0 %2328 }
 0xe69   : > { %3823 = vmatprep.subr.bf16.mxu1 %v2329_v57 }
 0xe6a   : > { %3824 = vmatpush3.bf16.msra.mxu1 %v2313_v42  ;;  %v4245_v42 = vld [vmem:[#allocation10 + $0x20] sm:$0xff]  }
 0xe6b   : > { %v4306_v2 = vpop.eup %4305 }
 0xe6c   : > { %v2288_v7 = vmul.f32 %v4306_v2, %v2282_v5  ;;  %v2331_v17 = vpop.permute.xlu0 %2330  ;;  %v2463_v5 = vpop.permute.xlu1 %2462 }
 0xe6d   : > { %3825 = vmatprep.subr.bf16.mxu1 %v2331_v17 }
 0xe6e   : > { %v2290_v29 = vsub.f32 2.0, %v2288_v7  ;;  %3826 = vmatpush3.bf16.msra.mxu1 %v2315_v51 }
 0xe6f   : > { %v4308_v47 = vpop.eup %4307  ;;  %4005 = vmatprep.subr.bf16.mxu1 %v5929_v58 }
 0xe70   : > { %v2289_v15 = vmul.f32 %v4308_v47, %v2285_v55  ;;  %v2292_v1 = vmul.f32 %v4306_v2, %v2290_v29  ;;  %v2447_v55 = vpop.permute.xlu0 %2446 }
 0xe72   : > { %v2291_v33 = vsub.f32 2.0, %v2289_v15  ;;  %v2294_v40 = vmul.f32 %v4298_v37, %v2292_v1  ;;  %v2295_v27 = vmul.f32 %v4300_v25, %v2292_v1 }
 0xe74   : > { %v2293_v11 = vmul.f32 %v4308_v47, %v2291_v33  ;;  %v2449_v57 = vpop.permute.xlu0 %2448 }
 0xe76   : > { %v2296_v24 = vmul.f32 %v4302_v35, %v2293_v11  ;;  %v2297_v28 = vmul.f32 %v4304_v16, %v2293_v11  ;;  %v2482_v11 = vsel %vm946_vm1, %v2447_v55, 0 }
 0xe78   : > { %v2299_v50 = vpack.c.bf16 %v2297_v28, %v2295_v27  ;;  %v2298_v49 = vpack.c.bf16 %v2296_v24, %v2294_v40  ;;  %v2451_v2 = vpop.permute.xlu0 %2450  ;;  %v2465_v24 = vpop.permute.xlu1 %2464  ;;  %v2485_v27 = vsel %vm946_vm1, %v2449_v57, 0 }
 0xe7a   : > { %2380 = vmatprep.mubr.bf16.mxu1 %v2299_v50  ;;  %v2488_v50 = vsel %vm946_vm1, %v2451_v2, 0 }
 0xe7b   : > { %2381 = vmatmul.mubr.bf16.vlgmr.msra.gmra.mrb[84].mxu1 %v2298_v49 }
 0xe7c   : > { %4006 = vmatpush3.bf16.msra.mxu1 %v4245_v42  ;;  %4007 = vmatprep.mubr.msk.bf16.mxu1 %vm4580_vm0, %v5929_v58  ;;  %v2453_v7 = vpop.permute.xlu0 %2452  ;;  %v2467_v28 = vpop.permute.xlu1 %2466 }
 0xe7d   : > { %4069 = vmatprep.subr.msk.bf16.mxu1 %vm946_vm1, %v2463_v5  ;;  %v2491_v42 = vsel %vm946_vm1, %v2453_v7, 0 }
 0xe80   : > { %v2455_v37 = vpop.permute.xlu0 %2454  ;;  %v2469_v49 = vpop.permute.xlu1 %2468 }
 0xe81   : > { %v2494_v55 = vsel %vm946_vm1, %v2455_v37, 0 }
 0xe84   : > { %v2457_v35 = vpop.permute.xlu0 %2456  ;;  %v2471_v5 = vpop.permute.xlu1 %2470 }
 0xe85   : > { %v2497_v57 = vsel %vm946_vm1, %v2457_v35, 0 }
 0xe88   : > { %v2459_v25 = vpop.permute.xlu0 %2458 }
 0xe89   : > { %v2500_v2 = vsel %vm946_vm1, %v2459_v25, 0 }
 0xe8c   : > { %v2461_v51 = vpop.permute.xlu0 %2460 }
 0xe8d   : > { %v2503_v7 = vsel %vm946_vm1, %v2461_v51, 0 }
 0xe90   : > { %v2445_v40 = vpop.permute.xlu0 %2444 }
 0xf4e   : > { %v3827_v16 = vpop.f32.mrb[84].mxu1 }
 0xf4f   : > { %v3828_v17 = vpop.f32.mrb[85].mxu1 }
 0xf50   : > { %v3829_v29 = vadd.f32 %v3828_v17, %v3827_v16  ;;  %v3830_v47 = vpop.f32.mrb[86].mxu1  ;;  %v2473_v16 = vpop.permute.xlu1 %2472 }
 0xf51   : > { %v3831_v15 = vpop.f32.mrb[87].mxu1 }
 0xf52   : > { %v3832_v1 = vadd.f32 %v3831_v15, %v3830_v47 }
 0xf54   : > { %v2389_v33 = vpack.c.bf16 %v3832_v1, %v3829_v29  ;;  %v2475_v17 = vpop.permute.xlu1 %2474 }
 0xf56   : > { %4008 = vmatmul.mubr.msk.bf16.vlgmr.msra.gmra.mrb[88].mxu1 %vm946_vm1, %v2389_v33 }
 0xf57   : > { %3836 = vmatpush3.bf16.xpose.msra.mxu1 %v2482_v11  ;;  %3851 = vmatprep.mubr.msk.bf16.mxu1 %vm946_vm1, %v2445_v40 }
 0xf58   : > { %4070 = vmatprep.subr.msk.bf16.mxu1 %vm946_vm1, %v2465_v24  ;;  %v2477_v29 = vpop.permute.xlu1 %2476 }
 0xf5f   : > { %3838 = vmatpush3.bf16.xpose.msra.mxu1 %v2485_v27 }
 0xf60   : > { %4071 = vmatprep.subr.msk.bf16.mxu1 %vm946_vm1, %v2467_v28 }
 0xf67   : > { %3840 = vmatpush3.bf16.xpose.msra.mxu1 %v2488_v50 }
 0xf68   : > { %4072 = vmatprep.subr.msk.bf16.mxu1 %vm946_vm1, %v2469_v49 }
 0xf6f   : > { %3842 = vmatpush3.bf16.xpose.msra.mxu1 %v2491_v42 }
 0xf70   : > { %4073 = vmatprep.subr.msk.bf16.mxu1 %vm946_vm1, %v2471_v5 }
 0xf77   : > { %3844 = vmatpush3.bf16.xpose.msra.mxu1 %v2494_v55 }
 0xf78   : > { %4074 = vmatprep.subr.msk.bf16.mxu1 %vm946_vm1, %v2473_v16 }
 0xf7f   : > { %3846 = vmatpush3.bf16.xpose.msra.mxu1 %v2497_v57 }
 0xf80   : > { %4075 = vmatprep.subr.msk.bf16.mxu1 %vm946_vm1, %v2475_v17 }
 0xf87   : > { %3848 = vmatpush3.bf16.xpose.msra.mxu1 %v2500_v2 }
 0xf88   : > { %4076 = vmatprep.subr.msk.bf16.mxu1 %vm946_vm1, %v2477_v29 }
 0xf8f   : > { %3850 = vmatpush3.bf16.xpose.msra.mxu1 %v2503_v7 }
 0xf96   : > { %3852 = vmatmul.mubr.msk.bf16.vlgmr.msra.gmra.mrb[92].mxu1 %vm946_vm1, %v2445_v40 }
0x1029   : > { %v2435_v37 = vpop.f32.mrb[88].mxu1 }
0x102a   : > { %v5574_v47 = vadd.f32 %v2435_v37, %v5476_v19  ;;  %v4009_v35 = vpop.f32.mrb[89].mxu1 }
0x102b   : > { %v2438_v15 = vpop.f32.mrb[90].mxu1 }
0x102c   : > { %v5577_v1 = vadd.f32 %v2438_v15, %v5479_v39  ;;  %v4010_v33 = vpop.f32.mrb[91].mxu1 }
0x1069   : > { %v2563_v25 = vpop.f32.mrb[92].mxu1 }
0x106a   : > { %v2564_v11 = vadd.f32 %v2563_v25, %v5126_v60  ;;  %v2565_v24 = vpop.f32.mrb[93].mxu1 }
0x106b   : > { %v2566_v27 = vadd.f32 %v2565_v24, %v5128_v61  ;;  %v2567_v51 = vpop.f32.mrb[94].mxu1 }
0x106c   : > { %v2568_v28 = vadd.f32 %v2567_v51, %v5130_v4  ;;  %v2569_v40 = vpop.f32.mrb[95].mxu1 }
0x106d   : > { %v2572_v50 = vmax.f32 %v2564_v11, %v2566_v27  ;;  %v2570_v19 = vadd.f32 %v2569_v40, %v5133_v9 }
0x106f   : > { %v2575_v49 = vmax.f32 %v2568_v28, %v2570_v19  ;;  %2573 = vmax.xlane.f32.xlu1 %v2572_v50 }
0x1071   : > { %2576 = vmax.xlane.f32.xlu0 %v2575_v49 }
0x1080   : > { %2610 = vrot.lane.b32.xlu1 %v4941_v48, %s4586_s10 }
0x1084   : > { %2628 = vrot.lane.b32.xlu1 %v4993_v45, %s4586_s10 }
0x1087   : > { %2626 = vrot.lane.b32.xlu0 %v4981_v38, %s4586_s10 }
0x1088   : > { %2630 = vrot.lane.b32.xlu1 %v5007_v56, %s4586_s10 }
0x108b   : > { %2612 = vrot.lane.b32.xlu0 %v4947_v54, %s4586_s10 }
0x108c   : > { %2632 = vrot.lane.b32.xlu1 %v5021_v3, %s4586_s10 }
0x108f   : > { %2614 = vrot.lane.b32.xlu0 %v4953_v62, %s4586_s10 }
0x1090   : > { %2634 = vrot.lane.b32.xlu1 %v5035_v13, %s4586_s10 }
0x1093   : > { %2616 = vrot.lane.b32.xlu0 %v4961_v8, %s4586_s10 }
0x1094   : > { %2636 = vrot.lane.b32.xlu1 %v5049_v23, %s4586_s10 }
0x1097   : > { %2618 = vrot.lane.b32.xlu0 %v5930_v22, %s4586_s10 }
0x1098   : > { %2638 = vrot.lane.b32.xlu1 %v5931_v34, %s4586_s10 }
0x109b   : > { %2620 = vrot.lane.b32.xlu0 %v4969_v20, %s4586_s10 }
0x10fc   : > { %v2574_v39 = vpop.xlane.xlu1 %2573 }
0x10fd   : > { %v2578_v42 = vsub.f32 %v2564_v11, %v2574_v39  ;;  %v2579_v5 = vsub.f32 %v2566_v27, %v2574_v39 }
0x10fe   : > { %v2577_v55 = vpop.xlane.xlu0 %2576 }
0x10ff   : > { %v2582_v16 = vmul.f32 1.442695, %v2578_v42  ;;  %v2584_v57 = vmul.f32 1.442695, %v2579_v5  ;;  %v2580_v17 = vsub.f32 %v2568_v28, %v2577_v55  ;;  %v2581_v2 = vsub.f32 %v2570_v19, %v2577_v55 }
0x1100   : > { %v2611_v29 = vpop.permute.xlu1 %2610 }
0x1101   : > { %4309 = vpow2.f32 %v2582_v16  ;;  %v2586_v7 = vmul.f32 1.442695, %v2580_v17  ;;  %v2588_v37 = vmul.f32 1.442695, %v2581_v2 }
0x1102   : > { %4311 = vpow2.f32 %v2584_v57  ;;  %v2627_v35 = vpop.permute.xlu0 %2626 }
0x1103   : > { %4313 = vpow2.f32 %v2586_v7  ;;  %3853 = vmatprep.subr.bf16.mxu0 %v2627_v35 }
0x1104   : > { %4315 = vpow2.f32 %v2588_v37  ;;  %3854 = vmatpush3.bf16.msra.mxu0 %v2611_v29  ;;  %v2629_v15 = vpop.permute.xlu1 %2628 }
0x1105   : > { %3855 = vmatprep.subr.bf16.mxu0 %v2629_v15 }
0x1106   : > { %v2613_v33 = vpop.permute.xlu0 %2612 }
0x1108   : > { %3856 = vmatpush3.bf16.msra.mxu0 %v2613_v33  ;;  %v2631_v25 = vpop.permute.xlu1 %2630 }
0x1109   : > { %3857 = vmatprep.subr.bf16.mxu0 %v2631_v25 }
0x110a   : > { %v2615_v11 = vpop.permute.xlu0 %2614 }
0x110b   : > { %v5609_v24 = vpop.eup %4309 }
0x110c   : > { %v5611_v27 = vpop.eup %4311  ;;  %3858 = vmatpush3.bf16.msra.mxu0 %v2615_v11  ;;  %v2633_v51 = vpop.permute.xlu1 %2632 }
0x110d   : > { %v4314_v28 = vpop.eup %4313  ;;  %3859 = vmatprep.subr.bf16.mxu0 %v2633_v51  ;;  %v2590_v40 = vadd.f32 %v5611_v27, %v5609_v24 }
0x110e   : > { %v4316_v50 = vpop.eup %4315  ;;  %v2617_v19 = vpop.permute.xlu0 %2616 }
0x110f   : > { %2591 = vadd.xlane.f32.xlu0 %v2590_v40  ;;  %v2593_v49 = vadd.f32 %v4316_v50, %v4314_v28 }
0x1110   : > { %3860 = vmatpush3.bf16.msra.mxu0 %v2617_v19  ;;  %v2635_v39 = vpop.permute.xlu1 %2634 }
0x1111   : > { %2594 = vadd.xlane.f32.xlu1 %v2593_v49  ;;  %3861 = vmatprep.subr.bf16.mxu0 %v2635_v39 }
0x1112   : > { %v2619_v42 = vpop.permute.xlu0 %2618 }
0x1114   : > { %3862 = vmatpush3.bf16.msra.mxu0 %v2619_v42  ;;  %v2637_v5 = vpop.permute.xlu1 %2636 }
0x1115   : > { %3863 = vmatprep.subr.bf16.mxu0 %v2637_v5 }
0x1116   : > { %v2621_v55 = vpop.permute.xlu0 %2620 }
0x1118   : > { %3864 = vmatpush3.bf16.msra.mxu0 %v2621_v55  ;;  %v2639_v16 = vpop.permute.xlu1 %2638 }
0x1119   : > { %3865 = vmatprep.subr.bf16.mxu0 %v2639_v16  ;;  %v4246_v16 = vld [vmem:[#allocation10 + $0x28] sm:$0xff]  }
0x1122   : > { %2640 = vrot.lane.b32.xlu1 %v5071_v44, %s4586_s10 }
0x1125   : > { %2622 = vrot.lane.b32.xlu0 %v4973_v26, %s4586_s10 }
0x1126   : > { %2756 = vrot.lane.b32.xlu1 %v4939_v46, %s4587_s16 }
0x1129   : > { %2624 = vrot.lane.b32.xlu0 %v4977_v32, %s4586_s10 }
0x112a   : > { %2758 = vrot.lane.b32.xlu1 %v4945_v52, %s4587_s16 }
0x112d   : > { %2772 = vrot.lane.b32.xlu0 %v4979_v36, %s4587_s16 }
0x112e   : > { %2760 = vrot.lane.b32.xlu1 %v4951_v59, %s4587_s16 }
0x1131   : > { %2774 = vrot.lane.b32.xlu0 %v4991_v43, %s4587_s16 }
0x1132   : > { %2762 = vrot.lane.b32.xlu1 %v4959_v6, %s4587_s16 }
0x1135   : > { %2776 = vrot.lane.b32.xlu0 %v5005_v53, %s4587_s16 }
0x1136   : > { %2764 = vrot.lane.b32.xlu1 %v4963_v12, %s4587_s16 }
0x1139   : > { %2778 = vrot.lane.b32.xlu0 %v5019_v63, %s4587_s16 }
0x113a   : > { %2766 = vrot.lane.b32.xlu1 %v4967_v18, %s4587_s16 }
0x113d   : > { %2780 = vrot.lane.b32.xlu0 %v5033_v10, %s4587_s16 }
0x113e   : > { %2768 = vrot.lane.b32.xlu1 %v5932_v14, %s4587_s16 }
0x1141   : > { %2782 = vrot.lane.b32.xlu0 %v5047_v21, %s4587_s16 }
0x1142   : > { %2770 = vrot.lane.b32.xlu1 %v4975_v30, %s4587_s16 }
0x1145   : > { %2784 = vrot.lane.b32.xlu0 %v5059_v31, %s4587_s16 }
0x1146   : > { %2754 = vrot.lane.b32.xlu1 %v4955_v0, %s4587_s16 }
0x1149   : > { %2786 = vrot.lane.b32.xlu0 %v5069_v41, %s4587_s16 }
0x119c   : > { %v2592_v57 = vpop.xlane.xlu0 %2591 }
0x119d   : > { %4317 = vrcp.f32 %v2592_v57 }
0x119e   : > { %v2595_v17 = vpop.xlane.xlu1 %2594 }
0x119f   : > { %4319 = vrcp.f32 %v2595_v17 }
0x11a0   : > { %v2623_v2 = vpop.permute.xlu0 %2622 }
0x11a1   : > { %3866 = vmatpush3.bf16.msra.mxu0 %v2623_v2 }
0x11a2   : > { %v2641_v29 = vpop.permute.xlu1 %2640 }
0x11a3   : > { %3867 = vmatprep.subr.bf16.mxu0 %v2641_v29 }
0x11a4   : > { %v2625_v7 = vpop.permute.xlu0 %2624 }
0x11a5   : > { %3868 = vmatpush3.bf16.msra.mxu0 %v2625_v7 }
0x11a6   : > { %4011 = vmatprep.subr.bf16.mxu0 %v5929_v58 }
0x11a7   : > { %v4318_v37 = vpop.eup %4317 }
0x11a8   : > { %v2598_v35 = vmul.f32 %v4318_v37, %v2592_v57  ;;  %v2773_v2 = vpop.permute.xlu0 %2772  ;;  %v2757_v57 = vpop.permute.xlu1 %2756 }
0x11a9   : > { %v4320_v15 = vpop.eup %4319 }
0x11aa   : > { %v2600_v33 = vsub.f32 2.0, %v2598_v35  ;;  %v2599_v25 = vmul.f32 %v4320_v15, %v2595_v17 }
0x11ac   : > { %v2602_v11 = vmul.f32 %v4318_v37, %v2600_v33  ;;  %v2601_v51 = vsub.f32 2.0, %v2599_v25  ;;  %v2759_v17 = vpop.permute.xlu1 %2758 }
0x11ae   : > { %v2603_v40 = vmul.f32 %v4320_v15, %v2601_v51  ;;  %v2604_v19 = vmul.f32 %v5609_v24, %v2602_v11  ;;  %v2605_v39 = vmul.f32 %v5611_v27, %v2602_v11 }
0x11b0   : > { %v2606_v49 = vmul.f32 %v4314_v28, %v2603_v40  ;;  %v2607_v42 = vmul.f32 %v4316_v50, %v2603_v40  ;;  %v2761_v29 = vpop.permute.xlu1 %2760  ;;  %v2792_v40 = vsel %vm946_vm1, %v2757_v57, 0 }
0x11b2   : > { %v2609_v5 = vpack.c.bf16 %v2607_v42, %v2605_v39  ;;  %v2608_v55 = vpack.c.bf16 %v2606_v49, %v2604_v19  ;;  %v2775_v49 = vpop.permute.xlu0 %2774  ;;  %v2795_v39 = vsel %vm946_vm1, %v2759_v17, 0 }
0x11b4   : > { %2690 = vmatprep.mubr.bf16.mxu0 %v2609_v5  ;;  %v2763_v24 = vpop.permute.xlu1 %2762  ;;  %v2798_v5 = vsel %vm946_vm1, %v2761_v29, 0 }
0x11b5   : > { %2691 = vmatmul.mubr.bf16.vlgmr.msra.gmra.mrb[36].mxu0 %v2608_v55 }
0x11b6   : > { %4012 = vmatpush3.bf16.msra.mxu0 %v4246_v16  ;;  %4013 = vmatprep.mubr.msk.bf16.mxu0 %vm4580_vm0, %v5929_v58  ;;  %v2777_v42 = vpop.permute.xlu0 %2776  ;;  %v2801_v16 = vsel %vm946_vm1, %v2763_v24, 0 }
0x11b7   : > { %4077 = vmatprep.subr.msk.bf16.mxu0 %vm946_vm1, %v2773_v2 }
0x11b8   : > { %v2765_v28 = vpop.permute.xlu1 %2764 }
0x11b9   : > { %v2804_v57 = vsel %vm946_vm1, %v2765_v28, 0 }
0x11ba   : > { %v2779_v55 = vpop.permute.xlu0 %2778 }
0x11bc   : > { %v2767_v7 = vpop.permute.xlu1 %2766 }
0x11bd   : > { %v2807_v17 = vsel %vm946_vm1, %v2767_v7, 0 }
0x11be   : > { %v2781_v2 = vpop.permute.xlu0 %2780 }
0x11c0   : > { %v2769_v27 = vpop.permute.xlu1 %2768 }
0x11c1   : > { %v2810_v29 = vsel %vm946_vm1, %v2769_v27, 0 }
0x11c4   : > { %v2771_v35 = vpop.permute.xlu1 %2770 }
0x11c5   : > { %v2813_v24 = vsel %vm946_vm1, %v2771_v35, 0 }
0x11c8   : > { %v2755_v19 = vpop.permute.xlu1 %2754 }
0x1288   : > { %v3869_v50 = vpop.f32.mrb[36].mxu0 }
0x1289   : > { %v3870_v37 = vpop.f32.mrb[37].mxu0 }
0x128a   : > { %v3871_v15 = vadd.f32 %v3870_v37, %v3869_v50  ;;  %v3872_v33 = vpop.f32.mrb[38].mxu0  ;;  %v2783_v50 = vpop.permute.xlu0 %2782 }
0x128b   : > { %v3873_v25 = vpop.f32.mrb[39].mxu0 }
0x128c   : > { %v3874_v11 = vadd.f32 %v3873_v25, %v3872_v33 }
0x128e   : > { %v2699_v51 = vpack.c.bf16 %v3874_v11, %v3871_v15  ;;  %v2785_v37 = vpop.permute.xlu0 %2784 }
0x1290   : > { %4014 = vmatmul.mubr.msk.bf16.vlgmr.msra.gmra.mrb[40].mxu0 %vm946_vm1, %v2699_v51 }
0x1291   : > { %3878 = vmatpush3.bf16.xpose.msra.mxu0 %v2792_v40  ;;  %3893 = vmatprep.mubr.msk.bf16.mxu0 %vm946_vm1, %v2755_v19 }
0x1292   : > { %4078 = vmatprep.subr.msk.bf16.mxu0 %vm946_vm1, %v2775_v49  ;;  %v2787_v15 = vpop.permute.xlu0 %2786 }
0x1299   : > { %3880 = vmatpush3.bf16.xpose.msra.mxu0 %v2795_v39 }
0x129a   : > { %4079 = vmatprep.subr.msk.bf16.mxu0 %vm946_vm1, %v2777_v42 }
0x12a1   : > { %3882 = vmatpush3.bf16.xpose.msra.mxu0 %v2798_v5 }
0x12a2   : > { %4080 = vmatprep.subr.msk.bf16.mxu0 %vm946_vm1, %v2779_v55 }
0x12a9   : > { %3884 = vmatpush3.bf16.xpose.msra.mxu0 %v2801_v16 }
0x12aa   : > { %4081 = vmatprep.subr.msk.bf16.mxu0 %vm946_vm1, %v2781_v2 }
0x12b1   : > { %3886 = vmatpush3.bf16.xpose.msra.mxu0 %v2804_v57 }
0x12b2   : > { %4082 = vmatprep.subr.msk.bf16.mxu0 %vm946_vm1, %v2783_v50 }
0x12b9   : > { %3888 = vmatpush3.bf16.xpose.msra.mxu0 %v2807_v17 }
0x12ba   : > { %4083 = vmatprep.subr.msk.bf16.mxu0 %vm946_vm1, %v2785_v37 }
0x12c1   : > { %3890 = vmatpush3.bf16.xpose.msra.mxu0 %v2810_v29 }
0x12c2   : > { %4084 = vmatprep.subr.msk.bf16.mxu0 %vm946_vm1, %v2787_v15 }
0x12c9   : > { %3892 = vmatpush3.bf16.xpose.msra.mxu0 %v2813_v24 }
0x12d0   : > { %3894 = vmatmul.mubr.msk.bf16.vlgmr.msra.gmra.mrb[44].mxu0 %vm946_vm1, %v2755_v19 }
0x1363   : > { %v2745_v28 = vpop.f32.mrb[40].mxu0 }
0x1364   : > { %v5680_v33 = vadd.f32 %v2745_v28, %v5574_v47  ;;  %v4015_v7 = vpop.f32.mrb[41].mxu0 }
0x1365   : > { %v2748_v25 = vpop.f32.mrb[42].mxu0 }
0x1366   : > { %v5683_v11 = vadd.f32 %v2748_v25, %v5577_v1  ;;  %v4016_v51 = vpop.f32.mrb[43].mxu0 }
0x13a3   : > { %v2873_v27 = vpop.f32.mrb[44].mxu0 }
0x13a4   : > { %v2874_v40 = vadd.f32 %v2873_v27, %v5126_v60  ;;  %v2875_v49 = vpop.f32.mrb[45].mxu0 }
0x13a5   : > { %v2876_v39 = vadd.f32 %v2875_v49, %v5128_v61  ;;  %v2877_v35 = vpop.f32.mrb[46].mxu0 }
0x13a6   : > { %v2878_v42 = vadd.f32 %v2877_v35, %v5130_v4  ;;  %v2879_v19 = vpop.f32.mrb[47].mxu0 }
0x13a7   : > { %v2882_v5 = vmax.f32 %v2874_v40, %v2876_v39  ;;  %v2880_v47 = vadd.f32 %v2879_v19, %v5133_v9 }
0x13a9   : > { %v2885_v55 = vmax.f32 %v2878_v42, %v2880_v47  ;;  %2883 = vmax.xlane.f32.xlu0 %v2882_v5 }
0x13ab   : > { %2886 = vmax.xlane.f32.xlu1 %v2885_v55 }
0x13bc   : > { %2936 = vrot.lane.b32.xlu1 %v4981_v38, %s4587_s16 }
0x13bf   : > { %2920 = vrot.lane.b32.xlu0 %v4941_v48, %s4587_s16 }
0x13c0   : > { %2938 = vrot.lane.b32.xlu1 %v4993_v45, %s4587_s16 }
0x13c3   : > { %2940 = vrot.lane.b32.xlu0 %v5007_v56, %s4587_s16 }
0x13c4   : > { %2922 = vrot.lane.b32.xlu1 %v4947_v54, %s4587_s16 }
0x13c7   : > { %2942 = vrot.lane.b32.xlu0 %v5021_v3, %s4587_s16 }
0x13c8   : > { %2924 = vrot.lane.b32.xlu1 %v4953_v62, %s4587_s16 }
0x13cb   : > { %2944 = vrot.lane.b32.xlu0 %v5035_v13, %s4587_s16 }
0x13cc   : > { %2926 = vrot.lane.b32.xlu1 %v4961_v8, %s4587_s16 }
0x13cf   : > { %2946 = vrot.lane.b32.xlu0 %v5049_v23, %s4587_s16 }
0x13d0   : > { %2928 = vrot.lane.b32.xlu1 %v5930_v22, %s4587_s16 }
0x13d4   : > { %2930 = vrot.lane.b32.xlu1 %v4969_v20, %s4587_s16 }
0x13d8   : > { %2932 = vrot.lane.b32.xlu1 %v4973_v26, %s4587_s16 }
0x13dc   : > { %2934 = vrot.lane.b32.xlu1 %v4977_v32, %s4587_s16 }
0x13e0   : > { %3082 = vrot.lane.b32.xlu1 %v4979_v36, %s4588_s15 }
0x13e4   : > { %3084 = vrot.lane.b32.xlu1 %v4991_v43, %s4588_s15 }
0x13e8   : > { %3086 = vrot.lane.b32.xlu1 %v5005_v53, %s4588_s15 }
0x13ec   : > { %3088 = vrot.lane.b32.xlu1 %v5019_v63, %s4588_s15 }
0x13f0   : > { %3090 = vrot.lane.b32.xlu1 %v5033_v10, %s4588_s15 }
0x13f4   : > { %3092 = vrot.lane.b32.xlu1 %v5047_v21, %s4588_s15 }
0x13f8   : > { %3094 = vrot.lane.b32.xlu1 %v5059_v31, %s4588_s15 }
0x13fc   : > { %3096 = vrot.lane.b32.xlu1 %v5069_v41, %s4588_s15 }
0x1436   : > { %v2884_v36 = vpop.xlane.xlu0 %2883 }
0x1437   : > { %v2888_v43 = vsub.f32 %v2874_v40, %v2884_v36  ;;  %v2889_v1 = vsub.f32 %v2876_v39, %v2884_v36 }
0x1438   : > { %v2887_v16 = vpop.xlane.xlu1 %2886 }
0x1439   : > { %v2892_v53 = vmul.f32 1.442695, %v2888_v43  ;;  %v2894_v2 = vmul.f32 1.442695, %v2889_v1  ;;  %v2890_v57 = vsub.f32 %v2878_v42, %v2887_v16  ;;  %v2891_v63 = vsub.f32 %v2880_v47, %v2887_v16 }
0x143a   : > { %v2921_v50 = vpop.permute.xlu0 %2920 }
0x143b   : > { %4321 = vpow2.f32 %v2892_v53  ;;  %v2896_v10 = vmul.f32 1.442695, %v2890_v57  ;;  %v2898_v17 = vmul.f32 1.442695, %v2891_v63  ;;  %v4247_v63 = vld [vmem:[#allocation10 + $0x30] sm:$0xff]  }
0x143c   : > { %4323 = vpow2.f32 %v2894_v2  ;;  %v2937_v21 = vpop.permute.xlu1 %2936 }
0x143d   : > { %4325 = vpow2.f32 %v2896_v10  ;;  %3895 = vmatprep.subr.bf16.mxu1 %v2937_v21 }
0x143e   : > { %4327 = vpow2.f32 %v2898_v17  ;;  %3896 = vmatpush3.bf16.msra.mxu1 %v2921_v50  ;;  %v2941_v31 = vpop.permute.xlu0 %2940 }
0x1440   : > { %v2939_v41 = vpop.permute.xlu1 %2938 }
0x1441   : > { %3897 = vmatprep.subr.bf16.mxu1 %v2939_v41 }
0x1442   : > { %v2943_v15 = vpop.permute.xlu0 %2942 }
0x1444   : > { %v2923_v37 = vpop.permute.xlu1 %2922 }
0x1445   : > { %v4322_v29 = vpop.eup %4321  ;;  %3898 = vmatpush3.bf16.msra.mxu1 %v2923_v37 }
0x1446   : > { %v4324_v24 = vpop.eup %4323  ;;  %3899 = vmatprep.subr.bf16.mxu1 %v2941_v31  ;;  %v2945_v27 = vpop.permute.xlu0 %2944 }
0x1447   : > { %v4326_v28 = vpop.eup %4325  ;;  %v2900_v7 = vadd.f32 %v4324_v24, %v4322_v29 }
0x1448   : > { %v4328_v25 = vpop.eup %4327  ;;  %v2925_v51 = vpop.permute.xlu1 %2924 }
0x1449   : > { %2901 = vadd.xlane.f32.xlu0 %v2900_v7  ;;  %3900 = vmatpush3.bf16.msra.mxu1 %v2925_v51  ;;  %v2903_v40 = vadd.f32 %v4328_v25, %v4326_v28 }
0x144a   : > { %3901 = vmatprep.subr.bf16.mxu1 %v2943_v15  ;;  %v2947_v35 = vpop.permute.xlu0 %2946 }
0x144c   : > { %v2927_v49 = vpop.permute.xlu1 %2926 }
0x144d   : > { %2904 = vadd.xlane.f32.xlu0 %v2903_v40  ;;  %3902 = vmatpush3.bf16.msra.mxu1 %v2927_v49 }
0x144e   : > { %3903 = vmatprep.subr.bf16.mxu1 %v2945_v27 }
0x1450   : > { %v2929_v39 = vpop.permute.xlu1 %2928 }
0x1451   : > { %3904 = vmatpush3.bf16.msra.mxu1 %v2929_v39 }
0x1452   : > { %3905 = vmatprep.subr.bf16.mxu1 %v2947_v35 }
0x1454   : > { %v2931_v42 = vpop.permute.xlu1 %2930 }
0x1455   : > { %3906 = vmatpush3.bf16.msra.mxu1 %v2931_v42 }
0x1463   : > { %2948 = vrot.lane.b32.xlu0 %v5931_v34, %s4587_s16 }
0x1467   : > { %2950 = vrot.lane.b32.xlu0 %v5071_v44, %s4587_s16 }
0x146b   : > { %3066 = vrot.lane.b32.xlu0 %v4939_v46, %s4588_s15 }
0x146f   : > { %3068 = vrot.lane.b32.xlu0 %v4945_v52, %s4588_s15 }
0x1473   : > { %3070 = vrot.lane.b32.xlu0 %v4951_v59, %s4588_s15  ;;  %v2933_v59 = vpop.permute.xlu1 %2932 }
0x1477   : > { %3072 = vrot.lane.b32.xlu0 %v4959_v6, %s4588_s15  ;;  %v2935_v5 = vpop.permute.xlu1 %2934 }
0x147b   : > { %3074 = vrot.lane.b32.xlu0 %v4963_v12, %s4588_s15  ;;  %v3083_v50 = vpop.permute.xlu1 %3082 }
0x147f   : > { %3076 = vrot.lane.b32.xlu0 %v4967_v18, %s4588_s15  ;;  %v3085_v35 = vpop.permute.xlu1 %3084 }
0x1483   : > { %3078 = vrot.lane.b32.xlu0 %v5932_v14, %s4588_s15 }
0x1487   : > { %3080 = vrot.lane.b32.xlu0 %v4975_v30, %s4588_s15 }
0x148b   : > { %3064 = vrot.lane.b32.xlu0 %v4955_v0, %s4588_s15 }
0x14d6   : > { %v2902_v46 = vpop.xlane.xlu0 %2901 }
0x14d7   : > { %4329 = vrcp.f32 %v2902_v46 }
0x14da   : > { %v2905_v52 = vpop.xlane.xlu0 %2904 }
0x14db   : > { %4331 = vrcp.f32 %v2905_v52 }
0x14de   : > { %v2949_v6 = vpop.permute.xlu0 %2948 }
0x14df   : > { %3907 = vmatprep.subr.bf16.mxu1 %v2949_v6 }
0x14e0   : > { %3908 = vmatpush3.bf16.msra.mxu1 %v2933_v59 }
0x14e1   : > { %v4330_v12 = vpop.eup %4329 }
0x14e2   : > { %v2908_v19 = vmul.f32 %v4330_v12, %v2902_v46  ;;  %v2951_v18 = vpop.permute.xlu0 %2950  ;;  %v3087_v46 = vpop.permute.xlu1 %3086 }
0x14e3   : > { %3909 = vmatprep.subr.bf16.mxu1 %v2951_v18 }
0x14e4   : > { %v2910_v14 = vsub.f32 2.0, %v2908_v19  ;;  %3910 = vmatpush3.bf16.msra.mxu1 %v2935_v5 }
0x14e5   : > { %v4332_v47 = vpop.eup %4331  ;;  %4017 = vmatprep.subr.bf16.mxu1 %v5929_v58 }
0x14e6   : > { %v2909_v30 = vmul.f32 %v4332_v47, %v2905_v52  ;;  %v2912_v0 = vmul.f32 %v4330_v12, %v2910_v14  ;;  %v3067_v10 = vpop.permute.xlu0 %3066  ;;  %v3089_v59 = vpop.permute.xlu1 %3088 }
0x14e7   : > { %v3102_v49 = vsel %vm946_vm1, %v3067_v10, 0 }
0x14e8   : > { %v2911_v55 = vsub.f32 2.0, %v2909_v30  ;;  %v2914_v43 = vmul.f32 %v4322_v29, %v2912_v0  ;;  %v2915_v16 = vmul.f32 %v4324_v24, %v2912_v0 }
0x14ea   : > { %v2913_v36 = vmul.f32 %v4332_v47, %v2911_v55  ;;  %v3069_v17 = vpop.permute.xlu0 %3068  ;;  %v3091_v12 = vpop.permute.xlu1 %3090 }
0x14eb   : > { %v3105_v42 = vsel %vm946_vm1, %v3069_v17, 0 }
0x14ec   : > { %v2916_v1 = vmul.f32 %v4326_v28, %v2913_v36  ;;  %v2917_v53 = vmul.f32 %v4328_v25, %v2913_v36 }
0x14ee   : > { %v2919_v2 = vpack.c.bf16 %v2917_v53, %v2915_v16  ;;  %v2918_v57 = vpack.c.bf16 %v2916_v1, %v2914_v43  ;;  %v3071_v21 = vpop.permute.xlu0 %3070  ;;  %v3093_v18 = vpop.permute.xlu1 %3092 }
0x14ef   : > { %v3108_v52 = vsel %vm946_vm1, %v3071_v21, 0 }
0x14f0   : > { %3000 = vmatprep.mubr.bf16.mxu1 %v2919_v2 }
0x14f1   : > { %3001 = vmatmul.mubr.bf16.vlgmr.msra.gmra.mrb[96].mxu1 %v2918_v57 }
0x14f2   : > { %4018 = vmatpush3.bf16.msra.mxu1 %v4247_v63  ;;  %4019 = vmatprep.mubr.msk.bf16.mxu1 %vm4580_vm0, %v5929_v58  ;;  %v3073_v31 = vpop.permute.xlu0 %3072  ;;  %v3095_v14 = vpop.permute.xlu1 %3094 }
0x14f3   : > { %4085 = vmatprep.subr.msk.bf16.mxu1 %vm946_vm1, %v3083_v50  ;;  %v3111_v6 = vsel %vm946_vm1, %v3073_v31, 0 }
0x14f6   : > { %v3075_v41 = vpop.permute.xlu0 %3074  ;;  %v3097_v30 = vpop.permute.xlu1 %3096 }
0x14f7   : > { %v3114_v19 = vsel %vm946_vm1, %v3075_v41, 0 }
0x14fa   : > { %v3077_v37 = vpop.permute.xlu0 %3076 }
0x14fb   : > { %v3117_v5 = vsel %vm946_vm1, %v3077_v37, 0 }
0x14fe   : > { %v3079_v29 = vpop.permute.xlu0 %3078 }
0x14ff   : > { %v3120_v47 = vsel %vm946_vm1, %v3079_v29, 0 }
0x1502   : > { %v3081_v28 = vpop.permute.xlu0 %3080 }
0x1503   : > { %v3123_v0 = vsel %vm946_vm1, %v3081_v28, 0 }
0x1506   : > { %v3065_v39 = vpop.permute.xlu0 %3064 }
0x15c4   : > { %v3911_v15 = vpop.f32.mrb[96].mxu1 }
0x15c5   : > { %v3912_v24 = vpop.f32.mrb[97].mxu1 }
0x15c6   : > { %v3913_v7 = vadd.f32 %v3912_v24, %v3911_v15  ;;  %v3914_v25 = vpop.f32.mrb[98].mxu1 }
0x15c7   : > { %v3915_v51 = vpop.f32.mrb[99].mxu1 }
0x15c8   : > { %v3916_v27 = vadd.f32 %v3915_v51, %v3914_v25 }
0x15ca   : > { %v3009_v40 = vpack.c.bf16 %v3916_v27, %v3913_v7 }
0x15cc   : > { %4020 = vmatmul.mubr.msk.bf16.vlgmr.msra.gmra.mrb[100].mxu1 %vm946_vm1, %v3009_v40 }
0x15cd   : > { %3920 = vmatpush3.bf16.xpose.msra.mxu1 %v3102_v49  ;;  %3935 = vmatprep.mubr.msk.bf16.mxu1 %vm946_vm1, %v3065_v39 }
0x15ce   : > { %4086 = vmatprep.subr.msk.bf16.mxu1 %vm946_vm1, %v3085_v35 }
0x15d5   : > { %3922 = vmatpush3.bf16.xpose.msra.mxu1 %v3105_v42 }
0x15d6   : > { %4087 = vmatprep.subr.msk.bf16.mxu1 %vm946_vm1, %v3087_v46 }
0x15dd   : > { %3924 = vmatpush3.bf16.xpose.msra.mxu1 %v3108_v52 }
0x15de   : > { %4088 = vmatprep.subr.msk.bf16.mxu1 %vm946_vm1, %v3089_v59 }
0x15e5   : > { %3926 = vmatpush3.bf16.xpose.msra.mxu1 %v3111_v6 }
0x15e6   : > { %4089 = vmatprep.subr.msk.bf16.mxu1 %vm946_vm1, %v3091_v12 }
0x15ed   : > { %3928 = vmatpush3.bf16.xpose.msra.mxu1 %v3114_v19 }
0x15ee   : > { %4090 = vmatprep.subr.msk.bf16.mxu1 %vm946_vm1, %v3093_v18 }
0x15f5   : > { %3930 = vmatpush3.bf16.xpose.msra.mxu1 %v3117_v5 }
0x15f6   : > { %4091 = vmatprep.subr.msk.bf16.mxu1 %vm946_vm1, %v3095_v14 }
0x15fd   : > { %3932 = vmatpush3.bf16.xpose.msra.mxu1 %v3120_v47 }
0x15fe   : > { %4092 = vmatprep.subr.msk.bf16.mxu1 %vm946_vm1, %v3097_v30 }
0x1605   : > { %3934 = vmatpush3.bf16.xpose.msra.mxu1 %v3123_v0 }
0x160c   : > { %3936 = vmatmul.mubr.msk.bf16.vlgmr.msra.gmra.mrb[104].mxu1 %vm946_vm1, %v3065_v39 }
0x169f   : > { %v3055_v55 = vpop.f32.mrb[100].mxu1 }
0x16a0   : > { %v5778_v36 = vadd.f32 %v3055_v55, %v5680_v33  ;;  %v4021_v43 = vpop.f32.mrb[101].mxu1 }
0x16a1   : > { %v3058_v1 = vpop.f32.mrb[102].mxu1  ;;  %v4248_v43 = vld [vmem:[#allocation10 + $0x38] sm:$0xff]  }
0x16a2   : > { %v5781_v16 = vadd.f32 %v3058_v1, %v5683_v11  ;;  %v4022_v53 = vpop.f32.mrb[103].mxu1 }
0x16df   : > { %v3183_v2 = vpop.f32.mrb[104].mxu1 }
0x16e0   : > { %v3184_v57 = vadd.f32 %v3183_v2, %v5126_v60  ;;  %v3185_v63 = vpop.f32.mrb[105].mxu1 }
0x16e1   : > { %v3186_v50 = vadd.f32 %v3185_v63, %v5128_v61  ;;  %v3187_v10 = vpop.f32.mrb[106].mxu1 }
0x16e2   : > { %v3188_v17 = vadd.f32 %v3187_v10, %v5130_v4  ;;  %v3189_v21 = vpop.f32.mrb[107].mxu1 }
0x16e3   : > { %v3192_v31 = vmax.f32 %v3184_v57, %v3186_v50  ;;  %v3190_v33 = vadd.f32 %v3189_v21, %v5133_v9  ;;  %v3607_v21 = vld [vmem:[%s5884_s5] ss:$0 sm:$0xff] }
0x16e5   : > { %v3195_v41 = vmax.f32 %v3188_v17, %v3190_v33  ;;  %3193 = vmax.xlane.f32.xlu1 %v3192_v31 }
0x16e7   : > { %3196 = vmax.xlane.f32.xlu0 %v3195_v41 }
0x16f6   : > { %3230 = vrot.lane.b32.xlu1 %v4941_v48, %s4588_s15 }
0x16fa   : > { %3248 = vrot.lane.b32.xlu1 %v4993_v45, %s4588_s15 }
0x16fd   : > { %3246 = vrot.lane.b32.xlu0 %v4981_v38, %s4588_s15 }
0x16fe   : > { %3250 = vrot.lane.b32.xlu1 %v5007_v56, %s4588_s15 }
0x1701   : > { %3232 = vrot.lane.b32.xlu0 %v4947_v54, %s4588_s15 }
0x1702   : > { %3252 = vrot.lane.b32.xlu1 %v5021_v3, %s4588_s15 }
0x1705   : > { %3234 = vrot.lane.b32.xlu0 %v4953_v62, %s4588_s15 }
0x1706   : > { %3254 = vrot.lane.b32.xlu1 %v5035_v13, %s4588_s15 }
0x1709   : > { %3236 = vrot.lane.b32.xlu0 %v4961_v8, %s4588_s15 }
0x170a   : > { %3256 = vrot.lane.b32.xlu1 %v5049_v23, %s4588_s15 }
0x170d   : > { %3238 = vrot.lane.b32.xlu0 %v5930_v22, %s4588_s15 }
0x170e   : > { %3258 = vrot.lane.b32.xlu1 %v5931_v34, %s4588_s15 }
0x1711   : > { %3240 = vrot.lane.b32.xlu0 %v4969_v20, %s4588_s15 }
0x1772   : > { %v3194_v48 = vpop.xlane.xlu1 %3193 }
0x1773   : > { %v3198_v54 = vsub.f32 %v3184_v57, %v3194_v48  ;;  %v3199_v62 = vsub.f32 %v3186_v50, %v3194_v48 }
0x1774   : > { %v3197_v38 = vpop.xlane.xlu0 %3196 }
0x1775   : > { %v3202_v45 = vmul.f32 1.442695, %v3198_v54  ;;  %v3204_v56 = vmul.f32 1.442695, %v3199_v62  ;;  %v3200_v3 = vsub.f32 %v3188_v17, %v3197_v38  ;;  %v3201_v8 = vsub.f32 %v3190_v33, %v3197_v38 }
0x1776   : > { %v3231_v13 = vpop.permute.xlu1 %3230 }
0x1777   : > { %4333 = vpow2.f32 %v3202_v45  ;;  %v3206_v23 = vmul.f32 1.442695, %v3200_v3  ;;  %v3208_v60 = vmul.f32 1.442695, %v3201_v8 }
0x1778   : > { %4335 = vpow2.f32 %v3204_v56  ;;  %v3247_v61 = vpop.permute.xlu0 %3246 }
0x1779   : > { %4337 = vpow2.f32 %v3206_v23  ;;  %3937 = vmatprep.subr.bf16.mxu0 %v3247_v61 }
0x177a   : > { %4339 = vpow2.f32 %v3208_v60  ;;  %3938 = vmatpush3.bf16.msra.mxu0 %v3231_v13  ;;  %v3249_v4 = vpop.permute.xlu1 %3248 }
0x177b   : > { %3939 = vmatprep.subr.bf16.mxu0 %v3249_v4 }
0x177c   : > { %v3233_v20 = vpop.permute.xlu0 %3232 }
0x177e   : > { %3940 = vmatpush3.bf16.msra.mxu0 %v3233_v20  ;;  %v3251_v9 = vpop.permute.xlu1 %3250 }
0x177f   : > { %3941 = vmatprep.subr.bf16.mxu0 %v3251_v9 }
0x1780   : > { %v3235_v22 = vpop.permute.xlu0 %3234 }
0x1781   : > { %v4334_v34 = vpop.eup %4333 }
0x1782   : > { %v4336_v11 = vpop.eup %4335  ;;  %3942 = vmatpush3.bf16.msra.mxu0 %v3235_v22  ;;  %v3253_v37 = vpop.permute.xlu1 %3252 }
0x1783   : > { %v4338_v29 = vpop.eup %4337  ;;  %3943 = vmatprep.subr.bf16.mxu0 %v3253_v37  ;;  %v3210_v15 = vadd.f32 %v4336_v11, %v4334_v34 }
0x1784   : > { %v4340_v24 = vpop.eup %4339  ;;  %v3237_v28 = vpop.permute.xlu0 %3236 }
0x1785   : > { %3211 = vadd.xlane.f32.xlu0 %v3210_v15  ;;  %v3213_v7 = vadd.f32 %v4340_v24, %v4338_v29 }
0x1786   : > { %3944 = vmatpush3.bf16.msra.mxu0 %v3237_v28  ;;  %v3255_v25 = vpop.permute.xlu1 %3254 }
0x1787   : > { %3214 = vadd.xlane.f32.xlu1 %v3213_v7  ;;  %3945 = vmatprep.subr.bf16.mxu0 %v3255_v25 }
0x1788   : > { %v3239_v51 = vpop.permute.xlu0 %3238 }
0x178a   : > { %3946 = vmatpush3.bf16.msra.mxu0 %v3239_v51  ;;  %v3257_v27 = vpop.permute.xlu1 %3256 }
0x178b   : > { %3947 = vmatprep.subr.bf16.mxu0 %v3257_v27 }
0x178c   : > { %v3241_v40 = vpop.permute.xlu0 %3240 }
0x178e   : > { %3948 = vmatpush3.bf16.msra.mxu0 %v3241_v40  ;;  %v3259_v49 = vpop.permute.xlu1 %3258 }
0x178f   : > { %3949 = vmatprep.subr.bf16.mxu0 %v3259_v49 }
0x1798   : > { %3260 = vrot.lane.b32.xlu1 %v5071_v44, %s4588_s15 }
0x179b   : > { %3242 = vrot.lane.b32.xlu0 %v4973_v26, %s4588_s15 }
0x179f   : > { %3244 = vrot.lane.b32.xlu0 %v4977_v32, %s4588_s15 }
0x1812   : > { %v3212_v39 = vpop.xlane.xlu0 %3211 }
0x1813   : > { %4341 = vrcp.f32 %v3212_v39 }
0x1814   : > { %v3215_v35 = vpop.xlane.xlu1 %3214 }
0x1815   : > { %4343 = vrcp.f32 %v3215_v35 }
0x1816   : > { %v3243_v42 = vpop.permute.xlu0 %3242 }
0x1817   : > { %3950 = vmatpush3.bf16.msra.mxu0 %v3243_v42 }
0x1818   : > { %v3261_v46 = vpop.permute.xlu1 %3260 }
0x1819   : > { %3951 = vmatprep.subr.bf16.mxu0 %v3261_v46 }
0x181a   : > { %v3245_v52 = vpop.permute.xlu0 %3244 }
0x181b   : > { %3952 = vmatpush3.bf16.msra.mxu0 %v3245_v52 }
0x181c   : > { %4023 = vmatprep.subr.bf16.mxu0 %v5929_v58 }
0x181d   : > { %v4342_v59 = vpop.eup %4341 }
0x181e   : > { %v3218_v44 = vmul.f32 %v4342_v59, %v3212_v39 }
0x181f   : > { %v4344_v6 = vpop.eup %4343 }
0x1820   : > { %v3220_v12 = vsub.f32 2.0, %v3218_v44  ;;  %v3219_v26 = vmul.f32 %v4344_v6, %v3215_v35 }
0x1822   : > { %v3222_v19 = vmul.f32 %v4342_v59, %v3220_v12  ;;  %v3221_v18 = vsub.f32 2.0, %v3219_v26 }
0x1824   : > { %v3223_v32 = vmul.f32 %v4344_v6, %v3221_v18  ;;  %v3224_v5 = vmul.f32 %v4334_v34, %v3222_v19  ;;  %v3225_v47 = vmul.f32 %v4336_v11, %v3222_v19 }
0x1826   : > { %v3226_v14 = vmul.f32 %v4338_v29, %v3223_v32  ;;  %v3227_v30 = vmul.f32 %v4340_v24, %v3223_v32 }
0x1828   : > { %v3229_v0 = vpack.c.bf16 %v3227_v30, %v3225_v47  ;;  %v3228_v55 = vpack.c.bf16 %v3226_v14, %v3224_v5 }
0x182a   : > { %3310 = vmatprep.mubr.bf16.mxu0 %v3229_v0 }
0x182b   : > { %3311 = vmatmul.mubr.bf16.vlgmr.msra.gmra.mrb[48].mxu0 %v3228_v55 }
0x182c   : > { %4025 = vmatprep.mubr.msk.bf16.mxu0 %vm4580_vm0, %v5929_v58  ;;  %4024 = vmatpush3.bf16.msra.mxu0 %v4248_v43 }
0x18fe   : > { %v3953_v1 = vpop.f32.mrb[48].mxu0 }
0x18ff   : > { %v3954_v53 = vpop.f32.mrb[49].mxu0 }
0x1900   : > { %v3955_v2 = vadd.f32 %v3954_v53, %v3953_v1  ;;  %v3956_v57 = vpop.f32.mrb[50].mxu0 }
0x1901   : > { %v3957_v63 = vpop.f32.mrb[51].mxu0 }
0x1902   : > { %v3958_v50 = vadd.f32 %v3957_v63, %v3956_v57 }
0x1904   : > { %v3319_v10 = vpack.c.bf16 %v3958_v50, %v3955_v2 }
0x1906   : > { %4026 = vmatmul.mubr.msk.bf16.vlgmr.msra.gmra.mrb[52].mxu0 %vm946_vm1, %v3319_v10 }
0x19d9   : > { %v3365_v17 = vpop.f32.mrb[52].mxu0 }
0x19da   : > { %v3372_v58 = vadd.f32 %v3365_v17, %v5778_v36  ;;  %v4027_v31 = vpop.f32.mrb[53].mxu0 }
0x19db   : > { %v3368_v33 = vpop.f32.mrb[54].mxu0 }
0x19dc   : > { %v3381_v41 = vadd.f32 %v3607_v21, %v3372_v58  ;;  %v3373_v48 = vadd.f32 %v3368_v33, %v5781_v16  ;;  %v4028_v54 = vpop.f32.mrb[55].mxu0 }
0x19de   : > { %3383 = vst [vmem:[%s352_s7] sm:$0xff] %v3381_v41  ;;  %v3382_v62 = vadd.f32 %v3607_v21, %v3373_v48 }
0x19e0   : > { %3384 = vst [vmem:[%s352_s7 + $0x8] sm:$0xff] %v3382_v62 }
0x19e1   : > { %4502 = shalt.err (!%p4499_p3)
}
0x19e2   : > { %s4503_s12 = scalar_lea.hbm %s5835_s29, 256  ;;  %s4507_s16 = scalar_lea.hbm %s5885_s6, 512 }
0x19e3   : > { %p4504_p9 = scmp.ne.s32.totalorder %s5835_s29, %s4503_s12  ;;  %p4508_p7 = scmp.lt.u32.totalorder %s5835_s29, %s5885_s6 }
0x19e4   : > { %p4509_p12 = scmp.lt.u32.totalorder %s4507_s16, %s4503_s12  ;;  %p4511_p2 = scmp.lt.u32.totalorder %s4503_s12, %s5835_s29 }
0x19e5   : > { %p4505_p13 = pnand %p4504_p9, %p4775_p5 }
0x19e6   : > { %p4510_p1 = por %p4509_p12, %p4508_p7 }
0x19e7   : > { %p4506_p11 = pneg %p4505_p13 }
0x19e8   : > { %p4512_p4 = por %p4511_p2, %p4510_p1 }
0x19ea   : > { %p4513_p0 = pnand %p4512_p4, %p4506_p11 }
0x19ec   : > { %4516 = shalt.err (!%p4513_p0)
}
0x19ed   : > { %s4590_s8 = smov 128   ;;  %s4591_s26 = smov 8  }
0x19ee   : > { %4109 = dma.vmem_to_hbm [thread:$0]  (%p4775_p5), %s5829_s13, 256, %s5835_s29, %s3386_s20, %s4590_s8, %s4590_s8, %s4591_s26  }
0x19ef PF: > { %s3414_s7 = sand.u32 1, %s4555_s21   ;;  %p5933_p8 = scmp.ne.s32.totalorder %s5906_s28, 0 }
0x19f0   : > { %p5934_p6 = scmp.ge.s32.totalorder %s4567_s24, 2  ;;  %s3415_s11 = scalar_lea.sflag [#allocation4], %s3414_s7 }
0x19f2   : > { %p4129_p10 = pnand %p5934_p6, %p5933_p8 }
0x19f4   : > { %4550 = dma.done.wait (!%p4129_p10), %s3415_s11, 256  }
0x19f5   : > { %4552 = vsyncadd (!%p4129_p10), %s3415_s11, 4294967040  ;;  %p23_p3 = scmp.ge.s32.totalorder %s4740_s14, 4   ;;  %s5935_s21 = smov %s4559_s22 }
0x19f6   : > { %s5936_s22 = smov %s4563_s23  ;;  %s5937_s23 = smov %s4771_s30 }
0x19f7   : > { %s5938_s24 = smov %s4740_s14  ;;  %25 = sbr.rel (!%p23_p3) target bundleno = 13 (0xd), region = 114 }
0x19fe   :  { %3420 = vsyncpa [#allocation3], 1 }
0x19ff   :  { %3422 = vsyncpa [#allocation3 + $0x1], 1 }
0x1a00   :  { %3423 = vsyncpa [#allocation6], 1 }
0x1a01   :  { %3425 = vsyncpa [#allocation6 + $0x1], 1 }
0x1a02   :  { %3426 = vsyncpa [#allocation9], 1 }
0x1a03   :  { %3427 = vsyncpa [#allocation4], 1 }
0x1a04   :  { %3429 = vsyncpa [#allocation4 + $0x1], 1 }

// kernel: tpu_custom_call.1
= control target key start
LH: loop header
LB: loop body
LE: loop exit
PB: predicated region body
PF: predicated region fallthrough
CT: control target
= control target key end

     0   :  { %s5879_s0 = inlined_call_operand.hbm [shape: bf16[32,128], index: 0, kind: input, shape index: {}]   ;;  %s5880_s1 = inlined_call_operand.hbm [shape: bf16[512,128], index: 1, kind: input, shape index: {}]   ;;  %s5881_s2 = inlined_call_operand.hbm [shape: bf16[128,128], index: 2, kind: input, shape index: {}]   ;;  %s5882_s3 = inlined_call_operand.hbm [shape: bf16[128,256], index: 3, kind: input, shape index: {}]   ;;  %s5883_s4 = inlined_call_operand.hbm [shape: bf16[128,128], index: 4, kind: input, shape index: {}]   ;;  %s5884_s5 = inlined_call_operand.vmem [shape: f32[1,128], index: 5, kind: input, shape index: {}]   ;;  %s5885_s6 = inlined_call_operand.hbm [shape: f32[32,128], index: 6, kind: output, shape index: {}]  }
   0x1   :  { %5901 = sst [smem:[#allocation20_spill]] %s5879_s0 }
   0x2   :  { %5902 = sst [smem:[#allocation21_spill]] %s5881_s2 }
   0x3   :  { %5903 = sst [smem:[#allocation22_spill]] %s5882_s3 }
   0x4   :  { %5904 = sst [smem:[#allocation23_spill]] %s5883_s4 }
   0x5   :  { %11 = vsyncpa [#allocation3], 0 }
   0x6   :  { %13 = vsyncpa [#allocation3 + $0x1], 0 }
   0x7   :  { %14 = vsyncpa [#allocation6], 0 }
   0x8   :  { %16 = vsyncpa [#allocation6 + $0x1], 0 }
   0x9   :  { %17 = vsyncpa [#allocation9], 0 }
   0xa   :  { %18 = vsyncpa [#allocation4], 0 }
   0xb   :  { %20 = vsyncpa [#allocation4 + $0x1], 0  ;;  %s4627_s21 = smov 0   ;;  %s4629_s22 = smov 0  }
   0xc   :  { %s4631_s23 = smov 0   ;;  %s4633_s24 = smov 0  }
   0xd LB: > { %s4648_s25 = sadd.s32 4294967295, %s4567_s24   ;;  %s3523_s26 = sadd.s32 4294967294, %s4567_s24   ;;  %s4567_s24 = sphi %s4633_s24, %s5938_s24   ;;  %s4563_s23 = sphi %s4631_s23, %s5937_s23   ;;  %s4559_s22 = sphi %s4629_s22, %s5936_s22   ;;  %s4555_s21 = sphi %s4627_s21, %s5935_s21  }
   0xe   : > { %p46_p0 = scmp.ne.s32.totalorder %s4559_s22, %s4555_s21  ;;  %p5886_p1 = scmp.eq.s32.totalorder %s4648_s25, 0 }
   0xf   : > { %p186_p3 = scmp.eq.s32.totalorder %s3523_s26, 1  ;;  %p3524_p5 = scmp.ge.s32.totalorder %s4567_s24, 1 }
  0x10   : > { %p4657_p4 = por %p5886_p1, %p46_p0  ;;  %p193_p7 = scmp.lt.s32.totalorder %s4567_s24, 3 }
  0x11   : > { %p4662_p6 = por %p186_p3, %p46_p0  ;;  %s4569_s30 = smov [#allocation7]  }
  0x12   : > { %s5905_s27 = scalar_select %p4657_p4, 1, 0 }
  0x13   : > { %s5906_s28 = scalar_select %p4662_p6, 1, 0 }
  0x14   : > { %p4667_p8 = pnand %p3524_p5, %p193_p7  ;;  %s205_s7 = sshll.u32 %s4569_s30, 4  ;;  %s4671_s7 = int_to_ptr.vmem [resolvable:$true] %s205_s7 }
  0x15   : > { %s4570_s9 = smov [#allocation8]   ;;  %s5909_s2 = sld [smem:[#allocation21_spill]] }
  0x16   : > { %s5907_s29 = scalar_select %p4667_p8, 1, 0 }
  0x17   : > { %p4111_p9 = pneg %p4667_p8  ;;  %s218_s10 = sshll.u32 %s4570_s9, 4  ;;  %s4682_s10 = int_to_ptr.vmem [resolvable:$true] %s218_s10 }
  0x19   : > { %p4678_p11 = pnand %p4111_p9, %p5886_p1 }
  0x1b   : > { %s4345_s13 = scalar_lea.hbm %s5909_s2, 1024  ;;  %p4692_p13 = pneg %p4678_p11 }
  0x1c   : > { %p4346_p12 = scmp.ne.s32.totalorder %s5909_s2, %s4345_s13  ;;  %p4352_p5 = scmp.lt.u32.totalorder %s4345_s13, %s5909_s2 }
  0x1e   : > { %p4348_p0 = pnand %p4692_p13, %p4346_p12 }
  0x20   : > { %p4349_p3 = pneg %p4348_p0 }
  0x22   : > { %p4354_p7 = pnand %p4352_p5, %p4349_p3 }
  0x24   : > { %4357 = shalt.err (!%p4354_p7)
}
  0x25   : > { %s4358_s19 = scalar_lea.vmem %s4671_s7, 1024  ;;  %p4366_p2 = scmp.lt.s32.totalorder %s4671_s7, %s4671_s7 }
  0x26   : > { %p4359_p9 = scmp.ne.s32.totalorder %s4671_s7, %s4358_s19  ;;  %p4367_p6 = scmp.lt.s32.totalorder %s4358_s19, %s4358_s19 }
  0x28   : > { %p4361_p10 = pnand %p4359_p9, %p4692_p13  ;;  %p4368_p12 = por %p4367_p6, %p4366_p2 }
  0x2a   : > { %p4362_p1 = pneg %p4361_p10 }
  0x2c   : > { %p4369_p0 = pnand %p4368_p12, %p4362_p1 }
  0x2e   : > { %4372 = shalt.err (!%p4369_p0)
}
  0x2f   : > { %s5887_s20 = smov 64   ;;  %s5889_s26 = smov 4  }
  0x30   : > { %4114 = dma.hbm_to_vmem [thread:$0]  (!%p4678_p11), %s5909_s2, 1024, %s4671_s7, [#allocation6], %s5887_s20, %s5887_s20, %s5889_s26  }
  0x31   : > { %s5911_s3 = sld [smem:[#allocation22_spill]] }
  0x37   : > { %s4373_s13 = scalar_lea.hbm %s5911_s3, 2048 }
  0x38   : > { %p4374_p1 = scmp.ne.s32.totalorder %s5911_s3, %s4373_s13  ;;  %p4380_p10 = scmp.lt.u32.totalorder %s4373_s13, %s5911_s3 }
  0x3a   : > { %p4376_p2 = pnand %p4374_p1, %p4692_p13 }
  0x3c   : > { %p4377_p6 = pneg %p4376_p2 }
  0x3e   : > { %p4382_p3 = pnand %p4380_p10, %p4377_p6 }
  0x40   : > { %4385 = shalt.err (!%p4382_p3)
}
  0x41   : > { %s4386_s7 = scalar_lea.vmem %s4682_s10, 2048  ;;  %p4394_p12 = scmp.lt.s32.totalorder %s4682_s10, %s4682_s10 }
  0x42   : > { %p4387_p5 = scmp.ne.s32.totalorder %s4682_s10, %s4386_s7  ;;  %p4395_p0 = scmp.lt.s32.totalorder %s4386_s7, %s4386_s7 }
  0x44   : > { %p4389_p7 = pnand %p4387_p5, %p4692_p13  ;;  %p4396_p1 = por %p4395_p0, %p4394_p12 }
  0x46   : > { %p4390_p9 = pneg %p4389_p7 }
  0x48   : > { %p4397_p2 = pnand %p4396_p1, %p4390_p9 }
  0x4a   : > { %4400 = shalt.err (!%p4397_p2)
}
  0x4b   : > { %s4573_s19 = smov 128   ;;  %s4574_s30 = smov 8  }
  0x4c   : > { %4117 = dma.hbm_to_vmem [thread:$0]  (!%p4678_p11), %s5911_s3, 2048, %s4682_s10, [#allocation9], %s4573_s19, %s4573_s19, %s4574_s30  }
  0x4d   : > { %s4575_s12 = smov [#allocation10]   ;;  %s4740_s14 = sadd.s32 1, %s4567_s24  }
  0x4e   : > { %s231_s13 = sshll.u32 %s4575_s12, 4  ;;  %s5912_s4 = sld [smem:[#allocation23_spill]]  ;;  %s232_s13 = int_to_ptr.vmem [resolvable:$true] %s231_s13 }
  0x54   : > { %s4401_s18 = scalar_lea.hbm %s5912_s4, 1024 }
  0x55   : > { %p4402_p6 = scmp.ne.s32.totalorder %s5912_s4, %s4401_s18  ;;  %p4408_p5 = scmp.lt.u32.totalorder %s4401_s18, %s5912_s4 }
  0x57   : > { %p4404_p10 = pnand %p4402_p6, %p4692_p13 }
  0x59   : > { %p4405_p3 = pneg %p4404_p10 }
  0x5b   : > { %p4410_p7 = pnand %p4408_p5, %p4405_p3 }
  0x5d   : > { %4413 = shalt.err (!%p4410_p7)
}
  0x5e   : > { %s4414_s10 = scalar_lea.vmem %s232_s13, 1024  ;;  %p4422_p1 = scmp.lt.s32.totalorder %s232_s13, %s232_s13 }
  0x5f   : > { %p4415_p9 = scmp.ne.s32.totalorder %s232_s13, %s4414_s10  ;;  %p4423_p2 = scmp.lt.s32.totalorder %s4414_s10, %s4414_s10 }
  0x61   : > { %p4417_p12 = pnand %p4415_p9, %p4692_p13  ;;  %p4424_p4 = por %p4423_p2, %p4422_p1 }
  0x63   : > { %p4418_p0 = pneg %p4417_p12 }
  0x65   : > { %p4425_p8 = pnand %p4424_p4, %p4418_p0 }
  0x67   : > { %4428 = shalt.err (!%p4425_p8)
}
  0x68   : > { %s5913_s20 = smov 4   ;;  %s5914_s19 = smov 64  }
  0x69   : > { %4120 = dma.hbm_to_vmem [thread:$0]  (!%p4678_p11), %s5912_s4, 1024, %s232_s13, [#allocation9], %s5914_s19, %s5914_s19, %s5913_s20  }
  0x6a   : > { %s30_s16 = ssub.s32 %s4567_s24, %s4740_s14  ;;  %s33_s8 = sadd.s32 1, %s4563_s23 }
  0x6b   : > { %p31_p4 = scmp.eq.s32.totalorder %s30_s16, 0  ;;  %p40_p8 = scmp.ne.s32.totalorder %s4563_s23, %s4559_s22 }
  0x6c   : > { %p41_p13 = scmp.eq.s32.totalorder %s4567_s24, 0  ;;  %p4135_p6 = scmp.lt.s32.totalorder %s4567_s24, 2 }
  0x6d   : > { %s4771_s30 = scalar_select %p31_p4, %s4563_s23, %s33_s8  }
  0x6e   : > { %p42_p10 = por %p41_p13, %p40_p8  ;;  %p5915_p3 = scmp.eq.s32.totalorder %s4648_s25, 1 }
  0x6f   : > { %s4780_s11 = sand.u32 1, %s4563_s23   ;;  %s3613_s12 = sshll.u32 %s4567_s24, 7 }
  0x70   : > { %p4775_p5 = por %p5915_p3, %p40_p8  ;;  %s3529_s13 = sshll.u32 %s4780_s11, 3 }
  0x71   : > { %s5917_s0 = sld [smem:[#allocation20_spill]]  ;;  %s252_s7 = scalar_lea.vmem [#allocation2], %s3529_s13 }
  0x72   : > { %s259_s10 = sshll.u32 %s252_s7, 4  ;;  %p4789_p11 = pnand %p4135_p6, %p42_p10  ;;  %s4793_s10 = int_to_ptr.vmem [resolvable:$true] %s259_s10 }
  0x73   : > { %s249_s16 = scalar_lea.sflag [#allocation3], %s4780_s11 }
  0x74   : > { %p4431_p9 = pneg %p4789_p11 }
  0x77   : > { %s4787_s18 = scalar_lea.hbm %s5917_s0, %s3613_s12  ;;  %s4434_s15 = scalar_lea.hbm %s5917_s0, 256 }
  0x78   : > { %s4429_s8 = scalar_lea.hbm %s4787_s18, 128  ;;  %p4435_p1 = scmp.lt.u32.totalorder %s4787_s18, %s5917_s0 }
  0x79   : > { %p4430_p7 = scmp.ne.s32.totalorder %s4787_s18, %s4429_s8  ;;  %p4436_p2 = scmp.lt.u32.totalorder %s4434_s15, %s4429_s8 }
  0x7a   : > { %p4438_p8 = scmp.lt.u32.totalorder %s4429_s8, %s4787_s18 }
  0x7b   : > { %p4432_p12 = pnand %p4431_p9, %p4430_p7  ;;  %p4437_p4 = por %p4436_p2, %p4435_p1 }
  0x7d   : > { %p4433_p0 = pneg %p4432_p12  ;;  %p4439_p13 = por %p4438_p8, %p4437_p4 }
  0x7f   : > { %p4440_p6 = pnand %p4439_p13, %p4433_p0 }
  0x81   : > { %4443 = shalt.err (!%p4440_p6)
}
  0x82   : > { %s4444_s26 = scalar_lea.vmem %s4793_s10, 128  ;;  %s4576_s12 = smov [#allocation2]  }
  0x83   : > { %p4445_p10 = scmp.ne.s32.totalorder %s4793_s10, %s4444_s26  ;;  %s4449_s13 = sshll.u32 %s4576_s12, 4  ;;  %s4450_s13 = int_to_ptr.vmem [resolvable:$false] %s4449_s13 }
  0x84   : > { %s4451_s17 = scalar_lea.vmem %s4450_s13, 256  ;;  %p4452_p12 = scmp.lt.s32.totalorder %s4793_s10, %s4450_s13 }
  0x85   : > { %p4447_p3 = pnand %p4445_p10, %p4431_p9  ;;  %p4453_p1 = scmp.lt.s32.totalorder %s4451_s17, %s4444_s26 }
  0x87   : > { %p4448_p7 = pneg %p4447_p3  ;;  %p4454_p2 = por %p4453_p1, %p4452_p12 }
  0x89   : > { %p4455_p4 = pnand %p4454_p2, %p4448_p7 }
  0x8b   : > { %4458 = shalt.err (!%p4455_p4)
}
  0x8c   : > { %4124 = dma.hbm_to_vmem [thread:$0]  (!%p4789_p11), %s4787_s18, 128, %s4793_s10, %s249_s16, %s5914_s19, %s5914_s19, %s5913_s20  }
  0x8d   : > { %s3532_s8 = sshll.u32 %s4780_s11, 7  ;;  %s3614_s15 = sshll.u32 %s4567_s24, 11 }
  0x8e   : > { %s4832_s12 = scalar_lea.hbm %s5880_s1, %s3614_s15  ;;  %s273_s13 = scalar_lea.vmem [#allocation5], %s3532_s8 }
  0x8f   : > { %s280_s17 = sshll.u32 %s273_s13, 4  ;;  %s5919_s0 = sand.u32 1, %s4567_s24   ;;  %s4834_s17 = int_to_ptr.vmem [resolvable:$true] %s280_s17 }
  0x90   : > { %s4838_s3 = scalar_lea.sflag [#allocation6], %s5919_s0  ;;  %s4459_s4 = scalar_lea.hbm %s4832_s12, 2048 }
  0x91   : > { %p4460_p0 = scmp.ne.s32.totalorder %s4832_s12, %s4459_s4  ;;  %s4464_s10 = scalar_lea.hbm %s5880_s1, 4096 }
  0x92   : > { %p4465_p6 = scmp.lt.u32.totalorder %s4832_s12, %s5880_s1  ;;  %p4466_p10 = scmp.lt.u32.totalorder %s4464_s10, %s4459_s4 }
  0x93   : > { %p4462_p8 = pnand %p4460_p0, %p4431_p9  ;;  %p4468_p7 = scmp.lt.u32.totalorder %s4459_s4, %s4832_s12 }
  0x94   : > { %p4467_p3 = por %p4466_p10, %p4465_p6 }
  0x95   : > { %p4463_p13 = pneg %p4462_p8 }
  0x96   : > { %p4469_p12 = por %p4468_p7, %p4467_p3 }
  0x98   : > { %p4470_p1 = pnand %p4469_p12, %p4463_p13 }
  0x9a   : > { %4473 = shalt.err (!%p4470_p1)
}
  0x9b   : > { %s4474_s0 = scalar_lea.vmem %s4834_s17, 2048  ;;  %s4577_s8 = smov [#allocation5]  }
  0x9c   : > { %p4475_p2 = scmp.ne.s32.totalorder %s4834_s17, %s4474_s0  ;;  %s4479_s26 = sshll.u32 %s4577_s8, 4  ;;  %s4480_s26 = int_to_ptr.vmem [resolvable:$false] %s4479_s26 }
  0x9d   : > { %s4481_s7 = scalar_lea.vmem %s4480_s26, 4096  ;;  %p4482_p8 = scmp.lt.s32.totalorder %s4834_s17, %s4480_s26 }
  0x9e   : > { %p4477_p4 = pnand %p4475_p2, %p4431_p9  ;;  %p4483_p6 = scmp.lt.s32.totalorder %s4481_s7, %s4474_s0 }
  0xa0   : > { %p4478_p0 = pneg %p4477_p4  ;;  %p4484_p10 = por %p4483_p6, %p4482_p8 }
  0xa2   : > { %p4485_p3 = pnand %p4484_p10, %p4478_p0 }
  0xa4   : > { %4488 = shalt.err (!%p4485_p3)
}
  0xa5   : > { %4127 = dma.hbm_to_vmem [thread:$0]  (!%p4789_p11), %s4832_s12, 2048, %s4834_s17, %s4838_s3, %s5914_s19, %s5914_s19, %s5913_s20  }
  0xa6   : > { %p5920_p9 = scmp.ne.s32.totalorder %s5907_s29, 0 }
  0xa8   : > { %292 = sbr.rel (%p5920_p9) target bundleno = 6639 (0x19ef), region = 44 }
  0xaf   : > { %s4870_s4 = sand.u32 1, %s4559_s22   ;;  %p5921_p13 = scmp.ne.s32.totalorder %s5905_s27, 0 }
  0xb0   : > { %s3536_s13 = sshll.u32 %s4870_s4, 3  ;;  %s295_s11 = scalar_lea.sflag [#allocation3], %s4870_s4 }
  0xb1   : > { %s4874_s18 = scalar_lea.vmem [#allocation2], %s3536_s13 }
  0xb2   : > { %4534 = dma.done.wait (%p5921_p13), %s295_s11, 128  }
  0xb3   : > { %4536 = vsyncadd (%p5921_p13), %s295_s11, 4294967168  ;;  %s303_s3 = sand.u32 1, %s4648_s25   ;;  %s3537_s29 = sshll.u32 %s4870_s4, 7 }
  0xb4   : > { %s304_s20 = scalar_lea.sflag [#allocation6], %s303_s3  ;;  %s4882_s19 = scalar_lea.vmem [#allocation5], %s3537_s29 }
  0xb5   : > { %4538 = dma.done.wait (%p5921_p13), %s304_s20, 2048  }
  0xb6   : > { %4540 = vsyncadd (%p5921_p13), %s304_s20, 4294965248  ;;  %p5922_p11 = scmp.eq.s32.totalorder %s4648_s25, 0 }
  0xb8   : > { %4542 = dma.done.wait (%p5922_p11), [#allocation6], 1024   ;;  %p5923_p7 = pmov %p5922_p11 }
  0xba   : > { %4544 = vsyncadd (%p5923_p7), [#allocation6], 4294966272  ;;  %p5924_p12 = pmov %p5923_p7 }
  0xbb   : > { %p5925_p1 = pmov %p5923_p7 }
  0xbc   : > { %4546 = dma.done.wait (%p5924_p12), [#allocation9], 3072  }
  0xbd   : > { %4548 = vsyncadd (%p5925_p1), [#allocation9], 4294964224  ;;  %v4578_v0 = vmov 0   ;;  %v5893_v1 = vmov 0.0   ;;  %vm4580_vm0 = vmmov 0   ;;  %v4224_v14 = vld [vmem:[#allocation7] sm:$0xff]  }
  0xbe   : > { %727 = vmatprep.mubr.bf16.mxu1 %v4578_v0  ;;  %3961 = vmatprep.subr.bf16.mxu0 %v5893_v1  ;;  %v4192_v2 = vld [vmem:[#allocation8 + $0x4] ss:$8 sps:$4 sm:$0xff]   ;;  %v4194_v3 = vld [vmem:[#allocation8] ss:$8 sps:$4 sm:$0xff]   ;;  %v4195_v4 = vld [vmem:[#allocation8 + $0x14] ss:$8 sps:$4 sm:$0xff]  }
  0xbf   : > { %3977 = vmatprep.mubr.msk.bf16.mxu0 %vm4580_vm0, %v5893_v1  ;;  %695 = vmatprep.subr.bf16.mxu1 %v4192_v2  ;;  %v4197_v5 = vld [vmem:[#allocation8 + $0x10] ss:$8 sps:$4 sm:$0xff]   ;;  %v4198_v6 = vld [vmem:[#allocation8 + $0x24] ss:$8 sps:$4 sm:$0xff]   ;;  %v4200_v7 = vld [vmem:[#allocation8 + $0x20] ss:$8 sps:$4 sm:$0xff]  }
  0xc0   : > { %696 = vmatpush1.bf16.msra.mxu1 %v4194_v3  ;;  %v4201_v8 = vld [vmem:[#allocation8 + $0x34] ss:$8 sps:$4 sm:$0xff]   ;;  %v4203_v9 = vld [vmem:[#allocation8 + $0x30] ss:$8 sps:$4 sm:$0xff]   ;;  %v4204_v10 = vld [vmem:[#allocation8 + $0x44] ss:$8 sps:$4 sm:$0xff]   ;;  %3962 = vmatpush3.bf16.msra.mxu0 %v4224_v14 }
  0xc1   : > { %697 = vmatprep.subr.bf16.mxu1 %v4195_v4  ;;  %v4206_v11 = vld [vmem:[#allocation8 + $0x40] ss:$8 sps:$4 sm:$0xff]   ;;  %v4207_v12 = vld [vmem:[#allocation8 + $0x54] ss:$8 sps:$4 sm:$0xff]   ;;  %v4209_v13 = vld [vmem:[#allocation8 + $0x50] ss:$8 sps:$4 sm:$0xff]   ;;  %3963 = vmatprep.subr.bf16.mxu0 %v5893_v1 }
  0xc2   : > { %v4210_v15 = vld [vmem:[#allocation8 + $0x64] ss:$8 sps:$4 sm:$0xff]   ;;  %v4212_v17 = vld [vmem:[#allocation8 + $0x60] ss:$8 sps:$4 sm:$0xff]   ;;  %v4213_v18 = vld [vmem:[#allocation8 + $0x74] ss:$8 sps:$4 sm:$0xff]  }
  0xc3   : > { %v4226_v16 = vld [vmem:[#allocation7 + $0x8] sm:$0xff]   ;;  %v4227_v19 = vld [vmem:[#allocation7 + $0x10] sm:$0xff]   ;;  %v4229_v21 = vld [vmem:[#allocation7 + $0x18] sm:$0xff]   ;;  %s4581_s27 = smov 112   ;;  %vm946_vm1 = vcmask 130048   ;;  %s4583_s2 = smov 96  }
  0xc4   : > { %698 = vmatpush1.bf16.msra.mxu1 %v4197_v5  ;;  %3964 = vmatpush3.bf16.msra.mxu0 %v4226_v16  ;;  %v4215_v20 = vld [vmem:[#allocation8 + $0x70] ss:$8 sps:$4 sm:$0xff]   ;;  %v4216_v22 = vld [vmem:[%s4882_s19] sm:$0xff]   ;;  %v4232_v24 = vld [vmem:[#allocation7 + $0x28] sm:$0xff]   ;;  %s4584_s12 = smov 80   ;;  %s4585_s17 = smov 64  }
  0xc5   : > { %699 = vmatprep.subr.bf16.mxu1 %v4198_v6  ;;  %3965 = vmatprep.subr.bf16.mxu0 %v5893_v1  ;;  %v4230_v23 = vld [vmem:[#allocation7 + $0x20] sm:$0xff]   ;;  %v4217_v25 = vld [vmem:[%s4882_s19 + $0x8] sm:$0xff]   ;;  %v4233_v26 = vld [vmem:[#allocation7 + $0x30] sm:$0xff]   ;;  %s4586_s10 = smov 48   ;;  %s4587_s16 = smov 32  }
  0xc6   : > { %v4235_v27 = vld [vmem:[#allocation7 + $0x38] sm:$0xff]   ;;  %v4218_v28 = vld [vmem:[%s4882_s19 + $0x10] sm:$0xff]   ;;  %v4220_v31 = vld [vmem:[%s4882_s19 + $0x20] sm:$0xff]   ;;  %s4588_s15 = smov 16   ;;  %s3541_s0 = sshll.u32 %s4870_s4, 4 }
  0xc7   : > { %v4236_v29 = vld [vmem:[%s4874_s18] sm:$0xff]   ;;  %v4221_v32 = vld [vmem:[%s4882_s19 + $0x28] sm:$0xff]   ;;  %v4225_v35 = vld [vmem:[%s4882_s19 + $0x40] sm:$0xff]   ;;  %s352_s7 = scalar_lea.vmem [#allocation11], %s3541_s0  ;;  %s3615_s11 = sshll.u32 %s4648_s25, 8 }
  0xc8   : > { %700 = vmatpush1.bf16.msra.mxu1 %v4200_v7  ;;  %3966 = vmatpush3.bf16.msra.mxu0 %v4227_v19  ;;  %v4219_v30 = vld [vmem:[%s4882_s19 + $0x18] sm:$0xff]   ;;  %v4222_v33 = vld [vmem:[%s4882_s19 + $0x30] sm:$0xff]   ;;  %v4228_v36 = vld [vmem:[%s4882_s19 + $0x48] sm:$0xff]   ;;  %s3399_s13 = sshll.u32 %s352_s7, 4  ;;  %s5835_s29 = scalar_lea.hbm %s5885_s6, %s3615_s11  ;;  %s5829_s13 = int_to_ptr.vmem [resolvable:$true] %s3399_s13 }
  0xc9   : > { %701 = vmatprep.subr.bf16.mxu1 %v4201_v8  ;;  %3967 = vmatprep.subr.bf16.mxu0 %v5893_v1  ;;  %v4223_v34 = vld [vmem:[%s4882_s19 + $0x38] sm:$0xff]   ;;  %v4231_v37 = vld [vmem:[%s4882_s19 + $0x50] sm:$0xff]   ;;  %v4237_v39 = vld [vmem:[%s4882_s19 + $0x60] sm:$0xff]   ;;  %s3386_s20 = scalar_lea.sflag [#allocation4], %s4870_s4  ;;  %s4489_s25 = scalar_lea.vmem %s5829_s13, 256 }
  0xca   : > { %v4234_v38 = vld [vmem:[%s4882_s19 + $0x58] sm:$0xff]   ;;  %v4238_v40 = vld [vmem:[%s4882_s19 + $0x68] sm:$0xff]   ;;  %v4239_v41 = vld [vmem:[%s4882_s19 + $0x70] sm:$0xff]   ;;  %p4490_p2 = scmp.ne.s32.totalorder %s5829_s13, %s4489_s25 }
  0xcb   : > { %v4240_v42 = vld [vmem:[%s4882_s19 + $0x78] sm:$0xff]   ;;  %s4589_s19 = smov [#allocation11]  }
  0xcc   : > { %702 = vmatpush1.bf16.msra.mxu1 %v4203_v9  ;;  %3968 = vmatpush3.bf16.msra.mxu0 %v4229_v21  ;;  %p4491_p4 = pnand %p4490_p2, %p4775_p5 }
  0xcd   : > { %703 = vmatprep.subr.bf16.mxu1 %v4204_v10  ;;  %3969 = vmatprep.subr.bf16.mxu0 %v5893_v1 }
  0xce   : > { %p4492_p0 = pneg %p4491_p4 }
  0xd0   : > { %704 = vmatpush1.bf16.msra.mxu1 %v4206_v11  ;;  %3970 = vmatpush3.bf16.msra.mxu0 %v4230_v23 }
  0xd1   : > { %705 = vmatprep.subr.bf16.mxu1 %v4207_v12  ;;  %3971 = vmatprep.subr.bf16.mxu0 %v5893_v1 }
  0xd4   : > { %706 = vmatpush1.bf16.msra.mxu1 %v4209_v13  ;;  %3972 = vmatpush3.bf16.msra.mxu0 %v4232_v24 }
  0xd5   : > { %707 = vmatprep.subr.bf16.mxu1 %v4210_v15  ;;  %3973 = vmatprep.subr.bf16.mxu0 %v5893_v1 }
  0xd8   : > { %708 = vmatpush1.bf16.msra.mxu1 %v4212_v17  ;;  %3974 = vmatpush3.bf16.msra.mxu0 %v4233_v26 }
  0xd9   : > { %709 = vmatprep.subr.bf16.mxu1 %v4213_v18  ;;  %3975 = vmatprep.subr.bf16.mxu0 %v5893_v1 }
  0xdc   : > { %710 = vmatpush1.bf16.msra.mxu1 %v4215_v20  ;;  %3976 = vmatpush3.bf16.msra.mxu0 %v4235_v27 }
  0xdf   : > { %728 = vmatmul.mubr.bf16.vlgmr.msra.gmra.mrb[0].mxu1 %v4216_v22  ;;  %3978 = vmatmul.mubr.bf16.vlgmr.msra.gmra.mrb[0].mxu0 %v4236_v29 }
  0xe0   : > { %737 = vmatprep.mubr.bf16.mxu1 %v4578_v0 }
  0xe7   : > { %738 = vmatmul.mubr.bf16.gmra.mrb[4].mxu1 %v4217_v25 }
  0xe8   : > { %747 = vmatprep.mubr.bf16.mxu1 %v4578_v0 }
  0xef   : > { %748 = vmatmul.mubr.bf16.gmra.mrb[8].mxu1 %v4218_v28 }
  0xf0   : > { %757 = vmatprep.mubr.bf16.mxu1 %v4578_v0 }
  0xf7   : > { %758 = vmatmul.mubr.bf16.gmra.mrb[12].mxu1 %v4219_v30 }
  0xf8   : > { %767 = vmatprep.mubr.bf16.mxu1 %v4578_v0 }
  0xff   : > { %768 = vmatmul.mubr.bf16.gmra.mrb[16].mxu1 %v4220_v31 }
 0x100   : > { %777 = vmatprep.mubr.bf16.mxu1 %v4578_v0 }
 0x107   : > { %778 = vmatmul.mubr.bf16.gmra.mrb[20].mxu1 %v4221_v32 }
 0x108   : > { %787 = vmatprep.mubr.bf16.mxu1 %v4578_v0 }
 0x10f   : > { %788 = vmatmul.mubr.bf16.gmra.mrb[24].mxu1 %v4222_v33 }
 0x110   : > { %797 = vmatprep.mubr.bf16.mxu1 %v4578_v0 }
 0x117   : > { %798 = vmatmul.mubr.bf16.gmra.mrb[28].mxu1 %v4223_v34 }
 0x118   : > { %807 = vmatprep.mubr.bf16.mxu1 %v4578_v0 }
 0x11f   : > { %808 = vmatmul.mubr.bf16.gmra.mrb[32].mxu1 %v4225_v35 }
 0x120   : > { %817 = vmatprep.mubr.bf16.mxu1 %v4578_v0 }
 0x127   : > { %818 = vmatmul.mubr.bf16.gmra.mrb[36].mxu1 %v4228_v36 }
 0x128   : > { %827 = vmatprep.mubr.bf16.mxu1 %v4578_v0 }
 0x12f   : > { %828 = vmatmul.mubr.bf16.gmra.mrb[40].mxu1 %v4231_v37 }
 0x130   : > { %837 = vmatprep.mubr.bf16.mxu1 %v4578_v0 }
 0x137   : > { %838 = vmatmul.mubr.bf16.gmra.mrb[44].mxu1 %v4234_v38 }
 0x138   : > { %847 = vmatprep.mubr.bf16.mxu1 %v4578_v0 }
 0x13f   : > { %848 = vmatmul.mubr.bf16.gmra.mrb[48].mxu1 %v4237_v39 }
 0x140   : > { %857 = vmatprep.mubr.bf16.mxu1 %v4578_v0 }
 0x147   : > { %858 = vmatmul.mubr.bf16.gmra.mrb[52].mxu1 %v4238_v40 }
 0x148   : > { %867 = vmatprep.mubr.bf16.mxu1 %v4578_v0 }
 0x14f   : > { %868 = vmatmul.mubr.bf16.gmra.mrb[56].mxu1 %v4239_v41 }
 0x150   : > { %877 = vmatprep.mubr.bf16.mxu1 %v4578_v0 }
 0x157   : > { %878 = vmatmul.mubr.bf16.gmra.mrb[60].mxu1 %v4240_v42 }
 0x1b2   : > { %v729_v43 = vpop.f32.mrb[0].mxu1  ;;  %v463_v58 = vpop.f32.mrb[0].mxu0 }
 0x1b3   : > { %v731_v44 = vpop.f32.mrb[1].mxu1  ;;  %v3979_v61 = vpop.f32.mrb[1].mxu0 }
 0x1b4   : > { %v733_v45 = vpop.f32.mrb[2].mxu1  ;;  %v466_v63 = vpop.f32.mrb[2].mxu0 }
 0x1b5   : > { %v4939_v46 = vpack.c.bf16 %v733_v45, %v729_v43  ;;  %v735_v47 = vpop.f32.mrb[3].mxu1  ;;  %v4955_v0 = vpack.c.bf16 %v466_v63, %v463_v58  ;;  %v3980_v2 = vpop.f32.mrb[3].mxu0 }
 0x1b6   : > { %v4941_v48 = vpack.c.bf16 %v735_v47, %v731_v44 }
 0x1b7   : > { %1142 = vrot.lane.b32.xlu0 %v4939_v46, %s4581_s27  ;;  %3641 = vmatprep.mubr.msk.bf16.mxu0 %vm946_vm1, %v4955_v0  ;;  %v951_v39 = vsel %vm946_vm1, %v4939_v46, 0 }
 0x1ba   : > { %v739_v49 = vpop.f32.mrb[4].mxu1 }
 0x1bb   : > { %v741_v50 = vpop.f32.mrb[5].mxu1 }
 0x1bc   : > { %v743_v51 = vpop.f32.mrb[6].mxu1 }
 0x1bd   : > { %v4945_v52 = vpack.c.bf16 %v743_v51, %v739_v49  ;;  %v745_v53 = vpop.f32.mrb[7].mxu1 }
 0x1be   : > { %v4947_v54 = vpack.c.bf16 %v745_v53, %v741_v50 }
 0x1bf   : > { %1144 = vrot.lane.b32.xlu1 %v4945_v52, %s4581_s27  ;;  %v954_v47 = vsel %vm946_vm1, %v4945_v52, 0 }
 0x1c2   : > { %v749_v55 = vpop.f32.mrb[8].mxu1 }
 0x1c3   : > { %v751_v56 = vpop.f32.mrb[9].mxu1 }
 0x1c4   : > { %v753_v57 = vpop.f32.mrb[10].mxu1 }
 0x1c5   : > { %v4951_v59 = vpack.c.bf16 %v753_v57, %v749_v55  ;;  %v755_v60 = vpop.f32.mrb[11].mxu1 }
 0x1c6   : > { %v4953_v62 = vpack.c.bf16 %v755_v60, %v751_v56 }
 0x1c7   : > { %v957_v57 = vsel %vm946_vm1, %v4951_v59, 0 }
 0x1ca   : > { %v759_v3 = vpop.f32.mrb[12].mxu1 }
 0x1cb   : > { %v761_v4 = vpop.f32.mrb[13].mxu1 }
 0x1cc   : > { %v763_v5 = vpop.f32.mrb[14].mxu1 }
 0x1cd   : > { %v4959_v6 = vpack.c.bf16 %v763_v5, %v759_v3  ;;  %v765_v7 = vpop.f32.mrb[15].mxu1 }
 0x1ce   : > { %v4961_v8 = vpack.c.bf16 %v765_v7, %v761_v4 }
 0x1cf   : > { %v960_v4 = vsel %vm946_vm1, %v4959_v6, 0 }
 0x1d2   : > { %v769_v9 = vpop.f32.mrb[16].mxu1 }
 0x1d3   : > { %v771_v10 = vpop.f32.mrb[17].mxu1 }
 0x1d4   : > { %v773_v11 = vpop.f32.mrb[18].mxu1 }
 0x1d5   : > { %v4963_v12 = vpack.c.bf16 %v773_v11, %v769_v9  ;;  %v775_v13 = vpop.f32.mrb[19].mxu1 }
 0x1d6   : > { %v4965_v14 = vpack.c.bf16 %v775_v13, %v771_v10 }
 0x1d8   : > { %5926 = vst [vmem:[#allocation17_spill] sm:$0xff] %v4965_v14 }
 0x1da   : > { %v779_v15 = vpop.f32.mrb[20].mxu1 }
 0x1db   : > { %v781_v16 = vpop.f32.mrb[21].mxu1 }
 0x1dc   : > { %v783_v17 = vpop.f32.mrb[22].mxu1 }
 0x1dd   : > { %v4967_v18 = vpack.c.bf16 %v783_v17, %v779_v15  ;;  %v785_v19 = vpop.f32.mrb[23].mxu1  ;;  %v963_v15 = vsel %vm946_vm1, %v4963_v12, 0 }
 0x1de   : > { %v4969_v20 = vpack.c.bf16 %v785_v19, %v781_v16 }
 0x1e2   : > { %v789_v21 = vpop.f32.mrb[24].mxu1 }
 0x1e3   : > { %v791_v22 = vpop.f32.mrb[25].mxu1 }
 0x1e4   : > { %v793_v23 = vpop.f32.mrb[26].mxu1 }
 0x1e5   : > { %v4971_v24 = vpack.c.bf16 %v793_v23, %v789_v21  ;;  %v795_v25 = vpop.f32.mrb[27].mxu1 }
 0x1e6   : > { %v4973_v26 = vpack.c.bf16 %v795_v25, %v791_v22  ;;  %v966_v25 = vsel %vm946_vm1, %v4967_v18, 0 }
 0x1e7   : > { %5927 = vst [vmem:[#allocation18_spill] sm:$0xff] %v4971_v24 }
 0x1ea   : > { %v799_v27 = vpop.f32.mrb[28].mxu1 }
 0x1eb   : > { %v801_v28 = vpop.f32.mrb[29].mxu1 }
 0x1ec   : > { %v803_v29 = vpop.f32.mrb[30].mxu1 }
 0x1ed   : > { %v4975_v30 = vpack.c.bf16 %v803_v29, %v799_v27  ;;  %v805_v31 = vpop.f32.mrb[31].mxu1 }
 0x1ee   : > { %v4977_v32 = vpack.c.bf16 %v805_v31, %v801_v28 }
 0x1f2   : > { %v809_v33 = vpop.f32.mrb[32].mxu1 }
 0x1f3   : > { %v811_v34 = vpop.f32.mrb[33].mxu1 }
 0x1f4   : > { %v813_v35 = vpop.f32.mrb[34].mxu1 }
 0x1f5   : > { %v4979_v36 = vpack.c.bf16 %v813_v35, %v809_v33  ;;  %v815_v37 = vpop.f32.mrb[35].mxu1  ;;  %v969_v35 = vsel %vm946_vm1, %v4971_v24, 0 }
 0x1f6   : > { %v4981_v38 = vpack.c.bf16 %v815_v37, %v811_v34 }
 0x1f7   : > { %1158 = vrot.lane.b32.xlu0 %v4979_v36, %s4581_s27  ;;  %4029 = vmatprep.subr.msk.bf16.mxu0 %vm946_vm1, %v4979_v36 }
 0x1f8   : > { %3626 = vmatpush3.bf16.xpose.msra.mxu0 %v951_v39 }
 0x1fa   : > { %v819_v40 = vpop.f32.mrb[36].mxu1 }
 0x1fb   : > { %1146 = vrot.lane.b32.xlu0 %v4951_v59, %s4581_s27  ;;  %v821_v41 = vpop.f32.mrb[37].mxu1 }
 0x1fc   : > { %v823_v42 = vpop.f32.mrb[38].mxu1 }
 0x1fd   : > { %v4991_v43 = vpack.c.bf16 %v823_v42, %v819_v40  ;;  %v825_v44 = vpop.f32.mrb[39].mxu1 }
 0x1fe   : > { %v4993_v45 = vpack.c.bf16 %v825_v44, %v821_v41 }
 0x1ff   : > { %1148 = vrot.lane.b32.xlu0 %v4959_v6, %s4581_s27  ;;  %1160 = vrot.lane.b32.xlu1 %v4991_v43, %s4581_s27 }
 0x200   : > { %4030 = vmatprep.subr.msk.bf16.mxu0 %vm946_vm1, %v4991_v43 }
 0x201   : > { %3628 = vmatpush3.bf16.xpose.msra.mxu0 %v954_v47  ;;  %v972_v47 = vsel %vm946_vm1, %v4975_v30, 0 }
 0x202   : > { %v829_v49 = vpop.f32.mrb[40].mxu1 }
 0x203   : > { %1150 = vrot.lane.b32.xlu0 %v4963_v12, %s4581_s27  ;;  %v831_v50 = vpop.f32.mrb[41].mxu1 }
 0x204   : > { %v833_v51 = vpop.f32.mrb[42].mxu1 }
 0x205   : > { %v5005_v53 = vpack.c.bf16 %v833_v51, %v829_v49  ;;  %v835_v55 = vpop.f32.mrb[43].mxu1 }
 0x206   : > { %v5007_v56 = vpack.c.bf16 %v835_v55, %v831_v50 }
 0x207   : > { %1152 = vrot.lane.b32.xlu0 %v4967_v18, %s4581_s27  ;;  %1162 = vrot.lane.b32.xlu1 %v5005_v53, %s4581_s27 }
 0x208   : > { %4031 = vmatprep.subr.msk.bf16.mxu0 %vm946_vm1, %v5005_v53 }
 0x209   : > { %3630 = vmatpush3.bf16.xpose.msra.mxu0 %v957_v57 }
 0x20a   : > { %v839_v58 = vpop.f32.mrb[44].mxu1 }
 0x20b   : > { %1154 = vrot.lane.b32.xlu0 %v4971_v24, %s4581_s27  ;;  %v841_v60 = vpop.f32.mrb[45].mxu1 }
 0x20c   : > { %v843_v61 = vpop.f32.mrb[46].mxu1 }
 0x20d   : > { %v5019_v63 = vpack.c.bf16 %v843_v61, %v839_v58  ;;  %v845_v2 = vpop.f32.mrb[47].mxu1 }
 0x20e   : > { %v5021_v3 = vpack.c.bf16 %v845_v2, %v841_v60 }
 0x20f   : > { %1156 = vrot.lane.b32.xlu0 %v4975_v30, %s4581_s27  ;;  %1164 = vrot.lane.b32.xlu1 %v5019_v63, %s4581_s27 }
 0x210   : > { %4032 = vmatprep.subr.msk.bf16.mxu0 %vm946_vm1, %v5019_v63 }
 0x211   : > { %3632 = vmatpush3.bf16.xpose.msra.mxu0 %v960_v4 }
 0x212   : > { %v849_v5 = vpop.f32.mrb[48].mxu1 }
 0x213   : > { %v851_v7 = vpop.f32.mrb[49].mxu1  ;;  %1124 = vrot.lane.b32.xlu0 %v4955_v0, %s4581_s27 }
 0x214   : > { %v853_v9 = vpop.f32.mrb[50].mxu1 }
 0x215   : > { %v5033_v10 = vpack.c.bf16 %v853_v9, %v849_v5  ;;  %v855_v11 = vpop.f32.mrb[51].mxu1 }
 0x216   : > { %v5035_v13 = vpack.c.bf16 %v855_v11, %v851_v7 }
 0x217   : > { %1166 = vrot.lane.b32.xlu1 %v5033_v10, %s4581_s27  ;;  %4033 = vmatprep.subr.msk.bf16.mxu0 %vm946_vm1, %v5033_v10 }
 0x218   : > { %1338 = vrot.lane.b32.xlu0 %v4981_v38, %s4581_s27 }
 0x219   : > { %3634 = vmatpush3.bf16.xpose.msra.mxu0 %v963_v15 }
 0x21a   : > { %v859_v16 = vpop.f32.mrb[52].mxu1 }
 0x21b   : > { %v861_v17 = vpop.f32.mrb[53].mxu1 }
 0x21c   : > { %1324 = vrot.lane.b32.xlu0 %v4947_v54, %s4581_s27  ;;  %v863_v19 = vpop.f32.mrb[54].mxu1 }
 0x21d   : > { %v5047_v21 = vpack.c.bf16 %v863_v19, %v859_v16  ;;  %v865_v22 = vpop.f32.mrb[55].mxu1 }
 0x21e   : > { %v5049_v23 = vpack.c.bf16 %v865_v22, %v861_v17 }
 0x21f   : > { %1168 = vrot.lane.b32.xlu1 %v5047_v21, %s4581_s27  ;;  %4034 = vmatprep.subr.msk.bf16.mxu0 %vm946_vm1, %v5047_v21 }
 0x220   : > { %1326 = vrot.lane.b32.xlu0 %v4953_v62, %s4581_s27 }
 0x221   : > { %3636 = vmatpush3.bf16.xpose.msra.mxu0 %v966_v25 }
 0x222   : > { %v869_v27 = vpop.f32.mrb[56].mxu1 }
 0x223   : > { %v871_v28 = vpop.f32.mrb[57].mxu1 }
 0x224   : > { %v873_v29 = vpop.f32.mrb[58].mxu1 }
 0x225   : > { %v5059_v31 = vpack.c.bf16 %v873_v29, %v869_v27  ;;  %v875_v33 = vpop.f32.mrb[59].mxu1 }
 0x226   : > { %v5061_v34 = vpack.c.bf16 %v875_v33, %v871_v28 }
 0x227   : > { %1170 = vrot.lane.b32.xlu1 %v5059_v31, %s4581_s27  ;;  %4035 = vmatprep.subr.msk.bf16.mxu0 %vm946_vm1, %v5059_v31 }
 0x228   : > { %5928 = vst [vmem:[#allocation19_spill] sm:$0xff] %v5061_v34 }
 0x229   : > { %3638 = vmatpush3.bf16.xpose.msra.mxu0 %v969_v35  ;;  %v1143_v49 = vpop.permute.xlu0 %1142 }
 0x22a   : > { %v879_v37 = vpop.f32.mrb[60].mxu1  ;;  %v1178_v51 = vsel %vm946_vm1, %v1143_v49, 0 }
 0x22b   : > { %v881_v39 = vpop.f32.mrb[61].mxu1 }
 0x22c   : > { %v883_v40 = vpop.f32.mrb[62].mxu1 }
 0x22d   : > { %v5069_v41 = vpack.c.bf16 %v883_v40, %v879_v37  ;;  %v885_v42 = vpop.f32.mrb[63].mxu1 }
 0x22e   : > { %v5071_v44 = vpack.c.bf16 %v885_v42, %v881_v39  ;;  %v920_v39 = vlaneseq }
 0x22f   : > { %1172 = vrot.lane.b32.xlu1 %v5069_v41, %s4581_s27  ;;  %4036 = vmatprep.subr.msk.bf16.mxu0 %vm946_vm1, %v5069_v41 }
 0x230   : > { %v921_v40 = vshrl.u32 %v920_v39, 7  ;;  %v924_v49 = vand.u32 127, %v920_v39 }
 0x231   : > { %3640 = vmatpush3.bf16.xpose.msra.mxu0 %v972_v47  ;;  %v1145_v55 = vpop.permute.xlu1 %1144 }
 0x232   : > { %3643 = vmatprep.subr.bf16.mxu0 %v4981_v38  ;;  %v1181_v61 = vsel %vm946_vm1, %v1145_v55, 0  ;;  %v922_v42 = vadd.s32 8, %v921_v40  ;;  %v926_v47 = vmul.u32 16, %v921_v40  ;;  %v925_v55 = vadd.s32 128, %v924_v49 }
 0x233   : > { %1322 = vrot.lane.b32.xlu1 %v4941_v48, %s4581_s27 }
 0x234   : > { %vm928_vm2 = vcmp.ge.s32.totalorder %v924_v49, %v926_v47  ;;  %vm929_vm4 = vcmp.ge.s32.totalorder %v925_v55, %v926_v47 }
 0x237   : > { %1340 = vrot.lane.b32.xlu1 %v4993_v45, %s4581_s27 }
 0x238   : > { %3642 = vmatmul.mubr.msk.bf16.vlgmr.msra.gmra.mrb[4].mxu0 %vm946_vm1, %v4955_v0 }
 0x239   : > { %3644 = vmatpush3.bf16.msra.mxu0 %v4941_v48 }
 0x23a   : > { %3645 = vmatprep.subr.bf16.mxu0 %v4993_v45 }
 0x23b   : > { %1342 = vrot.lane.b32.xlu1 %v5007_v56, %s4581_s27 }
 0x23d   : > { %3646 = vmatpush3.bf16.msra.mxu0 %v4947_v54 }
 0x23e   : > { %3647 = vmatprep.subr.bf16.mxu0 %v5007_v56 }
 0x23f   : > { %1344 = vrot.lane.b32.xlu1 %v5021_v3, %s4581_s27 }
 0x241   : > { %3648 = vmatpush3.bf16.msra.mxu0 %v4953_v62 }
 0x242   : > { %3649 = vmatprep.subr.bf16.mxu0 %v5021_v3 }
 0x245   : > { %3650 = vmatpush3.bf16.msra.mxu0 %v4961_v8 }
 0x246   : > { %3651 = vmatprep.subr.bf16.mxu0 %v5035_v13 }
 0x249   : > { %3652 = vmatpush3.bf16.msra.mxu0 %v4965_v14 }
 0x24a   : > { %3653 = vmatprep.subr.bf16.mxu0 %v5049_v23 }
 0x24d   : > { %3654 = vmatpush3.bf16.msra.mxu0 %v4969_v20 }
 0x24e   : > { %3655 = vmatprep.subr.bf16.mxu0 %v5061_v34 }
 0x251   : > { %3656 = vmatpush3.bf16.msra.mxu0 %v4973_v26 }
 0x252   : > { %3657 = vmatprep.subr.bf16.mxu0 %v5071_v44 }
 0x255   : > { %3658 = vmatpush3.bf16.msra.mxu0 %v4977_v32 }
 0x269   : > { %v1159_v50 = vpop.permute.xlu0 %1158 }
 0x26a   : > { %4037 = vmatprep.subr.msk.bf16.mxu1 %vm946_vm1, %v1159_v50  ;;  %v927_v50 = vmul.u32 16, %v922_v42 }
 0x26b   : > { %3666 = vmatpush3.bf16.xpose.msra.mxu1 %v1178_v51  ;;  %v932_v51 = vadd.s32 16, %v926_v47 }
 0x26c   : > { %vm930_vm6 = vcmp.ge.s32.totalorder %v924_v49, %v927_v50  ;;  %vm931_vm9 = vcmp.ge.s32.totalorder %v925_v55, %v927_v50 }
 0x26d   : > { %v1147_v57 = vpop.permute.xlu0 %1146  ;;  %vm934_vm3 = vcmp.lt.s32.totalorder %v924_v49, %v932_v51  ;;  %vm935_vm5 = vcmp.lt.s32.totalorder %v925_v55, %v932_v51 }
 0x26e   : > { %v1184_v7 = vsel %vm946_vm1, %v1147_v57, 0  ;;  %v933_v57 = vadd.s32 16, %v927_v50  ;;  %vm938_vm8 = vmand %vm928_vm2, %vm934_vm3 }
 0x26f   : > { %vm939_vm11 = vmand %vm929_vm4, %vm935_vm5 }
 0x270   : > { %vm936_vm7 = vcmp.lt.s32.totalorder %v924_v49, %v933_v57  ;;  %vm937_vm10 = vcmp.lt.s32.totalorder %v925_v55, %v933_v57 }
 0x271   : > { %v1149_v58 = vpop.permute.xlu0 %1148  ;;  %v1161_v60 = vpop.permute.xlu1 %1160  ;;  %vm940_vm12 = vmand %vm930_vm6, %vm936_vm7 }
 0x272   : > { %4038 = vmatprep.subr.msk.bf16.mxu1 %vm946_vm1, %v1161_v60  ;;  %v1187_v16 = vsel %vm946_vm1, %v1149_v58, 0  ;;  %v4582_v58 = vmov -1e+30   ;;  %vm941_vm13 = vmand %vm931_vm9, %vm937_vm10 }
 0x273   : > { %3668 = vmatpush3.bf16.xpose.msra.mxu1 %v1181_v61  ;;  %v5126_v60 = vsel %vm938_vm8, 0.0, %v4582_v58  ;;  %v5128_v61 = vsel %vm939_vm11, 0.0, %v4582_v58 }
 0x275   : > { %v1151_v2 = vpop.permute.xlu0 %1150 }
 0x276   : > { %v1190_v22 = vsel %vm946_vm1, %v1151_v2, 0 }
 0x279   : > { %v1153_v4 = vpop.permute.xlu0 %1152  ;;  %v1163_v5 = vpop.permute.xlu1 %1162 }
 0x27a   : > { %4039 = vmatprep.subr.msk.bf16.mxu1 %vm946_vm1, %v1163_v5  ;;  %v1193_v28 = vsel %vm946_vm1, %v1153_v4, 0  ;;  %v5130_v4 = vsel %vm940_vm12, 0.0, %v4582_v58 }
 0x27b   : > { %3670 = vmatpush3.bf16.xpose.msra.mxu1 %v1184_v7 }
 0x27d   : > { %v1155_v9 = vpop.permute.xlu0 %1154 }
 0x27e   : > { %v1196_v33 = vsel %vm946_vm1, %v1155_v9, 0  ;;  %v5133_v9 = vsel %vm941_vm13, 0.0, %v4582_v58 }
 0x281   : > { %v1157_v11 = vpop.permute.xlu0 %1156  ;;  %v1165_v15 = vpop.permute.xlu1 %1164 }
 0x282   : > { %4040 = vmatprep.subr.msk.bf16.mxu1 %vm946_vm1, %v1165_v15  ;;  %v1199_v37 = vsel %vm946_vm1, %v1157_v11, 0 }
 0x283   : > { %3672 = vmatpush3.bf16.xpose.msra.mxu1 %v1187_v16 }
 0x285   : > { %v1125_v17 = vpop.permute.xlu0 %1124 }
 0x286   : > { %3681 = vmatprep.mubr.msk.bf16.mxu1 %vm946_vm1, %v1125_v17 }
 0x289   : > { %v1167_v19 = vpop.permute.xlu1 %1166 }
 0x28a   : > { %v1339_v25 = vpop.permute.xlu0 %1338  ;;  %4041 = vmatprep.subr.msk.bf16.mxu1 %vm946_vm1, %v1167_v19 }
 0x28b   : > { %3683 = vmatprep.subr.bf16.mxu0 %v1339_v25  ;;  %3674 = vmatpush3.bf16.xpose.msra.mxu1 %v1190_v22 }
 0x28e   : > { %v5152_v55 = vpop.permute.xlu0 %1324 }
 0x291   : > { %v1169_v27 = vpop.permute.xlu1 %1168 }
 0x292   : > { %4042 = vmatprep.subr.msk.bf16.mxu1 %vm946_vm1, %v1169_v27  ;;  %v5160_v58 = vpop.permute.xlu0 %1326 }
 0x293   : > { %3676 = vmatpush3.bf16.xpose.msra.mxu1 %v1193_v28 }
 0x299   : > { %v1171_v29 = vpop.permute.xlu1 %1170 }
 0x29a   : > { %4043 = vmatprep.subr.msk.bf16.mxu1 %vm946_vm1, %v1171_v29 }
 0x29b   : > { %3678 = vmatpush3.bf16.xpose.msra.mxu1 %v1196_v33 }
 0x2a1   : > { %v1173_v35 = vpop.permute.xlu1 %1172 }
 0x2a2   : > { %4044 = vmatprep.subr.msk.bf16.mxu1 %vm946_vm1, %v1173_v35 }
 0x2a3   : > { %3680 = vmatpush3.bf16.xpose.msra.mxu1 %v1199_v37 }
 0x2a4   : > { %3987 = vmatprep.subr.bf16.mxu1 %v5893_v1 }
 0x2a5   : > { %v5146_v49 = vpop.permute.xlu1 %1322 }
 0x2a9   : > { %v5148_v50 = vpop.permute.xlu1 %1340 }
 0x2aa   : > { %3682 = vmatmul.mubr.msk.bf16.vlgmr.msra.gmra.mrb[64].mxu1 %vm946_vm1, %v1125_v17 }
 0x2ab   : > { %3989 = vmatprep.mubr.msk.bf16.mxu1 %vm4580_vm0, %v5893_v1 }
 0x2ad   : > { %v5150_v51 = vpop.permute.xlu1 %1342 }
 0x2b1   : > { %v5158_v57 = vpop.permute.xlu1 %1344 }
 0x30b   : > { %v1032_v2 = vpop.f32.mrb[4].mxu0 }
 0x30c   : > { %v1033_v5 = vadd.f32 %v1032_v2, %v5126_v60  ;;  %v1034_v7 = vpop.f32.mrb[5].mxu0 }
 0x30d   : > { %v1035_v11 = vadd.f32 %v1034_v7, %v5128_v61  ;;  %v1036_v15 = vpop.f32.mrb[6].mxu0 }
 0x30e   : > { %v1037_v16 = vadd.f32 %v1036_v15, %v5130_v4  ;;  %v1038_v17 = vpop.f32.mrb[7].mxu0 }
 0x30f   : > { %v1039_v19 = vadd.f32 %v1038_v17, %v5133_v9  ;;  %v1041_v22 = vmax.f32 %v1033_v5, %v1035_v11 }
 0x311   : > { %1042 = vmax.xlane.f32.xlu1 %v1041_v22  ;;  %v1044_v25 = vmax.f32 %v1037_v16, %v1039_v19 }
 0x313   : > { %1045 = vmax.xlane.f32.xlu0 %v1044_v25 }
 0x322   : > { %1346 = vrot.lane.b32.xlu1 %v5035_v13, %s4581_s27 }
 0x329   : > { %1328 = vrot.lane.b32.xlu0 %v4961_v8, %s4581_s27 }
 0x37d   : > { %v1259_v27 = vpop.f32.mrb[64].mxu1 }
 0x37e   : > { %v1260_v28 = vadd.f32 %v1259_v27, %v5126_v60  ;;  %v1261_v29 = vpop.f32.mrb[65].mxu1 }
 0x37f   : > { %v1262_v33 = vadd.f32 %v1261_v29, %v5128_v61  ;;  %v1263_v35 = vpop.f32.mrb[66].mxu1 }
 0x380   : > { %v1264_v37 = vadd.f32 %v1263_v35, %v5130_v4  ;;  %v1265_v39 = vpop.f32.mrb[67].mxu1 }
 0x381   : > { %v1266_v40 = vadd.f32 %v1265_v39, %v5133_v9  ;;  %v1268_v42 = vmax.f32 %v1260_v28, %v1262_v33 }
 0x383   : > { %1269 = vmax.xlane.f32.xlu0 %v1268_v42  ;;  %v1271_v47 = vmax.f32 %v1264_v37, %v1266_v40 }
 0x385   : > { %1272 = vmax.xlane.f32.xlu1 %v1271_v47 }
 0x396   : > { %1348 = vrot.lane.b32.xlu1 %v5049_v23, %s4581_s27 }
 0x399   : > { %1330 = vrot.lane.b32.xlu0 %v4965_v14, %s4581_s27 }
 0x39e   : > { %v1043_v2 = vpop.xlane.xlu1 %1042 }
 0x39f   : > { %v1047_v7 = vsub.f32 %v1033_v5, %v1043_v2  ;;  %v1048_v17 = vsub.f32 %v1035_v11, %v1043_v2 }
 0x3a0   : > { %v1046_v15 = vpop.xlane.xlu0 %1045 }
 0x3a1   : > { %v1049_v22 = vsub.f32 %v1037_v16, %v1046_v15  ;;  %v1050_v25 = vsub.f32 %v1039_v19, %v1046_v15  ;;  %v1051_v27 = vmul.f32 1.442695, %v1047_v7  ;;  %v1053_v29 = vmul.f32 1.442695, %v1048_v17 }
 0x3a2   : > { %v5180_v19 = vpop.permute.xlu1 %1346 }
 0x3a3   : > { %v1055_v35 = vmul.f32 1.442695, %v1049_v22  ;;  %v1057_v39 = vmul.f32 1.442695, %v1050_v25  ;;  %4249 = vpow2.f32 %v1051_v27 }
 0x3a4   : > { %4251 = vpow2.f32 %v1053_v29  ;;  %v5178_v16 = vpop.permute.xlu0 %1328 }
 0x3a5   : > { %4253 = vpow2.f32 %v1055_v35 }
 0x3a6   : > { %4255 = vpow2.f32 %v1057_v39 }
 0x3ad   : > { %v5162_v42 = vpop.eup %4249 }
 0x3ae   : > { %v5164_v47 = vpop.eup %4251 }
 0x3af   : > { %v5166_v1 = vpop.eup %4253  ;;  %v1059_v5 = vadd.f32 %v5164_v47, %v5162_v42 }
 0x3b0   : > { %v5168_v14 = vpop.eup %4255 }
 0x3b1   : > { %v1062_v11 = vadd.f32 %v5168_v14, %v5166_v1 }
 0x3b8   : > { %1060 = vadd.xlane.f32.xlu0 %v1059_v5 }
 0x3ba   : > { %1063 = vadd.xlane.f32.xlu1 %v1062_v11 }
 0x3cb   : > { %1350 = vrot.lane.b32.xlu1 %v5061_v34, %s4581_s27 }
 0x3ce   : > { %1332 = vrot.lane.b32.xlu0 %v4969_v20, %s4581_s27 }
 0x410   : > { %v1270_v2 = vpop.xlane.xlu0 %1269 }
 0x411   : > { %v1274_v7 = vsub.f32 %v1260_v28, %v1270_v2  ;;  %v1275_v15 = vsub.f32 %v1262_v33, %v1270_v2 }
 0x412   : > { %v1273_v17 = vpop.xlane.xlu1 %1272 }
 0x413   : > { %v1278_v22 = vmul.f32 1.442695, %v1274_v7  ;;  %v1280_v25 = vmul.f32 1.442695, %v1275_v15  ;;  %v1276_v27 = vsub.f32 %v1264_v37, %v1273_v17  ;;  %v1277_v29 = vsub.f32 %v1266_v40, %v1273_v17 }
 0x414   : > { %v1331_v40 = vpop.permute.xlu0 %1330 }
 0x415   : > { %4257 = vpow2.f32 %v1278_v22  ;;  %v1282_v35 = vmul.f32 1.442695, %v1276_v27  ;;  %v1284_v39 = vmul.f32 1.442695, %v1277_v29 }
 0x416   : > { %4259 = vpow2.f32 %v1280_v25  ;;  %v1349_v2 = vpop.permute.xlu1 %1348 }
 0x417   : > { %4261 = vpow2.f32 %v1282_v35 }
 0x418   : > { %4263 = vpow2.f32 %v1284_v39 }
 0x41f   : > { %v5182_v5 = vpop.eup %4257 }
 0x420   : > { %v5184_v11 = vpop.eup %4259 }
 0x421   : > { %v5186_v34 = vpop.eup %4261  ;;  %v1286_v28 = vadd.f32 %v5184_v11, %v5182_v5 }
 0x422   : > { %v5190_v33 = vpop.eup %4263 }
 0x423   : > { %1287 = vadd.xlane.f32.xlu0 %v1286_v28  ;;  %v1289_v37 = vadd.f32 %v5190_v33, %v5186_v34 }
 0x425   : > { %1290 = vadd.xlane.f32.xlu1 %v1289_v37 }
 0x436   : > { %1352 = vrot.lane.b32.xlu1 %v5071_v44, %s4581_s27 }
 0x439   : > { %1334 = vrot.lane.b32.xlu0 %v4973_v26, %s4581_s27 }
 0x43a   : > { %1516 = vrot.lane.b32.xlu1 %v4939_v46, %s4583_s2 }
 0x43d   : > { %1336 = vrot.lane.b32.xlu0 %v4977_v32, %s4581_s27  ;;  %s4493_s27 = sshll.u32 %s4589_s19, 4  ;;  %s4494_s27 = int_to_ptr.vmem [resolvable:$false] %s4493_s27 }
 0x43e   : > { %1518 = vrot.lane.b32.xlu1 %v4945_v52, %s4583_s2  ;;  %p4496_p8 = scmp.lt.s32.totalorder %s5829_s13, %s4494_s27 }
 0x441   : > { %1532 = vrot.lane.b32.xlu0 %v4979_v36, %s4583_s2 }
 0x442   : > { %1520 = vrot.lane.b32.xlu1 %v4951_v59, %s4583_s2 }
 0x445   : > { %1534 = vrot.lane.b32.xlu0 %v4991_v43, %s4583_s2  ;;  %v1061_v7 = vpop.xlane.xlu0 %1060 }
 0x446   : > { %4265 = vrcp.f32 %v1061_v7  ;;  %1522 = vrot.lane.b32.xlu1 %v4959_v6, %s4583_s2 }
 0x447   : > { %v1064_v15 = vpop.xlane.xlu1 %1063 }
 0x448   : > { %4267 = vrcp.f32 %v1064_v15 }
 0x449   : > { %1536 = vrot.lane.b32.xlu0 %v5005_v53, %s4583_s2 }
 0x44a   : > { %1524 = vrot.lane.b32.xlu1 %v4963_v12, %s4583_s2 }
 0x44d   : > { %1538 = vrot.lane.b32.xlu0 %v5019_v63, %s4583_s2 }
 0x44e   : > { %1526 = vrot.lane.b32.xlu1 %v4967_v18, %s4583_s2 }
 0x450   : > { %v4266_v17 = vpop.eup %4265 }
 0x451   : > { %v1067_v22 = vmul.f32 %v4266_v17, %v1061_v7  ;;  %1540 = vrot.lane.b32.xlu0 %v5033_v10, %s4583_s2 }
 0x452   : > { %v4268_v25 = vpop.eup %4267  ;;  %1528 = vrot.lane.b32.xlu1 %v4971_v24, %s4583_s2 }
 0x453   : > { %v1069_v27 = vsub.f32 2.0, %v1067_v22  ;;  %v1068_v29 = vmul.f32 %v4268_v25, %v1064_v15 }
 0x455   : > { %v1071_v35 = vmul.f32 %v4266_v17, %v1069_v27  ;;  %v1070_v39 = vsub.f32 2.0, %v1068_v29  ;;  %1542 = vrot.lane.b32.xlu0 %v5047_v21, %s4583_s2 }
 0x456   : > { %1530 = vrot.lane.b32.xlu1 %v4975_v30, %s4583_s2 }
 0x457   : > { %v1072_v28 = vmul.f32 %v4268_v25, %v1070_v39  ;;  %v1073_v37 = vmul.f32 %v5162_v42, %v1071_v35  ;;  %v1074_v24 = vmul.f32 %v5164_v47, %v1071_v35 }
 0x459   : > { %v1075_v7 = vmul.f32 %v5166_v1, %v1072_v28  ;;  %1544 = vrot.lane.b32.xlu0 %v5059_v31, %s4583_s2  ;;  %v1076_v15 = vmul.f32 %v5168_v14, %v1072_v28  ;;  %v1333_v1 = vpop.permute.xlu0 %1332  ;;  %v1351_v14 = vpop.permute.xlu1 %1350 }
 0x45a   : > { %1514 = vrot.lane.b32.xlu1 %v4955_v0, %s4583_s2 }
 0x45b   : > { %v1078_v17 = vpack.c.bf16 %v1076_v15, %v1074_v24  ;;  %v1077_v22 = vpack.c.bf16 %v1075_v7, %v1073_v37  ;;  %v4241_v15 = vld [vmem:[#allocation10 + $0x8] sm:$0xff]  }
 0x45d   : > { %1546 = vrot.lane.b32.xlu0 %v5069_v41, %s4583_s2  ;;  %1111 = vmatprep.mubr.bf16.mxu0 %v1078_v17 }
 0x45e   : > { %1112 = vmatmul.mubr.bf16.vlgmr.msra.gmra.mrb[8].mxu0 %v1077_v22 }
 0x45f   : > { %3684 = vmatpush3.bf16.msra.mxu0 %v5146_v49 }
 0x460   : > { %3685 = vmatprep.subr.bf16.mxu0 %v5148_v50 }
 0x463   : > { %3686 = vmatpush3.bf16.msra.mxu0 %v5152_v55  ;;  %v4242_v55 = vld [vmem:[#allocation10] sm:$0xff]  }
 0x464   : > { %3687 = vmatprep.subr.bf16.mxu0 %v5150_v51  ;;  %3988 = vmatpush3.bf16.msra.mxu1 %v4242_v55 }
 0x467   : > { %3688 = vmatpush3.bf16.msra.mxu0 %v5160_v58  ;;  %v5929_v58 = vmov 0.0  }
 0x468   : > { %3689 = vmatprep.subr.bf16.mxu0 %v5158_v57 }
 0x46b   : > { %3690 = vmatpush3.bf16.msra.mxu0 %v5178_v16 }
 0x46c   : > { %3691 = vmatprep.subr.bf16.mxu0 %v5180_v19 }
 0x46f   : > { %3692 = vmatpush3.bf16.msra.mxu0 %v1331_v40 }
 0x470   : > { %3693 = vmatprep.subr.bf16.mxu0 %v1349_v2 }
 0x473   : > { %3694 = vmatpush3.bf16.msra.mxu0 %v1333_v1 }
 0x474   : > { %3695 = vmatprep.subr.bf16.mxu0 %v1351_v14 }
 0x4b0   : > { %v1288_v24 = vpop.xlane.xlu0 %1287 }
 0x4b1   : > { %4269 = vrcp.f32 %v1288_v24 }
 0x4b2   : > { %v1291_v49 = vpop.xlane.xlu1 %1290 }
 0x4b3   : > { %4271 = vrcp.f32 %v1291_v49 }
 0x4b4   : > { %v1335_v50 = vpop.permute.xlu0 %1334 }
 0x4b5   : > { %3696 = vmatpush3.bf16.msra.mxu0 %v1335_v50 }
 0x4b6   : > { %v1353_v51 = vpop.permute.xlu1 %1352 }
 0x4b7   : > { %3697 = vmatprep.subr.bf16.mxu0 %v1353_v51 }
 0x4b8   : > { %v1337_v57 = vpop.permute.xlu0 %1336 }
 0x4b9   : > { %3698 = vmatpush3.bf16.msra.mxu0 %v1337_v57 }
 0x4ba   : > { %3981 = vmatprep.subr.bf16.mxu0 %v5929_v58 }
 0x4bb   : > { %v4270_v42 = vpop.eup %4269 }
 0x4bc   : > { %v1294_v47 = vmul.f32 %v4270_v42, %v1288_v24  ;;  %v1533_v17 = vpop.permute.xlu0 %1532 }
 0x4bd   : > { %v4272_v16 = vpop.eup %4271 }
 0x4be   : > { %v1296_v19 = vsub.f32 2.0, %v1294_v47  ;;  %v1295_v40 = vmul.f32 %v4272_v16, %v1291_v49 }
 0x4c0   : > { %v1298_v2 = vmul.f32 %v4270_v42, %v1296_v19  ;;  %v1297_v25 = vsub.f32 2.0, %v1295_v40 }
 0x4c2   : > { %v1299_v27 = vmul.f32 %v4272_v16, %v1297_v25  ;;  %v1300_v29 = vmul.f32 %v5182_v5, %v1298_v2  ;;  %v1301_v39 = vmul.f32 %v5184_v11, %v1298_v2 }
 0x4c4   : > { %v1302_v35 = vmul.f32 %v5186_v34, %v1299_v27  ;;  %v1303_v28 = vmul.f32 %v5190_v33, %v1299_v27  ;;  %v1517_v33 = vpop.permute.xlu1 %1516 }
 0x4c6   : > { %v1305_v37 = vpack.c.bf16 %v1303_v28, %v1301_v39  ;;  %v1304_v7 = vpack.c.bf16 %v1302_v35, %v1300_v29  ;;  %v1552_v35 = vsel %vm946_vm1, %v1517_v33, 0  ;;  %v1535_v28 = vpop.permute.xlu0 %1534 }
 0x4c8   : > { %1402 = vmatprep.mubr.bf16.mxu0 %v1305_v37  ;;  %v1519_v49 = vpop.permute.xlu1 %1518 }
 0x4c9   : > { %1403 = vmatmul.mubr.bf16.vlgmr.msra.gmra.mrb[12].mxu0 %v1304_v7  ;;  %v1555_v37 = vsel %vm946_vm1, %v1519_v49, 0 }
 0x4ca   : > { %3982 = vmatpush3.bf16.msra.mxu0 %v4241_v15  ;;  %3983 = vmatprep.mubr.msk.bf16.mxu0 %vm4580_vm0, %v5929_v58  ;;  %v1537_v7 = vpop.permute.xlu0 %1536 }
 0x4cb   : > { %4045 = vmatprep.subr.msk.bf16.mxu0 %vm946_vm1, %v1533_v17 }
 0x4cc   : > { %v1521_v50 = vpop.permute.xlu1 %1520 }
 0x4cd   : > { %v1558_v15 = vsel %vm946_vm1, %v1521_v50, 0 }
 0x4ce   : > { %v1539_v17 = vpop.permute.xlu0 %1538 }
 0x4d0   : > { %v1523_v51 = vpop.permute.xlu1 %1522 }
 0x4d4   : > { %v1525_v55 = vpop.permute.xlu1 %1524 }
 0x4d8   : > { %v1527_v57 = vpop.permute.xlu1 %1526 }
 0x4dc   : > { %v1529_v42 = vpop.permute.xlu1 %1528 }
 0x4e0   : > { %v1531_v19 = vpop.permute.xlu1 %1530 }
 0x4e1   : > { %v1573_v49 = vsel %vm946_vm1, %v1531_v19, 0 }
 0x4e4   : > { %v1515_v39 = vpop.permute.xlu1 %1514 }
 0x531   : > { %v3659_v22 = vpop.f32.mrb[8].mxu0 }
 0x532   : > { %v3660_v5 = vpop.f32.mrb[9].mxu0 }
 0x533   : > { %v3661_v1 = vadd.f32 %v3660_v5, %v3659_v22  ;;  %v3662_v34 = vpop.f32.mrb[10].mxu0  ;;  %v1561_v22 = vsel %vm946_vm1, %v1523_v51, 0  ;;  %v1541_v5 = vpop.permute.xlu0 %1540 }
 0x534   : > { %v3663_v14 = vpop.f32.mrb[11].mxu0 }
 0x535   : > { %v3664_v11 = vadd.f32 %v3663_v14, %v3662_v34  ;;  %v1567_v14 = vsel %vm946_vm1, %v1527_v57, 0 }
 0x537   : > { %v1120_v24 = vpack.c.bf16 %v3664_v11, %v3661_v1  ;;  %v1564_v1 = vsel %vm946_vm1, %v1525_v55, 0  ;;  %v1543_v34 = vpop.permute.xlu0 %1542 }
 0x539   : > { %3990 = vmatmul.mubr.msk.bf16.vlgmr.msra.gmra.mrb[68].mxu1 %vm946_vm1, %v1120_v24  ;;  %v1570_v24 = vsel %vm946_vm1, %v1529_v42, 0 }
 0x53b   : > { %v1545_v11 = vpop.permute.xlu0 %1544 }
 0x53f   : > { %v1547_v33 = vpop.permute.xlu0 %1546 }
 0x59c   : > { %v3699_v47 = vpop.f32.mrb[12].mxu0 }
 0x59d   : > { %v3700_v16 = vpop.f32.mrb[13].mxu0 }
 0x59e   : > { %v3701_v40 = vadd.f32 %v3700_v16, %v3699_v47  ;;  %v3702_v2 = vpop.f32.mrb[14].mxu0 }
 0x59f   : > { %v3703_v25 = vpop.f32.mrb[15].mxu0 }
 0x5a0   : > { %v3704_v27 = vadd.f32 %v3703_v25, %v3702_v2 }
 0x5a2   : > { %v1411_v29 = vpack.c.bf16 %v3704_v27, %v3701_v40 }
 0x5a4   : > { %3984 = vmatmul.mubr.msk.bf16.vlgmr.msra.gmra.mrb[16].mxu0 %vm946_vm1, %v1411_v29 }
 0x5a5   : > { %3710 = vmatpush3.bf16.xpose.msra.mxu0 %v1552_v35  ;;  %3725 = vmatprep.mubr.msk.bf16.mxu0 %vm946_vm1, %v1515_v39 }
 0x5a6   : > { %4046 = vmatprep.subr.msk.bf16.mxu0 %vm946_vm1, %v1535_v28 }
 0x5ad   : > { %3712 = vmatpush3.bf16.xpose.msra.mxu0 %v1555_v37 }
 0x5ae   : > { %4047 = vmatprep.subr.msk.bf16.mxu0 %vm946_vm1, %v1537_v7 }
 0x5b5   : > { %3714 = vmatpush3.bf16.xpose.msra.mxu0 %v1558_v15 }
 0x5b6   : > { %4048 = vmatprep.subr.msk.bf16.mxu0 %vm946_vm1, %v1539_v17 }
 0x5bd   : > { %3716 = vmatpush3.bf16.xpose.msra.mxu0 %v1561_v22  ;;  %v5930_v22 = vld [vmem:[#allocation17_spill] sm:$0xff] }
 0x5be   : > { %4049 = vmatprep.subr.msk.bf16.mxu0 %vm946_vm1, %v1541_v5 }
 0x5c5   : > { %3718 = vmatpush3.bf16.xpose.msra.mxu0 %v1564_v1 }
 0x5c6   : > { %4050 = vmatprep.subr.msk.bf16.mxu0 %vm946_vm1, %v1543_v34 }
 0x5cd   : > { %3720 = vmatpush3.bf16.xpose.msra.mxu0 %v1567_v14 }
 0x5ce   : > { %4051 = vmatprep.subr.msk.bf16.mxu0 %vm946_vm1, %v1545_v11 }
 0x5d5   : > { %3722 = vmatpush3.bf16.xpose.msra.mxu0 %v1570_v24 }
 0x5d6   : > { %4052 = vmatprep.subr.msk.bf16.mxu0 %vm946_vm1, %v1547_v33 }
 0x5dd   : > { %3724 = vmatpush3.bf16.xpose.msra.mxu0 %v1573_v49 }
 0x5e4   : > { %3726 = vmatmul.mubr.msk.bf16.vlgmr.msra.gmra.mrb[20].mxu0 %vm946_vm1, %v1515_v39 }
 0x60c   : > { %v1507_v50 = vpop.f32.mrb[68].mxu1 }
 0x60d   : > { %v3991_v51 = vpop.f32.mrb[69].mxu1 }
 0x60e   : > { %v1510_v55 = vpop.f32.mrb[70].mxu1 }
 0x60f   : > { %v3992_v47 = vpop.f32.mrb[71].mxu1 }
 0x677   : > { %v1457_v57 = vpop.f32.mrb[16].mxu0 }
 0x678   : > { %v5273_v16 = vadd.f32 %v1507_v50, %v1457_v57  ;;  %v3985_v40 = vpop.f32.mrb[17].mxu0 }
 0x679   : > { %v1460_v2 = vpop.f32.mrb[18].mxu0 }
 0x67a   : > { %v5275_v25 = vadd.f32 %v1510_v55, %v1460_v2  ;;  %v3986_v42 = vpop.f32.mrb[19].mxu0 }
 0x6b7   : > { %v1633_v27 = vpop.f32.mrb[20].mxu0 }
 0x6b8   : > { %v1634_v29 = vadd.f32 %v1633_v27, %v5126_v60  ;;  %v1635_v35 = vpop.f32.mrb[21].mxu0 }
 0x6b9   : > { %v1636_v19 = vadd.f32 %v1635_v35, %v5128_v61  ;;  %v1637_v28 = vpop.f32.mrb[22].mxu0 }
 0x6ba   : > { %v1638_v39 = vadd.f32 %v1637_v28, %v5130_v4  ;;  %v1639_v37 = vpop.f32.mrb[23].mxu0 }
 0x6bb   : > { %v1640_v7 = vadd.f32 %v1639_v37, %v5133_v9  ;;  %v1642_v15 = vmax.f32 %v1634_v29, %v1636_v19 }
 0x6bd   : > { %1643 = vmax.xlane.f32.xlu0 %v1642_v15  ;;  %v1645_v17 = vmax.f32 %v1638_v39, %v1640_v7 }
 0x6bf   : > { %1646 = vmax.xlane.f32.xlu1 %v1645_v17 }
 0x6d0   : > { %1696 = vrot.lane.b32.xlu1 %v4981_v38, %s4583_s2 }
 0x6d3   : > { %1680 = vrot.lane.b32.xlu0 %v4941_v48, %s4583_s2 }
 0x6d4   : > { %1698 = vrot.lane.b32.xlu1 %v4993_v45, %s4583_s2 }
 0x6d7   : > { %1700 = vrot.lane.b32.xlu0 %v5007_v56, %s4583_s2 }
 0x6d8   : > { %1682 = vrot.lane.b32.xlu1 %v4947_v54, %s4583_s2 }
 0x6db   : > { %1702 = vrot.lane.b32.xlu0 %v5021_v3, %s4583_s2 }
 0x6dc   : > { %1684 = vrot.lane.b32.xlu1 %v4953_v62, %s4583_s2 }
 0x6df   : > { %1704 = vrot.lane.b32.xlu0 %v5035_v13, %s4583_s2 }
 0x6e0   : > { %1686 = vrot.lane.b32.xlu1 %v4961_v8, %s4583_s2 }
 0x6e3   : > { %1706 = vrot.lane.b32.xlu0 %v5049_v23, %s4583_s2 }
 0x6e4   : > { %1688 = vrot.lane.b32.xlu1 %v5930_v22, %s4583_s2 }
 0x6e8   : > { %1690 = vrot.lane.b32.xlu1 %v4969_v20, %s4583_s2 }
 0x6ec   : > { %1692 = vrot.lane.b32.xlu1 %v4973_v26, %s4583_s2 }
 0x6f0   : > { %1694 = vrot.lane.b32.xlu1 %v4977_v32, %s4583_s2 }
 0x6f4   : > { %1842 = vrot.lane.b32.xlu1 %v4979_v36, %s4584_s12 }
 0x6f8   : > { %1844 = vrot.lane.b32.xlu1 %v4991_v43, %s4584_s12 }
 0x6fc   : > { %1846 = vrot.lane.b32.xlu1 %v5005_v53, %s4584_s12 }
 0x700   : > { %1848 = vrot.lane.b32.xlu1 %v5019_v63, %s4584_s12 }
 0x704   : > { %1850 = vrot.lane.b32.xlu1 %v5033_v10, %s4584_s12 }
 0x708   : > { %1852 = vrot.lane.b32.xlu1 %v5047_v21, %s4584_s12 }
 0x70c   : > { %1854 = vrot.lane.b32.xlu1 %v5059_v31, %s4584_s12 }
 0x710   : > { %1856 = vrot.lane.b32.xlu1 %v5069_v41, %s4584_s12 }
 0x74a   : > { %v1644_v5 = vpop.xlane.xlu0 %1643 }
 0x74b   : > { %v1648_v1 = vsub.f32 %v1634_v29, %v1644_v5  ;;  %v1649_v34 = vsub.f32 %v1636_v19, %v1644_v5 }
 0x74c   : > { %v1647_v14 = vpop.xlane.xlu1 %1646 }
 0x74d   : > { %v1652_v11 = vmul.f32 1.442695, %v1648_v1  ;;  %v1654_v24 = vmul.f32 1.442695, %v1649_v34  ;;  %v1650_v33 = vsub.f32 %v1638_v39, %v1647_v14  ;;  %v1651_v49 = vsub.f32 %v1640_v7, %v1647_v14  ;;  %v5931_v34 = vld [vmem:[#allocation19_spill] sm:$0xff]  ;;  %v5932_v14 = vld [vmem:[#allocation18_spill] sm:$0xff] }
 0x74e   : > { %v1681_v50 = vpop.permute.xlu0 %1680 }
 0x74f   : > { %4273 = vpow2.f32 %v1652_v11  ;;  %v1656_v51 = vmul.f32 1.442695, %v1650_v33  ;;  %v1658_v55 = vmul.f32 1.442695, %v1651_v49 }
 0x750   : > { %4275 = vpow2.f32 %v1654_v24  ;;  %v1697_v47 = vpop.permute.xlu1 %1696 }
 0x751   : > { %4277 = vpow2.f32 %v1656_v51  ;;  %3727 = vmatprep.subr.bf16.mxu1 %v1697_v47 }
 0x752   : > { %4279 = vpow2.f32 %v1658_v55  ;;  %3728 = vmatpush3.bf16.msra.mxu1 %v1681_v50  ;;  %v1701_v57 = vpop.permute.xlu0 %1700 }
 0x754   : > { %v1699_v40 = vpop.permute.xlu1 %1698 }
 0x755   : > { %3729 = vmatprep.subr.bf16.mxu1 %v1699_v40 }
 0x756   : > { %v1703_v27 = vpop.permute.xlu0 %1702 }
 0x758   : > { %v1683_v2 = vpop.permute.xlu1 %1682 }
 0x759   : > { %v4274_v42 = vpop.eup %4273  ;;  %3730 = vmatpush3.bf16.msra.mxu1 %v1683_v2 }
 0x75a   : > { %v4276_v29 = vpop.eup %4275  ;;  %3731 = vmatprep.subr.bf16.mxu1 %v1701_v57  ;;  %v1705_v37 = vpop.permute.xlu0 %1704 }
 0x75b   : > { %v4278_v35 = vpop.eup %4277  ;;  %v1660_v19 = vadd.f32 %v4276_v29, %v4274_v42 }
 0x75c   : > { %v4280_v28 = vpop.eup %4279  ;;  %v1685_v39 = vpop.permute.xlu1 %1684 }
 0x75d   : > { %1661 = vadd.xlane.f32.xlu0 %v1660_v19  ;;  %3732 = vmatpush3.bf16.msra.mxu1 %v1685_v39  ;;  %v1663_v7 = vadd.f32 %v4280_v28, %v4278_v35 }
 0x75e   : > { %3733 = vmatprep.subr.bf16.mxu1 %v1703_v27  ;;  %v1707_v5 = vpop.permute.xlu0 %1706 }
 0x760   : > { %v1687_v15 = vpop.permute.xlu1 %1686 }
 0x761   : > { %1664 = vadd.xlane.f32.xlu0 %v1663_v7  ;;  %3734 = vmatpush3.bf16.msra.mxu1 %v1687_v15 }
 0x762   : > { %3735 = vmatprep.subr.bf16.mxu1 %v1705_v37 }
 0x764   : > { %v1689_v17 = vpop.permute.xlu1 %1688 }
 0x765   : > { %3736 = vmatpush3.bf16.msra.mxu1 %v1689_v17 }
 0x766   : > { %3737 = vmatprep.subr.bf16.mxu1 %v1707_v5 }
 0x768   : > { %v1691_v1 = vpop.permute.xlu1 %1690 }
 0x769   : > { %3738 = vmatpush3.bf16.msra.mxu1 %v1691_v1 }
 0x76c   : > { %v1693_v33 = vpop.permute.xlu1 %1692 }
 0x770   : > { %v1695_v47 = vpop.permute.xlu1 %1694 }
 0x777   : > { %1708 = vrot.lane.b32.xlu0 %v5931_v34, %s4583_s2 }
 0x77b   : > { %1710 = vrot.lane.b32.xlu0 %v5071_v44, %s4583_s2  ;;  %s4495_s2 = scalar_lea.vmem %s4494_s27, 512 }
 0x77c   : > { %p4497_p6 = scmp.lt.s32.totalorder %s4495_s2, %s4489_s25 }
 0x77e   : > { %p4498_p10 = por %p4497_p6, %p4496_p8 }
 0x77f   : > { %1826 = vrot.lane.b32.xlu0 %v4939_v46, %s4584_s12 }
 0x780   : > { %p4499_p3 = pnand %p4498_p10, %p4492_p0 }
 0x783   : > { %1828 = vrot.lane.b32.xlu0 %v4945_v52, %s4584_s12 }
 0x787   : > { %1830 = vrot.lane.b32.xlu0 %v4951_v59, %s4584_s12 }
 0x78b   : > { %1832 = vrot.lane.b32.xlu0 %v4959_v6, %s4584_s12 }
 0x78f   : > { %1834 = vrot.lane.b32.xlu0 %v4963_v12, %s4584_s12 }
 0x793   : > { %1836 = vrot.lane.b32.xlu0 %v4967_v18, %s4584_s12 }
 0x797   : > { %1838 = vrot.lane.b32.xlu0 %v5932_v14, %s4584_s12 }
 0x79b   : > { %1840 = vrot.lane.b32.xlu0 %v4975_v30, %s4584_s12 }
 0x79f   : > { %1824 = vrot.lane.b32.xlu0 %v4955_v0, %s4584_s12 }
 0x7ea   : > { %v1662_v11 = vpop.xlane.xlu0 %1661 }
 0x7eb   : > { %4281 = vrcp.f32 %v1662_v11 }
 0x7ee   : > { %v1665_v24 = vpop.xlane.xlu0 %1664 }
 0x7ef   : > { %4283 = vrcp.f32 %v1665_v24 }
 0x7f2   : > { %v1709_v49 = vpop.permute.xlu0 %1708 }
 0x7f3   : > { %3739 = vmatprep.subr.bf16.mxu1 %v1709_v49 }
 0x7f4   : > { %3740 = vmatpush3.bf16.msra.mxu1 %v1693_v33  ;;  %v4243_v33 = vld [vmem:[#allocation10 + $0x10] sm:$0xff]  }
 0x7f5   : > { %v4282_v50 = vpop.eup %4281 }
 0x7f6   : > { %v1668_v51 = vmul.f32 %v4282_v50, %v1662_v11  ;;  %v1711_v55 = vpop.permute.xlu0 %1710  ;;  %v1843_v11 = vpop.permute.xlu1 %1842 }
 0x7f7   : > { %3741 = vmatprep.subr.bf16.mxu1 %v1711_v55 }
 0x7f8   : > { %v1670_v57 = vsub.f32 2.0, %v1668_v51  ;;  %3742 = vmatpush3.bf16.msra.mxu1 %v1695_v47 }
 0x7f9   : > { %v4284_v40 = vpop.eup %4283  ;;  %3993 = vmatprep.subr.bf16.mxu1 %v5929_v58 }
 0x7fa   : > { %v1669_v2 = vmul.f32 %v4284_v40, %v1665_v24  ;;  %v1672_v27 = vmul.f32 %v4282_v50, %v1670_v57  ;;  %v1827_v24 = vpop.permute.xlu0 %1826 }
 0x7fc   : > { %v1671_v19 = vsub.f32 2.0, %v1669_v2  ;;  %v1674_v37 = vmul.f32 %v4274_v42, %v1672_v27  ;;  %v1675_v15 = vmul.f32 %v4276_v29, %v1672_v27 }
 0x7fe   : > { %v1673_v39 = vmul.f32 %v4284_v40, %v1671_v19  ;;  %v1829_v49 = vpop.permute.xlu0 %1828 }
 0x800   : > { %v1676_v7 = vmul.f32 %v4278_v35, %v1673_v39  ;;  %v1677_v17 = vmul.f32 %v4280_v28, %v1673_v39  ;;  %v1862_v39 = vsel %vm946_vm1, %v1827_v24, 0 }
 0x802   : > { %v1679_v5 = vpack.c.bf16 %v1677_v17, %v1675_v15  ;;  %v1678_v1 = vpack.c.bf16 %v1676_v7, %v1674_v37  ;;  %v1831_v50 = vpop.permute.xlu0 %1830  ;;  %v1845_v7 = vpop.permute.xlu1 %1844  ;;  %v1865_v15 = vsel %vm946_vm1, %v1829_v49, 0 }
 0x804   : > { %1760 = vmatprep.mubr.bf16.mxu1 %v1679_v5  ;;  %v1868_v5 = vsel %vm946_vm1, %v1831_v50, 0 }
 0x805   : > { %1761 = vmatmul.mubr.bf16.vlgmr.msra.gmra.mrb[72].mxu1 %v1678_v1 }
 0x806   : > { %3994 = vmatpush3.bf16.msra.mxu1 %v4243_v33  ;;  %3995 = vmatprep.mubr.msk.bf16.mxu1 %vm4580_vm0, %v5929_v58  ;;  %v1833_v51 = vpop.permute.xlu0 %1832  ;;  %v1847_v17 = vpop.permute.xlu1 %1846 }
 0x807   : > { %4053 = vmatprep.subr.msk.bf16.mxu1 %vm946_vm1, %v1843_v11  ;;  %v1871_v33 = vsel %vm946_vm1, %v1833_v51, 0 }
 0x80a   : > { %v1835_v42 = vpop.permute.xlu0 %1834  ;;  %v1849_v1 = vpop.permute.xlu1 %1848 }
 0x80b   : > { %v1874_v24 = vsel %vm946_vm1, %v1835_v42, 0 }
 0x80e   : > { %v1837_v35 = vpop.permute.xlu0 %1836  ;;  %v1851_v11 = vpop.permute.xlu1 %1850 }
 0x80f   : > { %v1877_v49 = vsel %vm946_vm1, %v1837_v35, 0 }
 0x812   : > { %v1839_v29 = vpop.permute.xlu0 %1838 }
 0x813   : > { %v1880_v50 = vsel %vm946_vm1, %v1839_v29, 0 }
 0x816   : > { %v1841_v47 = vpop.permute.xlu0 %1840 }
 0x817   : > { %v1883_v51 = vsel %vm946_vm1, %v1841_v47, 0 }
 0x81a   : > { %v1825_v37 = vpop.permute.xlu0 %1824 }
 0x8d8   : > { %v3743_v28 = vpop.f32.mrb[72].mxu1 }
 0x8d9   : > { %v3744_v55 = vpop.f32.mrb[73].mxu1 }
 0x8da   : > { %v3745_v57 = vadd.f32 %v3744_v55, %v3743_v28  ;;  %v3746_v40 = vpop.f32.mrb[74].mxu1  ;;  %v1853_v28 = vpop.permute.xlu1 %1852 }
 0x8db   : > { %v3747_v2 = vpop.f32.mrb[75].mxu1 }
 0x8dc   : > { %v3748_v27 = vadd.f32 %v3747_v2, %v3746_v40 }
 0x8de   : > { %v1769_v19 = vpack.c.bf16 %v3748_v27, %v3745_v57  ;;  %v1855_v55 = vpop.permute.xlu1 %1854 }
 0x8e0   : > { %3996 = vmatmul.mubr.msk.bf16.vlgmr.msra.gmra.mrb[76].mxu1 %vm946_vm1, %v1769_v19 }
 0x8e1   : > { %3752 = vmatpush3.bf16.xpose.msra.mxu1 %v1862_v39  ;;  %3767 = vmatprep.mubr.msk.bf16.mxu1 %vm946_vm1, %v1825_v37 }
 0x8e2   : > { %4054 = vmatprep.subr.msk.bf16.mxu1 %vm946_vm1, %v1845_v7  ;;  %v1857_v57 = vpop.permute.xlu1 %1856 }
 0x8e9   : > { %3754 = vmatpush3.bf16.xpose.msra.mxu1 %v1865_v15 }
 0x8ea   : > { %4055 = vmatprep.subr.msk.bf16.mxu1 %vm946_vm1, %v1847_v17 }
 0x8f1   : > { %3756 = vmatpush3.bf16.xpose.msra.mxu1 %v1868_v5 }
 0x8f2   : > { %4056 = vmatprep.subr.msk.bf16.mxu1 %vm946_vm1, %v1849_v1 }
 0x8f9   : > { %3758 = vmatpush3.bf16.xpose.msra.mxu1 %v1871_v33 }
 0x8fa   : > { %4057 = vmatprep.subr.msk.bf16.mxu1 %vm946_vm1, %v1851_v11 }
 0x901   : > { %3760 = vmatpush3.bf16.xpose.msra.mxu1 %v1874_v24 }
 0x902   : > { %4058 = vmatprep.subr.msk.bf16.mxu1 %vm946_vm1, %v1853_v28 }
 0x909   : > { %3762 = vmatpush3.bf16.xpose.msra.mxu1 %v1877_v49 }
 0x90a   : > { %4059 = vmatprep.subr.msk.bf16.mxu1 %vm946_vm1, %v1855_v55 }
 0x911   : > { %3764 = vmatpush3.bf16.xpose.msra.mxu1 %v1880_v50 }
 0x912   : > { %4060 = vmatprep.subr.msk.bf16.mxu1 %vm946_vm1, %v1857_v57 }
 0x919   : > { %3766 = vmatpush3.bf16.xpose.msra.mxu1 %v1883_v51 }
 0x920   : > { %3768 = vmatmul.mubr.msk.bf16.vlgmr.msra.gmra.mrb[80].mxu1 %vm946_vm1, %v1825_v37 }
 0x9b3   : > { %v1815_v42 = vpop.f32.mrb[76].mxu1 }
 0x9b4   : > { %v5370_v40 = vadd.f32 %v1815_v42, %v5273_v16  ;;  %v3997_v35 = vpop.f32.mrb[77].mxu1 }
 0x9b5   : > { %v1818_v2 = vpop.f32.mrb[78].mxu1 }
 0x9b6   : > { %v5373_v27 = vadd.f32 %v1818_v2, %v5275_v25  ;;  %v3998_v19 = vpop.f32.mrb[79].mxu1 }
 0x9f3   : > { %v1943_v29 = vpop.f32.mrb[80].mxu1 }
 0x9f4   : > { %v1944_v39 = vadd.f32 %v1943_v29, %v5126_v60  ;;  %v1945_v7 = vpop.f32.mrb[81].mxu1 }
 0x9f5   : > { %v1946_v15 = vadd.f32 %v1945_v7, %v5128_v61  ;;  %v1947_v47 = vpop.f32.mrb[82].mxu1 }
 0x9f6   : > { %v1948_v17 = vadd.f32 %v1947_v47, %v5130_v4  ;;  %v1949_v37 = vpop.f32.mrb[83].mxu1 }
 0x9f7   : > { %v1950_v5 = vadd.f32 %v1949_v37, %v5133_v9  ;;  %v1952_v16 = vmax.f32 %v1944_v39, %v1946_v15 }
 0x9f9   : > { %1953 = vmax.xlane.f32.xlu1 %v1952_v16  ;;  %v1955_v1 = vmax.f32 %v1948_v17, %v1950_v5 }
 0x9fb   : > { %1956 = vmax.xlane.f32.xlu0 %v1955_v1 }
 0xa0a   : > { %1990 = vrot.lane.b32.xlu1 %v4941_v48, %s4584_s12 }
 0xa0e   : > { %2008 = vrot.lane.b32.xlu1 %v4993_v45, %s4584_s12 }
 0xa11   : > { %2006 = vrot.lane.b32.xlu0 %v4981_v38, %s4584_s12 }
 0xa12   : > { %2010 = vrot.lane.b32.xlu1 %v5007_v56, %s4584_s12 }
 0xa15   : > { %1992 = vrot.lane.b32.xlu0 %v4947_v54, %s4584_s12 }
 0xa16   : > { %2012 = vrot.lane.b32.xlu1 %v5021_v3, %s4584_s12 }
 0xa19   : > { %1994 = vrot.lane.b32.xlu0 %v4953_v62, %s4584_s12 }
 0xa1a   : > { %2014 = vrot.lane.b32.xlu1 %v5035_v13, %s4584_s12 }
 0xa1d   : > { %1996 = vrot.lane.b32.xlu0 %v4961_v8, %s4584_s12 }
 0xa1e   : > { %2016 = vrot.lane.b32.xlu1 %v5049_v23, %s4584_s12 }
 0xa21   : > { %1998 = vrot.lane.b32.xlu0 %v5930_v22, %s4584_s12 }
 0xa22   : > { %2018 = vrot.lane.b32.xlu1 %v5931_v34, %s4584_s12 }
 0xa25   : > { %2000 = vrot.lane.b32.xlu0 %v4969_v20, %s4584_s12 }
 0xa86   : > { %v1954_v25 = vpop.xlane.xlu1 %1953 }
 0xa87   : > { %v1958_v33 = vsub.f32 %v1944_v39, %v1954_v25  ;;  %v1959_v11 = vsub.f32 %v1946_v15, %v1954_v25 }
 0xa88   : > { %v1957_v24 = vpop.xlane.xlu0 %1956 }
 0xa89   : > { %v1962_v28 = vmul.f32 1.442695, %v1958_v33  ;;  %v1964_v49 = vmul.f32 1.442695, %v1959_v11  ;;  %v1960_v55 = vsub.f32 %v1948_v17, %v1957_v24  ;;  %v1961_v50 = vsub.f32 %v1950_v5, %v1957_v24 }
 0xa8a   : > { %v1991_v57 = vpop.permute.xlu1 %1990 }
 0xa8b   : > { %4285 = vpow2.f32 %v1962_v28  ;;  %v1966_v51 = vmul.f32 1.442695, %v1960_v55  ;;  %v1968_v42 = vmul.f32 1.442695, %v1961_v50 }
 0xa8c   : > { %4287 = vpow2.f32 %v1964_v49  ;;  %v2007_v35 = vpop.permute.xlu0 %2006 }
 0xa8d   : > { %4289 = vpow2.f32 %v1966_v51  ;;  %3769 = vmatprep.subr.bf16.mxu0 %v2007_v35 }
 0xa8e   : > { %4291 = vpow2.f32 %v1968_v42  ;;  %3770 = vmatpush3.bf16.msra.mxu0 %v1991_v57  ;;  %v2009_v2 = vpop.permute.xlu1 %2008 }
 0xa8f   : > { %3771 = vmatprep.subr.bf16.mxu0 %v2009_v2 }
 0xa90   : > { %v1993_v19 = vpop.permute.xlu0 %1992 }
 0xa92   : > { %3772 = vmatpush3.bf16.msra.mxu0 %v1993_v19  ;;  %v2011_v29 = vpop.permute.xlu1 %2010 }
 0xa93   : > { %3773 = vmatprep.subr.bf16.mxu0 %v2011_v29 }
 0xa94   : > { %v1995_v39 = vpop.permute.xlu0 %1994 }
 0xa95   : > { %v5405_v7 = vpop.eup %4285 }
 0xa96   : > { %v5407_v15 = vpop.eup %4287  ;;  %3774 = vmatpush3.bf16.msra.mxu0 %v1995_v39  ;;  %v2013_v47 = vpop.permute.xlu1 %2012 }
 0xa97   : > { %v4290_v17 = vpop.eup %4289  ;;  %3775 = vmatprep.subr.bf16.mxu0 %v2013_v47  ;;  %v1970_v37 = vadd.f32 %v5407_v15, %v5405_v7 }
 0xa98   : > { %v4292_v5 = vpop.eup %4291  ;;  %v1997_v16 = vpop.permute.xlu0 %1996 }
 0xa99   : > { %1971 = vadd.xlane.f32.xlu0 %v1970_v37  ;;  %v1973_v1 = vadd.f32 %v4292_v5, %v4290_v17 }
 0xa9a   : > { %3776 = vmatpush3.bf16.msra.mxu0 %v1997_v16  ;;  %v2015_v25 = vpop.permute.xlu1 %2014 }
 0xa9b   : > { %1974 = vadd.xlane.f32.xlu1 %v1973_v1  ;;  %3777 = vmatprep.subr.bf16.mxu0 %v2015_v25 }
 0xa9c   : > { %v1999_v33 = vpop.permute.xlu0 %1998 }
 0xa9e   : > { %3778 = vmatpush3.bf16.msra.mxu0 %v1999_v33  ;;  %v2017_v11 = vpop.permute.xlu1 %2016 }
 0xa9f   : > { %3779 = vmatprep.subr.bf16.mxu0 %v2017_v11 }
 0xaa0   : > { %v2001_v24 = vpop.permute.xlu0 %2000 }
 0xaa2   : > { %3780 = vmatpush3.bf16.msra.mxu0 %v2001_v24  ;;  %v2019_v28 = vpop.permute.xlu1 %2018 }
 0xaa3   : > { %3781 = vmatprep.subr.bf16.mxu0 %v2019_v28  ;;  %v4244_v28 = vld [vmem:[#allocation10 + $0x18] sm:$0xff]  }
 0xaac   : > { %2020 = vrot.lane.b32.xlu1 %v5071_v44, %s4584_s12 }
 0xaaf   : > { %2002 = vrot.lane.b32.xlu0 %v4973_v26, %s4584_s12 }
 0xab0   : > { %2136 = vrot.lane.b32.xlu1 %v4939_v46, %s4585_s17 }
 0xab3   : > { %2004 = vrot.lane.b32.xlu0 %v4977_v32, %s4584_s12 }
 0xab4   : > { %2138 = vrot.lane.b32.xlu1 %v4945_v52, %s4585_s17 }
 0xab7   : > { %2152 = vrot.lane.b32.xlu0 %v4979_v36, %s4585_s17 }
 0xab8   : > { %2140 = vrot.lane.b32.xlu1 %v4951_v59, %s4585_s17 }
 0xabb   : > { %2154 = vrot.lane.b32.xlu0 %v4991_v43, %s4585_s17 }
 0xabc   : > { %2142 = vrot.lane.b32.xlu1 %v4959_v6, %s4585_s17 }
 0xabf   : > { %2156 = vrot.lane.b32.xlu0 %v5005_v53, %s4585_s17 }
 0xac0   : > { %2144 = vrot.lane.b32.xlu1 %v4963_v12, %s4585_s17 }
 0xac3   : > { %2158 = vrot.lane.b32.xlu0 %v5019_v63, %s4585_s17 }
 0xac4   : > { %2146 = vrot.lane.b32.xlu1 %v4967_v18, %s4585_s17 }
 0xac7   : > { %2160 = vrot.lane.b32.xlu0 %v5033_v10, %s4585_s17 }
 0xac8   : > { %2148 = vrot.lane.b32.xlu1 %v5932_v14, %s4585_s17 }
 0xacb   : > { %2162 = vrot.lane.b32.xlu0 %v5047_v21, %s4585_s17 }
 0xacc   : > { %2150 = vrot.lane.b32.xlu1 %v4975_v30, %s4585_s17 }
 0xacf   : > { %2164 = vrot.lane.b32.xlu0 %v5059_v31, %s4585_s17 }
 0xad0   : > { %2134 = vrot.lane.b32.xlu1 %v4955_v0, %s4585_s17 }
 0xad3   : > { %2166 = vrot.lane.b32.xlu0 %v5069_v41, %s4585_s17 }
 0xb26   : > { %v1972_v49 = vpop.xlane.xlu0 %1971 }
 0xb27   : > { %4293 = vrcp.f32 %v1972_v49 }
 0xb28   : > { %v1975_v55 = vpop.xlane.xlu1 %1974 }
 0xb29   : > { %4295 = vrcp.f32 %v1975_v55 }
 0xb2a   : > { %v2003_v50 = vpop.permute.xlu0 %2002 }
 0xb2b   : > { %3782 = vmatpush3.bf16.msra.mxu0 %v2003_v50 }
 0xb2c   : > { %v2021_v57 = vpop.permute.xlu1 %2020 }
 0xb2d   : > { %3783 = vmatprep.subr.bf16.mxu0 %v2021_v57 }
 0xb2e   : > { %v2005_v51 = vpop.permute.xlu0 %2004 }
 0xb2f   : > { %3784 = vmatpush3.bf16.msra.mxu0 %v2005_v51 }
 0xb30   : > { %3999 = vmatprep.subr.bf16.mxu0 %v5929_v58 }
 0xb31   : > { %v4294_v42 = vpop.eup %4293 }
 0xb32   : > { %v1978_v35 = vmul.f32 %v4294_v42, %v1972_v49  ;;  %v2153_v50 = vpop.permute.xlu0 %2152  ;;  %v2137_v49 = vpop.permute.xlu1 %2136 }
 0xb33   : > { %v4296_v2 = vpop.eup %4295 }
 0xb34   : > { %v1980_v19 = vsub.f32 2.0, %v1978_v35  ;;  %v1979_v29 = vmul.f32 %v4296_v2, %v1975_v55 }
 0xb36   : > { %v1982_v39 = vmul.f32 %v4294_v42, %v1980_v19  ;;  %v1981_v47 = vsub.f32 2.0, %v1979_v29  ;;  %v2139_v55 = vpop.permute.xlu1 %2138 }
 0xb38   : > { %v1983_v37 = vmul.f32 %v4296_v2, %v1981_v47  ;;  %v1984_v16 = vmul.f32 %v5405_v7, %v1982_v39  ;;  %v1985_v25 = vmul.f32 %v5407_v15, %v1982_v39 }
 0xb3a   : > { %v1986_v1 = vmul.f32 %v4290_v17, %v1983_v37  ;;  %v1987_v33 = vmul.f32 %v4292_v5, %v1983_v37  ;;  %v2141_v57 = vpop.permute.xlu1 %2140  ;;  %v2172_v37 = vsel %vm946_vm1, %v2137_v49, 0 }
 0xb3c   : > { %v1989_v11 = vpack.c.bf16 %v1987_v33, %v1985_v25  ;;  %v1988_v24 = vpack.c.bf16 %v1986_v1, %v1984_v16  ;;  %v2155_v1 = vpop.permute.xlu0 %2154  ;;  %v2175_v25 = vsel %vm946_vm1, %v2139_v55, 0 }
 0xb3e   : > { %2070 = vmatprep.mubr.bf16.mxu0 %v1989_v11  ;;  %v2143_v7 = vpop.permute.xlu1 %2142  ;;  %v2178_v11 = vsel %vm946_vm1, %v2141_v57, 0 }
 0xb3f   : > { %2071 = vmatmul.mubr.bf16.vlgmr.msra.gmra.mrb[24].mxu0 %v1988_v24 }
 0xb40   : > { %4000 = vmatpush3.bf16.msra.mxu0 %v4244_v28  ;;  %4001 = vmatprep.mubr.msk.bf16.mxu0 %vm4580_vm0, %v5929_v58  ;;  %v2157_v33 = vpop.permute.xlu0 %2156  ;;  %v2181_v28 = vsel %vm946_vm1, %v2143_v7, 0 }
 0xb41   : > { %4061 = vmatprep.subr.msk.bf16.mxu0 %vm946_vm1, %v2153_v50 }
 0xb42   : > { %v2145_v17 = vpop.permute.xlu1 %2144 }
 0xb43   : > { %v2184_v49 = vsel %vm946_vm1, %v2145_v17, 0 }
 0xb44   : > { %v2159_v24 = vpop.permute.xlu0 %2158 }
 0xb46   : > { %v2147_v51 = vpop.permute.xlu1 %2146 }
 0xb47   : > { %v2187_v55 = vsel %vm946_vm1, %v2147_v51, 0 }
 0xb48   : > { %v2161_v50 = vpop.permute.xlu0 %2160 }
 0xb4a   : > { %v2149_v15 = vpop.permute.xlu1 %2148 }
 0xb4b   : > { %v2190_v57 = vsel %vm946_vm1, %v2149_v15, 0 }
 0xb4e   : > { %v2151_v35 = vpop.permute.xlu1 %2150 }
 0xb4f   : > { %v2193_v7 = vsel %vm946_vm1, %v2151_v35, 0 }
 0xb52   : > { %v2135_v16 = vpop.permute.xlu1 %2134 }
 0xc12   : > { %v3785_v5 = vpop.f32.mrb[24].mxu0 }
 0xc13   : > { %v3786_v42 = vpop.f32.mrb[25].mxu0 }
 0xc14   : > { %v3787_v2 = vadd.f32 %v3786_v42, %v3785_v5  ;;  %v3788_v19 = vpop.f32.mrb[26].mxu0  ;;  %v2163_v5 = vpop.permute.xlu0 %2162 }
 0xc15   : > { %v3789_v29 = vpop.f32.mrb[27].mxu0 }
 0xc16   : > { %v3790_v39 = vadd.f32 %v3789_v29, %v3788_v19 }
 0xc18   : > { %v2079_v47 = vpack.c.bf16 %v3790_v39, %v3787_v2  ;;  %v2165_v42 = vpop.permute.xlu0 %2164 }
 0xc1a   : > { %4002 = vmatmul.mubr.msk.bf16.vlgmr.msra.gmra.mrb[28].mxu0 %vm946_vm1, %v2079_v47 }
 0xc1b   : > { %3794 = vmatpush3.bf16.xpose.msra.mxu0 %v2172_v37  ;;  %3809 = vmatprep.mubr.msk.bf16.mxu0 %vm946_vm1, %v2135_v16 }
 0xc1c   : > { %4062 = vmatprep.subr.msk.bf16.mxu0 %vm946_vm1, %v2155_v1  ;;  %v2167_v2 = vpop.permute.xlu0 %2166 }
 0xc23   : > { %3796 = vmatpush3.bf16.xpose.msra.mxu0 %v2175_v25 }
 0xc24   : > { %4063 = vmatprep.subr.msk.bf16.mxu0 %vm946_vm1, %v2157_v33 }
 0xc2b   : > { %3798 = vmatpush3.bf16.xpose.msra.mxu0 %v2178_v11 }
 0xc2c   : > { %4064 = vmatprep.subr.msk.bf16.mxu0 %vm946_vm1, %v2159_v24 }
 0xc33   : > { %3800 = vmatpush3.bf16.xpose.msra.mxu0 %v2181_v28 }
 0xc34   : > { %4065 = vmatprep.subr.msk.bf16.mxu0 %vm946_vm1, %v2161_v50 }
 0xc3b   : > { %3802 = vmatpush3.bf16.xpose.msra.mxu0 %v2184_v49 }
 0xc3c   : > { %4066 = vmatprep.subr.msk.bf16.mxu0 %vm946_vm1, %v2163_v5 }
 0xc43   : > { %3804 = vmatpush3.bf16.xpose.msra.mxu0 %v2187_v55 }
 0xc44   : > { %4067 = vmatprep.subr.msk.bf16.mxu0 %vm946_vm1, %v2165_v42 }
 0xc4b   : > { %3806 = vmatpush3.bf16.xpose.msra.mxu0 %v2190_v57 }
 0xc4c   : > { %4068 = vmatprep.subr.msk.bf16.mxu0 %vm946_vm1, %v2167_v2 }
 0xc53   : > { %3808 = vmatpush3.bf16.xpose.msra.mxu0 %v2193_v7 }
 0xc5a   : > { %3810 = vmatmul.mubr.msk.bf16.vlgmr.msra.gmra.mrb[32].mxu0 %vm946_vm1, %v2135_v16 }
 0xced   : > { %v2125_v17 = vpop.f32.mrb[28].mxu0 }
 0xcee   : > { %v5476_v19 = vadd.f32 %v2125_v17, %v5370_v40  ;;  %v4003_v51 = vpop.f32.mrb[29].mxu0 }
 0xcef   : > { %v2128_v29 = vpop.f32.mrb[30].mxu0 }
 0xcf0   : > { %v5479_v39 = vadd.f32 %v2128_v29, %v5373_v27  ;;  %v4004_v47 = vpop.f32.mrb[31].mxu0 }
 0xd2d   : > { %v2253_v15 = vpop.f32.mrb[32].mxu0 }
 0xd2e   : > { %v2254_v37 = vadd.f32 %v2253_v15, %v5126_v60  ;;  %v2255_v1 = vpop.f32.mrb[33].mxu0 }
 0xd2f   : > { %v2256_v25 = vadd.f32 %v2255_v1, %v5128_v61  ;;  %v2257_v35 = vpop.f32.mrb[34].mxu0 }
 0xd30   : > { %v2258_v33 = vadd.f32 %v2257_v35, %v5130_v4  ;;  %v2259_v16 = vpop.f32.mrb[35].mxu0 }
 0xd31   : > { %v2262_v11 = vmax.f32 %v2254_v37, %v2256_v25  ;;  %v2260_v40 = vadd.f32 %v2259_v16, %v5133_v9 }
 0xd33   : > { %v2265_v24 = vmax.f32 %v2258_v33, %v2260_v40  ;;  %2263 = vmax.xlane.f32.xlu0 %v2262_v11 }
 0xd35   : > { %2266 = vmax.xlane.f32.xlu1 %v2265_v24 }
 0xd46   : > { %2316 = vrot.lane.b32.xlu1 %v4981_v38, %s4585_s17 }
 0xd49   : > { %2300 = vrot.lane.b32.xlu0 %v4941_v48, %s4585_s17 }
 0xd4a   : > { %2318 = vrot.lane.b32.xlu1 %v4993_v45, %s4585_s17 }
 0xd4d   : > { %2320 = vrot.lane.b32.xlu0 %v5007_v56, %s4585_s17 }
 0xd4e   : > { %2302 = vrot.lane.b32.xlu1 %v4947_v54, %s4585_s17 }
 0xd51   : > { %2322 = vrot.lane.b32.xlu0 %v5021_v3, %s4585_s17 }
 0xd52   : > { %2304 = vrot.lane.b32.xlu1 %v4953_v62, %s4585_s17 }
 0xd55   : > { %2324 = vrot.lane.b32.xlu0 %v5035_v13, %s4585_s17 }
 0xd56   : > { %2306 = vrot.lane.b32.xlu1 %v4961_v8, %s4585_s17 }
 0xd59   : > { %2326 = vrot.lane.b32.xlu0 %v5049_v23, %s4585_s17 }
 0xd5a   : > { %2308 = vrot.lane.b32.xlu1 %v5930_v22, %s4585_s17 }
 0xd5e   : > { %2310 = vrot.lane.b32.xlu1 %v4969_v20, %s4585_s17 }
 0xd62   : > { %2312 = vrot.lane.b32.xlu1 %v4973_v26, %s4585_s17 }
 0xd66   : > { %2314 = vrot.lane.b32.xlu1 %v4977_v32, %s4585_s17 }
 0xd6a   : > { %2462 = vrot.lane.b32.xlu1 %v4979_v36, %s4586_s10 }
 0xd6e   : > { %2464 = vrot.lane.b32.xlu1 %v4991_v43, %s4586_s10 }
 0xd72   : > { %2466 = vrot.lane.b32.xlu1 %v5005_v53, %s4586_s10 }
 0xd76   : > { %2468 = vrot.lane.b32.xlu1 %v5019_v63, %s4586_s10 }
 0xd7a   : > { %2470 = vrot.lane.b32.xlu1 %v5033_v10, %s4586_s10 }
 0xd7e   : > { %2472 = vrot.lane.b32.xlu1 %v5047_v21, %s4586_s10 }
 0xd82   : > { %2474 = vrot.lane.b32.xlu1 %v5059_v31, %s4586_s10 }
 0xd86   : > { %2476 = vrot.lane.b32.xlu1 %v5069_v41, %s4586_s10 }
 0xdc0   : > { %v2264_v27 = vpop.xlane.xlu0 %2263 }
 0xdc1   : > { %v2268_v28 = vsub.f32 %v2254_v37, %v2264_v27  ;;  %v2269_v50 = vsub.f32 %v2256_v25, %v2264_v27 }
 0xdc2   : > { %v2267_v49 = vpop.xlane.xlu1 %2266 }
 0xdc3   : > { %v2272_v5 = vmul.f32 1.442695, %v2268_v28  ;;  %v2274_v55 = vmul.f32 1.442695, %v2269_v50  ;;  %v2270_v42 = vsub.f32 %v2258_v33, %v2267_v49  ;;  %v2271_v57 = vsub.f32 %v2260_v40, %v2267_v49 }
 0xdc4   : > { %v2301_v2 = vpop.permute.xlu0 %2300 }
 0xdc5   : > { %4297 = vpow2.f32 %v2272_v5  ;;  %v2276_v7 = vmul.f32 1.442695, %v2270_v42  ;;  %v2278_v17 = vmul.f32 1.442695, %v2271_v57 }
 0xdc6   : > { %4299 = vpow2.f32 %v2274_v55  ;;  %v2317_v51 = vpop.permute.xlu1 %2316 }
 0xdc7   : > { %4301 = vpow2.f32 %v2276_v7  ;;  %3811 = vmatprep.subr.bf16.mxu1 %v2317_v51 }
 0xdc8   : > { %4303 = vpow2.f32 %v2278_v17  ;;  %3812 = vmatpush3.bf16.msra.mxu1 %v2301_v2  ;;  %v2321_v29 = vpop.permute.xlu0 %2320 }
 0xdca   : > { %v2319_v47 = vpop.permute.xlu1 %2318 }
 0xdcb   : > { %3813 = vmatprep.subr.bf16.mxu1 %v2319_v47 }
 0xdcc   : > { %v2323_v1 = vpop.permute.xlu0 %2322 }
 0xdce   : > { %v2303_v15 = vpop.permute.xlu1 %2302 }
 0xdcf   : > { %v4298_v37 = vpop.eup %4297  ;;  %3814 = vmatpush3.bf16.msra.mxu1 %v2303_v15 }
 0xdd0   : > { %v4300_v25 = vpop.eup %4299  ;;  %3815 = vmatprep.subr.bf16.mxu1 %v2321_v29  ;;  %v2325_v40 = vpop.permute.xlu0 %2324 }
 0xdd1   : > { %v4302_v35 = vpop.eup %4301  ;;  %v2280_v33 = vadd.f32 %v4300_v25, %v4298_v37 }
 0xdd2   : > { %v4304_v16 = vpop.eup %4303  ;;  %v2305_v11 = vpop.permute.xlu1 %2304 }
 0xdd3   : > { %2281 = vadd.xlane.f32.xlu0 %v2280_v33  ;;  %3816 = vmatpush3.bf16.msra.mxu1 %v2305_v11  ;;  %v2283_v24 = vadd.f32 %v4304_v16, %v4302_v35 }
 0xdd4   : > { %3817 = vmatprep.subr.bf16.mxu1 %v2323_v1  ;;  %v2327_v50 = vpop.permute.xlu0 %2326 }
 0xdd6   : > { %v2307_v27 = vpop.permute.xlu1 %2306 }
 0xdd7   : > { %2284 = vadd.xlane.f32.xlu0 %v2283_v24  ;;  %3818 = vmatpush3.bf16.msra.mxu1 %v2307_v27 }
 0xdd8   : > { %3819 = vmatprep.subr.bf16.mxu1 %v2325_v40 }
 0xdda   : > { %v2309_v28 = vpop.permute.xlu1 %2308 }
 0xddb   : > { %3820 = vmatpush3.bf16.msra.mxu1 %v2309_v28 }
 0xddc   : > { %3821 = vmatprep.subr.bf16.mxu1 %v2327_v50 }
 0xdde   : > { %v2311_v49 = vpop.permute.xlu1 %2310 }
 0xddf   : > { %3822 = vmatpush3.bf16.msra.mxu1 %v2311_v49 }
 0xde2   : > { %v2313_v42 = vpop.permute.xlu1 %2312 }
 0xde6   : > { %v2315_v51 = vpop.permute.xlu1 %2314 }
 0xded   : > { %2328 = vrot.lane.b32.xlu0 %v5931_v34, %s4585_s17 }
 0xdf1   : > { %2330 = vrot.lane.b32.xlu0 %v5071_v44, %s4585_s17 }
 0xdf5   : > { %2446 = vrot.lane.b32.xlu0 %v4939_v46, %s4586_s10 }
 0xdf9   : > { %2448 = vrot.lane.b32.xlu0 %v4945_v52, %s4586_s10 }
 0xdfd   : > { %2450 = vrot.lane.b32.xlu0 %v4951_v59, %s4586_s10 }
 0xe01   : > { %2452 = vrot.lane.b32.xlu0 %v4959_v6, %s4586_s10 }
 0xe05   : > { %2454 = vrot.lane.b32.xlu0 %v4963_v12, %s4586_s10 }
 0xe09   : > { %2456 = vrot.lane.b32.xlu0 %v4967_v18, %s4586_s10 }
 0xe0d   : > { %2458 = vrot.lane.b32.xlu0 %v5932_v14, %s4586_s10 }
 0xe11   : > { %2460 = vrot.lane.b32.xlu0 %v4975_v30, %s4586_s10 }
 0xe15   : > { %2444 = vrot.lane.b32.xlu0 %v4955_v0, %s4586_s10 }
 0xe60   : > { %v2282_v5 = vpop.xlane.xlu0 %2281 }
 0xe61   : > { %4305 = vrcp.f32 %v2282_v5 }
 0xe64   : > { %v2285_v55 = vpop.xlane.xlu0 %2284 }
 0xe65   : > { %4307 = vrcp.f32 %v2285_v55 }
 0xe68   : > { %v2329_v57 = vpop.permute.xlu0 %2328 }
 0xe69   : > { %3823 = vmatprep.subr.bf16.mxu1 %v2329_v57 }
 0xe6a   : > { %3824 = vmatpush3.bf16.msra.mxu1 %v2313_v42  ;;  %v4245_v42 = vld [vmem:[#allocation10 + $0x20] sm:$0xff]  }
 0xe6b   : > { %v4306_v2 = vpop.eup %4305 }
 0xe6c   : > { %v2288_v7 = vmul.f32 %v4306_v2, %v2282_v5  ;;  %v2331_v17 = vpop.permute.xlu0 %2330  ;;  %v2463_v5 = vpop.permute.xlu1 %2462 }
 0xe6d   : > { %3825 = vmatprep.subr.bf16.mxu1 %v2331_v17 }
 0xe6e   : > { %v2290_v29 = vsub.f32 2.0, %v2288_v7  ;;  %3826 = vmatpush3.bf16.msra.mxu1 %v2315_v51 }
 0xe6f   : > { %v4308_v47 = vpop.eup %4307  ;;  %4005 = vmatprep.subr.bf16.mxu1 %v5929_v58 }
 0xe70   : > { %v2289_v15 = vmul.f32 %v4308_v47, %v2285_v55  ;;  %v2292_v1 = vmul.f32 %v4306_v2, %v2290_v29  ;;  %v2447_v55 = vpop.permute.xlu0 %2446 }
 0xe72   : > { %v2291_v33 = vsub.f32 2.0, %v2289_v15  ;;  %v2294_v40 = vmul.f32 %v4298_v37, %v2292_v1  ;;  %v2295_v27 = vmul.f32 %v4300_v25, %v2292_v1 }
 0xe74   : > { %v2293_v11 = vmul.f32 %v4308_v47, %v2291_v33  ;;  %v2449_v57 = vpop.permute.xlu0 %2448 }
 0xe76   : > { %v2296_v24 = vmul.f32 %v4302_v35, %v2293_v11  ;;  %v2297_v28 = vmul.f32 %v4304_v16, %v2293_v11  ;;  %v2482_v11 = vsel %vm946_vm1, %v2447_v55, 0 }
 0xe78   : > { %v2299_v50 = vpack.c.bf16 %v2297_v28, %v2295_v27  ;;  %v2298_v49 = vpack.c.bf16 %v2296_v24, %v2294_v40  ;;  %v2451_v2 = vpop.permute.xlu0 %2450  ;;  %v2465_v24 = vpop.permute.xlu1 %2464  ;;  %v2485_v27 = vsel %vm946_vm1, %v2449_v57, 0 }
 0xe7a   : > { %2380 = vmatprep.mubr.bf16.mxu1 %v2299_v50  ;;  %v2488_v50 = vsel %vm946_vm1, %v2451_v2, 0 }
 0xe7b   : > { %2381 = vmatmul.mubr.bf16.vlgmr.msra.gmra.mrb[84].mxu1 %v2298_v49 }
 0xe7c   : > { %4006 = vmatpush3.bf16.msra.mxu1 %v4245_v42  ;;  %4007 = vmatprep.mubr.msk.bf16.mxu1 %vm4580_vm0, %v5929_v58  ;;  %v2453_v7 = vpop.permute.xlu0 %2452  ;;  %v2467_v28 = vpop.permute.xlu1 %2466 }
 0xe7d   : > { %4069 = vmatprep.subr.msk.bf16.mxu1 %vm946_vm1, %v2463_v5  ;;  %v2491_v42 = vsel %vm946_vm1, %v2453_v7, 0 }
 0xe80   : > { %v2455_v37 = vpop.permute.xlu0 %2454  ;;  %v2469_v49 = vpop.permute.xlu1 %2468 }
 0xe81   : > { %v2494_v55 = vsel %vm946_vm1, %v2455_v37, 0 }
 0xe84   : > { %v2457_v35 = vpop.permute.xlu0 %2456  ;;  %v2471_v5 = vpop.permute.xlu1 %2470 }
 0xe85   : > { %v2497_v57 = vsel %vm946_vm1, %v2457_v35, 0 }
 0xe88   : > { %v2459_v25 = vpop.permute.xlu0 %2458 }
 0xe89   : > { %v2500_v2 = vsel %vm946_vm1, %v2459_v25, 0 }
 0xe8c   : > { %v2461_v51 = vpop.permute.xlu0 %2460 }
 0xe8d   : > { %v2503_v7 = vsel %vm946_vm1, %v2461_v51, 0 }
 0xe90   : > { %v2445_v40 = vpop.permute.xlu0 %2444 }
 0xf4e   : > { %v3827_v16 = vpop.f32.mrb[84].mxu1 }
 0xf4f   : > { %v3828_v17 = vpop.f32.mrb[85].mxu1 }
 0xf50   : > { %v3829_v29 = vadd.f32 %v3828_v17, %v3827_v16  ;;  %v3830_v47 = vpop.f32.mrb[86].mxu1  ;;  %v2473_v16 = vpop.permute.xlu1 %2472 }
 0xf51   : > { %v3831_v15 = vpop.f32.mrb[87].mxu1 }
 0xf52   : > { %v3832_v1 = vadd.f32 %v3831_v15, %v3830_v47 }
 0xf54   : > { %v2389_v33 = vpack.c.bf16 %v3832_v1, %v3829_v29  ;;  %v2475_v17 = vpop.permute.xlu1 %2474 }
 0xf56   : > { %4008 = vmatmul.mubr.msk.bf16.vlgmr.msra.gmra.mrb[88].mxu1 %vm946_vm1, %v2389_v33 }
 0xf57   : > { %3836 = vmatpush3.bf16.xpose.msra.mxu1 %v2482_v11  ;;  %3851 = vmatprep.mubr.msk.bf16.mxu1 %vm946_vm1, %v2445_v40 }
 0xf58   : > { %4070 = vmatprep.subr.msk.bf16.mxu1 %vm946_vm1, %v2465_v24  ;;  %v2477_v29 = vpop.permute.xlu1 %2476 }
 0xf5f   : > { %3838 = vmatpush3.bf16.xpose.msra.mxu1 %v2485_v27 }
 0xf60   : > { %4071 = vmatprep.subr.msk.bf16.mxu1 %vm946_vm1, %v2467_v28 }
 0xf67   : > { %3840 = vmatpush3.bf16.xpose.msra.mxu1 %v2488_v50 }
 0xf68   : > { %4072 = vmatprep.subr.msk.bf16.mxu1 %vm946_vm1, %v2469_v49 }
 0xf6f   : > { %3842 = vmatpush3.bf16.xpose.msra.mxu1 %v2491_v42 }
 0xf70   : > { %4073 = vmatprep.subr.msk.bf16.mxu1 %vm946_vm1, %v2471_v5 }
 0xf77   : > { %3844 = vmatpush3.bf16.xpose.msra.mxu1 %v2494_v55 }
 0xf78   : > { %4074 = vmatprep.subr.msk.bf16.mxu1 %vm946_vm1, %v2473_v16 }
 0xf7f   : > { %3846 = vmatpush3.bf16.xpose.msra.mxu1 %v2497_v57 }
 0xf80   : > { %4075 = vmatprep.subr.msk.bf16.mxu1 %vm946_vm1, %v2475_v17 }
 0xf87   : > { %3848 = vmatpush3.bf16.xpose.msra.mxu1 %v2500_v2 }
 0xf88   : > { %4076 = vmatprep.subr.msk.bf16.mxu1 %vm946_vm1, %v2477_v29 }
 0xf8f   : > { %3850 = vmatpush3.bf16.xpose.msra.mxu1 %v2503_v7 }
 0xf96   : > { %3852 = vmatmul.mubr.msk.bf16.vlgmr.msra.gmra.mrb[92].mxu1 %vm946_vm1, %v2445_v40 }
0x1029   : > { %v2435_v37 = vpop.f32.mrb[88].mxu1 }
0x102a   : > { %v5574_v47 = vadd.f32 %v2435_v37, %v5476_v19  ;;  %v4009_v35 = vpop.f32.mrb[89].mxu1 }
0x102b   : > { %v2438_v15 = vpop.f32.mrb[90].mxu1 }
0x102c   : > { %v5577_v1 = vadd.f32 %v2438_v15, %v5479_v39  ;;  %v4010_v33 = vpop.f32.mrb[91].mxu1 }
0x1069   : > { %v2563_v25 = vpop.f32.mrb[92].mxu1 }
0x106a   : > { %v2564_v11 = vadd.f32 %v2563_v25, %v5126_v60  ;;  %v2565_v24 = vpop.f32.mrb[93].mxu1 }
0x106b   : > { %v2566_v27 = vadd.f32 %v2565_v24, %v5128_v61  ;;  %v2567_v51 = vpop.f32.mrb[94].mxu1 }
0x106c   : > { %v2568_v28 = vadd.f32 %v2567_v51, %v5130_v4  ;;  %v2569_v40 = vpop.f32.mrb[95].mxu1 }
0x106d   : > { %v2572_v50 = vmax.f32 %v2564_v11, %v2566_v27  ;;  %v2570_v19 = vadd.f32 %v2569_v40, %v5133_v9 }
0x106f   : > { %v2575_v49 = vmax.f32 %v2568_v28, %v2570_v19  ;;  %2573 = vmax.xlane.f32.xlu1 %v2572_v50 }
0x1071   : > { %2576 = vmax.xlane.f32.xlu0 %v2575_v49 }
0x1080   : > { %2610 = vrot.lane.b32.xlu1 %v4941_v48, %s4586_s10 }
0x1084   : > { %2628 = vrot.lane.b32.xlu1 %v4993_v45, %s4586_s10 }
0x1087   : > { %2626 = vrot.lane.b32.xlu0 %v4981_v38, %s4586_s10 }
0x1088   : > { %2630 = vrot.lane.b32.xlu1 %v5007_v56, %s4586_s10 }
0x108b   : > { %2612 = vrot.lane.b32.xlu0 %v4947_v54, %s4586_s10 }
0x108c   : > { %2632 = vrot.lane.b32.xlu1 %v5021_v3, %s4586_s10 }
0x108f   : > { %2614 = vrot.lane.b32.xlu0 %v4953_v62, %s4586_s10 }
0x1090   : > { %2634 = vrot.lane.b32.xlu1 %v5035_v13, %s4586_s10 }
0x1093   : > { %2616 = vrot.lane.b32.xlu0 %v4961_v8, %s4586_s10 }
0x1094   : > { %2636 = vrot.lane.b32.xlu1 %v5049_v23, %s4586_s10 }
0x1097   : > { %2618 = vrot.lane.b32.xlu0 %v5930_v22, %s4586_s10 }
0x1098   : > { %2638 = vrot.lane.b32.xlu1 %v5931_v34, %s4586_s10 }
0x109b   : > { %2620 = vrot.lane.b32.xlu0 %v4969_v20, %s4586_s10 }
0x10fc   : > { %v2574_v39 = vpop.xlane.xlu1 %2573 }
0x10fd   : > { %v2578_v42 = vsub.f32 %v2564_v11, %v2574_v39  ;;  %v2579_v5 = vsub.f32 %v2566_v27, %v2574_v39 }
0x10fe   : > { %v2577_v55 = vpop.xlane.xlu0 %2576 }
0x10ff   : > { %v2582_v16 = vmul.f32 1.442695, %v2578_v42  ;;  %v2584_v57 = vmul.f32 1.442695, %v2579_v5  ;;  %v2580_v17 = vsub.f32 %v2568_v28, %v2577_v55  ;;  %v2581_v2 = vsub.f32 %v2570_v19, %v2577_v55 }
0x1100   : > { %v2611_v29 = vpop.permute.xlu1 %2610 }
0x1101   : > { %4309 = vpow2.f32 %v2582_v16  ;;  %v2586_v7 = vmul.f32 1.442695, %v2580_v17  ;;  %v2588_v37 = vmul.f32 1.442695, %v2581_v2 }
0x1102   : > { %4311 = vpow2.f32 %v2584_v57  ;;  %v2627_v35 = vpop.permute.xlu0 %2626 }
0x1103   : > { %4313 = vpow2.f32 %v2586_v7  ;;  %3853 = vmatprep.subr.bf16.mxu0 %v2627_v35 }
0x1104   : > { %4315 = vpow2.f32 %v2588_v37  ;;  %3854 = vmatpush3.bf16.msra.mxu0 %v2611_v29  ;;  %v2629_v15 = vpop.permute.xlu1 %2628 }
0x1105   : > { %3855 = vmatprep.subr.bf16.mxu0 %v2629_v15 }
0x1106   : > { %v2613_v33 = vpop.permute.xlu0 %2612 }
0x1108   : > { %3856 = vmatpush3.bf16.msra.mxu0 %v2613_v33  ;;  %v2631_v25 = vpop.permute.xlu1 %2630 }
0x1109   : > { %3857 = vmatprep.subr.bf16.mxu0 %v2631_v25 }
0x110a   : > { %v2615_v11 = vpop.permute.xlu0 %2614 }
0x110b   : > { %v5609_v24 = vpop.eup %4309 }
0x110c   : > { %v5611_v27 = vpop.eup %4311  ;;  %3858 = vmatpush3.bf16.msra.mxu0 %v2615_v11  ;;  %v2633_v51 = vpop.permute.xlu1 %2632 }
0x110d   : > { %v4314_v28 = vpop.eup %4313  ;;  %3859 = vmatprep.subr.bf16.mxu0 %v2633_v51  ;;  %v2590_v40 = vadd.f32 %v5611_v27, %v5609_v24 }
0x110e   : > { %v4316_v50 = vpop.eup %4315  ;;  %v2617_v19 = vpop.permute.xlu0 %2616 }
0x110f   : > { %2591 = vadd.xlane.f32.xlu0 %v2590_v40  ;;  %v2593_v49 = vadd.f32 %v4316_v50, %v4314_v28 }
0x1110   : > { %3860 = vmatpush3.bf16.msra.mxu0 %v2617_v19  ;;  %v2635_v39 = vpop.permute.xlu1 %2634 }
0x1111   : > { %2594 = vadd.xlane.f32.xlu1 %v2593_v49  ;;  %3861 = vmatprep.subr.bf16.mxu0 %v2635_v39 }
0x1112   : > { %v2619_v42 = vpop.permute.xlu0 %2618 }
0x1114   : > { %3862 = vmatpush3.bf16.msra.mxu0 %v2619_v42  ;;  %v2637_v5 = vpop.permute.xlu1 %2636 }
0x1115   : > { %3863 = vmatprep.subr.bf16.mxu0 %v2637_v5 }
0x1116   : > { %v2621_v55 = vpop.permute.xlu0 %2620 }
0x1118   : > { %3864 = vmatpush3.bf16.msra.mxu0 %v2621_v55  ;;  %v2639_v16 = vpop.permute.xlu1 %2638 }
0x1119   : > { %3865 = vmatprep.subr.bf16.mxu0 %v2639_v16  ;;  %v4246_v16 = vld [vmem:[#allocation10 + $0x28] sm:$0xff]  }
0x1122   : > { %2640 = vrot.lane.b32.xlu1 %v5071_v44, %s4586_s10 }
0x1125   : > { %2622 = vrot.lane.b32.xlu0 %v4973_v26, %s4586_s10 }
0x1126   : > { %2756 = vrot.lane.b32.xlu1 %v4939_v46, %s4587_s16 }
0x1129   : > { %2624 = vrot.lane.b32.xlu0 %v4977_v32, %s4586_s10 }
0x112a   : > { %2758 = vrot.lane.b32.xlu1 %v4945_v52, %s4587_s16 }
0x112d   : > { %2772 = vrot.lane.b32.xlu0 %v4979_v36, %s4587_s16 }
0x112e   : > { %2760 = vrot.lane.b32.xlu1 %v4951_v59, %s4587_s16 }
0x1131   : > { %2774 = vrot.lane.b32.xlu0 %v4991_v43, %s4587_s16 }
0x1132   : > { %2762 = vrot.lane.b32.xlu1 %v4959_v6, %s4587_s16 }
0x1135   : > { %2776 = vrot.lane.b32.xlu0 %v5005_v53, %s4587_s16 }
0x1136   : > { %2764 = vrot.lane.b32.xlu1 %v4963_v12, %s4587_s16 }
0x1139   : > { %2778 = vrot.lane.b32.xlu0 %v5019_v63, %s4587_s16 }
0x113a   : > { %2766 = vrot.lane.b32.xlu1 %v4967_v18, %s4587_s16 }
0x113d   : > { %2780 = vrot.lane.b32.xlu0 %v5033_v10, %s4587_s16 }
0x113e   : > { %2768 = vrot.lane.b32.xlu1 %v5932_v14, %s4587_s16 }
0x1141   : > { %2782 = vrot.lane.b32.xlu0 %v5047_v21, %s4587_s16 }
0x1142   : > { %2770 = vrot.lane.b32.xlu1 %v4975_v30, %s4587_s16 }
0x1145   : > { %2784 = vrot.lane.b32.xlu0 %v5059_v31, %s4587_s16 }
0x1146   : > { %2754 = vrot.lane.b32.xlu1 %v4955_v0, %s4587_s16 }
0x1149   : > { %2786 = vrot.lane.b32.xlu0 %v5069_v41, %s4587_s16 }
0x119c   : > { %v2592_v57 = vpop.xlane.xlu0 %2591 }
0x119d   : > { %4317 = vrcp.f32 %v2592_v57 }
0x119e   : > { %v2595_v17 = vpop.xlane.xlu1 %2594 }
0x119f   : > { %4319 = vrcp.f32 %v2595_v17 }
0x11a0   : > { %v2623_v2 = vpop.permute.xlu0 %2622 }
0x11a1   : > { %3866 = vmatpush3.bf16.msra.mxu0 %v2623_v2 }
0x11a2   : > { %v2641_v29 = vpop.permute.xlu1 %2640 }
0x11a3   : > { %3867 = vmatprep.subr.bf16.mxu0 %v2641_v29 }
0x11a4   : > { %v2625_v7 = vpop.permute.xlu0 %2624 }
0x11a5   : > { %3868 = vmatpush3.bf16.msra.mxu0 %v2625_v7 }
0x11a6   : > { %4011 = vmatprep.subr.bf16.mxu0 %v5929_v58 }
0x11a7   : > { %v4318_v37 = vpop.eup %4317 }
0x11a8   : > { %v2598_v35 = vmul.f32 %v4318_v37, %v2592_v57  ;;  %v2773_v2 = vpop.permute.xlu0 %2772  ;;  %v2757_v57 = vpop.permute.xlu1 %2756 }
0x11a9   : > { %v4320_v15 = vpop.eup %4319 }
0x11aa   : > { %v2600_v33 = vsub.f32 2.0, %v2598_v35  ;;  %v2599_v25 = vmul.f32 %v4320_v15, %v2595_v17 }
0x11ac   : > { %v2602_v11 = vmul.f32 %v4318_v37, %v2600_v33  ;;  %v2601_v51 = vsub.f32 2.0, %v2599_v25  ;;  %v2759_v17 = vpop.permute.xlu1 %2758 }
0x11ae   : > { %v2603_v40 = vmul.f32 %v4320_v15, %v2601_v51  ;;  %v2604_v19 = vmul.f32 %v5609_v24, %v2602_v11  ;;  %v2605_v39 = vmul.f32 %v5611_v27, %v2602_v11 }
0x11b0   : > { %v2606_v49 = vmul.f32 %v4314_v28, %v2603_v40  ;;  %v2607_v42 = vmul.f32 %v4316_v50, %v2603_v40  ;;  %v2761_v29 = vpop.permute.xlu1 %2760  ;;  %v2792_v40 = vsel %vm946_vm1, %v2757_v57, 0 }
0x11b2   : > { %v2609_v5 = vpack.c.bf16 %v2607_v42, %v2605_v39  ;;  %v2608_v55 = vpack.c.bf16 %v2606_v49, %v2604_v19  ;;  %v2775_v49 = vpop.permute.xlu0 %2774  ;;  %v2795_v39 = vsel %vm946_vm1, %v2759_v17, 0 }
0x11b4   : > { %2690 = vmatprep.mubr.bf16.mxu0 %v2609_v5  ;;  %v2763_v24 = vpop.permute.xlu1 %2762  ;;  %v2798_v5 = vsel %vm946_vm1, %v2761_v29, 0 }
0x11b5   : > { %2691 = vmatmul.mubr.bf16.vlgmr.msra.gmra.mrb[36].mxu0 %v2608_v55 }
0x11b6   : > { %4012 = vmatpush3.bf16.msra.mxu0 %v4246_v16  ;;  %4013 = vmatprep.mubr.msk.bf16.mxu0 %vm4580_vm0, %v5929_v58  ;;  %v2777_v42 = vpop.permute.xlu0 %2776  ;;  %v2801_v16 = vsel %vm946_vm1, %v2763_v24, 0 }
0x11b7   : > { %4077 = vmatprep.subr.msk.bf16.mxu0 %vm946_vm1, %v2773_v2 }
0x11b8   : > { %v2765_v28 = vpop.permute.xlu1 %2764 }
0x11b9   : > { %v2804_v57 = vsel %vm946_vm1, %v2765_v28, 0 }
0x11ba   : > { %v2779_v55 = vpop.permute.xlu0 %2778 }
0x11bc   : > { %v2767_v7 = vpop.permute.xlu1 %2766 }
0x11bd   : > { %v2807_v17 = vsel %vm946_vm1, %v2767_v7, 0 }
0x11be   : > { %v2781_v2 = vpop.permute.xlu0 %2780 }
0x11c0   : > { %v2769_v27 = vpop.permute.xlu1 %2768 }
0x11c1   : > { %v2810_v29 = vsel %vm946_vm1, %v2769_v27, 0 }
0x11c4   : > { %v2771_v35 = vpop.permute.xlu1 %2770 }
0x11c5   : > { %v2813_v24 = vsel %vm946_vm1, %v2771_v35, 0 }
0x11c8   : > { %v2755_v19 = vpop.permute.xlu1 %2754 }
0x1288   : > { %v3869_v50 = vpop.f32.mrb[36].mxu0 }
0x1289   : > { %v3870_v37 = vpop.f32.mrb[37].mxu0 }
0x128a   : > { %v3871_v15 = vadd.f32 %v3870_v37, %v3869_v50  ;;  %v3872_v33 = vpop.f32.mrb[38].mxu0  ;;  %v2783_v50 = vpop.permute.xlu0 %2782 }
0x128b   : > { %v3873_v25 = vpop.f32.mrb[39].mxu0 }
0x128c   : > { %v3874_v11 = vadd.f32 %v3873_v25, %v3872_v33 }
0x128e   : > { %v2699_v51 = vpack.c.bf16 %v3874_v11, %v3871_v15  ;;  %v2785_v37 = vpop.permute.xlu0 %2784 }
0x1290   : > { %4014 = vmatmul.mubr.msk.bf16.vlgmr.msra.gmra.mrb[40].mxu0 %vm946_vm1, %v2699_v51 }
0x1291   : > { %3878 = vmatpush3.bf16.xpose.msra.mxu0 %v2792_v40  ;;  %3893 = vmatprep.mubr.msk.bf16.mxu0 %vm946_vm1, %v2755_v19 }
0x1292   : > { %4078 = vmatprep.subr.msk.bf16.mxu0 %vm946_vm1, %v2775_v49  ;;  %v2787_v15 = vpop.permute.xlu0 %2786 }
0x1299   : > { %3880 = vmatpush3.bf16.xpose.msra.mxu0 %v2795_v39 }
0x129a   : > { %4079 = vmatprep.subr.msk.bf16.mxu0 %vm946_vm1, %v2777_v42 }
0x12a1   : > { %3882 = vmatpush3.bf16.xpose.msra.mxu0 %v2798_v5 }
0x12a2   : > { %4080 = vmatprep.subr.msk.bf16.mxu0 %vm946_vm1, %v2779_v55 }
0x12a9   : > { %3884 = vmatpush3.bf16.xpose.msra.mxu0 %v2801_v16 }
0x12aa   : > { %4081 = vmatprep.subr.msk.bf16.mxu0 %vm946_vm1, %v2781_v2 }
0x12b1   : > { %3886 = vmatpush3.bf16.xpose.msra.mxu0 %v2804_v57 }
0x12b2   : > { %4082 = vmatprep.subr.msk.bf16.mxu0 %vm946_vm1, %v2783_v50 }
0x12b9   : > { %3888 = vmatpush3.bf16.xpose.msra.mxu0 %v2807_v17 }
0x12ba   : > { %4083 = vmatprep.subr.msk.bf16.mxu0 %vm946_vm1, %v2785_v37 }
0x12c1   : > { %3890 = vmatpush3.bf16.xpose.msra.mxu0 %v2810_v29 }
0x12c2   : > { %4084 = vmatprep.subr.msk.bf16.mxu0 %vm946_vm1, %v2787_v15 }
0x12c9   : > { %3892 = vmatpush3.bf16.xpose.msra.mxu0 %v2813_v24 }
0x12d0   : > { %3894 = vmatmul.mubr.msk.bf16.vlgmr.msra.gmra.mrb[44].mxu0 %vm946_vm1, %v2755_v19 }
0x1363   : > { %v2745_v28 = vpop.f32.mrb[40].mxu0 }
0x1364   : > { %v5680_v33 = vadd.f32 %v2745_v28, %v5574_v47  ;;  %v4015_v7 = vpop.f32.mrb[41].mxu0 }
0x1365   : > { %v2748_v25 = vpop.f32.mrb[42].mxu0 }
0x1366   : > { %v5683_v11 = vadd.f32 %v2748_v25, %v5577_v1  ;;  %v4016_v51 = vpop.f32.mrb[43].mxu0 }
0x13a3   : > { %v2873_v27 = vpop.f32.mrb[44].mxu0 }
0x13a4   : > { %v2874_v40 = vadd.f32 %v2873_v27, %v5126_v60  ;;  %v2875_v49 = vpop.f32.mrb[45].mxu0 }
0x13a5   : > { %v2876_v39 = vadd.f32 %v2875_v49, %v5128_v61  ;;  %v2877_v35 = vpop.f32.mrb[46].mxu0 }
0x13a6   : > { %v2878_v42 = vadd.f32 %v2877_v35, %v5130_v4  ;;  %v2879_v19 = vpop.f32.mrb[47].mxu0 }
0x13a7   : > { %v2882_v5 = vmax.f32 %v2874_v40, %v2876_v39  ;;  %v2880_v47 = vadd.f32 %v2879_v19, %v5133_v9 }
0x13a9   : > { %v2885_v55 = vmax.f32 %v2878_v42, %v2880_v47  ;;  %2883 = vmax.xlane.f32.xlu0 %v2882_v5 }
0x13ab   : > { %2886 = vmax.xlane.f32.xlu1 %v2885_v55 }
0x13bc   : > { %2936 = vrot.lane.b32.xlu1 %v4981_v38, %s4587_s16 }
0x13bf   : > { %2920 = vrot.lane.b32.xlu0 %v4941_v48, %s4587_s16 }
0x13c0   : > { %2938 = vrot.lane.b32.xlu1 %v4993_v45, %s4587_s16 }
0x13c3   : > { %2940 = vrot.lane.b32.xlu0 %v5007_v56, %s4587_s16 }
0x13c4   : > { %2922 = vrot.lane.b32.xlu1 %v4947_v54, %s4587_s16 }
0x13c7   : > { %2942 = vrot.lane.b32.xlu0 %v5021_v3, %s4587_s16 }
0x13c8   : > { %2924 = vrot.lane.b32.xlu1 %v4953_v62, %s4587_s16 }
0x13cb   : > { %2944 = vrot.lane.b32.xlu0 %v5035_v13, %s4587_s16 }
0x13cc   : > { %2926 = vrot.lane.b32.xlu1 %v4961_v8, %s4587_s16 }
0x13cf   : > { %2946 = vrot.lane.b32.xlu0 %v5049_v23, %s4587_s16 }
0x13d0   : > { %2928 = vrot.lane.b32.xlu1 %v5930_v22, %s4587_s16 }
0x13d4   : > { %2930 = vrot.lane.b32.xlu1 %v4969_v20, %s4587_s16 }
0x13d8   : > { %2932 = vrot.lane.b32.xlu1 %v4973_v26, %s4587_s16 }
0x13dc   : > { %2934 = vrot.lane.b32.xlu1 %v4977_v32, %s4587_s16 }
0x13e0   : > { %3082 = vrot.lane.b32.xlu1 %v4979_v36, %s4588_s15 }
0x13e4   : > { %3084 = vrot.lane.b32.xlu1 %v4991_v43, %s4588_s15 }
0x13e8   : > { %3086 = vrot.lane.b32.xlu1 %v5005_v53, %s4588_s15 }
0x13ec   : > { %3088 = vrot.lane.b32.xlu1 %v5019_v63, %s4588_s15 }
0x13f0   : > { %3090 = vrot.lane.b32.xlu1 %v5033_v10, %s4588_s15 }
0x13f4   : > { %3092 = vrot.lane.b32.xlu1 %v5047_v21, %s4588_s15 }
0x13f8   : > { %3094 = vrot.lane.b32.xlu1 %v5059_v31, %s4588_s15 }
0x13fc   : > { %3096 = vrot.lane.b32.xlu1 %v5069_v41, %s4588_s15 }
0x1436   : > { %v2884_v36 = vpop.xlane.xlu0 %2883 }
0x1437   : > { %v2888_v43 = vsub.f32 %v2874_v40, %v2884_v36  ;;  %v2889_v1 = vsub.f32 %v2876_v39, %v2884_v36 }
0x1438   : > { %v2887_v16 = vpop.xlane.xlu1 %2886 }
0x1439   : > { %v2892_v53 = vmul.f32 1.442695, %v2888_v43  ;;  %v2894_v2 = vmul.f32 1.442695, %v2889_v1  ;;  %v2890_v57 = vsub.f32 %v2878_v42, %v2887_v16  ;;  %v2891_v63 = vsub.f32 %v2880_v47, %v2887_v16 }
0x143a   : > { %v2921_v50 = vpop.permute.xlu0 %2920 }
0x143b   : > { %4321 = vpow2.f32 %v2892_v53  ;;  %v2896_v10 = vmul.f32 1.442695, %v2890_v57  ;;  %v2898_v17 = vmul.f32 1.442695, %v2891_v63  ;;  %v4247_v63 = vld [vmem:[#allocation10 + $0x30] sm:$0xff]  }
0x143c   : > { %4323 = vpow2.f32 %v2894_v2  ;;  %v2937_v21 = vpop.permute.xlu1 %2936 }
0x143d   : > { %4325 = vpow2.f32 %v2896_v10  ;;  %3895 = vmatprep.subr.bf16.mxu1 %v2937_v21 }
0x143e   : > { %4327 = vpow2.f32 %v2898_v17  ;;  %3896 = vmatpush3.bf16.msra.mxu1 %v2921_v50  ;;  %v2941_v31 = vpop.permute.xlu0 %2940 }
0x1440   : > { %v2939_v41 = vpop.permute.xlu1 %2938 }
0x1441   : > { %3897 = vmatprep.subr.bf16.mxu1 %v2939_v41 }
0x1442   : > { %v2943_v15 = vpop.permute.xlu0 %2942 }
0x1444   : > { %v2923_v37 = vpop.permute.xlu1 %2922 }
0x1445   : > { %v4322_v29 = vpop.eup %4321  ;;  %3898 = vmatpush3.bf16.msra.mxu1 %v2923_v37 }
0x1446   : > { %v4324_v24 = vpop.eup %4323  ;;  %3899 = vmatprep.subr.bf16.mxu1 %v2941_v31  ;;  %v2945_v27 = vpop.permute.xlu0 %2944 }
0x1447   : > { %v4326_v28 = vpop.eup %4325  ;;  %v2900_v7 = vadd.f32 %v4324_v24, %v4322_v29 }
0x1448   : > { %v4328_v25 = vpop.eup %4327  ;;  %v2925_v51 = vpop.permute.xlu1 %2924 }
0x1449   : > { %2901 = vadd.xlane.f32.xlu0 %v2900_v7  ;;  %3900 = vmatpush3.bf16.msra.mxu1 %v2925_v51  ;;  %v2903_v40 = vadd.f32 %v4328_v25, %v4326_v28 }
0x144a   : > { %3901 = vmatprep.subr.bf16.mxu1 %v2943_v15  ;;  %v2947_v35 = vpop.permute.xlu0 %2946 }
0x144c   : > { %v2927_v49 = vpop.permute.xlu1 %2926 }
0x144d   : > { %2904 = vadd.xlane.f32.xlu0 %v2903_v40  ;;  %3902 = vmatpush3.bf16.msra.mxu1 %v2927_v49 }
0x144e   : > { %3903 = vmatprep.subr.bf16.mxu1 %v2945_v27 }
0x1450   : > { %v2929_v39 = vpop.permute.xlu1 %2928 }
0x1451   : > { %3904 = vmatpush3.bf16.msra.mxu1 %v2929_v39 }
0x1452   : > { %3905 = vmatprep.subr.bf16.mxu1 %v2947_v35 }
0x1454   : > { %v2931_v42 = vpop.permute.xlu1 %2930 }
0x1455   : > { %3906 = vmatpush3.bf16.msra.mxu1 %v2931_v42 }
0x1463   : > { %2948 = vrot.lane.b32.xlu0 %v5931_v34, %s4587_s16 }
0x1467   : > { %2950 = vrot.lane.b32.xlu0 %v5071_v44, %s4587_s16 }
0x146b   : > { %3066 = vrot.lane.b32.xlu0 %v4939_v46, %s4588_s15 }
0x146f   : > { %3068 = vrot.lane.b32.xlu0 %v4945_v52, %s4588_s15 }
0x1473   : > { %3070 = vrot.lane.b32.xlu0 %v4951_v59, %s4588_s15  ;;  %v2933_v59 = vpop.permute.xlu1 %2932 }
0x1477   : > { %3072 = vrot.lane.b32.xlu0 %v4959_v6, %s4588_s15  ;;  %v2935_v5 = vpop.permute.xlu1 %2934 }
0x147b   : > { %3074 = vrot.lane.b32.xlu0 %v4963_v12, %s4588_s15  ;;  %v3083_v50 = vpop.permute.xlu1 %3082 }
0x147f   : > { %3076 = vrot.lane.b32.xlu0 %v4967_v18, %s4588_s15  ;;  %v3085_v35 = vpop.permute.xlu1 %3084 }
0x1483   : > { %3078 = vrot.lane.b32.xlu0 %v5932_v14, %s4588_s15 }
0x1487   : > { %3080 = vrot.lane.b32.xlu0 %v4975_v30, %s4588_s15 }
0x148b   : > { %3064 = vrot.lane.b32.xlu0 %v4955_v0, %s4588_s15 }
0x14d6   : > { %v2902_v46 = vpop.xlane.xlu0 %2901 }
0x14d7   : > { %4329 = vrcp.f32 %v2902_v46 }
0x14da   : > { %v2905_v52 = vpop.xlane.xlu0 %2904 }
0x14db   : > { %4331 = vrcp.f32 %v2905_v52 }
0x14de   : > { %v2949_v6 = vpop.permute.xlu0 %2948 }
0x14df   : > { %3907 = vmatprep.subr.bf16.mxu1 %v2949_v6 }
0x14e0   : > { %3908 = vmatpush3.bf16.msra.mxu1 %v2933_v59 }
0x14e1   : > { %v4330_v12 = vpop.eup %4329 }
0x14e2   : > { %v2908_v19 = vmul.f32 %v4330_v12, %v2902_v46  ;;  %v2951_v18 = vpop.permute.xlu0 %2950  ;;  %v3087_v46 = vpop.permute.xlu1 %3086 }
0x14e3   : > { %3909 = vmatprep.subr.bf16.mxu1 %v2951_v18 }
0x14e4   : > { %v2910_v14 = vsub.f32 2.0, %v2908_v19  ;;  %3910 = vmatpush3.bf16.msra.mxu1 %v2935_v5 }
0x14e5   : > { %v4332_v47 = vpop.eup %4331  ;;  %4017 = vmatprep.subr.bf16.mxu1 %v5929_v58 }
0x14e6   : > { %v2909_v30 = vmul.f32 %v4332_v47, %v2905_v52  ;;  %v2912_v0 = vmul.f32 %v4330_v12, %v2910_v14  ;;  %v3067_v10 = vpop.permute.xlu0 %3066  ;;  %v3089_v59 = vpop.permute.xlu1 %3088 }
0x14e7   : > { %v3102_v49 = vsel %vm946_vm1, %v3067_v10, 0 }
0x14e8   : > { %v2911_v55 = vsub.f32 2.0, %v2909_v30  ;;  %v2914_v43 = vmul.f32 %v4322_v29, %v2912_v0  ;;  %v2915_v16 = vmul.f32 %v4324_v24, %v2912_v0 }
0x14ea   : > { %v2913_v36 = vmul.f32 %v4332_v47, %v2911_v55  ;;  %v3069_v17 = vpop.permute.xlu0 %3068  ;;  %v3091_v12 = vpop.permute.xlu1 %3090 }
0x14eb   : > { %v3105_v42 = vsel %vm946_vm1, %v3069_v17, 0 }
0x14ec   : > { %v2916_v1 = vmul.f32 %v4326_v28, %v2913_v36  ;;  %v2917_v53 = vmul.f32 %v4328_v25, %v2913_v36 }
0x14ee   : > { %v2919_v2 = vpack.c.bf16 %v2917_v53, %v2915_v16  ;;  %v2918_v57 = vpack.c.bf16 %v2916_v1, %v2914_v43  ;;  %v3071_v21 = vpop.permute.xlu0 %3070  ;;  %v3093_v18 = vpop.permute.xlu1 %3092 }
0x14ef   : > { %v3108_v52 = vsel %vm946_vm1, %v3071_v21, 0 }
0x14f0   : > { %3000 = vmatprep.mubr.bf16.mxu1 %v2919_v2 }
0x14f1   : > { %3001 = vmatmul.mubr.bf16.vlgmr.msra.gmra.mrb[96].mxu1 %v2918_v57 }
0x14f2   : > { %4018 = vmatpush3.bf16.msra.mxu1 %v4247_v63  ;;  %4019 = vmatprep.mubr.msk.bf16.mxu1 %vm4580_vm0, %v5929_v58  ;;  %v3073_v31 = vpop.permute.xlu0 %3072  ;;  %v3095_v14 = vpop.permute.xlu1 %3094 }
0x14f3   : > { %4085 = vmatprep.subr.msk.bf16.mxu1 %vm946_vm1, %v3083_v50  ;;  %v3111_v6 = vsel %vm946_vm1, %v3073_v31, 0 }
0x14f6   : > { %v3075_v41 = vpop.permute.xlu0 %3074  ;;  %v3097_v30 = vpop.permute.xlu1 %3096 }
0x14f7   : > { %v3114_v19 = vsel %vm946_vm1, %v3075_v41, 0 }
0x14fa   : > { %v3077_v37 = vpop.permute.xlu0 %3076 }
0x14fb   : > { %v3117_v5 = vsel %vm946_vm1, %v3077_v37, 0 }
0x14fe   : > { %v3079_v29 = vpop.permute.xlu0 %3078 }
0x14ff   : > { %v3120_v47 = vsel %vm946_vm1, %v3079_v29, 0 }
0x1502   : > { %v3081_v28 = vpop.permute.xlu0 %3080 }
0x1503   : > { %v3123_v0 = vsel %vm946_vm1, %v3081_v28, 0 }
0x1506   : > { %v3065_v39 = vpop.permute.xlu0 %3064 }
0x15c4   : > { %v3911_v15 = vpop.f32.mrb[96].mxu1 }
0x15c5   : > { %v3912_v24 = vpop.f32.mrb[97].mxu1 }
0x15c6   : > { %v3913_v7 = vadd.f32 %v3912_v24, %v3911_v15  ;;  %v3914_v25 = vpop.f32.mrb[98].mxu1 }
0x15c7   : > { %v3915_v51 = vpop.f32.mrb[99].mxu1 }
0x15c8   : > { %v3916_v27 = vadd.f32 %v3915_v51, %v3914_v25 }
0x15ca   : > { %v3009_v40 = vpack.c.bf16 %v3916_v27, %v3913_v7 }
0x15cc   : > { %4020 = vmatmul.mubr.msk.bf16.vlgmr.msra.gmra.mrb[100].mxu1 %vm946_vm1, %v3009_v40 }
0x15cd   : > { %3920 = vmatpush3.bf16.xpose.msra.mxu1 %v3102_v49  ;;  %3935 = vmatprep.mubr.msk.bf16.mxu1 %vm946_vm1, %v3065_v39 }
0x15ce   : > { %4086 = vmatprep.subr.msk.bf16.mxu1 %vm946_vm1, %v3085_v35 }
0x15d5   : > { %3922 = vmatpush3.bf16.xpose.msra.mxu1 %v3105_v42 }
0x15d6   : > { %4087 = vmatprep.subr.msk.bf16.mxu1 %vm946_vm1, %v3087_v46 }
0x15dd   : > { %3924 = vmatpush3.bf16.xpose.msra.mxu1 %v3108_v52 }
0x15de   : > { %4088 = vmatprep.subr.msk.bf16.mxu1 %vm946_vm1, %v3089_v59 }
0x15e5   : > { %3926 = vmatpush3.bf16.xpose.msra.mxu1 %v3111_v6 }
0x15e6   : > { %4089 = vmatprep.subr.msk.bf16.mxu1 %vm946_vm1, %v3091_v12 }
0x15ed   : > { %3928 = vmatpush3.bf16.xpose.msra.mxu1 %v3114_v19 }
0x15ee   : > { %4090 = vmatprep.subr.msk.bf16.mxu1 %vm946_vm1, %v3093_v18 }
0x15f5   : > { %3930 = vmatpush3.bf16.xpose.msra.mxu1 %v3117_v5 }
0x15f6   : > { %4091 = vmatprep.subr.msk.bf16.mxu1 %vm946_vm1, %v3095_v14 }
0x15fd   : > { %3932 = vmatpush3.bf16.xpose.msra.mxu1 %v3120_v47 }
0x15fe   : > { %4092 = vmatprep.subr.msk.bf16.mxu1 %vm946_vm1, %v3097_v30 }
0x1605   : > { %3934 = vmatpush3.bf16.xpose.msra.mxu1 %v3123_v0 }
0x160c   : > { %3936 = vmatmul.mubr.msk.bf16.vlgmr.msra.gmra.mrb[104].mxu1 %vm946_vm1, %v3065_v39 }
0x169f   : > { %v3055_v55 = vpop.f32.mrb[100].mxu1 }
0x16a0   : > { %v5778_v36 = vadd.f32 %v3055_v55, %v5680_v33  ;;  %v4021_v43 = vpop.f32.mrb[101].mxu1 }
0x16a1   : > { %v3058_v1 = vpop.f32.mrb[102].mxu1  ;;  %v4248_v43 = vld [vmem:[#allocation10 + $0x38] sm:$0xff]  }
0x16a2   : > { %v5781_v16 = vadd.f32 %v3058_v1, %v5683_v11  ;;  %v4022_v53 = vpop.f32.mrb[103].mxu1 }
0x16df   : > { %v3183_v2 = vpop.f32.mrb[104].mxu1 }
0x16e0   : > { %v3184_v57 = vadd.f32 %v3183_v2, %v5126_v60  ;;  %v3185_v63 = vpop.f32.mrb[105].mxu1 }
0x16e1   : > { %v3186_v50 = vadd.f32 %v3185_v63, %v5128_v61  ;;  %v3187_v10 = vpop.f32.mrb[106].mxu1 }
0x16e2   : > { %v3188_v17 = vadd.f32 %v3187_v10, %v5130_v4  ;;  %v3189_v21 = vpop.f32.mrb[107].mxu1 }
0x16e3   : > { %v3192_v31 = vmax.f32 %v3184_v57, %v3186_v50  ;;  %v3190_v33 = vadd.f32 %v3189_v21, %v5133_v9  ;;  %v3607_v21 = vld [vmem:[%s5884_s5] ss:$0 sm:$0xff] }
0x16e5   : > { %v3195_v41 = vmax.f32 %v3188_v17, %v3190_v33  ;;  %3193 = vmax.xlane.f32.xlu1 %v3192_v31 }
0x16e7   : > { %3196 = vmax.xlane.f32.xlu0 %v3195_v41 }
0x16f6   : > { %3230 = vrot.lane.b32.xlu1 %v4941_v48, %s4588_s15 }
0x16fa   : > { %3248 = vrot.lane.b32.xlu1 %v4993_v45, %s4588_s15 }
0x16fd   : > { %3246 = vrot.lane.b32.xlu0 %v4981_v38, %s4588_s15 }
0x16fe   : > { %3250 = vrot.lane.b32.xlu1 %v5007_v56, %s4588_s15 }
0x1701   : > { %3232 = vrot.lane.b32.xlu0 %v4947_v54, %s4588_s15 }
0x1702   : > { %3252 = vrot.lane.b32.xlu1 %v5021_v3, %s4588_s15 }
0x1705   : > { %3234 = vrot.lane.b32.xlu0 %v4953_v62, %s4588_s15 }
0x1706   : > { %3254 = vrot.lane.b32.xlu1 %v5035_v13, %s4588_s15 }
0x1709   : > { %3236 = vrot.lane.b32.xlu0 %v4961_v8, %s4588_s15 }
0x170a   : > { %3256 = vrot.lane.b32.xlu1 %v5049_v23, %s4588_s15 }
0x170d   : > { %3238 = vrot.lane.b32.xlu0 %v5930_v22, %s4588_s15 }
0x170e   : > { %3258 = vrot.lane.b32.xlu1 %v5931_v34, %s4588_s15 }
0x1711   : > { %3240 = vrot.lane.b32.xlu0 %v4969_v20, %s4588_s15 }
0x1772   : > { %v3194_v48 = vpop.xlane.xlu1 %3193 }
0x1773   : > { %v3198_v54 = vsub.f32 %v3184_v57, %v3194_v48  ;;  %v3199_v62 = vsub.f32 %v3186_v50, %v3194_v48 }
0x1774   : > { %v3197_v38 = vpop.xlane.xlu0 %3196 }
0x1775   : > { %v3202_v45 = vmul.f32 1.442695, %v3198_v54  ;;  %v3204_v56 = vmul.f32 1.442695, %v3199_v62  ;;  %v3200_v3 = vsub.f32 %v3188_v17, %v3197_v38  ;;  %v3201_v8 = vsub.f32 %v3190_v33, %v3197_v38 }
0x1776   : > { %v3231_v13 = vpop.permute.xlu1 %3230 }
0x1777   : > { %4333 = vpow2.f32 %v3202_v45  ;;  %v3206_v23 = vmul.f32 1.442695, %v3200_v3  ;;  %v3208_v60 = vmul.f32 1.442695, %v3201_v8 }
0x1778   : > { %4335 = vpow2.f32 %v3204_v56  ;;  %v3247_v61 = vpop.permute.xlu0 %3246 }
0x1779   : > { %4337 = vpow2.f32 %v3206_v23  ;;  %3937 = vmatprep.subr.bf16.mxu0 %v3247_v61 }
0x177a   : > { %4339 = vpow2.f32 %v3208_v60  ;;  %3938 = vmatpush3.bf16.msra.mxu0 %v3231_v13  ;;  %v3249_v4 = vpop.permute.xlu1 %3248 }
0x177b   : > { %3939 = vmatprep.subr.bf16.mxu0 %v3249_v4 }
0x177c   : > { %v3233_v20 = vpop.permute.xlu0 %3232 }
0x177e   : > { %3940 = vmatpush3.bf16.msra.mxu0 %v3233_v20  ;;  %v3251_v9 = vpop.permute.xlu1 %3250 }
0x177f   : > { %3941 = vmatprep.subr.bf16.mxu0 %v3251_v9 }
0x1780   : > { %v3235_v22 = vpop.permute.xlu0 %3234 }
0x1781   : > { %v4334_v34 = vpop.eup %4333 }
0x1782   : > { %v4336_v11 = vpop.eup %4335  ;;  %3942 = vmatpush3.bf16.msra.mxu0 %v3235_v22  ;;  %v3253_v37 = vpop.permute.xlu1 %3252 }
0x1783   : > { %v4338_v29 = vpop.eup %4337  ;;  %3943 = vmatprep.subr.bf16.mxu0 %v3253_v37  ;;  %v3210_v15 = vadd.f32 %v4336_v11, %v4334_v34 }
0x1784   : > { %v4340_v24 = vpop.eup %4339  ;;  %v3237_v28 = vpop.permute.xlu0 %3236 }
0x1785   : > { %3211 = vadd.xlane.f32.xlu0 %v3210_v15  ;;  %v3213_v7 = vadd.f32 %v4340_v24, %v4338_v29 }
0x1786   : > { %3944 = vmatpush3.bf16.msra.mxu0 %v3237_v28  ;;  %v3255_v25 = vpop.permute.xlu1 %3254 }
0x1787   : > { %3214 = vadd.xlane.f32.xlu1 %v3213_v7  ;;  %3945 = vmatprep.subr.bf16.mxu0 %v3255_v25 }
0x1788   : > { %v3239_v51 = vpop.permute.xlu0 %3238 }
0x178a   : > { %3946 = vmatpush3.bf16.msra.mxu0 %v3239_v51  ;;  %v3257_v27 = vpop.permute.xlu1 %3256 }
0x178b   : > { %3947 = vmatprep.subr.bf16.mxu0 %v3257_v27 }
0x178c   : > { %v3241_v40 = vpop.permute.xlu0 %3240 }
0x178e   : > { %3948 = vmatpush3.bf16.msra.mxu0 %v3241_v40  ;;  %v3259_v49 = vpop.permute.xlu1 %3258 }
0x178f   : > { %3949 = vmatprep.subr.bf16.mxu0 %v3259_v49 }
0x1798   : > { %3260 = vrot.lane.b32.xlu1 %v5071_v44, %s4588_s15 }
0x179b   : > { %3242 = vrot.lane.b32.xlu0 %v4973_v26, %s4588_s15 }
0x179f   : > { %3244 = vrot.lane.b32.xlu0 %v4977_v32, %s4588_s15 }
0x1812   : > { %v3212_v39 = vpop.xlane.xlu0 %3211 }
0x1813   : > { %4341 = vrcp.f32 %v3212_v39 }
0x1814   : > { %v3215_v35 = vpop.xlane.xlu1 %3214 }
0x1815   : > { %4343 = vrcp.f32 %v3215_v35 }
0x1816   : > { %v3243_v42 = vpop.permute.xlu0 %3242 }
0x1817   : > { %3950 = vmatpush3.bf16.msra.mxu0 %v3243_v42 }
0x1818   : > { %v3261_v46 = vpop.permute.xlu1 %3260 }
0x1819   : > { %3951 = vmatprep.subr.bf16.mxu0 %v3261_v46 }
0x181a   : > { %v3245_v52 = vpop.permute.xlu0 %3244 }
0x181b   : > { %3952 = vmatpush3.bf16.msra.mxu0 %v3245_v52 }
0x181c   : > { %4023 = vmatprep.subr.bf16.mxu0 %v5929_v58 }
0x181d   : > { %v4342_v59 = vpop.eup %4341 }
0x181e   : > { %v3218_v44 = vmul.f32 %v4342_v59, %v3212_v39 }
0x181f   : > { %v4344_v6 = vpop.eup %4343 }
0x1820   : > { %v3220_v12 = vsub.f32 2.0, %v3218_v44  ;;  %v3219_v26 = vmul.f32 %v4344_v6, %v3215_v35 }
0x1822   : > { %v3222_v19 = vmul.f32 %v4342_v59, %v3220_v12  ;;  %v3221_v18 = vsub.f32 2.0, %v3219_v26 }
0x1824   : > { %v3223_v32 = vmul.f32 %v4344_v6, %v3221_v18  ;;  %v3224_v5 = vmul.f32 %v4334_v34, %v3222_v19  ;;  %v3225_v47 = vmul.f32 %v4336_v11, %v3222_v19 }
0x1826   : > { %v3226_v14 = vmul.f32 %v4338_v29, %v3223_v32  ;;  %v3227_v30 = vmul.f32 %v4340_v24, %v3223_v32 }
0x1828   : > { %v3229_v0 = vpack.c.bf16 %v3227_v30, %v3225_v47  ;;  %v3228_v55 = vpack.c.bf16 %v3226_v14, %v3224_v5 }
0x182a   : > { %3310 = vmatprep.mubr.bf16.mxu0 %v3229_v0 }
0x182b   : > { %3311 = vmatmul.mubr.bf16.vlgmr.msra.gmra.mrb[48].mxu0 %v3228_v55 }
0x182c   : > { %4025 = vmatprep.mubr.msk.bf16.mxu0 %vm4580_vm0, %v5929_v58  ;;  %4024 = vmatpush3.bf16.msra.mxu0 %v4248_v43 }
0x18fe   : > { %v3953_v1 = vpop.f32.mrb[48].mxu0 }
0x18ff   : > { %v3954_v53 = vpop.f32.mrb[49].mxu0 }
0x1900   : > { %v3955_v2 = vadd.f32 %v3954_v53, %v3953_v1  ;;  %v3956_v57 = vpop.f32.mrb[50].mxu0 }
0x1901   : > { %v3957_v63 = vpop.f32.mrb[51].mxu0 }
0x1902   : > { %v3958_v50 = vadd.f32 %v3957_v63, %v3956_v57 }
0x1904   : > { %v3319_v10 = vpack.c.bf16 %v3958_v50, %v3955_v2 }
0x1906   : > { %4026 = vmatmul.mubr.msk.bf16.vlgmr.msra.gmra.mrb[52].mxu0 %vm946_vm1, %v3319_v10 }
0x19d9   : > { %v3365_v17 = vpop.f32.mrb[52].mxu0 }
0x19da   : > { %v3372_v58 = vadd.f32 %v3365_v17, %v5778_v36  ;;  %v4027_v31 = vpop.f32.mrb[53].mxu0 }
0x19db   : > { %v3368_v33 = vpop.f32.mrb[54].mxu0 }
0x19dc   : > { %v3381_v41 = vadd.f32 %v3607_v21, %v3372_v58  ;;  %v3373_v48 = vadd.f32 %v3368_v33, %v5781_v16  ;;  %v4028_v54 = vpop.f32.mrb[55].mxu0 }
0x19de   : > { %3383 = vst [vmem:[%s352_s7] sm:$0xff] %v3381_v41  ;;  %v3382_v62 = vadd.f32 %v3607_v21, %v3373_v48 }
0x19e0   : > { %3384 = vst [vmem:[%s352_s7 + $0x8] sm:$0xff] %v3382_v62 }
0x19e1   : > { %4502 = shalt.err (!%p4499_p3)
}
0x19e2   : > { %s4503_s12 = scalar_lea.hbm %s5835_s29, 256  ;;  %s4507_s16 = scalar_lea.hbm %s5885_s6, 512 }
0x19e3   : > { %p4504_p9 = scmp.ne.s32.totalorder %s5835_s29, %s4503_s12  ;;  %p4508_p7 = scmp.lt.u32.totalorder %s5835_s29, %s5885_s6 }
0x19e4   : > { %p4509_p12 = scmp.lt.u32.totalorder %s4507_s16, %s4503_s12  ;;  %p4511_p2 = scmp.lt.u32.totalorder %s4503_s12, %s5835_s29 }
0x19e5   : > { %p4505_p13 = pnand %p4504_p9, %p4775_p5 }
0x19e6   : > { %p4510_p1 = por %p4509_p12, %p4508_p7 }
0x19e7   : > { %p4506_p11 = pneg %p4505_p13 }
0x19e8   : > { %p4512_p4 = por %p4511_p2, %p4510_p1 }
0x19ea   : > { %p4513_p0 = pnand %p4512_p4, %p4506_p11 }
0x19ec   : > { %4516 = shalt.err (!%p4513_p0)
}
0x19ed   : > { %s4590_s8 = smov 128   ;;  %s4591_s26 = smov 8  }
0x19ee   : > { %4109 = dma.vmem_to_hbm [thread:$0]  (%p4775_p5), %s5829_s13, 256, %s5835_s29, %s3386_s20, %s4590_s8, %s4590_s8, %s4591_s26  }
0x19ef PF: > { %s3414_s7 = sand.u32 1, %s4555_s21   ;;  %p5933_p8 = scmp.ne.s32.totalorder %s5906_s28, 0 }
0x19f0   : > { %p5934_p6 = scmp.ge.s32.totalorder %s4567_s24, 2  ;;  %s3415_s11 = scalar_lea.sflag [#allocation4], %s3414_s7 }
0x19f2   : > { %p4129_p10 = pnand %p5934_p6, %p5933_p8 }
0x19f4   : > { %4550 = dma.done.wait (!%p4129_p10), %s3415_s11, 256  }
0x19f5   : > { %4552 = vsyncadd (!%p4129_p10), %s3415_s11, 4294967040  ;;  %p23_p3 = scmp.ge.s32.totalorder %s4740_s14, 4   ;;  %s5935_s21 = smov %s4559_s22 }
0x19f6   : > { %s5936_s22 = smov %s4563_s23  ;;  %s5937_s23 = smov %s4771_s30 }
0x19f7   : > { %s5938_s24 = smov %s4740_s14  ;;  %25 = sbr.rel (!%p23_p3) target bundleno = 13 (0xd), region = 114 }
0x19fe   :  { %3420 = vsyncpa [#allocation3], 1 }
0x19ff   :  { %3422 = vsyncpa [#allocation3 + $0x1], 1 }
0x1a00   :  { %3423 = vsyncpa [#allocation6], 1 }
0x1a01   :  { %3425 = vsyncpa [#allocation6 + $0x1], 1 }
0x1a02   :  { %3426 = vsyncpa [#allocation9], 1 }
0x1a03   :  { %3427 = vsyncpa [#allocation4], 1 }
0x1a04   :  { %3429 = vsyncpa [#allocation4 + $0x1], 1 }

</bundles_post_ra>
